<compile_context>
chip_gen: v5e
topology: v5e:2x2
jax: 0.10.0
libtpu: 0.0.40
codegen_flags: <defaults>
</compile_context>

<pallas_src>
import jax
import jax.numpy as jnp
from jax.experimental import pallas as pl
from jax.experimental.pallas import tpu as pltpu

H = W = 32            # spatial size implied by the 64*16*16 flatten after 2x2 pool
CIN = 3
COUT = 64
PH = PW = 16          # pooled spatial
NPOS = PH * PW        # 256 pooled positions per image
FLAT = COUT * NPOS    # 16384
NCLASS = 2
KTAP = 9 * CIN        # 27 real conv taps
KPAD = 32             # taps per parity: 27 taps + 1 bias-tap + 4 zero pad
KBIG = 4 * KPAD       # 128 = 4 parities packed along lanes
NBIG = 4 * COUT       # 256 = conv result, one 64-lane group per parity
B_TILE = 8            # images per grid step


# ---------------------------------------------------------------------------
# Fused kernel: conv(+bias) -> 2x2 maxpool -> relu -> linear
# ---------------------------------------------------------------------------
def fused_kernel(pat_ref, wc_ref, w2_ref, sel_ref, b2_ref, o_ref):
    # pat_ref: (B_TILE*256, 128) patch rows; row = b*256 + ph*16 + pw,
    #          col = parity*32 + tap (tap 27 is the constant-1 bias tap).
    # wc_ref : (128, 256) block-diagonal conv weight (+ bias row per parity).
    # w2_ref : (2, 256, 128) linear weight, lanes 64:128 are zero.
    # sel_ref: (B_TILE, B_TILE*256) per-image row-sum selector (0/1).
    # b2_ref : (1, 2)
    # o_ref  : (B_TILE, 2)

    # conv + bias for all 4 pool parities in one MXU matmul.
    res = jnp.dot(pat_ref[...], wc_ref[...],
                  preferred_element_type=jnp.float32)        # (B*256, 256)

    # 2x2 maxpool = max over the four 64-lane parity groups.
    m = jnp.maximum(res[:, : 2 * COUT], res[:, 2 * COUT:])   # (B*256, 128)
    m = jnp.maximum(m, pltpu.roll(m, shift=COUT, axis=1))    # fold 64-lane halves
    pooled = jnp.maximum(m, 0.0)                             # relu; halves duplicated

    # Linear: logits[b,k] = sum_{r,c} pooled[b,r,c] * w2[k,r,c]  (+ bias).
    pooled3 = pooled.reshape(B_TILE, NPOS, 2 * COUT)          # free leading split
    sel = sel_ref[...]
    cols = []
    for k in range(NCLASS):
        prod = (pooled3 * w2_ref[k]).reshape(B_TILE * NPOS, 2 * COUT)
        part = jnp.dot(sel, prod, preferred_element_type=jnp.float32)  # (B,128)
        cols.append(jnp.sum(part, axis=1, keepdims=True))              # (B,1)
    o_ref[...] = jnp.concatenate(cols, axis=1) + b2_ref[...]


# ---------------------------------------------------------------------------
# Wrapper: torch-layout params -> packed kernel operands, one pallas_call.
# ---------------------------------------------------------------------------
def rfcry_forward(x_nchw, params):
    # params (torch layouts):
    #   w1: (64, 3, 3, 3)  Conv2d.weight (cout, cin, kh, kw)
    #   b1: (64,)          Conv2d.bias
    #   w2: (2, 16384)     Linear.weight, columns indexed c*256 + ph*16 + pw
    #   b2: (2,)           Linear.bias
    w1, b1, w2, b2 = params
    n = x_nchw.shape[0]

    # --- conv weight: (32,64) rows ordered (kh,kw,cin), row 27 = bias ---
    w1r = jnp.transpose(w1, (2, 3, 1, 0)).reshape(KTAP, COUT).astype(jnp.float32)
    w1r = jnp.concatenate(
        [w1r, b1.reshape(1, COUT).astype(jnp.float32),
         jnp.zeros((KPAD - KTAP - 1, COUT), jnp.float32)], axis=0)     # (32, 64)
    # block-diagonal (128,256): parity p -> rows 32p:32p+32, cols 64p:64p+64
    wc = jnp.zeros((KBIG, NBIG), jnp.float32)
    for p in range(4):
        wc = wc.at[p * KPAD:(p + 1) * KPAD, p * COUT:(p + 1) * COUT].set(w1r)

    # --- linear weight: fold torch's NCHW flatten; pad lanes 64->128 with 0 ---
    w2r = jnp.transpose(w2.reshape(NCLASS, COUT, PH, PW), (0, 2, 3, 1))
    w2r = w2r.reshape(NCLASS, NPOS, COUT).astype(jnp.float32)
    w2r = jnp.concatenate(
        [w2r, jnp.zeros((NCLASS, NPOS, COUT), jnp.float32)], axis=-1)  # (2,256,128)
    b2r = b2.reshape(1, NCLASS).astype(jnp.float32)

    # --- per-image row-sum selector ---
    sel = jnp.repeat(jnp.eye(B_TILE, dtype=jnp.float32), NPOS, axis=1)  # (8, 2048)

    # --- im2col: lane-dense patches, 4 pool parities packed along lanes ---
    x_nhwc = jnp.transpose(x_nchw, (0, 2, 3, 1)).astype(jnp.float32)
    xp = jnp.pad(x_nhwc, ((0, 0), (1, 1), (1, 1), (0, 0)))              # (n,34,34,3)
    taps = [xp[:, dh:dh + H, dw:dw + W, :]
            for dh in range(3) for dw in range(3)]
    pat = jnp.concatenate(
        taps + [jnp.ones((n, H, W, 1), jnp.float32),                    # bias tap
                jnp.zeros((n, H, W, KPAD - KTAP - 1), jnp.float32)],
        axis=-1)                                                        # (n,32,32,32)
    pat = pat.reshape(n, PH, 2, PW, 2, KPAD)                            # (n,ph,i,pw,j,k)
    pat = jnp.transpose(pat, (0, 1, 3, 2, 4, 5))                        # (n,ph,pw,i,j,k)
    pat = pat.reshape(n, NPOS, KBIG)                                    # (n,256,128)

    n_pad = ((n + B_TILE - 1) // B_TILE) * B_TILE
    if n_pad != n:
        pat = jnp.pad(pat, ((0, n_pad - n), (0, 0), (0, 0)))
    pat = pat.reshape(n_pad * NPOS, KBIG)                               # (n_pad*256,128)

    out = pl.pallas_call(
        fused_kernel,
        out_shape=jax.ShapeDtypeStruct((n_pad, NCLASS), jnp.float32),
        grid=(n_pad // B_TILE,),
        in_specs=[
            pl.BlockSpec((B_TILE * NPOS, KBIG), lambda i: (i, 0)),
            pl.BlockSpec((KBIG, NBIG), lambda i: (0, 0)),
            pl.BlockSpec((NCLASS, NPOS, 2 * COUT), lambda i: (0, 0, 0)),
            pl.BlockSpec((B_TILE, B_TILE * NPOS), lambda i: (0, 0)),
            pl.BlockSpec((1, NCLASS), lambda i: (0, 0)),
        ],
        out_specs=pl.BlockSpec((B_TILE, NCLASS), lambda i: (i, 0)),
        compiler_params=pltpu.CompilerParams(
            dimension_semantics=("parallel",)),
    )(pat, wc, w2r, sel, b2r)
    return out[:n]


# ---------------------------------------------------------------------------
# Pure-JAX reference (same math, no Pallas) for a sanity check
# ---------------------------------------------------------------------------
def rfcry_reference(x_nchw, params):
    w1, b1, w2, b2 = params
    n = x_nchw.shape[0]
    x = jnp.transpose(x_nchw, (0, 2, 3, 1)).astype(jnp.float32)
    xp = jnp.pad(x, ((0, 0), (1, 1), (1, 1), (0, 0)))
    w1_hwio = jnp.transpose(w1, (2, 3, 1, 0))                  # (kh,kw,cin,cout)
    conv = jnp.zeros((n, H, W, COUT), jnp.float32)
    for dh in range(3):
        for dw in range(3):
            conv = conv + jnp.einsum(
                "nhwc,cf->nhwf", xp[:, dh:dh + H, dw:dw + W, :],
                w1_hwio[dh, dw], precision=jax.lax.Precision.HIGHEST)
    conv = conv + b1.reshape(1, 1, 1, COUT)
    pooled = jnp.max(conv.reshape(n, PH, 2, PW, 2, COUT), axis=(2, 4))
    pooled = jnp.maximum(pooled, 0.0)
    flat = jnp.transpose(pooled, (0, 3, 1, 2)).reshape(n, FLAT)  # NCHW flatten
    return (jnp.dot(flat, w2.T, precision=jax.lax.Precision.HIGHEST)
            + b2.reshape(1, NCLASS))


if __name__ == "__main__":
    key = jax.random.PRNGKey(0)
    kx, kw1, kb1, kw2, kb2 = jax.random.split(key, 5)

    # input: torch NCHW, (batch=2, 3, 32, 32) -- 32x32 is implied by the module.
    x = jax.random.normal(kx, (2, CIN, H, W), jnp.float32)

    # Deterministic synthetic parameters in torch layouts.
    w1 = 0.05 * jax.random.normal(kw1, (COUT, CIN, 3, 3), jnp.float32)
    b1 = 0.05 * jax.random.normal(kb1, (COUT,), jnp.float32)
    w2 = 0.01 * jax.random.normal(kw2, (NCLASS, FLAT), jnp.float32)
    b2 = 0.01 * jax.random.normal(kb2, (NCLASS,), jnp.float32)
    params = (w1, b1, w2, b2)

    out = jax.block_until_ready(rfcry_forward(x, params))
    ref = rfcry_reference(x, params)

    assert out.shape == (2, NCLASS), out.shape
    assert bool(jnp.allclose(out, ref, rtol=2e-2, atol=2e-2)), (
        "max abs diff = " + str(jnp.max(jnp.abs(out - ref))))
    print("KERNEL_OK")
</pallas_src>

<mosaic_0001>
module attributes {stable_mosaic.version = 11 : i64} {
  func.func @fused_kernel(%arg0: i32, %arg1: memref<2048x128xf32, #tpu.memory_space<vmem>>, %arg2: memref<128x256xf32, #tpu.memory_space<vmem>>, %arg3: memref<2x256x128xf32, #tpu.memory_space<vmem>>, %arg4: memref<8x2048xf32, #tpu.memory_space<vmem>>, %arg5: memref<1x2xf32, #tpu.memory_space<vmem>>, %arg6: memref<8x2xf32, #tpu.memory_space<vmem>>) attributes {dimension_semantics = [#tpu.dimension_semantics<parallel>], iteration_bounds = array<i64: 1>, scalar_prefetch = 0 : i64, scratch_operands = 0 : i64, tpu.core_type = #tpu.core_type<tc>, window_params = [{transform_indices = @transform_0, window_bounds = array<i64: 2048, 128>}, {pipeline_mode = #tpu.pipeline_mode<synchronous>, transform_indices = @transform_1, window_bounds = array<i64: 128, 256>}, {pipeline_mode = #tpu.pipeline_mode<synchronous>, transform_indices = @transform_2, window_bounds = array<i64: 2, 256, 128>}, {pipeline_mode = #tpu.pipeline_mode<synchronous>, transform_indices = @transform_3, window_bounds = array<i64: 8, 2048>}, {pipeline_mode = #tpu.pipeline_mode<synchronous>, transform_indices = @transform_4, window_bounds = array<i64: 1, 2>}, {transform_indices = @transform_5, window_bounds = array<i64: 8, 2>}]} {
    %c0 = arith.constant 0 : index
    %c0_0 = arith.constant 0 : index
    %0 = vector.load %arg1[%c0, %c0_0] : memref<2048x128xf32, #tpu.memory_space<vmem>>, vector<2048x128xf32>
    %c0_1 = arith.constant 0 : index
    %c0_2 = arith.constant 0 : index
    %1 = vector.load %arg2[%c0_1, %c0_2] : memref<128x256xf32, #tpu.memory_space<vmem>>, vector<128x256xf32>
    %cst = arith.constant dense<0.000000e+00> : vector<2048x256xf32>
    %2 = tpu.matmul %0, %1, %cst {dimension_numbers = #tpu.dot_dimension_numbers<[1], [0], [0], [1], [0, 0, 1, 1], [], []>} : vector<2048x128xf32>, vector<128x256xf32>, vector<2048x256xf32> -> vector<2048x256xf32>
    %3 = vector.extract_strided_slice %2 {offsets = [0, 0], sizes = [2048, 128], strides = [1, 1]} : vector<2048x256xf32> to vector<2048x128xf32>
    %4 = vector.extract_strided_slice %2 {offsets = [0, 128], sizes = [2048, 128], strides = [1, 1]} : vector<2048x256xf32> to vector<2048x128xf32>
    %5 = arith.maximumf %3, %4 : vector<2048x128xf32>
    %c64_i32 = arith.constant 64 : i32
    %6 = tpu.dynamic_rotate %5 by %c64_i32 dim 1 : vector<2048x128xf32>, i32 -> vector<2048x128xf32>
    %7 = arith.maximumf %5, %6 : vector<2048x128xf32>
    %cst_3 = arith.constant 0.000000e+00 : f32
    %8 = vector.broadcast %cst_3 : f32 to vector<2048x128xf32>
    %9 = arith.maximumf %7, %8 : vector<2048x128xf32>
    %10 = vector.shape_cast %9 : vector<2048x128xf32> to vector<8x256x128xf32>
    %c0_4 = arith.constant 0 : index
    %c0_5 = arith.constant 0 : index
    %11 = vector.load %arg4[%c0_4, %c0_5] : memref<8x2048xf32, #tpu.memory_space<vmem>>, vector<8x2048xf32>
    %c0_6 = arith.constant 0 : index
    %c0_7 = arith.constant 0 : index
    %c0_8 = arith.constant 0 : index
    %12 = vector.load %arg3[%c0_6, %c0_7, %c0_8] : memref<2x256x128xf32, #tpu.memory_space<vmem>>, vector<1x256x128xf32>
    %13 = vector.shape_cast %12 : vector<1x256x128xf32> to vector<256x128xf32>
    %14 = vector.shape_cast %13 : vector<256x128xf32> to vector<1x256x128xf32>
    %15 = vector.broadcast %14 : vector<1x256x128xf32> to vector<8x256x128xf32>
    %16 = arith.mulf %10, %15 : vector<8x256x128xf32>
    %17 = vector.shape_cast %16 : vector<8x256x128xf32> to vector<2048x128xf32>
    %cst_9 = arith.constant dense<0.000000e+00> : vector<8x128xf32>
    %18 = tpu.matmul %11, %17, %cst_9 {dimension_numbers = #tpu.dot_dimension_numbers<[1], [0], [0], [1], [0, 0, 1, 1], [], []>} : vector<8x2048xf32>, vector<2048x128xf32>, vector<8x128xf32> -> vector<8x128xf32>
    %cst_10 = arith.constant dense<0.000000e+00> : vector<8xf32>
    %19 = vector.multi_reduction <add>, %18, %cst_10 [1] : vector<8x128xf32> to vector<8xf32>
    %20 = vector.shape_cast %19 : vector<8xf32> to vector<8x1xf32>
    %c1 = arith.constant 1 : index
    %c0_11 = arith.constant 0 : index
    %c0_12 = arith.constant 0 : index
    %21 = vector.load %arg3[%c1, %c0_11, %c0_12] : memref<2x256x128xf32, #tpu.memory_space<vmem>>, vector<1x256x128xf32>
    %22 = vector.shape_cast %21 : vector<1x256x128xf32> to vector<256x128xf32>
    %23 = vector.shape_cast %22 : vector<256x128xf32> to vector<1x256x128xf32>
    %24 = vector.broadcast %23 : vector<1x256x128xf32> to vector<8x256x128xf32>
    %25 = arith.mulf %10, %24 : vector<8x256x128xf32>
    %26 = vector.shape_cast %25 : vector<8x256x128xf32> to vector<2048x128xf32>
    %cst_13 = arith.constant dense<0.000000e+00> : vector<8x128xf32>
    %27 = tpu.matmul %11, %26, %cst_13 {dimension_numbers = #tpu.dot_dimension_numbers<[1], [0], [0], [1], [0, 0, 1, 1], [], []>} : vector<8x2048xf32>, vector<2048x128xf32>, vector<8x128xf32> -> vector<8x128xf32>
    %cst_14 = arith.constant dense<0.000000e+00> : vector<8xf32>
    %28 = vector.multi_reduction <add>, %27, %cst_14 [1] : vector<8x128xf32> to vector<8xf32>
    %29 = vector.shape_cast %28 : vector<8xf32> to vector<8x1xf32>
    %30 = tpu.concatenate %20, %29 in 1 : vector<8x1xf32>, vector<8x1xf32> -> vector<8x2xf32>
    %c0_15 = arith.constant 0 : index
    %c0_16 = arith.constant 0 : index
    %31 = vector.load %arg5[%c0_15, %c0_16] : memref<1x2xf32, #tpu.memory_space<vmem>>, vector<1x2xf32>
    %32 = vector.broadcast %31 : vector<1x2xf32> to vector<8x2xf32>
    %33 = arith.addf %30, %32 : vector<8x2xf32>
    %c0_17 = arith.constant 0 : index
    %c0_18 = arith.constant 0 : index
    %34 = vector.load %arg6[%c0_17, %c0_18] : memref<8x2xf32, #tpu.memory_space<vmem>>, vector<8x2xf32>
    tpu.vector_store %arg6[%c0_17, %c0_18], %33 {strides = array<i32>} : memref<8x2xf32, #tpu.memory_space<vmem>>, vector<8x2xf32>,
    return
  }
  func.func @transform_0(%arg0: i32) -> (i32, i32) {
    %c0_i32 = arith.constant 0 : i32
    %c0_i32_0 = arith.constant 0 : i32
    return %arg0, %c0_i32 : i32, i32
  }
  func.func @transform_1(%arg0: i32) -> (i32, i32) {
    %c0_i32 = arith.constant 0 : i32
    %c0_i32_0 = arith.constant 0 : i32
    %c0_i32_1 = arith.constant 0 : i32
    return %c0_i32, %c0_i32_0 : i32, i32
  }
  func.func @transform_2(%arg0: i32) -> (i32, i32, i32) {
    %c0_i32 = arith.constant 0 : i32
    %c0_i32_0 = arith.constant 0 : i32
    %c0_i32_1 = arith.constant 0 : i32
    %c0_i32_2 = arith.constant 0 : i32
    return %c0_i32, %c0_i32_0, %c0_i32_1 : i32, i32, i32
  }
  func.func @transform_3(%arg0: i32) -> (i32, i32) {
    %c0_i32 = arith.constant 0 : i32
    %c0_i32_0 = arith.constant 0 : i32
    %c0_i32_1 = arith.constant 0 : i32
    return %c0_i32, %c0_i32_0 : i32, i32
  }
  func.func @transform_4(%arg0: i32) -> (i32, i32) {
    %c0_i32 = arith.constant 0 : i32
    %c0_i32_0 = arith.constant 0 : i32
    %c0_i32_1 = arith.constant 0 : i32
    return %c0_i32, %c0_i32_0 : i32, i32
  }
  func.func @transform_5(%arg0: i32) -> (i32, i32) {
    %c0_i32 = arith.constant 0 : i32
    %c0_i32_0 = arith.constant 0 : i32
    return %arg0, %c0_i32 : i32, i32
  }
}

</mosaic_0001>

<bundles_post_ra>
// kernel: tpu_custom_call.1
= control target key start
LH: loop header
LB: loop body
LE: loop exit
PB: predicated region body
PF: predicated region fallthrough
CT: control target
= control target key end

     0   :  { %10 = vsyncpa [#allocation3], 0  ;;  %s8410_s0 = inlined_call_operand.hbm [shape: f32[2048,128], index: 0, kind: input, shape index: {}]   ;;  %s8411_s1 = inlined_call_operand.hbm [shape: f32[128,256], index: 1, kind: input, shape index: {}]   ;;  %s8412_s2 = inlined_call_operand.hbm [shape: f32[2,256,128], index: 2, kind: input, shape index: {}]   ;;  %s8413_s3 = inlined_call_operand.hbm [shape: f32[8,2048], index: 3, kind: input, shape index: {}]   ;;  %s8414_s4 = inlined_call_operand.vmem [shape: f32[1,2], index: 4, kind: input, shape index: {}]   ;;  %s8415_s5 = inlined_call_operand.vmem [shape: f32[8,2], index: 5, kind: output, shape index: {}]  }
   0x1   :  { %11 = vsyncpa [#allocation5], 0  ;;  %s30_s20 = sshll.u32 %s8411_s1, 4  ;;  %s31_s20 = int_to_ptr.hbm [resolvable:$true] %s30_s20 }
   0x2   :  { %12 = vsyncpa [#allocation8], 0  ;;  %s4744_s21 = smov [#allocation4]   ;;  %s17_s25 = sshll.u32 %s8410_s0, 4  ;;  %s18_s25 = int_to_ptr.hbm [resolvable:$true] %s17_s25 }
   0x3   :  { %s32_s22 = sshll.u32 %s4744_s21, 4  ;;  %s4745_s26 = smov 256   ;;  %s33_s22 = int_to_ptr.vmem [resolvable:$true] %s32_s22 }
   0x4   :  { %s4746_s27 = smov 16   ;;  %s4747_s28 = smov [#allocation2]  }
   0x5   :  { %38 = dma.hbm_to_vmem [thread:$0]  %s31_s20, 4096, %s33_s22, [#allocation5], %s4745_s26, %s4745_s26, %s4746_s27  }
   0x6   :  { %s19_s29 = sshll.u32 %s4747_s28, 4  ;;  %s4748_s30 = smov 128   ;;  %s20_s29 = int_to_ptr.vmem [resolvable:$true] %s19_s29 }
   0x7   :  { %s4749_s6 = smov 8   ;;  %s43_s8 = sshll.u32 %s8412_s2, 4  ;;  %s44_s8 = int_to_ptr.hbm [resolvable:$true] %s43_s8 }
   0x8   :  { %25 = dma.hbm_to_vmem [thread:$0]  %s18_s25, 32768, %s20_s29, [#allocation3], %s4748_s30, %s4748_s30, %s4749_s6  }
   0x9   :  { %s4750_s9 = smov [#allocation6]   ;;  %s57_s12 = sshll.u32 %s8413_s3, 4  ;;  %s58_s12 = int_to_ptr.hbm [resolvable:$true] %s57_s12 }
   0xa   :  { %s45_s10 = sshll.u32 %s4750_s9, 4  ;;  %s4751_s13 = smov [#allocation7]   ;;  %s46_s10 = int_to_ptr.vmem [resolvable:$true] %s45_s10 }
   0xb   :  { %51 = dma.hbm_to_vmem [thread:$0]  %s44_s8, 8192, %s46_s10, [#allocation5], %s4748_s30, %s4748_s30, %s4749_s6  }
   0xc   :  { %s59_s14 = sshll.u32 %s4751_s13, 4  ;;  %s60_s14 = int_to_ptr.vmem [resolvable:$true] %s59_s14 }
   0xd   :  { %62 = dma.hbm_to_vmem [thread:$0]  %s58_s12, 2048, %s60_s14, [#allocation8]  }
   0xe   :  { %4738 = dma.done.wait [#allocation3], 32768  }
   0xf   :  { %4739 = vsyncadd [#allocation3], 4294934528 }
  0x10   :  { %4740 = dma.done.wait [#allocation5], 12288  }
  0x11   :  { %4741 = vsyncadd [#allocation5], 4294955008 }
  0x12   :  { %4742 = dma.done.wait [#allocation8], 2048  }
  0x13   :  { %4743 = vsyncadd [#allocation8], 4294965248  ;;  %v367_v0 = vld [vmem:[#allocation4 + $0xf0] sm:$0xff]  ;;  %v368_v1 = vld [vmem:[#allocation4 + $0xf8] sm:$0xff]  ;;  %s4752_s2 = smov 64   ;;  %vm4456_vm0 = vcmask 7168  }
  0x14   :  { %v365_v2 = vld [vmem:[#allocation4 + $0xe0] sm:$0xff]  ;;  %369 = vmatpush.msra.mxu0 %v367_v0  ;;  %4472 = vmatpush.msra.mxu2 %v367_v0  ;;  %v366_v3 = vld [vmem:[#allocation4 + $0xe8] sm:$0xff]  ;;  %v363_v4 = vld [vmem:[#allocation4 + $0xd0] sm:$0xff]  ;;  %vm4463_vm1 = vcmask 15360  }
  0x15   :  { %1154 = vmatpush.msra.mxu1 %v368_v1  ;;  %4488 = vmatpush.msra.mxu3 %v368_v1  ;;  %v364_v5 = vld [vmem:[#allocation4 + $0xd8] sm:$0xff]  ;;  %v361_v6 = vld [vmem:[#allocation4 + $0xc0] sm:$0xff]  ;;  %v362_v7 = vld [vmem:[#allocation4 + $0xc8] sm:$0xff] }
  0x16   :  { %370 = vmatpush.msra.mxu0 %v365_v2  ;;  %4473 = vmatpush.msra.mxu2 %v365_v2  ;;  %v359_v8 = vld [vmem:[#allocation4 + $0xb0] sm:$0xff]  ;;  %v360_v9 = vld [vmem:[#allocation4 + $0xb8] sm:$0xff]  ;;  %v357_v10 = vld [vmem:[#allocation4 + $0xa0] sm:$0xff] }
  0x17   :  { %1155 = vmatpush.msra.mxu1 %v366_v3  ;;  %4489 = vmatpush.msra.mxu3 %v366_v3  ;;  %v358_v11 = vld [vmem:[#allocation4 + $0xa8] sm:$0xff]  ;;  %v355_v12 = vld [vmem:[#allocation4 + $0x90] sm:$0xff]  ;;  %v356_v13 = vld [vmem:[#allocation4 + $0x98] sm:$0xff] }
  0x18   :  { %371 = vmatpush.msra.mxu0 %v363_v4  ;;  %4474 = vmatpush.msra.mxu2 %v363_v4  ;;  %v353_v14 = vld [vmem:[#allocation4 + $0x80] sm:$0xff]  ;;  %v354_v15 = vld [vmem:[#allocation4 + $0x88] sm:$0xff]  ;;  %v351_v16 = vld [vmem:[#allocation4 + $0x70] sm:$0xff] }
  0x19   :  { %1156 = vmatpush.msra.mxu1 %v364_v5  ;;  %4490 = vmatpush.msra.mxu3 %v364_v5  ;;  %v352_v17 = vld [vmem:[#allocation4 + $0x78] sm:$0xff]  ;;  %v349_v18 = vld [vmem:[#allocation4 + $0x60] sm:$0xff]  ;;  %v350_v19 = vld [vmem:[#allocation4 + $0x68] sm:$0xff] }
  0x1a   :  { %372 = vmatpush.msra.mxu0 %v361_v6  ;;  %4475 = vmatpush.msra.mxu2 %v361_v6  ;;  %v347_v20 = vld [vmem:[#allocation4 + $0x50] sm:$0xff]  ;;  %v348_v21 = vld [vmem:[#allocation4 + $0x58] sm:$0xff]  ;;  %v345_v22 = vld [vmem:[#allocation4 + $0x40] sm:$0xff] }
  0x1b   :  { %1157 = vmatpush.msra.mxu1 %v362_v7  ;;  %4491 = vmatpush.msra.mxu3 %v362_v7  ;;  %v346_v23 = vld [vmem:[#allocation4 + $0x48] sm:$0xff]  ;;  %v343_v24 = vld [vmem:[#allocation4 + $0x30] sm:$0xff]  ;;  %v344_v25 = vld [vmem:[#allocation4 + $0x38] sm:$0xff] }
  0x1c   :  { %373 = vmatpush.msra.mxu0 %v359_v8  ;;  %4476 = vmatpush.msra.mxu2 %v359_v8  ;;  %v341_v26 = vld [vmem:[#allocation4 + $0x20] sm:$0xff]  ;;  %v342_v27 = vld [vmem:[#allocation4 + $0x28] sm:$0xff]  ;;  %v339_v28 = vld [vmem:[#allocation4 + $0x10] sm:$0xff] }
  0x1d   :  { %1158 = vmatpush.msra.mxu1 %v360_v9  ;;  %4492 = vmatpush.msra.mxu3 %v360_v9  ;;  %v340_v29 = vld [vmem:[#allocation4 + $0x18] sm:$0xff]  ;;  %v337_v30 = vld [vmem:[#allocation4] sm:$0xff]  ;;  %v338_v31 = vld [vmem:[#allocation4 + $0x8] sm:$0xff] }
  0x1e   :  { %374 = vmatpush.msra.mxu0 %v357_v10  ;;  %4477 = vmatpush.msra.mxu2 %v357_v10  ;;  %v81_v32 = vld [vmem:[#allocation2] sm:$0xff]  ;;  %v240_v33 = vld [vmem:[#allocation2 + $0x4f8] sm:$0xff]  ;;  %v82_v34 = vld [vmem:[#allocation2 + $0x8] sm:$0xff] }
  0x1f   :  { %1159 = vmatpush.msra.mxu1 %v358_v11  ;;  %4493 = vmatpush.msra.mxu3 %v358_v11  ;;  %v241_v35 = vld [vmem:[#allocation2 + $0x500] sm:$0xff]  ;;  %v83_v36 = vld [vmem:[#allocation2 + $0x10] sm:$0xff]  ;;  %v242_v37 = vld [vmem:[#allocation2 + $0x508] sm:$0xff] }
  0x20   :  { %375 = vmatpush.msra.mxu0 %v355_v12  ;;  %4478 = vmatpush.msra.mxu2 %v355_v12  ;;  %v84_v38 = vld [vmem:[#allocation2 + $0x18] sm:$0xff]  ;;  %v243_v39 = vld [vmem:[#allocation2 + $0x510] sm:$0xff]  ;;  %v85_v40 = vld [vmem:[#allocation2 + $0x20] sm:$0xff] }
  0x21   :  { %1160 = vmatpush.msra.mxu1 %v356_v13  ;;  %4494 = vmatpush.msra.mxu3 %v356_v13  ;;  %v244_v41 = vld [vmem:[#allocation2 + $0x518] sm:$0xff]  ;;  %v86_v42 = vld [vmem:[#allocation2 + $0x28] sm:$0xff]  ;;  %v245_v43 = vld [vmem:[#allocation2 + $0x520] sm:$0xff] }
  0x22   :  { %376 = vmatpush.msra.mxu0 %v353_v14  ;;  %4479 = vmatpush.msra.mxu2 %v353_v14  ;;  %v87_v44 = vld [vmem:[#allocation2 + $0x30] sm:$0xff]  ;;  %v246_v45 = vld [vmem:[#allocation2 + $0x528] sm:$0xff]  ;;  %v88_v46 = vld [vmem:[#allocation2 + $0x38] sm:$0xff] }
  0x23   :  { %1161 = vmatpush.msra.mxu1 %v354_v15  ;;  %4495 = vmatpush.msra.mxu3 %v354_v15  ;;  %v247_v47 = vld [vmem:[#allocation2 + $0x530] sm:$0xff]  ;;  %v89_v48 = vld [vmem:[#allocation2 + $0x40] sm:$0xff]  ;;  %v248_v49 = vld [vmem:[#allocation2 + $0x538] sm:$0xff] }
  0x24   :  { %377 = vmatpush.msra.mxu0 %v351_v16  ;;  %4480 = vmatpush.msra.mxu2 %v351_v16  ;;  %v90_v50 = vld [vmem:[#allocation2 + $0x48] sm:$0xff]  ;;  %v249_v51 = vld [vmem:[#allocation2 + $0x540] sm:$0xff]  ;;  %v91_v52 = vld [vmem:[#allocation2 + $0x50] sm:$0xff] }
  0x25   :  { %1162 = vmatpush.msra.mxu1 %v352_v17  ;;  %4496 = vmatpush.msra.mxu3 %v352_v17  ;;  %v250_v53 = vld [vmem:[#allocation2 + $0x548] sm:$0xff]  ;;  %v92_v54 = vld [vmem:[#allocation2 + $0x58] sm:$0xff]  ;;  %v251_v55 = vld [vmem:[#allocation2 + $0x550] sm:$0xff] }
  0x26   :  { %378 = vmatpush.msra.mxu0 %v349_v18  ;;  %4481 = vmatpush.msra.mxu2 %v349_v18  ;;  %v93_v56 = vld [vmem:[#allocation2 + $0x60] sm:$0xff]  ;;  %v252_v57 = vld [vmem:[#allocation2 + $0x558] sm:$0xff]  ;;  %v94_v58 = vld [vmem:[#allocation2 + $0x68] sm:$0xff] }
  0x27   :  { %1163 = vmatpush.msra.mxu1 %v350_v19  ;;  %4497 = vmatpush.msra.mxu3 %v350_v19  ;;  %v253_v59 = vld [vmem:[#allocation2 + $0x560] sm:$0xff]  ;;  %v95_v60 = vld [vmem:[#allocation2 + $0x70] sm:$0xff]  ;;  %v254_v61 = vld [vmem:[#allocation2 + $0x568] sm:$0xff] }
  0x28   :  { %379 = vmatpush.msra.mxu0 %v347_v20  ;;  %4482 = vmatpush.msra.mxu2 %v347_v20  ;;  %v96_v62 = vld [vmem:[#allocation2 + $0x78] sm:$0xff]  ;;  %v255_v63 = vld [vmem:[#allocation2 + $0x570] sm:$0xff]  ;;  %v97_v1 = vld [vmem:[#allocation2 + $0x80] sm:$0xff] }
  0x29   :  { %1164 = vmatpush.msra.mxu1 %v348_v21  ;;  %4498 = vmatpush.msra.mxu3 %v348_v21  ;;  %v256_v2 = vld [vmem:[#allocation2 + $0x578] sm:$0xff]  ;;  %v98_v8 = vld [vmem:[#allocation2 + $0x88] sm:$0xff]  ;;  %v257_v9 = vld [vmem:[#allocation2 + $0x580] sm:$0xff] }
  0x2a   :  { %380 = vmatpush.msra.mxu0 %v345_v22  ;;  %4483 = vmatpush.msra.mxu2 %v345_v22  ;;  %v99_v15 = vld [vmem:[#allocation2 + $0x90] sm:$0xff]  ;;  %v258_v16 = vld [vmem:[#allocation2 + $0x588] sm:$0xff] }
  0x2b   :  { %1165 = vmatpush.msra.mxu1 %v346_v23  ;;  %4499 = vmatpush.msra.mxu3 %v346_v23 }
  0x2c   :  { %381 = vmatpush.msra.mxu0 %v343_v24  ;;  %4484 = vmatpush.msra.mxu2 %v343_v24  ;;  %v259_v24 = vld [vmem:[#allocation2 + $0x590] sm:$0xff] }
  0x2d   :  { %1166 = vmatpush.msra.mxu1 %v344_v25  ;;  %4500 = vmatpush.msra.mxu3 %v344_v25  ;;  %v100_v25 = vld [vmem:[#allocation2 + $0x98] sm:$0xff] }
  0x2e   :  { %382 = vmatpush.msra.mxu0 %v341_v26  ;;  %4485 = vmatpush.msra.mxu2 %v341_v26 }
  0x2f   :  { %1167 = vmatpush.msra.mxu1 %v342_v27  ;;  %4501 = vmatpush.msra.mxu3 %v342_v27 }
  0x30   :  { %383 = vmatpush.msra.mxu0 %v339_v28  ;;  %4486 = vmatpush.msra.mxu2 %v339_v28 }
  0x31   :  { %1168 = vmatpush.msra.mxu1 %v340_v29  ;;  %4502 = vmatpush.msra.mxu3 %v340_v29 }
  0x32   :  { %384 = vmatpush.msra.mxu0 %v337_v30  ;;  %4487 = vmatpush.msra.mxu2 %v337_v30 }
  0x33   :  { %1169 = vmatpush.msra.mxu1 %v338_v31  ;;  %4503 = vmatpush.msra.mxu3 %v338_v31 }
  0x34   :  { %385 = vmatmul.f32.vlgmr.msra.gmra.mxu0 %v81_v32  ;;  %862 = vmatmul.f32.vlgmr.msra.gmra.mxu2 %v240_v33 }
  0x35   :  { %1170 = vmatmul.f32.vlgmr.msra.gmra.mxu1 %v81_v32  ;;  %1647 = vmatmul.f32.vlgmr.msra.gmra.mxu3 %v240_v33  ;;  %v101_v32 = vld [vmem:[#allocation2 + $0xa0] sm:$0xff]  ;;  %v260_v33 = vld [vmem:[#allocation2 + $0x598] sm:$0xff] }
  0x3c   :  { %388 = vmatmul.f32.gmra.mxu0 %v82_v34  ;;  %865 = vmatmul.f32.gmra.mxu2 %v241_v35 }
  0x3d   :  { %1173 = vmatmul.f32.gmra.mxu1 %v82_v34  ;;  %1650 = vmatmul.f32.gmra.mxu3 %v241_v35 }
  0x44   :  { %391 = vmatmul.f32.gmra.mxu0 %v83_v36  ;;  %868 = vmatmul.f32.gmra.mxu2 %v242_v37 }
  0x45   :  { %1176 = vmatmul.f32.gmra.mxu1 %v83_v36  ;;  %1653 = vmatmul.f32.gmra.mxu3 %v242_v37 }
  0x4c   :  { %394 = vmatmul.f32.gmra.mxu0 %v84_v38  ;;  %871 = vmatmul.f32.gmra.mxu2 %v243_v39 }
  0x4d   :  { %1179 = vmatmul.f32.gmra.mxu1 %v84_v38  ;;  %1656 = vmatmul.f32.gmra.mxu3 %v243_v39 }
  0x54   :  { %397 = vmatmul.f32.gmra.mxu0 %v85_v40  ;;  %874 = vmatmul.f32.gmra.mxu2 %v244_v41 }
  0x55   :  { %1182 = vmatmul.f32.gmra.mxu1 %v85_v40  ;;  %1659 = vmatmul.f32.gmra.mxu3 %v244_v41  ;;  %v102_v41 = vld [vmem:[#allocation2 + $0xa8] sm:$0xff] }
  0x5c   :  { %400 = vmatmul.f32.gmra.mxu0 %v86_v42  ;;  %877 = vmatmul.f32.gmra.mxu2 %v245_v43 }
  0x5d   :  { %1185 = vmatmul.f32.gmra.mxu1 %v86_v42  ;;  %1662 = vmatmul.f32.gmra.mxu3 %v245_v43  ;;  %v261_v42 = vld [vmem:[#allocation2 + $0x5a0] sm:$0xff] }
  0x64   :  { %403 = vmatmul.f32.gmra.mxu0 %v87_v44  ;;  %880 = vmatmul.f32.gmra.mxu2 %v246_v45 }
  0x65   :  { %1188 = vmatmul.f32.gmra.mxu1 %v87_v44  ;;  %1665 = vmatmul.f32.gmra.mxu3 %v246_v45 }
  0x6c   :  { %406 = vmatmul.f32.gmra.mxu0 %v88_v46  ;;  %883 = vmatmul.f32.gmra.mxu2 %v247_v47 }
  0x6d   :  { %1191 = vmatmul.f32.gmra.mxu1 %v88_v46  ;;  %1668 = vmatmul.f32.gmra.mxu3 %v247_v47 }
  0x74   :  { %409 = vmatmul.f32.gmra.mxu0 %v89_v48  ;;  %886 = vmatmul.f32.gmra.mxu2 %v248_v49 }
  0x75   :  { %1194 = vmatmul.f32.gmra.mxu1 %v89_v48  ;;  %1671 = vmatmul.f32.gmra.mxu3 %v248_v49  ;;  %v103_v49 = vld [vmem:[#allocation2 + $0xb0] sm:$0xff] }
  0x7c   :  { %412 = vmatmul.f32.gmra.mxu0 %v90_v50  ;;  %889 = vmatmul.f32.gmra.mxu2 %v249_v51 }
  0x7d   :  { %1197 = vmatmul.f32.gmra.mxu1 %v90_v50  ;;  %1674 = vmatmul.f32.gmra.mxu3 %v249_v51  ;;  %v262_v50 = vld [vmem:[#allocation2 + $0x5a8] sm:$0xff] }
  0x84   :  { %415 = vmatmul.f32.gmra.mxu0 %v91_v52  ;;  %892 = vmatmul.f32.gmra.mxu2 %v250_v53 }
  0x85   :  { %1200 = vmatmul.f32.gmra.mxu1 %v91_v52  ;;  %1677 = vmatmul.f32.gmra.mxu3 %v250_v53 }
  0x8c   :  { %418 = vmatmul.f32.gmra.mxu0 %v92_v54  ;;  %895 = vmatmul.f32.gmra.mxu2 %v251_v55 }
  0x8d   :  { %1203 = vmatmul.f32.gmra.mxu1 %v92_v54  ;;  %1680 = vmatmul.f32.gmra.mxu3 %v251_v55 }
  0x94   :  { %421 = vmatmul.f32.gmra.mxu0 %v93_v56  ;;  %898 = vmatmul.f32.gmra.mxu2 %v252_v57 }
  0x95   :  { %1206 = vmatmul.f32.gmra.mxu1 %v93_v56  ;;  %1683 = vmatmul.f32.gmra.mxu3 %v252_v57  ;;  %v104_v57 = vld [vmem:[#allocation2 + $0xb8] sm:$0xff] }
  0x9c   :  { %424 = vmatmul.f32.gmra.mxu0 %v94_v58  ;;  %901 = vmatmul.f32.gmra.mxu2 %v253_v59 }
  0x9d   :  { %1209 = vmatmul.f32.gmra.mxu1 %v94_v58  ;;  %1686 = vmatmul.f32.gmra.mxu3 %v253_v59  ;;  %v263_v58 = vld [vmem:[#allocation2 + $0x5b0] sm:$0xff] }
  0xa4   :  { %427 = vmatmul.f32.gmra.mxu0 %v95_v60  ;;  %904 = vmatmul.f32.gmra.mxu2 %v254_v61 }
  0xa5   :  { %1212 = vmatmul.f32.gmra.mxu1 %v95_v60  ;;  %1689 = vmatmul.f32.gmra.mxu3 %v254_v61 }
  0xac   :  { %430 = vmatmul.f32.gmra.mxu0 %v96_v62  ;;  %907 = vmatmul.f32.gmra.mxu2 %v255_v63 }
  0xad   :  { %1215 = vmatmul.f32.gmra.mxu1 %v96_v62  ;;  %1692 = vmatmul.f32.gmra.mxu3 %v255_v63 }
  0xb1   :  { %v386_v0 = vpop.f32.mrf.mxu0 }
  0xb2   :  { %v1171_v3 = vpop.f32.mrf.mxu1 }
  0xb3   :  { %v4795_v4 = vmax.f32 %v386_v0, %v1171_v3  ;;  %v105_v0 = vld [vmem:[#allocation2 + $0xc0] sm:$0xff] }
  0xb4   :  { %433 = vmatmul.f32.gmra.mxu0 %v97_v1  ;;  %910 = vmatmul.f32.gmra.mxu2 %v256_v2 }
  0xb5   :  { %1218 = vmatmul.f32.gmra.mxu1 %v97_v1  ;;  %1695 = vmatmul.f32.gmra.mxu3 %v256_v2  ;;  %v264_v1 = vld [vmem:[#allocation2 + $0x5b8] sm:$0xff] }
  0xb6   :  { %2195 = vrot.lane.b32.xlu0 %v4795_v4, %s4752_s2 }
  0xb7   :  { %v863_v5 = vpop.f32.mrf.mxu2 }
  0xb8   :  { %v1648_v6 = vpop.f32.mrf.mxu3 }
  0xb9   :  { %v389_v7 = vpop.f32.mrf.mxu0  ;;  %v4799_v10 = vmax.f32 %v863_v5, %v1648_v6 }
  0xba   :  { %v1174_v11 = vpop.f32.mrf.mxu1 }
  0xbb   :  { %8790 = vst [vmem:[#allocation12_spill] sm:$0xff] %v4799_v10  ;;  %v4809_v20 = vmax.f32 %v389_v7, %v1174_v11  ;;  %v106_v11 = vld [vmem:[#allocation2 + $0xc8] sm:$0xff] }
  0xbc   :  { %436 = vmatmul.f32.gmra.mxu0 %v98_v8  ;;  %913 = vmatmul.f32.gmra.mxu2 %v257_v9 }
  0xbd   :  { %1221 = vmatmul.f32.gmra.mxu1 %v98_v8  ;;  %1698 = vmatmul.f32.gmra.mxu3 %v257_v9 }
  0xbe   :  { %2513 = vrot.lane.b32.xlu0 %v4799_v10, %s4752_s2 }
  0xbf   :  { %v866_v12 = vpop.f32.mrf.mxu2 }
  0xc0   :  { %v1651_v13 = vpop.f32.mrf.mxu3 }
  0xc1   :  { %v392_v14 = vpop.f32.mrf.mxu0  ;;  %v4803_v17 = vmax.f32 %v866_v12, %v1651_v13  ;;  %v265_v12 = vld [vmem:[#allocation2 + $0x5c0] sm:$0xff] }
  0xc2   :  { %v1177_v18 = vpop.f32.mrf.mxu1 }
  0xc3   :  { %8791 = vst [vmem:[#allocation13_spill] sm:$0xff] %v4803_v17  ;;  %v4805_v19 = vmax.f32 %v392_v14, %v1177_v18  ;;  %2515 = vrot.lane.b32.xlu2 %v4803_v17, %s4752_s2  ;;  %v121_v17 = vld [vmem:[#allocation2 + $0x140] sm:$0xff] }
  0xc4   :  { %439 = vmatmul.f32.gmra.mxu0 %v99_v15  ;;  %916 = vmatmul.f32.gmra.mxu2 %v258_v16 }
  0xc5   :  { %1224 = vmatmul.f32.gmra.mxu1 %v99_v15  ;;  %1701 = vmatmul.f32.gmra.mxu3 %v258_v16 }
  0xc6   :  { %2197 = vrot.lane.b32.xlu0 %v4809_v20, %s4752_s2  ;;  %2199 = vrot.lane.b32.xlu1 %v4805_v19, %s4752_s2 }
  0xc7   :  { %v869_v21 = vpop.f32.mrf.mxu2 }
  0xc8   :  { %v1654_v22 = vpop.f32.mrf.mxu3 }
  0xc9   :  { %v395_v23 = vpop.f32.mrf.mxu0  ;;  %v4815_v26 = vmax.f32 %v869_v21, %v1654_v22  ;;  %v107_v22 = vld [vmem:[#allocation2 + $0xd0] sm:$0xff] }
  0xca   :  { %v1180_v27 = vpop.f32.mrf.mxu1 }
  0xcb   :  { %8792 = vst [vmem:[#allocation14_spill] sm:$0xff] %v4815_v26  ;;  %v4825_v36 = vmax.f32 %v395_v23, %v1180_v27  ;;  %v266_v23 = vld [vmem:[#allocation2 + $0x5c8] sm:$0xff] }
  0xcc   :  { %919 = vmatmul.f32.gmra.mxu2 %v259_v24  ;;  %442 = vmatmul.f32.gmra.mxu0 %v100_v25 }
  0xcd   :  { %1704 = vmatmul.f32.gmra.mxu3 %v259_v24  ;;  %1227 = vmatmul.f32.gmra.mxu1 %v100_v25 }
  0xce   :  { %2517 = vrot.lane.b32.xlu1 %v4815_v26, %s4752_s2 }
  0xcf   :  { %v872_v28 = vpop.f32.mrf.mxu2 }
  0xd0   :  { %v1657_v29 = vpop.f32.mrf.mxu3 }
  0xd1   :  { %v4819_v30 = vmax.f32 %v872_v28, %v1657_v29  ;;  %v398_v31 = vpop.f32.mrf.mxu0 }
  0xd2   :  { %v1183_v34 = vpop.f32.mrf.mxu1 }
  0xd3   :  { %8793 = vst [vmem:[#allocation15_spill] sm:$0xff] %v4819_v30  ;;  %v4821_v35 = vmax.f32 %v398_v31, %v1183_v34  ;;  %2519 = vrot.lane.b32.xlu0 %v4819_v30, %s4752_s2  ;;  %v108_v31 = vld [vmem:[#allocation2 + $0xd8] sm:$0xff] }
  0xd4   :  { %445 = vmatmul.f32.gmra.mxu0 %v101_v32  ;;  %922 = vmatmul.f32.gmra.mxu2 %v260_v33 }
  0xd5   :  { %1230 = vmatmul.f32.gmra.mxu1 %v101_v32  ;;  %1707 = vmatmul.f32.gmra.mxu3 %v260_v33  ;;  %v267_v32 = vld [vmem:[#allocation2 + $0x5d0] sm:$0xff] }
  0xd6   :  { %2201 = vrot.lane.b32.xlu1 %v4825_v36, %s4752_s2  ;;  %2203 = vrot.lane.b32.xlu2 %v4821_v35, %s4752_s2 }
  0xd7   :  { %v875_v37 = vpop.f32.mrf.mxu2 }
  0xd8   :  { %v1660_v38 = vpop.f32.mrf.mxu3 }
  0xd9   :  { %v4831_v39 = vmax.f32 %v875_v37, %v1660_v38  ;;  %v401_v40 = vpop.f32.mrf.mxu0 }
  0xda   :  { %v1186_v43 = vpop.f32.mrf.mxu1 }
  0xdb   :  { %8794 = vst [vmem:[#allocation16_spill] sm:$0xff] %v4831_v39  ;;  %v4833_v44 = vmax.f32 %v401_v40, %v1186_v43  ;;  %2521 = vrot.lane.b32.xlu0 %v4831_v39, %s4752_s2  ;;  %v109_v43 = vld [vmem:[#allocation2 + $0xe0] sm:$0xff] }
  0xdc   :  { %448 = vmatmul.f32.gmra.mxu0 %v102_v41  ;;  %925 = vmatmul.f32.gmra.mxu2 %v261_v42 }
  0xdd   :  { %1233 = vmatmul.f32.gmra.mxu1 %v102_v41  ;;  %1710 = vmatmul.f32.gmra.mxu3 %v261_v42 }
  0xde   :  { %2205 = vrot.lane.b32.xlu2 %v4833_v44, %s4752_s2 }
  0xdf   :  { %v878_v45 = vpop.f32.mrf.mxu2 }
  0xe0   :  { %v1663_v46 = vpop.f32.mrf.mxu3 }
  0xe1   :  { %v4839_v47 = vmax.f32 %v878_v45, %v1663_v46  ;;  %v404_v48 = vpop.f32.mrf.mxu0  ;;  %v268_v45 = vld [vmem:[#allocation2 + $0x5d8] sm:$0xff] }
  0xe2   :  { %v1189_v51 = vpop.f32.mrf.mxu1 }
  0xe3   :  { %8795 = vst [vmem:[#allocation17_spill] sm:$0xff] %v4839_v47  ;;  %2523 = vrot.lane.b32.xlu0 %v4839_v47, %s4752_s2  ;;  %v4843_v54 = vmax.f32 %v404_v48, %v1189_v51 }
  0xe4   :  { %451 = vmatmul.f32.gmra.mxu0 %v103_v49  ;;  %928 = vmatmul.f32.gmra.mxu2 %v262_v50 }
  0xe5   :  { %1236 = vmatmul.f32.gmra.mxu1 %v103_v49  ;;  %1713 = vmatmul.f32.gmra.mxu3 %v262_v50 }
  0xe7   :  { %v881_v52 = vpop.f32.mrf.mxu2 }
  0xe8   :  { %v1666_v53 = vpop.f32.mrf.mxu3 }
  0xe9   :  { %v4845_v55 = vmax.f32 %v881_v52, %v1666_v53  ;;  %v407_v56 = vpop.f32.mrf.mxu0  ;;  %v110_v53 = vld [vmem:[#allocation2 + $0xe8] sm:$0xff] }
  0xea   :  { %v1192_v59 = vpop.f32.mrf.mxu1 }
  0xeb   :  { %8796 = vst [vmem:[#allocation18_spill] sm:$0xff] %v4845_v55  ;;  %v4847_v60 = vmax.f32 %v407_v56, %v1192_v59  ;;  %2207 = vrot.lane.b32.xlu0 %v4843_v54, %s4752_s2  ;;  %2525 = vrot.lane.b32.xlu2 %v4845_v55, %s4752_s2  ;;  %v269_v56 = vld [vmem:[#allocation2 + $0x5e0] sm:$0xff] }
  0xec   :  { %454 = vmatmul.f32.gmra.mxu0 %v104_v57  ;;  %931 = vmatmul.f32.gmra.mxu2 %v263_v58 }
  0xed   :  { %1239 = vmatmul.f32.gmra.mxu1 %v104_v57  ;;  %1716 = vmatmul.f32.gmra.mxu3 %v263_v58 }
  0xee   :  { %2209 = vrot.lane.b32.xlu1 %v4847_v60, %s4752_s2 }
  0xef   :  { %v884_v61 = vpop.f32.mrf.mxu2 }
  0xf0   :  { %v1669_v62 = vpop.f32.mrf.mxu3 }
  0xf1   :  { %v410_v63 = vpop.f32.mrf.mxu0  ;;  %v4855_v2 = vmax.f32 %v884_v61, %v1669_v62 }
  0xf2   :  { %v1195_v3 = vpop.f32.mrf.mxu1 }
  0xf3   :  { %8797 = vst [vmem:[#allocation19_spill] sm:$0xff] %v4855_v2  ;;  %v4857_v5 = vmax.f32 %v410_v63, %v1195_v3  ;;  %v111_v63 = vld [vmem:[#allocation2 + $0xf0] sm:$0xff] }
  0xf4   :  { %457 = vmatmul.f32.gmra.mxu0 %v105_v0  ;;  %934 = vmatmul.f32.gmra.mxu2 %v264_v1 }
  0xf5   :  { %1242 = vmatmul.f32.gmra.mxu1 %v105_v0  ;;  %1719 = vmatmul.f32.gmra.mxu3 %v264_v1  ;;  %v270_v0 = vld [vmem:[#allocation2 + $0x5e8] sm:$0xff] }
  0xf6   :  { %2211 = vrot.lane.b32.xlu2 %v4857_v5, %s4752_s2  ;;  %2527 = vrot.lane.b32.xlu1 %v4855_v2, %s4752_s2 }
  0xf7   :  { %v887_v6 = vpop.f32.mrf.mxu2 }
  0xf8   :  { %v1672_v7 = vpop.f32.mrf.mxu3 }
  0xf9   :  { %v4863_v8 = vmax.f32 %v887_v6, %v1672_v7  ;;  %v413_v9 = vpop.f32.mrf.mxu0 }
  0xfa   :  { %v1198_v13 = vpop.f32.mrf.mxu1 }
  0xfb   :  { %8798 = vst [vmem:[#allocation20_spill] sm:$0xff] %v4863_v8  ;;  %2529 = vrot.lane.b32.xlu0 %v4863_v8, %s4752_s2  ;;  %v4867_v16 = vmax.f32 %v413_v9, %v1198_v13  ;;  %v112_v13 = vld [vmem:[#allocation2 + $0xf8] sm:$0xff]  ;;  %v125_v8 = vld [vmem:[#allocation2 + $0x160] sm:$0xff] }
  0xfc   :  { %460 = vmatmul.f32.gmra.mxu0 %v106_v11  ;;  %937 = vmatmul.f32.gmra.mxu2 %v265_v12 }
  0xfd   :  { %1245 = vmatmul.f32.gmra.mxu1 %v106_v11  ;;  %1722 = vmatmul.f32.gmra.mxu3 %v265_v12 }
  0xff   :  { %v890_v14 = vpop.f32.mrf.mxu2 }
 0x100   :  { %v1675_v15 = vpop.f32.mrf.mxu3 }
 0x101   :  { %v4869_v18 = vmax.f32 %v890_v14, %v1675_v15  ;;  %v416_v21 = vpop.f32.mrf.mxu0  ;;  %v271_v14 = vld [vmem:[#allocation2 + $0x5f0] sm:$0xff] }
 0x102   :  { %v1201_v24 = vpop.f32.mrf.mxu1 }
 0x103   :  { %8799 = vst [vmem:[#allocation21_spill] sm:$0xff] %v4869_v18  ;;  %v4871_v25 = vmax.f32 %v416_v21, %v1201_v24  ;;  %2213 = vrot.lane.b32.xlu0 %v4867_v16, %s4752_s2  ;;  %2531 = vrot.lane.b32.xlu2 %v4869_v18, %s4752_s2 }
 0x104   :  { %463 = vmatmul.f32.gmra.mxu0 %v107_v22  ;;  %940 = vmatmul.f32.gmra.mxu2 %v266_v23 }
 0x105   :  { %1248 = vmatmul.f32.gmra.mxu1 %v107_v22  ;;  %1725 = vmatmul.f32.gmra.mxu3 %v266_v23 }
 0x106   :  { %2215 = vrot.lane.b32.xlu1 %v4871_v25, %s4752_s2 }
 0x107   :  { %v893_v27 = vpop.f32.mrf.mxu2 }
 0x108   :  { %v1678_v28 = vpop.f32.mrf.mxu3 }
 0x109   :  { %v419_v29 = vpop.f32.mrf.mxu0  ;;  %v4879_v33 = vmax.f32 %v893_v27, %v1678_v28  ;;  %v113_v27 = vld [vmem:[#allocation2 + $0x100] sm:$0xff] }
 0x10a   :  { %v1204_v34 = vpop.f32.mrf.mxu1 }
 0x10b   :  { %8800 = vst [vmem:[#allocation22_spill] sm:$0xff] %v4879_v33  ;;  %v4881_v37 = vmax.f32 %v419_v29, %v1204_v34 }
 0x10c   :  { %466 = vmatmul.f32.gmra.mxu0 %v108_v31  ;;  %943 = vmatmul.f32.gmra.mxu2 %v267_v32 }
 0x10d   :  { %1251 = vmatmul.f32.gmra.mxu1 %v108_v31  ;;  %1728 = vmatmul.f32.gmra.mxu3 %v267_v32  ;;  %v272_v31 = vld [vmem:[#allocation2 + $0x5f8] sm:$0xff] }
 0x10e   :  { %2217 = vrot.lane.b32.xlu2 %v4881_v37, %s4752_s2  ;;  %2533 = vrot.lane.b32.xlu1 %v4879_v33, %s4752_s2 }
 0x10f   :  { %v896_v38 = vpop.f32.mrf.mxu2 }
 0x110   :  { %v1681_v40 = vpop.f32.mrf.mxu3 }
 0x111   :  { %v4887_v41 = vmax.f32 %v896_v38, %v1681_v40  ;;  %v422_v42 = vpop.f32.mrf.mxu0 }
 0x112   :  { %v1207_v46 = vpop.f32.mrf.mxu1 }
 0x113   :  { %8801 = vst [vmem:[#allocation23_spill] sm:$0xff] %v4887_v41  ;;  %2535 = vrot.lane.b32.xlu0 %v4887_v41, %s4752_s2  ;;  %v4891_v50 = vmax.f32 %v422_v42, %v1207_v46  ;;  %v114_v42 = vld [vmem:[#allocation2 + $0x108] sm:$0xff] }
 0x114   :  { %469 = vmatmul.f32.gmra.mxu0 %v109_v43  ;;  %946 = vmatmul.f32.gmra.mxu2 %v268_v45 }
 0x115   :  { %1254 = vmatmul.f32.gmra.mxu1 %v109_v43  ;;  %1731 = vmatmul.f32.gmra.mxu3 %v268_v45 }
 0x117   :  { %v899_v48 = vpop.f32.mrf.mxu2 }
 0x118   :  { %v1684_v49 = vpop.f32.mrf.mxu3 }
 0x119   :  { %v4893_v51 = vmax.f32 %v899_v48, %v1684_v49  ;;  %v425_v52 = vpop.f32.mrf.mxu0  ;;  %v273_v48 = vld [vmem:[#allocation2 + $0x600] sm:$0xff] }
 0x11a   :  { %v1210_v57 = vpop.f32.mrf.mxu1 }
 0x11b   :  { %8802 = vst [vmem:[#allocation24_spill] sm:$0xff] %v4893_v51  ;;  %v4895_v58 = vmax.f32 %v425_v52, %v1210_v57  ;;  %2219 = vrot.lane.b32.xlu0 %v4891_v50, %s4752_s2  ;;  %2537 = vrot.lane.b32.xlu2 %v4893_v51, %s4752_s2 }
 0x11c   :  { %472 = vmatmul.f32.gmra.mxu0 %v110_v53  ;;  %949 = vmatmul.f32.gmra.mxu2 %v269_v56 }
 0x11d   :  { %1257 = vmatmul.f32.gmra.mxu1 %v110_v53  ;;  %1734 = vmatmul.f32.gmra.mxu3 %v269_v56 }
 0x11e   :  { %2221 = vrot.lane.b32.xlu1 %v4895_v58, %s4752_s2 }
 0x11f   :  { %v902_v59 = vpop.f32.mrf.mxu2 }
 0x120   :  { %v1687_v61 = vpop.f32.mrf.mxu3 }
 0x121   :  { %v428_v62 = vpop.f32.mrf.mxu0  ;;  %v4903_v1 = vmax.f32 %v902_v59, %v1687_v61 }
 0x122   :  { %v1213_v3 = vpop.f32.mrf.mxu1 }
 0x123   :  { %8803 = vst [vmem:[#allocation25_spill] sm:$0xff] %v4903_v1  ;;  %v4905_v6 = vmax.f32 %v428_v62, %v1213_v3  ;;  %v274_v62 = vld [vmem:[#allocation2 + $0x608] sm:$0xff] }
 0x124   :  { %475 = vmatmul.f32.gmra.mxu0 %v111_v63  ;;  %952 = vmatmul.f32.gmra.mxu2 %v270_v0 }
 0x125   :  { %1260 = vmatmul.f32.gmra.mxu1 %v111_v63  ;;  %1737 = vmatmul.f32.gmra.mxu3 %v270_v0  ;;  %v115_v63 = vld [vmem:[#allocation2 + $0x110] sm:$0xff] }
 0x126   :  { %2223 = vrot.lane.b32.xlu2 %v4905_v6, %s4752_s2  ;;  %2539 = vrot.lane.b32.xlu1 %v4903_v1, %s4752_s2 }
 0x127   :  { %v905_v7 = vpop.f32.mrf.mxu2 }
 0x128   :  { %v1690_v9 = vpop.f32.mrf.mxu3  ;;  %v4927_v34 = vpop.permute.xlu0 %2195 }
 0x129   :  { %v4911_v11 = vmax.f32 %v905_v7, %v1690_v9  ;;  %v431_v12 = vpop.f32.mrf.mxu0 }
 0x12a   :  { %v1216_v15 = vpop.f32.mrf.mxu1 }
 0x12b   :  { %8804 = vst [vmem:[#allocation26_spill] sm:$0xff] %v4911_v11  ;;  %2541 = vrot.lane.b32.xlu0 %v4911_v11, %s4752_s2  ;;  %v4915_v22 = vmax.f32 %v431_v12, %v1216_v15 }
 0x12c   :  { %478 = vmatmul.f32.gmra.mxu0 %v112_v13  ;;  %955 = vmatmul.f32.gmra.mxu2 %v271_v14 }
 0x12d   :  { %1263 = vmatmul.f32.gmra.mxu1 %v112_v13  ;;  %1740 = vmatmul.f32.gmra.mxu3 %v271_v14  ;;  %v275_v13 = vld [vmem:[#allocation2 + $0x610] sm:$0xff]  ;;  %v116_v14 = vld [vmem:[#allocation2 + $0x118] sm:$0xff] }
 0x12f   :  { %v908_v21 = vpop.f32.mrf.mxu2 }
 0x130   :  { %v1693_v23 = vpop.f32.mrf.mxu3  ;;  %v4933_v52 = vpop.permute.xlu0 %2513 }
 0x131   :  { %v434_v24 = vpop.f32.mrf.mxu0  ;;  %v4917_v28 = vmax.f32 %v908_v21, %v1693_v23  ;;  %8807 = vst [vmem:[#allocation29_spill] sm:$0xff] %v4933_v52 }
 0x132   :  { %v1219_v29 = vpop.f32.mrf.mxu1 }
 0x133   :  { %8805 = vst [vmem:[#allocation27_spill] sm:$0xff] %v4917_v28  ;;  %v4919_v32 = vmax.f32 %v434_v24, %v1219_v29  ;;  %2225 = vrot.lane.b32.xlu0 %v4915_v22, %s4752_s2  ;;  %2543 = vrot.lane.b32.xlu2 %v4917_v28, %s4752_s2 }
 0x134   :  { %481 = vmatmul.f32.gmra.mxu0 %v113_v27  ;;  %958 = vmatmul.f32.gmra.mxu2 %v272_v31 }
 0x135   :  { %1266 = vmatmul.f32.gmra.mxu1 %v113_v27  ;;  %1743 = vmatmul.f32.gmra.mxu3 %v272_v31 }
 0x136   :  { %2227 = vrot.lane.b32.xlu1 %v4919_v32, %s4752_s2 }
 0x137   :  { %v911_v38 = vpop.f32.mrf.mxu2 }
 0x138   :  { %v1696_v40 = vpop.f32.mrf.mxu3  ;;  %v4945_v15 = vpop.permute.xlu0 %2197 }
 0x139   :  { %v4929_v43 = vmax.f32 %v911_v38, %v1696_v40  ;;  %v437_v45 = vpop.f32.mrf.mxu0  ;;  %v276_v40 = vld [vmem:[#allocation2 + $0x618] sm:$0xff] }
 0x13a   :  { %v1222_v46 = vpop.f32.mrf.mxu1 }
 0x13b   :  { %8806 = vst [vmem:[#allocation28_spill] sm:$0xff] %v4929_v43  ;;  %2545 = vrot.lane.b32.xlu2 %v4929_v43, %s4752_s2  ;;  %v4935_v56 = vmax.f32 %v437_v45, %v1222_v46 }
 0x13c   :  { %484 = vmatmul.f32.gmra.mxu0 %v114_v42  ;;  %961 = vmatmul.f32.gmra.mxu2 %v273_v48 }
 0x13d   :  { %1269 = vmatmul.f32.gmra.mxu1 %v114_v42  ;;  %1746 = vmatmul.f32.gmra.mxu3 %v273_v48  ;;  %v117_v42 = vld [vmem:[#allocation2 + $0x120] sm:$0xff]  ;;  %v4963_v48 = vpop.permute.xlu2 %2515 }
 0x13e   :  { %8812 = vst [vmem:[#allocation34_spill] sm:$0xff] %v4963_v48 }
 0x13f   :  { %v914_v49 = vpop.f32.mrf.mxu2 }
 0x140   :  { %v1699_v53 = vpop.f32.mrf.mxu3 }
 0x141   :  { %v4937_v57 = vmax.f32 %v914_v49, %v1699_v53  ;;  %v440_v59 = vpop.f32.mrf.mxu0 }
 0x142   :  { %v1225_v61 = vpop.f32.mrf.mxu1 }
 0x143   :  { %8808 = vst [vmem:[#allocation30_spill] sm:$0xff] %v4937_v57  ;;  %2547 = vrot.lane.b32.xlu0 %v4937_v57, %s4752_s2  ;;  %2229 = vrot.lane.b32.xlu2 %v4935_v56, %s4752_s2  ;;  %v4943_v7 = vmax.f32 %v440_v59, %v1225_v61 }
 0x144   :  { %964 = vmatmul.f32.gmra.mxu2 %v274_v62  ;;  %487 = vmatmul.f32.gmra.mxu0 %v115_v63 }
 0x145   :  { %1272 = vmatmul.f32.gmra.mxu1 %v115_v63  ;;  %1749 = vmatmul.f32.gmra.mxu3 %v274_v62  ;;  %v4957_v45 = vpop.permute.xlu0 %2519  ;;  %v277_v63 = vld [vmem:[#allocation2 + $0x620] sm:$0xff] }
 0x146   :  { %8811 = vst [vmem:[#allocation33_spill] sm:$0xff] %v4957_v45 }
 0x147   :  { %v917_v0 = vpop.f32.mrf.mxu2 }
 0x148   :  { %v1702_v3 = vpop.f32.mrf.mxu3 }
 0x149   :  { %v443_v9 = vpop.f32.mrf.mxu0  ;;  %v4953_v24 = vmax.f32 %v917_v0, %v1702_v3  ;;  %v118_v0 = vld [vmem:[#allocation2 + $0x128] sm:$0xff] }
 0x14a   :  { %v1228_v12 = vpop.f32.mrf.mxu1 }
 0x14b   :  { %v4947_v21 = vmax.f32 %v443_v9, %v1228_v12  ;;  %2231 = vrot.lane.b32.xlu0 %v4943_v7, %s4752_s2  ;;  %8809 = vst [vmem:[#allocation31_spill] sm:$0xff] %v4953_v24 }
 0x14c   :  { %967 = vmatmul.f32.gmra.mxu2 %v275_v13  ;;  %490 = vmatmul.f32.gmra.mxu0 %v116_v14 }
 0x14d   :  { %1275 = vmatmul.f32.gmra.mxu1 %v116_v14  ;;  %1752 = vmatmul.f32.gmra.mxu3 %v275_v13  ;;  %v4975_v9 = vpop.permute.xlu0 %2521 }
 0x14e   :  { %2233 = vrot.lane.b32.xlu1 %v4947_v21, %s4752_s2  ;;  %8814 = vst [vmem:[#allocation36_spill] sm:$0xff] %v4975_v9 }
 0x14f   :  { %v920_v23 = vpop.f32.mrf.mxu2 }
 0x150   :  { %v1705_v27 = vpop.f32.mrf.mxu3 }
 0x151   :  { %v4955_v29 = vmax.f32 %v920_v23, %v1705_v27  ;;  %v446_v31 = vpop.f32.mrf.mxu0 }
 0x152   :  { %v1231_v38 = vpop.f32.mrf.mxu1 }
 0x153   :  { %8810 = vst [vmem:[#allocation32_spill] sm:$0xff] %v4955_v29  ;;  %2551 = vrot.lane.b32.xlu2 %v4955_v29, %s4752_s2  ;;  %2549 = vrot.lane.b32.xlu0 %v4953_v24, %s4752_s2  ;;  %v4965_v53 = vmax.f32 %v446_v31, %v1231_v38  ;;  %v119_v31 = vld [vmem:[#allocation2 + $0x130] sm:$0xff]  ;;  %v278_v38 = vld [vmem:[#allocation2 + $0x628] sm:$0xff] }
 0x154   :  { %970 = vmatmul.f32.gmra.mxu2 %v276_v40  ;;  %493 = vmatmul.f32.gmra.mxu0 %v117_v42 }
 0x155   :  { %1278 = vmatmul.f32.gmra.mxu1 %v117_v42  ;;  %1755 = vmatmul.f32.gmra.mxu3 %v276_v40  ;;  %v4981_v40 = vpop.permute.xlu2 %2203  ;;  %v4983_v42 = vpop.permute.xlu1 %2199 }
 0x157   :  { %v923_v46 = vpop.f32.mrf.mxu2 }
 0x158   :  { %v1708_v49 = vpop.f32.mrf.mxu3 }
 0x159   :  { %v4967_v59 = vmax.f32 %v923_v46, %v1708_v49  ;;  %v449_v61 = vpop.f32.mrf.mxu0  ;;  %v4987_v46 = vpop.permute.xlu0 %2523 }
 0x15a   :  { %v1234_v62 = vpop.f32.mrf.mxu1  ;;  %8816 = vst [vmem:[#allocation38_spill] sm:$0xff] %v4987_v46  ;;  %v124_v46 = vld [vmem:[#allocation2 + $0x158] sm:$0xff] }
 0x15b   :  { %8813 = vst [vmem:[#allocation35_spill] sm:$0xff] %v4967_v59  ;;  %v4969_v3 = vmax.f32 %v449_v61, %v1234_v62  ;;  %2553 = vrot.lane.b32.xlu1 %v4967_v59, %s4752_s2  ;;  %2235 = vrot.lane.b32.xlu2 %v4965_v53, %s4752_s2 }
 0x15c   :  { %973 = vmatmul.f32.gmra.mxu2 %v277_v63  ;;  %496 = vmatmul.f32.gmra.mxu0 %v118_v0 }
 0x15d   :  { %1281 = vmatmul.f32.gmra.mxu1 %v118_v0  ;;  %1758 = vmatmul.f32.gmra.mxu3 %v277_v63  ;;  %v4995_v24 = vpop.permute.xlu2 %2205 }
 0x15e   :  { %2237 = vrot.lane.b32.xlu0 %v4969_v3, %s4752_s2 }
 0x15f   :  { %v926_v12 = vpop.f32.mrf.mxu2 }
 0x160   :  { %v1711_v13 = vpop.f32.mrf.mxu3 }
 0x161   :  { %v4979_v14 = vmax.f32 %v926_v12, %v1711_v13  ;;  %v452_v23 = vpop.f32.mrf.mxu0  ;;  %v279_v12 = vld [vmem:[#allocation2 + $0x630] sm:$0xff]  ;;  %v120_v13 = vld [vmem:[#allocation2 + $0x138] sm:$0xff] }
 0x162   :  { %v1237_v27 = vpop.f32.mrf.mxu1 }
 0x163   :  { %8815 = vst [vmem:[#allocation37_spill] sm:$0xff] %v4979_v14  ;;  %2555 = vrot.lane.b32.xlu1 %v4979_v14, %s4752_s2  ;;  %v4989_v62 = vmax.f32 %v452_v23, %v1237_v27  ;;  %v280_v14 = vld [vmem:[#allocation2 + $0x638] sm:$0xff] }
 0x164   :  { %976 = vmatmul.f32.gmra.mxu2 %v278_v38  ;;  %499 = vmatmul.f32.gmra.mxu0 %v119_v31 }
 0x165   :  { %1284 = vmatmul.f32.gmra.mxu1 %v119_v31  ;;  %1761 = vmatmul.f32.gmra.mxu3 %v278_v38  ;;  %v4997_v31 = vpop.permute.xlu1 %2517  ;;  %v5003_v38 = vpop.permute.xlu0 %2207 }
 0x166   :  { %8817 = vst [vmem:[#allocation39_spill] sm:$0xff] %v4997_v31  ;;  %v122_v31 = vld [vmem:[#allocation2 + $0x148] sm:$0xff] }
 0x167   :  { %v929_v49 = vpop.f32.mrf.mxu2 }
 0x168   :  { %v1714_v61 = vpop.f32.mrf.mxu3 }
 0x169   :  { %v455_v63 = vpop.f32.mrf.mxu0  ;;  %v5001_v27 = vmax.f32 %v929_v49, %v1714_v61 }
 0x16a   :  { %v1240_v0 = vpop.f32.mrf.mxu1 }
 0x16b   :  { %v4991_v57 = vmax.f32 %v455_v63, %v1240_v0  ;;  %2239 = vrot.lane.b32.xlu1 %v4989_v62, %s4752_s2  ;;  %8818 = vst [vmem:[#allocation40_spill] sm:$0xff] %v5001_v27 }
 0x16c   :  { %979 = vmatmul.f32.gmra.mxu2 %v279_v12  ;;  %502 = vmatmul.f32.gmra.mxu0 %v120_v13 }
 0x16d   :  { %1287 = vmatmul.f32.gmra.mxu1 %v120_v13  ;;  %1764 = vmatmul.f32.gmra.mxu3 %v279_v12  ;;  %v5011_v12 = vpop.permute.xlu2 %2525  ;;  %v5013_v61 = vpop.permute.xlu1 %2201 }
 0x16e   :  { %2241 = vrot.lane.b32.xlu2 %v4991_v57, %s4752_s2  ;;  %8820 = vst [vmem:[#allocation42_spill] sm:$0xff] %v5011_v12  ;;  %v5015_v13 = vpop.permute.xlu0 %2529 }
 0x16f   :  { %v932_v23 = vpop.f32.mrf.mxu2  ;;  %8821 = vst [vmem:[#allocation43_spill] sm:$0xff] %v5015_v13 }
 0x170   :  { %v1717_v63 = vpop.f32.mrf.mxu3 }
 0x171   :  { %v5005_v0 = vmax.f32 %v932_v23, %v1717_v63  ;;  %v458_v29 = vpop.f32.mrf.mxu0 }
 0x172   :  { %v1243_v59 = vpop.f32.mrf.mxu1 }
 0x173   :  { %8819 = vst [vmem:[#allocation41_spill] sm:$0xff] %v5005_v0  ;;  %2559 = vrot.lane.b32.xlu0 %v5005_v0, %s4752_s2  ;;  %2557 = vrot.lane.b32.xlu1 %v5001_v27, %s4752_s2  ;;  %v5017_v63 = vmax.f32 %v458_v29, %v1243_v59  ;;  %v281_v27 = vld [vmem:[#allocation2 + $0x640] sm:$0xff] }
 0x174   :  { %982 = vmatmul.f32.gmra.mxu2 %v280_v14  ;;  %505 = vmatmul.f32.gmra.mxu0 %v121_v17 }
 0x175   :  { %1290 = vmatmul.f32.gmra.mxu1 %v121_v17  ;;  %1767 = vmatmul.f32.gmra.mxu3 %v280_v14  ;;  %v5027_v17 = vpop.permute.xlu2 %2211  ;;  %v5031_v59 = vpop.permute.xlu1 %2209 }
 0x176   :  { %v5033_v45 = vpop.permute.xlu0 %2213 }
 0x177   :  { %v935_v49 = vpop.f32.mrf.mxu2 }
 0x178   :  { %v1720_v23 = vpop.f32.mrf.mxu3 }
 0x179   :  { %v5019_v48 = vmax.f32 %v935_v49, %v1720_v23  ;;  %v461_v0 = vpop.f32.mrf.mxu0  ;;  %v282_v49 = vld [vmem:[#allocation2 + $0x648] sm:$0xff]  ;;  %v123_v23 = vld [vmem:[#allocation2 + $0x150] sm:$0xff] }
 0x17a   :  { %v1246_v26 = vpop.f32.mrf.mxu1 }
 0x17b   :  { %8822 = vst [vmem:[#allocation44_spill] sm:$0xff] %v5019_v48  ;;  %v5021_v30 = vmax.f32 %v461_v0, %v1246_v26  ;;  %2243 = vrot.lane.b32.xlu0 %v5017_v63, %s4752_s2  ;;  %2561 = vrot.lane.b32.xlu2 %v5019_v48, %s4752_s2 }
 0x17c   :  { %985 = vmatmul.f32.gmra.mxu2 %v281_v27  ;;  %508 = vmatmul.f32.gmra.mxu0 %v122_v31 }
 0x17d   :  { %1293 = vmatmul.f32.gmra.mxu1 %v122_v31  ;;  %1770 = vmatmul.f32.gmra.mxu3 %v281_v27  ;;  %v5039_v31 = vpop.permute.xlu2 %2531  ;;  %v5045_v9 = vpop.permute.xlu1 %2527 }
 0x17e   :  { %2245 = vrot.lane.b32.xlu1 %v5021_v30, %s4752_s2  ;;  %8824 = vst [vmem:[#allocation46_spill] sm:$0xff] %v5039_v31 }
 0x17f   :  { %v938_v29 = vpop.f32.mrf.mxu2  ;;  %8825 = vst [vmem:[#allocation47_spill] sm:$0xff] %v5045_v9  ;;  %v284_v9 = vld [vmem:[#allocation2 + $0x658] sm:$0xff] }
 0x180   :  { %v1723_v26 = vpop.f32.mrf.mxu3 }
 0x181   :  { %v464_v14 = vpop.f32.mrf.mxu0  ;;  %v5035_v48 = vmax.f32 %v938_v29, %v1723_v26 }
 0x182   :  { %v1249_v0 = vpop.f32.mrf.mxu1 }
 0x183   :  { %8823 = vst [vmem:[#allocation45_spill] sm:$0xff] %v5035_v48  ;;  %v5037_v39 = vmax.f32 %v464_v14, %v1249_v0  ;;  %v283_v0 = vld [vmem:[#allocation2 + $0x650] sm:$0xff] }
 0x184   :  { %988 = vmatmul.f32.gmra.mxu2 %v282_v49  ;;  %511 = vmatmul.f32.gmra.mxu0 %v123_v23 }
 0x185   :  { %1296 = vmatmul.f32.gmra.mxu1 %v123_v23  ;;  %1773 = vmatmul.f32.gmra.mxu3 %v282_v49  ;;  %v5049_v49 = vpop.permute.xlu0 %2535  ;;  %v5059_v13 = vpop.permute.xlu1 %2215 }
 0x186   :  { %2247 = vrot.lane.b32.xlu2 %v5037_v39, %s4752_s2  ;;  %2563 = vrot.lane.b32.xlu1 %v5035_v48, %s4752_s2  ;;  %8827 = vst [vmem:[#allocation49_spill] sm:$0xff] %v5049_v49  ;;  %v5053_v48 = vpop.permute.xlu2 %2217 }
 0x187   :  { %v941_v27 = vpop.f32.mrf.mxu2 }
 0x188   :  { %v1726_v47 = vpop.f32.mrf.mxu3 }
 0x189   :  { %v5047_v29 = vmax.f32 %v941_v27, %v1726_v47  ;;  %v467_v26 = vpop.f32.mrf.mxu0 }
 0x18a   :  { %v1252_v14 = vpop.f32.mrf.mxu1 }
 0x18b   :  { %8826 = vst [vmem:[#allocation48_spill] sm:$0xff] %v5047_v29  ;;  %2565 = vrot.lane.b32.xlu0 %v5047_v29, %s4752_s2  ;;  %v5055_v12 = vmax.f32 %v467_v26, %v1252_v14 }
 0x18c   :  { %991 = vmatmul.f32.gmra.mxu2 %v283_v0  ;;  %514 = vmatmul.f32.gmra.mxu0 %v124_v46 }
 0x18d   :  { %1299 = vmatmul.f32.gmra.mxu1 %v124_v46  ;;  %1776 = vmatmul.f32.gmra.mxu3 %v283_v0  ;;  %v5067_v46 = vpop.permute.xlu0 %2219  ;;  %v5073_v29 = vpop.permute.xlu1 %2533 }
 0x18e   :  { %v5071_v26 = vpop.permute.xlu2 %2537  ;;  %8830 = vst [vmem:[#allocation52_spill] sm:$0xff] %v5073_v29 }
 0x18f   :  { %v944_v23 = vpop.f32.mrf.mxu2  ;;  %8829 = vst [vmem:[#allocation51_spill] sm:$0xff] %v5071_v26 }
 0x190   :  { %v1729_v55 = vpop.f32.mrf.mxu3 }
 0x191   :  { %v5057_v47 = vmax.f32 %v944_v23, %v1729_v55  ;;  %v470_v27 = vpop.f32.mrf.mxu0  ;;  %v285_v23 = vld [vmem:[#allocation2 + $0x660] sm:$0xff] }
 0x192   :  { %v1255_v2 = vpop.f32.mrf.mxu1 }
 0x193   :  { %8828 = vst [vmem:[#allocation50_spill] sm:$0xff] %v5057_v47  ;;  %v5061_v18 = vmax.f32 %v470_v27, %v1255_v2  ;;  %2249 = vrot.lane.b32.xlu0 %v5055_v12, %s4752_s2  ;;  %2567 = vrot.lane.b32.xlu2 %v5057_v47, %s4752_s2  ;;  %v126_v27 = vld [vmem:[#allocation2 + $0x168] sm:$0xff] }
 0x194   :  { %994 = vmatmul.f32.gmra.mxu2 %v284_v9  ;;  %517 = vmatmul.f32.gmra.mxu0 %v125_v8 }
 0x195   :  { %1302 = vmatmul.f32.gmra.mxu1 %v125_v8  ;;  %1779 = vmatmul.f32.gmra.mxu3 %v284_v9 }
 0x196   :  { %2251 = vrot.lane.b32.xlu1 %v5061_v18, %s4752_s2  ;;  %v2224_v29 = vpop.permute.xlu2 %2223 }
 0x197   :  { %v947_v55 = vpop.f32.mrf.mxu2  ;;  %v2721_v49 = vmax.f32 %v4905_v6, %v2224_v29 }
 0x198   :  { %v1732_v2 = vpop.f32.mrf.mxu3 }
 0x199   :  { %v473_v14 = vpop.f32.mrf.mxu0  ;;  %v5075_v47 = vmax.f32 %v947_v55, %v1732_v2  ;;  %v5094_v11 = vmax.f32 %v2721_v49, 0.0  ;;  %v2718_v49 = vmax.f32 %v4881_v37, %v5053_v48 }
 0x19a   :  { %v1258_v0 = vpop.f32.mrf.mxu1 }
 0x19b   :  { %8831 = vst [vmem:[#allocation53_spill] sm:$0xff] %v5075_v47  ;;  %v5077_v31 = vmax.f32 %v473_v14, %v1258_v0  ;;  %v286_v14 = vld [vmem:[#allocation2 + $0x668] sm:$0xff]  ;;  %v127_v0 = vld [vmem:[#allocation2 + $0x170] sm:$0xff]  ;;  %v5120_v48 = vmax.f32 %v2718_v49, 0.0 }
 0x19c   :  { %997 = vmatmul.f32.gmra.mxu2 %v285_v23  ;;  %520 = vmatmul.f32.gmra.mxu0 %v126_v27  ;;  %8835 = vst [vmem:[#allocation57_spill] sm:$0xff] %v5094_v11 }
 0x19d   :  { %1305 = vmatmul.f32.gmra.mxu1 %v126_v27  ;;  %v5079_v8 = vpop.permute.xlu0 %2541  ;;  %1782 = vmatmul.f32.gmra.mxu3 %v285_v23  ;;  %v2222_v23 = vpop.permute.xlu1 %2221  ;;  %8839 = vst [vmem:[#allocation61_spill] sm:$0xff] %v5120_v48 }
 0x19e   :  { %8832 = vst [vmem:[#allocation54_spill] sm:$0xff] %v5079_v8  ;;  %2253 = vrot.lane.b32.xlu2 %v5077_v31, %s4752_s2  ;;  %2569 = vrot.lane.b32.xlu1 %v5075_v47, %s4752_s2  ;;  %v2720_v51 = vmax.f32 %v4895_v58, %v2222_v23  ;;  %v3249_v58 = vld [vmem:[#allocation6 + $0x70] sm:$0xff] }
 0x19f   :  { %v950_v9 = vpop.f32.mrf.mxu2 }
 0x1a0   :  { %v1735_v33 = vpop.f32.mrf.mxu3 }
 0x1a1   :  { %v5085_v41 = vmax.f32 %v950_v9, %v1735_v33  ;;  %v476_v55 = vpop.f32.mrf.mxu0  ;;  %v3250_v33 = vld [vmem:[#allocation6 + $0x78] sm:$0xff] }
 0x1a2   :  { %v1261_v2 = vpop.f32.mrf.mxu1 }
 0x1a3   :  { %8833 = vst [vmem:[#allocation55_spill] sm:$0xff] %v5085_v41  ;;  %2571 = vrot.lane.b32.xlu0 %v5085_v41, %s4752_s2  ;;  %v2719_v41 = vmax.f32 %v4891_v50, %v5067_v46  ;;  %v5098_v8 = vmax.f32 %v476_v55, %v1261_v2  ;;  %v3248_v50 = vld [vmem:[#allocation6 + $0x68] sm:$0xff]  ;;  %v2717_v46 = vmax.f32 %v4871_v25, %v5059_v13  ;;  %v3246_v13 = vld [vmem:[#allocation6 + $0x58] sm:$0xff] }
 0x1a4   :  { %1000 = vmatmul.f32.gmra.mxu2 %v286_v14  ;;  %523 = vmatmul.f32.gmra.mxu0 %v127_v0  ;;  %v2716_v55 = vmax.f32 %v4867_v16, %v5033_v45  ;;  %v2715_v2 = vmax.f32 %v4857_v5, %v5027_v17  ;;  %v3245_v16 = vld [vmem:[#allocation6 + $0x50] sm:$0xff]  ;;  %v2714_v45 = vmax.f32 %v4847_v60, %v5031_v59  ;;  %v3244_v17 = vld [vmem:[#allocation6 + $0x48] sm:$0xff]  ;;  %v3243_v60 = vld [vmem:[#allocation6 + $0x40] sm:$0xff] }
 0x1a5   :  { %1308 = vmatmul.f32.gmra.mxu1 %v127_v0  ;;  %v2226_v27 = vpop.permute.xlu0 %2225  ;;  %1785 = vmatmul.f32.gmra.mxu3 %v286_v14  ;;  %v128_v14 = vld [vmem:[#allocation2 + $0x178] sm:$0xff]  ;;  %v5127_v23 = vmax.f32 %v2717_v46, 0.0  ;;  %v3278_v5 = vmul.f32 %v3246_v13, %v5120_v48  ;;  %v2713_v46 = vmax.f32 %v4843_v54, %v5003_v38  ;;  %v2712_v59 = vmax.f32 %v4833_v44, %v4995_v24 }
 0x1a6   :  { %v2722_v47 = vmax.f32 %v4915_v22, %v2226_v27  ;;  %v287_v22 = vld [vmem:[#allocation2 + $0x670] sm:$0xff]  ;;  %v3242_v38 = vld [vmem:[#allocation6 + $0x38] sm:$0xff] }
 0x1a7   :  { %v953_v9 = vpop.f32.mrf.mxu2  ;;  %8840 = vst [vmem:[#allocation62_spill] sm:$0xff] %v5127_v23 }
 0x1a8   :  { %v5092_v26 = vmax.f32 %v2722_v47, 0.0  ;;  %v1738_v1 = vpop.f32.mrf.mxu3  ;;  %v5107_v47 = vmax.f32 %v2720_v51, 0.0  ;;  %v3247_v51 = vld [vmem:[#allocation6 + $0x60] sm:$0xff] }
 0x1a9   :  { %v479_v28 = vpop.f32.mrf.mxu0  ;;  %v5101_v0 = vmax.f32 %v953_v9, %v1738_v1  ;;  %v5113_v1 = vmax.f32 %v2719_v41, 0.0 }
 0x1aa   :  { %8834 = vst [vmem:[#allocation56_spill] sm:$0xff] %v5092_v26  ;;  %v1264_v6 = vpop.f32.mrf.mxu1  ;;  %v3282_v29 = vmul.f32 %v3250_v33, %v5092_v26  ;;  %v3280_v25 = vmul.f32 %v3248_v50, %v5107_v47  ;;  %v5139_v50 = vmax.f32 %v2715_v2, 0.0 }
 0x1ab   :  { %8836 = vst [vmem:[#allocation58_spill] sm:$0xff] %v5101_v0  ;;  %v5103_v27 = vmax.f32 %v479_v28, %v1264_v6  ;;  %2255 = vrot.lane.b32.xlu0 %v5098_v8, %s4752_s2  ;;  %v3281_v28 = vmul.f32 %v3249_v58, %v5094_v11  ;;  %2573 = vrot.lane.b32.xlu2 %v5101_v0, %s4752_s2  ;;  %v5134_v58 = vmax.f32 %v2716_v55, 0.0 }
 0x1ac   :  { %8837 = vst [vmem:[#allocation59_spill] sm:$0xff] %v5107_v47  ;;  %3523 = vmatpush.msrb.mxu2 %v3282_v29  ;;  %526 = vmatmul.f32.gmra.mxu0 %v128_v14  ;;  %v3279_v6 = vmul.f32 %v3247_v51, %v5113_v1  ;;  %v288_v29 = vld [vmem:[#allocation2 + $0x678] sm:$0xff]  ;;  %v3275_v2 = vmul.f32 %v3243_v60, %v5139_v50 }
 0x1ad   :  { %1003 = vmatmul.f32.gmra.mxu2 %v287_v22  ;;  %1311 = vmatmul.f32.gmra.mxu1 %v128_v14  ;;  %8838 = vst [vmem:[#allocation60_spill] sm:$0xff] %v5113_v1  ;;  %v3276_v55 = vmul.f32 %v3244_v17, %v5134_v58  ;;  %v2708_v17 = vmax.f32 %v4809_v20, %v4945_v15  ;;  %v131_v15 = vld [vmem:[#allocation2 + $0x190] sm:$0xff]  ;;  %v137_v1 = vld [vmem:[#allocation2 + $0x1c0] sm:$0xff]  ;;  %v296_v47 = vld [vmem:[#allocation2 + $0x6b8] sm:$0xff] }
 0x1ae   :  { %1788 = vmatmul.f32.gmra.mxu3 %v287_v22  ;;  %2257 = vrot.lane.b32.xlu1 %v5103_v27, %s4752_s2  ;;  %v129_v22 = vld [vmem:[#allocation2 + $0x180] sm:$0xff]  ;;  %8841 = vst [vmem:[#allocation63_spill] sm:$0xff] %v5134_v58 }
 0x1af   :  { %v956_v37 = vpop.f32.mrf.mxu2  ;;  %3524 = vmatpush.msrb.mxu2 %v3281_v28  ;;  %8843 = vst [vmem:[#allocation65_spill] sm:$0xff] %v5139_v50  ;;  %v3277_v28 = vmul.f32 %v3245_v16, %v5127_v23  ;;  %v3240_v16 = vld [vmem:[#allocation6 + $0x28] sm:$0xff] }
 0x1b0   :  { %v1741_v41 = vpop.f32.mrf.mxu3 }
 0x1b1   :  { %3525 = vmatpush.msrb.mxu2 %v3280_v25  ;;  %v482_v33 = vpop.f32.mrf.mxu0  ;;  %v5136_v49 = vmax.f32 %v956_v37, %v1741_v41  ;;  %v5148_v37 = vmax.f32 %v2714_v45, 0.0  ;;  %v2711_v25 = vmax.f32 %v4821_v35, %v4981_v40  ;;  %v5155_v41 = vmax.f32 %v2713_v46, 0.0  ;;  %v5167_v40 = vpop.permute.xlu1 %2539 }
 0x1b2   :  { %v1267_v9 = vpop.f32.mrf.mxu1  ;;  %8848 = vst [vmem:[#allocation70_spill] sm:$0xff] %v5167_v40  ;;  %v302_v40 = vld [vmem:[#allocation2 + $0x6e8] sm:$0xff] }
 0x1b3   :  { %v5130_v14 = vmax.f32 %v482_v33, %v1267_v9  ;;  %8842 = vst [vmem:[#allocation64_spill] sm:$0xff] %v5136_v49  ;;  %3526 = vmatpush.msrb.mxu2 %v3279_v6  ;;  %v289_v33 = vld [vmem:[#allocation2 + $0x680] sm:$0xff]  ;;  %v130_v9 = vld [vmem:[#allocation2 + $0x188] sm:$0xff]  ;;  %v3241_v6 = vld [vmem:[#allocation6 + $0x30] sm:$0xff]  ;;  %v3274_v35 = vmul.f32 %v3242_v38, %v5148_v37  ;;  %v5169_v45 = vmax.f32 %v2711_v25, 0.0 }
 0x1b4   :  { %529 = vmatmul.f32.gmra.mxu0 %v129_v22  ;;  %8844 = vst [vmem:[#allocation66_spill] sm:$0xff] %v5148_v37  ;;  %v290_v25 = vld [vmem:[#allocation2 + $0x688] sm:$0xff] }
 0x1b5   :  { %1006 = vmatmul.f32.gmra.mxu2 %v288_v29  ;;  %1314 = vmatmul.f32.gmra.mxu1 %v129_v22  ;;  %8845 = vst [vmem:[#allocation67_spill] sm:$0xff] %v5155_v41  ;;  %v2710_v22 = vmax.f32 %v4825_v36, %v5013_v61  ;;  %v3273_v36 = vmul.f32 %v3241_v6, %v5155_v41  ;;  %v3239_v61 = vld [vmem:[#allocation6 + $0x20] sm:$0xff] }
 0x1b6   :  { %3527 = vmatpush.msrb.mxu2 %v3278_v5  ;;  %1791 = vmatmul.f32.gmra.mxu3 %v288_v29  ;;  %v5160_v29 = vmax.f32 %v2712_v59, 0.0  ;;  %8849 = vst [vmem:[#allocation71_spill] sm:$0xff] %v5169_v45  ;;  %v2709_v5 = vmax.f32 %v4805_v19, %v4983_v42  ;;  %v2707_v59 = vmax.f32 %v4795_v4, %v4927_v34  ;;  %v3238_v19 = vld [vmem:[#allocation6 + $0x18] sm:$0xff]  ;;  %v3236_v34 = vld [vmem:[#allocation6 + $0x8] sm:$0xff] }
 0x1b7   :  { %2259 = vrot.lane.b32.xlu2 %v5130_v14, %s4752_s2  ;;  %v959_v51 = vpop.f32.mrf.mxu2  ;;  %2575 = vrot.lane.b32.xlu1 %v5136_v49, %s4752_s2  ;;  %v5176_v46 = vmax.f32 %v2710_v22, 0.0  ;;  %v3271_v20 = vmul.f32 %v3239_v61, %v5169_v45  ;;  %v140_v49 = vld [vmem:[#allocation2 + $0x1d8] sm:$0xff] }
 0x1b8   :  { %3528 = vmatpush.msrb.mxu2 %v3277_v28  ;;  %v1744_v54 = vpop.f32.mrf.mxu3  ;;  %8847 = vst [vmem:[#allocation69_spill] sm:$0xff] %v5160_v29  ;;  %v3272_v60 = vmul.f32 %v3240_v16, %v5160_v29  ;;  %v5181_v42 = vmax.f32 %v2709_v5, 0.0 }
 0x1b9   :  { %v5157_v13 = vmax.f32 %v959_v51, %v1744_v54  ;;  %v485_v44 = vpop.f32.mrf.mxu0  ;;  %8850 = vst [vmem:[#allocation72_spill] sm:$0xff] %v5176_v46  ;;  %v3270_v4 = vmul.f32 %v3238_v19, %v5176_v46  ;;  %v5198_v22 = vpop.permute.xlu1 %2227 }
 0x1ba   :  { %3529 = vmatpush.msrb.mxu2 %v3276_v55  ;;  %v1270_v24 = vpop.f32.mrf.mxu1  ;;  %8851 = vst [vmem:[#allocation73_spill] sm:$0xff] %v5181_v42 }
 0x1bb   :  { %8846 = vst [vmem:[#allocation68_spill] sm:$0xff] %v5157_v13  ;;  %2577 = vrot.lane.b32.xlu0 %v5157_v13, %s4752_s2  ;;  %v5183_v55 = vmax.f32 %v485_v44, %v1270_v24  ;;  %v5195_v44 = vmax.f32 %v2707_v59, 0.0  ;;  %v132_v59 = vld [vmem:[#allocation2 + $0x198] sm:$0xff]  ;;  %v299_v13 = vld [vmem:[#allocation2 + $0x6d0] sm:$0xff] }
 0x1bc   :  { %3530 = vmatpush.msrb.mxu2 %v3275_v2  ;;  %532 = vmatmul.f32.gmra.mxu0 %v130_v9 }
 0x1bd   :  { %1009 = vmatmul.f32.gmra.mxu2 %v289_v33  ;;  %1317 = vmatmul.f32.gmra.mxu1 %v130_v9  ;;  %v5188_v9 = vmax.f32 %v2708_v17, 0.0  ;;  %8854 = vst [vmem:[#allocation76_spill] sm:$0xff] %v5195_v44 }
 0x1be   :  { %3531 = vmatpush.msrb.mxu2 %v3274_v35  ;;  %1794 = vmatmul.f32.gmra.mxu3 %v289_v33  ;;  %v3237_v33 = vld [vmem:[#allocation6 + $0x10] sm:$0xff]  ;;  %v3235_v35 = vld [vmem:[#allocation6] sm:$0xff] }
 0x1bf   :  { %v962_v28 = vpop.f32.mrf.mxu2  ;;  %8853 = vst [vmem:[#allocation75_spill] sm:$0xff] %v5188_v9  ;;  %v3269_v24 = vmul.f32 %v3237_v33, %v5181_v42  ;;  %v3268_v5 = vmul.f32 %v3236_v34, %v5188_v9  ;;  %v292_v34 = vld [vmem:[#allocation2 + $0x698] sm:$0xff]  ;;  %v135_v9 = vld [vmem:[#allocation2 + $0x1b0] sm:$0xff] }
 0x1c0   :  { %3532 = vmatpush.msrb.mxu2 %v3273_v36  ;;  %v1747_v51 = vpop.f32.mrf.mxu3 }
 0x1c1   :  { %v5185_v54 = vmax.f32 %v962_v28, %v1747_v51  ;;  %v488_v2 = vpop.f32.mrf.mxu0  ;;  %v3267_v28 = vmul.f32 %v3235_v35, %v5195_v44  ;;  %v5206_v51 = vpop.permute.xlu2 %2543 }
 0x1c2   :  { %3533 = vmatpush.msrb.mxu2 %v3272_v60  ;;  %v1273_v38 = vpop.f32.mrf.mxu1  ;;  %v291_v60 = vld [vmem:[#allocation2 + $0x690] sm:$0xff]  ;;  %8856 = vst [vmem:[#allocation78_spill] sm:$0xff] %v5206_v51 }
 0x1c3   :  { %8852 = vst [vmem:[#allocation74_spill] sm:$0xff] %v5185_v54  ;;  %v5190_v6 = vmax.f32 %v488_v2, %v1273_v38  ;;  %2261 = vrot.lane.b32.xlu0 %v5183_v55, %s4752_s2 }
 0x1c4   :  { %3534 = vmatpush.msrb.mxu2 %v3271_v20  ;;  %535 = vmatmul.f32.gmra.mxu0 %v131_v15  ;;  %v5210_v20 = vpop.permute.xlu0 %2547 }
 0x1c5   :  { %1012 = vmatmul.f32.gmra.mxu2 %v290_v25  ;;  %1320 = vmatmul.f32.gmra.mxu1 %v131_v15  ;;  %8857 = vst [vmem:[#allocation79_spill] sm:$0xff] %v5210_v20  ;;  %v5214_v15 = vpop.permute.xlu1 %2233 }
 0x1c6   :  { %3535 = vmatpush.msrb.mxu2 %v3270_v4  ;;  %1797 = vmatmul.f32.gmra.mxu3 %v290_v25 }
 0x1c7   :  { %2263 = vrot.lane.b32.xlu1 %v5190_v6, %s4752_s2  ;;  %v965_v16 = vpop.f32.mrf.mxu2 }
 0x1c8   :  { %3536 = vmatpush.msrb.mxu2 %v3269_v24  ;;  %v1750_v36 = vpop.f32.mrf.mxu3  ;;  %v133_v24 = vld [vmem:[#allocation2 + $0x1a0] sm:$0xff] }
 0x1c9   :  { %v5203_v61 = vmax.f32 %v965_v16, %v1750_v36  ;;  %v491_v19 = vpop.f32.mrf.mxu0 }
 0x1ca   :  { %3537 = vmatpush.msrb.mxu2 %v3268_v5  ;;  %v1276_v17 = vpop.f32.mrf.mxu1  ;;  %v5220_v5 = vpop.permute.xlu2 %2545 }
 0x1cb   :  { %8855 = vst [vmem:[#allocation77_spill] sm:$0xff] %v5203_v61  ;;  %v5208_v38 = vmax.f32 %v491_v19, %v1276_v17 }
 0x1cc   :  { %3538 = vmatpush.msrb.mxu2 %v3267_v28  ;;  %538 = vmatmul.f32.gmra.mxu0 %v132_v59  ;;  %8859 = vst [vmem:[#allocation81_spill] sm:$0xff] %v5220_v5  ;;  %v5226_v17 = vpop.permute.xlu0 %2231 }
 0x1cd   :  { %1015 = vmatmul.f32.gmra.mxu2 %v291_v60  ;;  %1323 = vmatmul.f32.gmra.mxu1 %v132_v59  ;;  %v5224_v36 = vpop.permute.xlu1 %2553 }
 0x1ce   :  { %1800 = vmatmul.f32.gmra.mxu3 %v291_v60  ;;  %2265 = vrot.lane.b32.xlu2 %v5208_v38, %s4752_s2  ;;  %8860 = vst [vmem:[#allocation82_spill] sm:$0xff] %v5224_v36 }
 0x1cf   :  { %v968_v25 = vpop.f32.mrf.mxu2 }
 0x1d0   :  { %v1753_v2 = vpop.f32.mrf.mxu3 }
 0x1d1   :  { %v5216_v33 = vmax.f32 %v968_v25, %v1753_v2  ;;  %v494_v35 = vpop.f32.mrf.mxu0  ;;  %v293_v25 = vld [vmem:[#allocation2 + $0x6a0] sm:$0xff]  ;;  %v134_v2 = vld [vmem:[#allocation2 + $0x1a8] sm:$0xff] }
 0x1d2   :  { %v1279_v4 = vpop.f32.mrf.mxu1 }
 0x1d3   :  { %8858 = vst [vmem:[#allocation80_spill] sm:$0xff] %v5216_v33  ;;  %v5218_v16 = vmax.f32 %v494_v35, %v1279_v4  ;;  %v175_v33 = vld [vmem:[#allocation2 + $0x2f0] sm:$0xff] }
 0x1d4   :  { %541 = vmatmul.f32.gmra.mxu0 %v133_v24 }
 0x1d5   :  { %1018 = vmatmul.f32.gmra.mxu2 %v292_v34  ;;  %1326 = vmatmul.f32.gmra.mxu1 %v133_v24  ;;  %v5238_v24 = vpop.permute.xlu0 %2549 }
 0x1d6   :  { %1803 = vmatmul.f32.gmra.mxu3 %v292_v34  ;;  %2267 = vrot.lane.b32.xlu0 %v5218_v16, %s4752_s2  ;;  %v5236_v34 = vpop.permute.xlu2 %2229  ;;  %8862 = vst [vmem:[#allocation84_spill] sm:$0xff] %v5238_v24 }
 0x1d7   :  { %v971_v28 = vpop.f32.mrf.mxu2 }
 0x1d8   :  { %v1756_v60 = vpop.f32.mrf.mxu3 }
 0x1d9   :  { %v5228_v59 = vmax.f32 %v971_v28, %v1756_v60  ;;  %v497_v4 = vpop.f32.mrf.mxu0  ;;  %v5240_v60 = vpop.permute.xlu1 %2555 }
 0x1da   :  { %v1282_v19 = vpop.f32.mrf.mxu1  ;;  %8863 = vst [vmem:[#allocation85_spill] sm:$0xff] %v5240_v60  ;;  %v298_v60 = vld [vmem:[#allocation2 + $0x6c8] sm:$0xff] }
 0x1db   :  { %8861 = vst [vmem:[#allocation83_spill] sm:$0xff] %v5228_v59  ;;  %v5230_v35 = vmax.f32 %v497_v4, %v1282_v19  ;;  %2585 = vrot.lane.b32.xlu2 %v5228_v59, %s4752_s2  ;;  %v294_v4 = vld [vmem:[#allocation2 + $0x6a8] sm:$0xff] }
 0x1dc   :  { %544 = vmatmul.f32.gmra.mxu0 %v134_v2 }
 0x1dd   :  { %1021 = vmatmul.f32.gmra.mxu2 %v293_v25  ;;  %1329 = vmatmul.f32.gmra.mxu1 %v134_v2  ;;  %v5252_v41 = vpop.permute.xlu0 %2237 }
 0x1de   :  { %1806 = vmatmul.f32.gmra.mxu3 %v293_v25  ;;  %2269 = vrot.lane.b32.xlu1 %v5230_v35, %s4752_s2  ;;  %v5248_v25 = vpop.permute.xlu2 %2551 }
 0x1df   :  { %v974_v28 = vpop.f32.mrf.mxu2  ;;  %8865 = vst [vmem:[#allocation87_spill] sm:$0xff] %v5248_v25 }
 0x1e0   :  { %v1759_v44 = vpop.f32.mrf.mxu3 }
 0x1e1   :  { %v5242_v42 = vmax.f32 %v974_v28, %v1759_v44  ;;  %v500_v46 = vpop.f32.mrf.mxu0  ;;  %v295_v28 = vld [vmem:[#allocation2 + $0x6b0] sm:$0xff]  ;;  %v5256_v37 = vpop.permute.xlu1 %2239 }
 0x1e2   :  { %v1285_v19 = vpop.f32.mrf.mxu1 }
 0x1e3   :  { %8864 = vst [vmem:[#allocation86_spill] sm:$0xff] %v5242_v42  ;;  %v5244_v45 = vmax.f32 %v500_v46, %v1285_v19  ;;  %v136_v19 = vld [vmem:[#allocation2 + $0x1b8] sm:$0xff] }
 0x1e4   :  { %547 = vmatmul.f32.gmra.mxu0 %v135_v9 }
 0x1e5   :  { %1024 = vmatmul.f32.gmra.mxu2 %v294_v4  ;;  %1332 = vmatmul.f32.gmra.mxu1 %v135_v9  ;;  %v5262_v23 = vpop.permute.xlu0 %2559 }
 0x1e6   :  { %1809 = vmatmul.f32.gmra.mxu3 %v294_v4  ;;  %2271 = vrot.lane.b32.xlu2 %v5244_v45, %s4752_s2  ;;  %v5260_v50 = vpop.permute.xlu2 %2235  ;;  %8867 = vst [vmem:[#allocation89_spill] sm:$0xff] %v5262_v23 }
 0x1e7   :  { %2587 = vrot.lane.b32.xlu1 %v5242_v42, %s4752_s2  ;;  %v977_v2 = vpop.f32.mrf.mxu2 }
 0x1e8   :  { %v1762_v29 = vpop.f32.mrf.mxu3 }
 0x1e9   :  { %v5254_v44 = vmax.f32 %v977_v2, %v1762_v29  ;;  %v503_v4 = vpop.f32.mrf.mxu0  ;;  %v5268_v11 = vpop.permute.xlu1 %2557 }
 0x1ea   :  { %v1288_v46 = vpop.f32.mrf.mxu1  ;;  %8869 = vst [vmem:[#allocation91_spill] sm:$0xff] %v5268_v11 }
 0x1eb   :  { %8866 = vst [vmem:[#allocation88_spill] sm:$0xff] %v5254_v44  ;;  %2589 = vrot.lane.b32.xlu0 %v5254_v44, %s4752_s2  ;;  %v5264_v29 = vmax.f32 %v503_v4, %v1288_v46  ;;  %v138_v4 = vld [vmem:[#allocation2 + $0x1c8] sm:$0xff] }
 0x1ec   :  { %550 = vmatmul.f32.gmra.mxu0 %v136_v19 }
 0x1ed   :  { %1027 = vmatmul.f32.gmra.mxu2 %v295_v28  ;;  %1335 = vmatmul.f32.gmra.mxu1 %v136_v19  ;;  %v297_v19 = vld [vmem:[#allocation2 + $0x6c0] sm:$0xff]  ;;  %v5282_v24 = vpop.permute.xlu0 %2243 }
 0x1ee   :  { %1812 = vmatmul.f32.gmra.mxu3 %v295_v28 }
 0x1ef   :  { %v980_v9 = vpop.f32.mrf.mxu2 }
 0x1f0   :  { %v1765_v58 = vpop.f32.mrf.mxu3 }
 0x1f1   :  { %v5266_v2 = vmax.f32 %v980_v9, %v1765_v58  ;;  %v506_v26 = vpop.f32.mrf.mxu0  ;;  %v5286_v36 = vpop.permute.xlu1 %2245 }
 0x1f2   :  { %v1291_v48 = vpop.f32.mrf.mxu1 }
 0x1f3   :  { %8868 = vst [vmem:[#allocation90_spill] sm:$0xff] %v5266_v2  ;;  %v5270_v20 = vmax.f32 %v506_v26, %v1291_v48  ;;  %2273 = vrot.lane.b32.xlu0 %v5264_v29, %s4752_s2  ;;  %2591 = vrot.lane.b32.xlu2 %v5266_v2, %s4752_s2  ;;  %v5278_v26 = vpop.permute.xlu2 %2241 }
 0x1f4   :  { %553 = vmatmul.f32.gmra.mxu0 %v137_v1 }
 0x1f5   :  { %1030 = vmatmul.f32.gmra.mxu2 %v296_v47  ;;  %1338 = vmatmul.f32.gmra.mxu1 %v137_v1 }
 0x1f6   :  { %1815 = vmatmul.f32.gmra.mxu3 %v296_v47  ;;  %2275 = vrot.lane.b32.xlu1 %v5270_v20, %s4752_s2 }
 0x1f7   :  { %v983_v58 = vpop.f32.mrf.mxu2 }
 0x1f8   :  { %v1768_v46 = vpop.f32.mrf.mxu3 }
 0x1f9   :  { %v5280_v48 = vmax.f32 %v983_v58, %v1768_v46  ;;  %v509_v9 = vpop.f32.mrf.mxu0 }
 0x1fa   :  { %v1294_v28 = vpop.f32.mrf.mxu1 }
 0x1fb   :  { %8870 = vst [vmem:[#allocation92_spill] sm:$0xff] %v5280_v48  ;;  %v5284_v25 = vmax.f32 %v509_v9, %v1294_v28  ;;  %v139_v28 = vld [vmem:[#allocation2 + $0x1d0] sm:$0xff]  ;;  %v5294_v9 = vpop.permute.xlu2 %2561 }
 0x1fc   :  { %556 = vmatmul.f32.gmra.mxu0 %v138_v4  ;;  %8872 = vst [vmem:[#allocation94_spill] sm:$0xff] %v5294_v9 }
 0x1fd   :  { %1033 = vmatmul.f32.gmra.mxu2 %v297_v19  ;;  %1341 = vmatmul.f32.gmra.mxu1 %v138_v4  ;;  %v5296_v23 = vpop.permute.xlu0 %2565 }
 0x1fe   :  { %1818 = vmatmul.f32.gmra.mxu3 %v297_v19  ;;  %2277 = vrot.lane.b32.xlu2 %v5284_v25, %s4752_s2  ;;  %8873 = vst [vmem:[#allocation95_spill] sm:$0xff] %v5296_v23  ;;  %v5300_v19 = vpop.permute.xlu1 %2563 }
 0x1ff   :  { %2593 = vrot.lane.b32.xlu1 %v5280_v48, %s4752_s2  ;;  %v986_v47 = vpop.f32.mrf.mxu2  ;;  %8874 = vst [vmem:[#allocation96_spill] sm:$0xff] %v5300_v19  ;;  %v142_v48 = vld [vmem:[#allocation2 + $0x1e8] sm:$0xff] }
 0x200   :  { %v1771_v1 = vpop.f32.mrf.mxu3 }
 0x201   :  { %v5292_v58 = vmax.f32 %v986_v47, %v1771_v1  ;;  %v512_v11 = vpop.f32.mrf.mxu0 }
 0x202   :  { %v1297_v46 = vpop.f32.mrf.mxu1 }
 0x203   :  { %8871 = vst [vmem:[#allocation93_spill] sm:$0xff] %v5292_v58  ;;  %2595 = vrot.lane.b32.xlu0 %v5292_v58, %s4752_s2  ;;  %v5302_v47 = vmax.f32 %v512_v11, %v1297_v46  ;;  %v5310_v19 = vpop.permute.xlu2 %2247 }
 0x204   :  { %559 = vmatmul.f32.gmra.mxu0 %v139_v28 }
 0x205   :  { %1036 = vmatmul.f32.gmra.mxu2 %v298_v60  ;;  %1344 = vmatmul.f32.gmra.mxu1 %v139_v28  ;;  %v300_v28 = vld [vmem:[#allocation2 + $0x6d8] sm:$0xff] }
 0x206   :  { %1821 = vmatmul.f32.gmra.mxu3 %v298_v60  ;;  %v5312_v60 = vpop.permute.xlu0 %2249 }
 0x207   :  { %v989_v4 = vpop.f32.mrf.mxu2 }
 0x208   :  { %v1774_v1 = vpop.f32.mrf.mxu3  ;;  %v2252_v11 = vpop.permute.xlu1 %2251 }
 0x209   :  { %v5304_v9 = vmax.f32 %v989_v4, %v1774_v1  ;;  %v515_v59 = vpop.f32.mrf.mxu0  ;;  %v141_v4 = vld [vmem:[#allocation2 + $0x1e0] sm:$0xff] }
 0x20a   :  { %v1300_v0 = vpop.f32.mrf.mxu1 }
 0x20b   :  { %8875 = vst [vmem:[#allocation97_spill] sm:$0xff] %v5304_v9  ;;  %v5306_v23 = vmax.f32 %v515_v59, %v1300_v0  ;;  %2279 = vrot.lane.b32.xlu0 %v5302_v47, %s4752_s2  ;;  %2597 = vrot.lane.b32.xlu2 %v5304_v9, %s4752_s2  ;;  %v5322_v2 = vpop.permute.xlu2 %2567 }
 0x20c   :  { %562 = vmatmul.f32.gmra.mxu0 %v140_v49  ;;  %8877 = vst [vmem:[#allocation99_spill] sm:$0xff] %v5322_v2 }
 0x20d   :  { %1039 = vmatmul.f32.gmra.mxu2 %v299_v13  ;;  %1347 = vmatmul.f32.gmra.mxu1 %v140_v49 }
 0x20e   :  { %1824 = vmatmul.f32.gmra.mxu3 %v299_v13  ;;  %2281 = vrot.lane.b32.xlu1 %v5306_v23, %s4752_s2 }
 0x20f   :  { %v992_v0 = vpop.f32.mrf.mxu2 }
 0x210   :  { %v1777_v59 = vpop.f32.mrf.mxu3  ;;  %v5330_v49 = vpop.permute.xlu1 %2569 }
 0x211   :  { %v5318_v1 = vmax.f32 %v992_v0, %v1777_v59  ;;  %v518_v42 = vpop.f32.mrf.mxu0  ;;  %8879 = vst [vmem:[#allocation101_spill] sm:$0xff] %v5330_v49 }
 0x212   :  { %v1303_v46 = vpop.f32.mrf.mxu1 }
 0x213   :  { %8876 = vst [vmem:[#allocation98_spill] sm:$0xff] %v5318_v1  ;;  %v5320_v44 = vmax.f32 %v518_v42, %v1303_v46  ;;  %v301_v46 = vld [vmem:[#allocation2 + $0x6e0] sm:$0xff] }
 0x214   :  { %565 = vmatmul.f32.gmra.mxu0 %v141_v4 }
 0x215   :  { %1042 = vmatmul.f32.gmra.mxu2 %v300_v28  ;;  %1350 = vmatmul.f32.gmra.mxu1 %v141_v4  ;;  %v5324_v13 = vpop.permute.xlu0 %2571  ;;  %v2254_v4 = vpop.permute.xlu2 %2253 }
 0x216   :  { %1827 = vmatmul.f32.gmra.mxu3 %v300_v28  ;;  %8878 = vst [vmem:[#allocation100_spill] sm:$0xff] %v5324_v13  ;;  %2283 = vrot.lane.b32.xlu2 %v5320_v44, %s4752_s2 }
 0x217   :  { %2599 = vrot.lane.b32.xlu1 %v5318_v1, %s4752_s2  ;;  %v995_v0 = vpop.f32.mrf.mxu2 }
 0x218   :  { %v1780_v59 = vpop.f32.mrf.mxu3 }
 0x219   :  { %v5332_v2 = vmax.f32 %v995_v0, %v1780_v59  ;;  %v521_v58 = vpop.f32.mrf.mxu0  ;;  %v2736_v59 = vmax.f32 %v5077_v31, %v2254_v4 }
 0x21a   :  { %v1306_v42 = vpop.f32.mrf.mxu1 }
 0x21b   :  { %8880 = vst [vmem:[#allocation102_spill] sm:$0xff] %v5332_v2  ;;  %v5334_v28 = vmax.f32 %v521_v58, %v1306_v42  ;;  %v5350_v31 = vmax.f32 %v2736_v59, 0.0 }
 0x21c   :  { %568 = vmatmul.f32.gmra.mxu0 %v142_v48 }
 0x21d   :  { %1045 = vmatmul.f32.gmra.mxu2 %v301_v46  ;;  %1353 = vmatmul.f32.gmra.mxu1 %v142_v48  ;;  %v2256_v13 = vpop.permute.xlu0 %2255  ;;  %v2735_v48 = vmax.f32 %v5061_v18, %v2252_v11  ;;  %8884 = vst [vmem:[#allocation106_spill] sm:$0xff] %v5350_v31  ;;  %v3264_v18 = vld [vmem:[#allocation6 + $0xe8] sm:$0xff] }
 0x21e   :  { %1830 = vmatmul.f32.gmra.mxu3 %v301_v46  ;;  %2285 = vrot.lane.b32.xlu0 %v5334_v28, %s4752_s2  ;;  %v2737_v49 = vmax.f32 %v5098_v8, %v2256_v13  ;;  %v143_v46 = vld [vmem:[#allocation2 + $0x1f0] sm:$0xff]  ;;  %v3266_v8 = vld [vmem:[#allocation6 + $0xf8] sm:$0xff] }
 0x21f   :  { %2601 = vrot.lane.b32.xlu1 %v5332_v2, %s4752_s2  ;;  %v998_v9 = vpop.f32.mrf.mxu2  ;;  %v3265_v13 = vld [vmem:[#allocation6 + $0xf0] sm:$0xff]  ;;  %v5357_v11 = vmax.f32 %v2735_v48, 0.0 }
 0x220   :  { %v2258_v0 = vpop.permute.xlu1 %2257  ;;  %v1783_v42 = vpop.f32.mrf.mxu3  ;;  %v5346_v43 = vmax.f32 %v2737_v49, 0.0 }
 0x221   :  { %v2738_v58 = vmax.f32 %v5103_v27, %v2258_v0  ;;  %v5343_v54 = vmax.f32 %v998_v9, %v1783_v42  ;;  %v524_v51 = vpop.f32.mrf.mxu0  ;;  %v2734_v9 = vmax.f32 %v5055_v12, %v5312_v60  ;;  %8885 = vst [vmem:[#allocation107_spill] sm:$0xff] %v5357_v11  ;;  %v2733_v0 = vmax.f32 %v5037_v39, %v5310_v19  ;;  %v303_v60 = vld [vmem:[#allocation2 + $0x6f0] sm:$0xff]  ;;  %v144_v42 = vld [vmem:[#allocation2 + $0x1f8] sm:$0xff] }
 0x222   :  { %v1309_v1 = vpop.f32.mrf.mxu1  ;;  %8882 = vst [vmem:[#allocation104_spill] sm:$0xff] %v5346_v43  ;;  %v3297_v4 = vmul.f32 %v3265_v13, %v5346_v43  ;;  %v3296_v12 = vmul.f32 %v3264_v18, %v5350_v31  ;;  %v3262_v19 = vld [vmem:[#allocation6 + $0xd8] sm:$0xff]  ;;  %v2731_v18 = vmax.f32 %v5017_v63, %v5282_v24  ;;  %v2729_v24 = vmax.f32 %v4989_v62, %v5256_v37 }
 0x223   :  { %8881 = vst [vmem:[#allocation103_spill] sm:$0xff] %v5343_v54  ;;  %v5348_v2 = vmax.f32 %v2738_v58, 0.0  ;;  %v5365_v48 = vmax.f32 %v2734_v9, 0.0  ;;  %v5376_v31 = vmax.f32 %v524_v51, %v1309_v1  ;;  %v3260_v51 = vld [vmem:[#allocation6 + $0xc8] sm:$0xff]  ;;  %v3258_v37 = vld [vmem:[#allocation6 + $0xb8] sm:$0xff] }
 0x224   :  { %571 = vmatmul.f32.gmra.mxu0 %v143_v46  ;;  %v5391_v1 = vmax.f32 %v2731_v18, 0.0 }
 0x225   :  { %8883 = vst [vmem:[#allocation105_spill] sm:$0xff] %v5348_v2  ;;  %1048 = vmatmul.f32.gmra.mxu2 %v302_v40  ;;  %1356 = vmatmul.f32.gmra.mxu1 %v143_v46  ;;  %v3298_v27 = vmul.f32 %v3266_v8, %v5348_v2  ;;  %v2732_v46 = vmax.f32 %v5021_v30, %v5286_v36  ;;  %v3261_v30 = vld [vmem:[#allocation6 + $0xd0] sm:$0xff] }
 0x226   :  { %1833 = vmatmul.f32.gmra.mxu3 %v302_v40  ;;  %v3263_v40 = vld [vmem:[#allocation6 + $0xe0] sm:$0xff]  ;;  %8886 = vst [vmem:[#allocation108_spill] sm:$0xff] %v5365_v48  ;;  %v2730_v36 = vmax.f32 %v4991_v57, %v5278_v26 }
 0x227   :  { %2603 = vrot.lane.b32.xlu1 %v5343_v54, %s4752_s2  ;;  %3543 = vmatpush.msrb.mxu3 %v3298_v27  ;;  %v1001_v49 = vpop.f32.mrf.mxu2  ;;  %v3295_v39 = vmul.f32 %v3263_v40, %v5357_v11  ;;  %v5382_v9 = vmax.f32 %v2732_v46, 0.0  ;;  %8890 = vst [vmem:[#allocation112_spill] sm:$0xff] %v5391_v1  ;;  %v3259_v40 = vld [vmem:[#allocation6 + $0xc0] sm:$0xff] }
 0x228   :  { %v1786_v59 = vpop.f32.mrf.mxu3  ;;  %v3291_v18 = vmul.f32 %v3259_v40, %v5391_v1 }
 0x229   :  { %3544 = vmatpush.msrb.mxu3 %v3297_v4  ;;  %v5367_v8 = vmax.f32 %v1001_v49, %v1786_v59  ;;  %v527_v27 = vpop.f32.mrf.mxu0  ;;  %v5372_v4 = vmax.f32 %v2733_v0, 0.0  ;;  %8889 = vst [vmem:[#allocation111_spill] sm:$0xff] %v5382_v9  ;;  %v3294_v49 = vmul.f32 %v3262_v19, %v5365_v48  ;;  %v304_v59 = vld [vmem:[#allocation2 + $0x6f8] sm:$0xff] }
 0x22a   :  { %v1312_v58 = vpop.f32.mrf.mxu1 }
 0x22b   :  { %8887 = vst [vmem:[#allocation109_spill] sm:$0xff] %v5367_v8  ;;  %v5369_v13 = vmax.f32 %v527_v27, %v1312_v58  ;;  %3545 = vmatpush.msrb.mxu3 %v3296_v12  ;;  %2605 = vrot.lane.b32.xlu0 %v5367_v8, %s4752_s2  ;;  %v3293_v57 = vmul.f32 %v3261_v30, %v5372_v4  ;;  %v5394_v58 = vmax.f32 %v2730_v36, 0.0  ;;  %v5412_v36 = vpop.permute.xlu2 %2573 }
 0x22c   :  { %8888 = vst [vmem:[#allocation110_spill] sm:$0xff] %v5372_v4  ;;  %574 = vmatmul.f32.gmra.mxu0 %v144_v42  ;;  %v2728_v12 = vmax.f32 %v4969_v3, %v5252_v41  ;;  %v2727_v27 = vmax.f32 %v4965_v53, %v5260_v50  ;;  %v3257_v3 = vld [vmem:[#allocation6 + $0xb0] sm:$0xff]  ;;  %v2726_v41 = vmax.f32 %v4947_v21, %v5214_v15 }
 0x22d   :  { %1051 = vmatmul.f32.gmra.mxu2 %v303_v60  ;;  %1359 = vmatmul.f32.gmra.mxu1 %v144_v42  ;;  %8891 = vst [vmem:[#allocation113_spill] sm:$0xff] %v5394_v58  ;;  %v145_v42 = vld [vmem:[#allocation2 + $0x200] sm:$0xff]  ;;  %v3290_v53 = vmul.f32 %v3258_v37, %v5394_v58  ;;  %v311_v58 = vld [vmem:[#allocation2 + $0x730] sm:$0xff] }
 0x22e   :  { %3546 = vmatpush.msrb.mxu3 %v3295_v39  ;;  %2289 = vrot.lane.b32.xlu2 %v5369_v13, %s4752_s2  ;;  %v5403_v39 = vmax.f32 %v2729_v24, 0.0  ;;  %v5410_v30 = vmax.f32 %v2728_v12, 0.0  ;;  %8895 = vst [vmem:[#allocation117_spill] sm:$0xff] %v5412_v36  ;;  %v5426_v40 = vmax.f32 %v2726_v41, 0.0  ;;  %v146_v12 = vld [vmem:[#allocation2 + $0x208] sm:$0xff] }
 0x22f   :  { %1836 = vmatmul.f32.gmra.mxu3 %v303_v60  ;;  %2287 = vrot.lane.b32.xlu1 %v5376_v31, %s4752_s2  ;;  %v3292_v60 = vmul.f32 %v3260_v51, %v5382_v9  ;;  %v2725_v51 = vmax.f32 %v4943_v7, %v5226_v17  ;;  %v152_v9 = vld [vmem:[#allocation2 + $0x238] sm:$0xff] }
 0x230   :  { %v1004_v63 = vpop.f32.mrf.mxu2  ;;  %3547 = vmatpush.msrb.mxu3 %v3294_v49  ;;  %8893 = vst [vmem:[#allocation115_spill] sm:$0xff] %v5403_v39  ;;  %v3256_v49 = vld [vmem:[#allocation6 + $0xa8] sm:$0xff]  ;;  %v3289_v21 = vmul.f32 %v3257_v3, %v5403_v39 }
 0x231   :  { %v1789_v26 = vpop.f32.mrf.mxu3  ;;  %v530_v62 = vpop.f32.mrf.mxu0  ;;  %8894 = vst [vmem:[#allocation116_spill] sm:$0xff] %v5410_v30 }
 0x232   :  { %v1315_v0 = vpop.f32.mrf.mxu1  ;;  %3548 = vmatpush.msrb.mxu3 %v3293_v57  ;;  %v5399_v46 = vmax.f32 %v1004_v63, %v1789_v26  ;;  %v5417_v63 = vmax.f32 %v2727_v27, 0.0  ;;  %v3255_v57 = vld [vmem:[#allocation6 + $0xa0] sm:$0xff]  ;;  %8897 = vst [vmem:[#allocation119_spill] sm:$0xff] %v5426_v40 }
 0x233   :  { %v5405_v19 = vmax.f32 %v530_v62, %v1315_v0  ;;  %v305_v26 = vld [vmem:[#allocation2 + $0x700] sm:$0xff]  ;;  %v2724_v0 = vmax.f32 %v4935_v56, %v5236_v34  ;;  %v5433_v62 = vmax.f32 %v2725_v51, 0.0  ;;  %v3253_v34 = vld [vmem:[#allocation6 + $0x90] sm:$0xff]  ;;  %v5445_v41 = vpop.permute.xlu2 %2259 }
 0x234   :  { %8892 = vst [vmem:[#allocation114_spill] sm:$0xff] %v5399_v46  ;;  %3549 = vmatpush.msrb.mxu3 %v3292_v60  ;;  %577 = vmatmul.f32.gmra.mxu0 %v145_v42  ;;  %v3254_v60 = vld [vmem:[#allocation6 + $0x98] sm:$0xff]  ;;  %v3287_v56 = vmul.f32 %v3255_v57, %v5417_v63  ;;  %v3251_v51 = vld [vmem:[#allocation6 + $0x80] sm:$0xff]  ;;  %v147_v57 = vld [vmem:[#allocation2 + $0x210] sm:$0xff] }
 0x235   :  { %1054 = vmatmul.f32.gmra.mxu2 %v304_v59  ;;  %1362 = vmatmul.f32.gmra.mxu1 %v145_v42  ;;  %8896 = vst [vmem:[#allocation118_spill] sm:$0xff] %v5417_v63  ;;  %v2723_v42 = vmax.f32 %v4919_v32, %v5198_v22  ;;  %v5438_v27 = vmax.f32 %v2724_v0, 0.0  ;;  %v3252_v22 = vld [vmem:[#allocation6 + $0x88] sm:$0xff]  ;;  %v151_v63 = vld [vmem:[#allocation2 + $0x230] sm:$0xff] }
 0x236   :  { %3550 = vmatpush.msrb.mxu3 %v3291_v18  ;;  %2607 = vrot.lane.b32.xlu2 %v5399_v46, %s4752_s2  ;;  %8899 = vst [vmem:[#allocation121_spill] sm:$0xff] %v5433_v62  ;;  %v3286_v18 = vmul.f32 %v3254_v60, %v5426_v40 }
 0x237   :  { %1839 = vmatmul.f32.gmra.mxu3 %v304_v59  ;;  %2291 = vrot.lane.b32.xlu0 %v5405_v19, %s4752_s2  ;;  %v3288_v59 = vmul.f32 %v3256_v49, %v5410_v30  ;;  %8900 = vst [vmem:[#allocation122_spill] sm:$0xff] %v5438_v27  ;;  %v5443_v3 = vmax.f32 %v2723_v42, 0.0 }
 0x238   :  { %v1007_v50 = vpop.f32.mrf.mxu2  ;;  %3551 = vmatpush.msrb.mxu3 %v3290_v53  ;;  %v3285_v53 = vmul.f32 %v3253_v34, %v5433_v62  ;;  %v5460_v34 = vpop.permute.xlu1 %2575 }
 0x239   :  { %v1792_v15 = vpop.f32.mrf.mxu3  ;;  %v533_v17 = vpop.f32.mrf.mxu0  ;;  %8901 = vst [vmem:[#allocation123_spill] sm:$0xff] %v5443_v3 }
 0x23a   :  { %v1318_v24 = vpop.f32.mrf.mxu1  ;;  %3552 = vmatpush.msrb.mxu3 %v3289_v21  ;;  %v5429_v7 = vmax.f32 %v1007_v50, %v1792_v15  ;;  %v306_v21 = vld [vmem:[#allocation2 + $0x708] sm:$0xff]  ;;  %8903 = vst [vmem:[#allocation125_spill] sm:$0xff] %v5460_v34 }
 0x23b   :  { %v5435_v37 = vmax.f32 %v533_v17, %v1318_v24  ;;  %v3284_v24 = vmul.f32 %v3252_v22, %v5438_v27  ;;  %v5458_v17 = vpop.permute.xlu2 %2265  ;;  %v154_v34 = vld [vmem:[#allocation2 + $0x248] sm:$0xff] }
 0x23c   :  { %8898 = vst [vmem:[#allocation120_spill] sm:$0xff] %v5429_v7  ;;  %3553 = vmatpush.msrb.mxu3 %v3288_v59  ;;  %580 = vmatmul.f32.gmra.mxu0 %v146_v12  ;;  %v3283_v59 = vmul.f32 %v3251_v51, %v5443_v3 }
 0x23d   :  { %1057 = vmatmul.f32.gmra.mxu2 %v305_v26  ;;  %1365 = vmatmul.f32.gmra.mxu1 %v146_v12 }
 0x23e   :  { %3554 = vmatpush.msrb.mxu3 %v3287_v56  ;;  %2609 = vrot.lane.b32.xlu2 %v5429_v7, %s4752_s2  ;;  %v307_v56 = vld [vmem:[#allocation2 + $0x710] sm:$0xff] }
 0x23f   :  { %1842 = vmatmul.f32.gmra.mxu3 %v305_v26  ;;  %2293 = vrot.lane.b32.xlu1 %v5435_v37, %s4752_s2 }
 0x240   :  { %v1010_v32 = vpop.f32.mrf.mxu2  ;;  %3555 = vmatpush.msrb.mxu3 %v3286_v18 }
 0x241   :  { %v1795_v50 = vpop.f32.mrf.mxu3  ;;  %v536_v26 = vpop.f32.mrf.mxu0 }
 0x242   :  { %v1321_v49 = vpop.f32.mrf.mxu1  ;;  %v5450_v15 = vmax.f32 %v1010_v32, %v1795_v50  ;;  %3556 = vmatpush.msrb.mxu3 %v3285_v53  ;;  %v148_v32 = vld [vmem:[#allocation2 + $0x218] sm:$0xff] }
 0x243   :  { %v5453_v0 = vmax.f32 %v536_v26, %v1321_v49  ;;  %v5468_v49 = vpop.permute.xlu2 %2585  ;;  %v149_v26 = vld [vmem:[#allocation2 + $0x220] sm:$0xff] }
 0x244   :  { %8902 = vst [vmem:[#allocation124_spill] sm:$0xff] %v5450_v15  ;;  %3557 = vmatpush.msrb.mxu3 %v3284_v24  ;;  %583 = vmatmul.f32.gmra.mxu0 %v147_v57  ;;  %v308_v24 = vld [vmem:[#allocation2 + $0x718] sm:$0xff] }
 0x245   :  { %1060 = vmatmul.f32.gmra.mxu2 %v306_v21  ;;  %1368 = vmatmul.f32.gmra.mxu1 %v147_v57  ;;  %8905 = vst [vmem:[#allocation127_spill] sm:$0xff] %v5468_v49 }
 0x246   :  { %3558 = vmatpush.msrb.mxu3 %v3283_v59  ;;  %2295 = vrot.lane.b32.xlu2 %v5453_v0, %s4752_s2 }
 0x247   :  { %1845 = vmatmul.f32.gmra.mxu3 %v306_v21 }
 0x248   :  { %v1013_v12 = vpop.f32.mrf.mxu2 }
 0x249   :  { %v1798_v60 = vpop.f32.mrf.mxu3  ;;  %v539_v22 = vpop.f32.mrf.mxu0 }
 0x24a   :  { %v1324_v42 = vpop.f32.mrf.mxu1  ;;  %v5462_v18 = vmax.f32 %v1013_v12, %v1798_v60  ;;  %v5472_v12 = vpop.permute.xlu1 %2263 }
 0x24b   :  { %v5464_v53 = vmax.f32 %v539_v22, %v1324_v42  ;;  %v309_v22 = vld [vmem:[#allocation2 + $0x720] sm:$0xff] }
 0x24c   :  { %8904 = vst [vmem:[#allocation126_spill] sm:$0xff] %v5462_v18  ;;  %586 = vmatmul.f32.gmra.mxu0 %v148_v32 }
 0x24d   :  { %1063 = vmatmul.f32.gmra.mxu2 %v307_v56  ;;  %1371 = vmatmul.f32.gmra.mxu1 %v148_v32 }
 0x24e   :  { %2297 = vrot.lane.b32.xlu0 %v5464_v53, %s4752_s2 }
 0x24f   :  { %1848 = vmatmul.f32.gmra.mxu3 %v307_v56 }
 0x250   :  { %v1016_v50 = vpop.f32.mrf.mxu2 }
 0x251   :  { %v1801_v51 = vpop.f32.mrf.mxu3  ;;  %v542_v59 = vpop.f32.mrf.mxu0 }
 0x252   :  { %v1327_v21 = vpop.f32.mrf.mxu1  ;;  %v5470_v57 = vmax.f32 %v1016_v50, %v1801_v51  ;;  %v150_v50 = vld [vmem:[#allocation2 + $0x228] sm:$0xff]  ;;  %v5480_v51 = vpop.permute.xlu2 %2271 }
 0x253   :  { %v5474_v60 = vmax.f32 %v542_v59, %v1327_v21  ;;  %v5482_v62 = vpop.permute.xlu1 %2269 }
 0x254   :  { %8906 = vst [vmem:[#allocation128_spill] sm:$0xff] %v5470_v57  ;;  %589 = vmatmul.f32.gmra.mxu0 %v149_v26 }
 0x255   :  { %1066 = vmatmul.f32.gmra.mxu2 %v308_v24  ;;  %1374 = vmatmul.f32.gmra.mxu1 %v149_v26  ;;  %v5486_v26 = vpop.permute.xlu0 %2577 }
 0x256   :  { %2299 = vrot.lane.b32.xlu1 %v5474_v60, %s4752_s2  ;;  %8908 = vst [vmem:[#allocation130_spill] sm:$0xff] %v5486_v26 }
 0x257   :  { %1851 = vmatmul.f32.gmra.mxu3 %v308_v24 }
 0x258   :  { %v1019_v42 = vpop.f32.mrf.mxu2 }
 0x259   :  { %v1804_v56 = vpop.f32.mrf.mxu3  ;;  %v545_v27 = vpop.f32.mrf.mxu0 }
 0x25a   :  { %v1330_v32 = vpop.f32.mrf.mxu1  ;;  %v5478_v3 = vmax.f32 %v1019_v42, %v1804_v56  ;;  %v310_v56 = vld [vmem:[#allocation2 + $0x728] sm:$0xff]  ;;  %v5492_v30 = vpop.permute.xlu2 %2591 }
 0x25b   :  { %v5484_v21 = vmax.f32 %v545_v27, %v1330_v32  ;;  %8910 = vst [vmem:[#allocation132_spill] sm:$0xff] %v5492_v30  ;;  %v5494_v32 = vpop.permute.xlu1 %2587 }
 0x25c   :  { %8907 = vst [vmem:[#allocation129_spill] sm:$0xff] %v5478_v3  ;;  %592 = vmatmul.f32.gmra.mxu0 %v150_v50 }
 0x25d   :  { %1069 = vmatmul.f32.gmra.mxu2 %v309_v22  ;;  %1377 = vmatmul.f32.gmra.mxu1 %v150_v50  ;;  %8911 = vst [vmem:[#allocation133_spill] sm:$0xff] %v5494_v32 }
 0x25e   :  { %2301 = vrot.lane.b32.xlu2 %v5484_v21, %s4752_s2 }
 0x25f   :  { %1854 = vmatmul.f32.gmra.mxu3 %v309_v22  ;;  %v5500_v22 = vpop.permute.xlu0 %2261 }
 0x260   :  { %v1022_v24 = vpop.f32.mrf.mxu2 }
 0x261   :  { %v1807_v59 = vpop.f32.mrf.mxu3  ;;  %v548_v27 = vpop.f32.mrf.mxu0 }
 0x262   :  { %v1333_v42 = vpop.f32.mrf.mxu1  ;;  %v5490_v40 = vmax.f32 %v1022_v24, %v1807_v59 }
 0x263   :  { %v5496_v39 = vmax.f32 %v548_v27, %v1333_v42 }
 0x264   :  { %8909 = vst [vmem:[#allocation131_spill] sm:$0xff] %v5490_v40  ;;  %595 = vmatmul.f32.gmra.mxu0 %v151_v63 }
 0x265   :  { %1072 = vmatmul.f32.gmra.mxu2 %v310_v56  ;;  %1380 = vmatmul.f32.gmra.mxu1 %v151_v63  ;;  %v5508_v63 = vpop.permute.xlu2 %2277 }
 0x266   :  { %2303 = vrot.lane.b32.xlu0 %v5496_v39, %s4752_s2 }
 0x267   :  { %1857 = vmatmul.f32.gmra.mxu3 %v310_v56  ;;  %v5514_v56 = vpop.permute.xlu0 %2267 }
 0x268   :  { %v1025_v50 = vpop.f32.mrf.mxu2  ;;  %v5510_v42 = vpop.permute.xlu1 %2275 }
 0x269   :  { %v1810_v24 = vpop.f32.mrf.mxu3  ;;  %v551_v4 = vpop.f32.mrf.mxu0 }
 0x26a   :  { %v1336_v59 = vpop.f32.mrf.mxu1  ;;  %v5502_v1 = vmax.f32 %v1025_v50, %v1810_v24  ;;  %v312_v24 = vld [vmem:[#allocation2 + $0x738] sm:$0xff] }
 0x26b   :  { %v5504_v48 = vmax.f32 %v551_v4, %v1336_v59  ;;  %v153_v59 = vld [vmem:[#allocation2 + $0x240] sm:$0xff] }
 0x26c   :  { %8912 = vst [vmem:[#allocation134_spill] sm:$0xff] %v5502_v1  ;;  %2621 = vrot.lane.b32.xlu2 %v5502_v1, %s4752_s2  ;;  %598 = vmatmul.f32.gmra.mxu0 %v152_v9 }
 0x26d   :  { %1075 = vmatmul.f32.gmra.mxu2 %v311_v58  ;;  %1383 = vmatmul.f32.gmra.mxu1 %v152_v9  ;;  %v5520_v1 = vpop.permute.xlu2 %2597 }
 0x26e   :  { %2305 = vrot.lane.b32.xlu1 %v5504_v48, %s4752_s2  ;;  %8914 = vst [vmem:[#allocation136_spill] sm:$0xff] %v5520_v1 }
 0x26f   :  { %1860 = vmatmul.f32.gmra.mxu3 %v311_v58  ;;  %v5528_v58 = vpop.permute.xlu0 %2589 }
 0x270   :  { %v1028_v27 = vpop.f32.mrf.mxu2  ;;  %8916 = vst [vmem:[#allocation138_spill] sm:$0xff] %v5528_v58  ;;  %v314_v58 = vld [vmem:[#allocation2 + $0x748] sm:$0xff] }
 0x271   :  { %v1813_v50 = vpop.f32.mrf.mxu3  ;;  %v554_v43 = vpop.f32.mrf.mxu0 }
 0x272   :  { %v1339_v4 = vpop.f32.mrf.mxu1  ;;  %v5516_v11 = vmax.f32 %v1028_v27, %v1813_v50  ;;  %v5524_v9 = vpop.permute.xlu1 %2593 }
 0x273   :  { %v5518_v2 = vmax.f32 %v554_v43, %v1339_v4  ;;  %8915 = vst [vmem:[#allocation137_spill] sm:$0xff] %v5524_v9  ;;  %v313_v4 = vld [vmem:[#allocation2 + $0x740] sm:$0xff] }
 0x274   :  { %8913 = vst [vmem:[#allocation135_spill] sm:$0xff] %v5516_v11  ;;  %601 = vmatmul.f32.gmra.mxu0 %v153_v59 }
 0x275   :  { %1078 = vmatmul.f32.gmra.mxu2 %v312_v24  ;;  %1386 = vmatmul.f32.gmra.mxu1 %v153_v59 }
 0x276   :  { %2307 = vrot.lane.b32.xlu2 %v5518_v2, %s4752_s2  ;;  %2623 = vrot.lane.b32.xlu1 %v5516_v11, %s4752_s2 }
 0x277   :  { %1863 = vmatmul.f32.gmra.mxu3 %v312_v24  ;;  %v5534_v24 = vpop.permute.xlu2 %2283  ;;  %v5542_v9 = vpop.permute.xlu0 %2273 }
 0x278   :  { %v1031_v27 = vpop.f32.mrf.mxu2 }
 0x279   :  { %v1816_v50 = vpop.f32.mrf.mxu3  ;;  %v557_v26 = vpop.f32.mrf.mxu0 }
 0x27a   :  { %v1342_v43 = vpop.f32.mrf.mxu1  ;;  %v5530_v36 = vmax.f32 %v1031_v27, %v1816_v50  ;;  %v155_v50 = vld [vmem:[#allocation2 + $0x250] sm:$0xff] }
 0x27b   :  { %v5538_v30 = vmax.f32 %v557_v26, %v1342_v43 }
 0x27c   :  { %8917 = vst [vmem:[#allocation139_spill] sm:$0xff] %v5530_v36  ;;  %2625 = vrot.lane.b32.xlu0 %v5530_v36, %s4752_s2  ;;  %604 = vmatmul.f32.gmra.mxu0 %v154_v34 }
 0x27d   :  { %1081 = vmatmul.f32.gmra.mxu2 %v313_v4  ;;  %1389 = vmatmul.f32.gmra.mxu1 %v154_v34 }
 0x27f   :  { %1866 = vmatmul.f32.gmra.mxu3 %v313_v4  ;;  %v156_v4 = vld [vmem:[#allocation2 + $0x258] sm:$0xff]  ;;  %v5555_v54 = vpop.permute.xlu0 %2595 }
 0x280   :  { %v5536_v59 = vpop.permute.xlu1 %2281  ;;  %v1034_v11 = vpop.f32.mrf.mxu2  ;;  %8920 = vst [vmem:[#allocation142_spill] sm:$0xff] %v5555_v54 }
 0x281   :  { %v1819_v49 = vpop.f32.mrf.mxu3  ;;  %v560_v36 = vpop.f32.mrf.mxu0  ;;  %v2750_v18 = vmax.f32 %v5306_v23, %v5536_v59  ;;  %v2748_v23 = vmax.f32 %v5284_v25, %v5508_v63  ;;  %v160_v63 = vld [vmem:[#allocation2 + $0x278] sm:$0xff] }
 0x282   :  { %v1345_v32 = vpop.f32.mrf.mxu1  ;;  %v5540_v27 = vmax.f32 %v1034_v11, %v1819_v49 }
 0x283   :  { %v5544_v1 = vmax.f32 %v560_v36, %v1345_v32  ;;  %v315_v36 = vld [vmem:[#allocation2 + $0x750] sm:$0xff]  ;;  %v5608_v59 = vmax.f32 %v2750_v18, 0.0 }
 0x284   :  { %8918 = vst [vmem:[#allocation140_spill] sm:$0xff] %v5540_v27  ;;  %2309 = vrot.lane.b32.xlu0 %v5538_v30, %s4752_s2  ;;  %2627 = vrot.lane.b32.xlu2 %v5540_v27, %s4752_s2 }
 0x285   :  { %1084 = vmatmul.f32.gmra.mxu2 %v314_v58  ;;  %1392 = vmatmul.f32.gmra.mxu1 %v155_v50  ;;  %8931 = vst [vmem:[#allocation153_spill] sm:$0xff] %v5608_v59 }
 0x286   :  { %607 = vmatmul.f32.gmra.mxu0 %v155_v50  ;;  %2311 = vrot.lane.b32.xlu1 %v5544_v1, %s4752_s2 }
 0x287   :  { %1869 = vmatmul.f32.gmra.mxu3 %v314_v58  ;;  %v4514_v58 = vld [vmem:[#allocation6 + $0x78] sm:$0xff] }
 0x288   :  { %v1037_v34 = vpop.f32.mrf.mxu2  ;;  %v2290_v49 = vpop.permute.xlu2 %2289 }
 0x289   :  { %v5552_v11 = vpop.permute.xlu1 %2599  ;;  %v1822_v26 = vpop.f32.mrf.mxu3  ;;  %v2754_v32 = vmax.f32 %v5369_v13, %v2290_v49 }
 0x28a   :  { %8919 = vst [vmem:[#allocation141_spill] sm:$0xff] %v5552_v11  ;;  %v1348_v43 = vpop.f32.mrf.mxu1  ;;  %v5557_v8 = vmax.f32 %v1037_v34, %v1822_v26  ;;  %v563_v27 = vpop.f32.mrf.mxu0 }
 0x28b   :  { %v5559_v50 = vmax.f32 %v2754_v32, 0.0  ;;  %v5561_v46 = vmax.f32 %v563_v27, %v1348_v43  ;;  %v316_v27 = vld [vmem:[#allocation2 + $0x758] sm:$0xff]  ;;  %v157_v43 = vld [vmem:[#allocation2 + $0x260] sm:$0xff] }
 0x28c   :  { %8921 = vst [vmem:[#allocation143_spill] sm:$0xff] %v5557_v8 }
 0x28d   :  { %8922 = vst [vmem:[#allocation144_spill] sm:$0xff] %v5559_v50  ;;  %1087 = vmatmul.f32.gmra.mxu2 %v315_v36  ;;  %1395 = vmatmul.f32.gmra.mxu1 %v156_v4  ;;  %v3314_v11 = vmul.f32 %v4514_v58, %v5559_v50 }
 0x28e   :  { %610 = vmatmul.f32.gmra.mxu0 %v156_v4  ;;  %2313 = vrot.lane.b32.xlu2 %v5561_v46, %s4752_s2  ;;  %v2280_v4 = vpop.permute.xlu0 %2279 }
 0x28f   :  { %1872 = vmatmul.f32.gmra.mxu3 %v315_v36  ;;  %2629 = vrot.lane.b32.xlu1 %v5557_v8, %s4752_s2 }
 0x290   :  { %3563 = vmatpush.msra.mxu2 %v3314_v11  ;;  %v1040_v34 = vpop.f32.mrf.mxu2 }
 0x291   :  { %v5568_v13 = vpop.permute.xlu1 %2601  ;;  %v1825_v49 = vpop.f32.mrf.mxu3 }
 0x292   :  { %8923 = vst [vmem:[#allocation145_spill] sm:$0xff] %v5568_v13  ;;  %v5570_v26 = vmax.f32 %v1040_v34, %v1825_v49  ;;  %v1351_v32 = vpop.f32.mrf.mxu1  ;;  %v566_v54 = vpop.f32.mrf.mxu0  ;;  %v158_v49 = vld [vmem:[#allocation2 + $0x268] sm:$0xff]  ;;  %v317_v13 = vld [vmem:[#allocation2 + $0x760] sm:$0xff] }
 0x293   :  { %v5576_v50 = vmax.f32 %v566_v54, %v1351_v32 }
 0x294   :  { %8924 = vst [vmem:[#allocation146_spill] sm:$0xff] %v5570_v26  ;;  %2631 = vrot.lane.b32.xlu0 %v5570_v26, %s4752_s2  ;;  %v318_v26 = vld [vmem:[#allocation2 + $0x768] sm:$0xff] }
 0x295   :  { %1090 = vmatmul.f32.gmra.mxu2 %v316_v27  ;;  %1398 = vmatmul.f32.gmra.mxu1 %v157_v43 }
 0x296   :  { %613 = vmatmul.f32.gmra.mxu0 %v157_v43 }
 0x297   :  { %1875 = vmatmul.f32.gmra.mxu3 %v316_v27  ;;  %v2286_v27 = vpop.permute.xlu0 %2285 }
 0x298   :  { %v1043_v11 = vpop.f32.mrf.mxu2  ;;  %v2752_v54 = vmax.f32 %v5334_v28, %v2286_v27 }
 0x299   :  { %v5574_v36 = vpop.permute.xlu1 %2603  ;;  %v1828_v58 = vpop.f32.mrf.mxu3 }
 0x29a   :  { %8925 = vst [vmem:[#allocation147_spill] sm:$0xff] %v5574_v36  ;;  %v5578_v8 = vmax.f32 %v1043_v11, %v1828_v58  ;;  %v1354_v34 = vpop.f32.mrf.mxu1  ;;  %v569_v7 = vpop.f32.mrf.mxu0 }
 0x29b   :  { %v5580_v15 = vmax.f32 %v569_v7, %v1354_v34  ;;  %v2751_v7 = vmax.f32 %v5320_v44, %v5534_v24  ;;  %v4515_v24 = vld [vmem:[#allocation6 + $0x70] sm:$0xff] }
 0x29c   :  { %8926 = vst [vmem:[#allocation148_spill] sm:$0xff] %v5578_v8  ;;  %2633 = vrot.lane.b32.xlu2 %v5578_v8, %s4752_s2  ;;  %2315 = vrot.lane.b32.xlu0 %v5576_v50, %s4752_s2 }
 0x29d   :  { %1093 = vmatmul.f32.gmra.mxu2 %v317_v13  ;;  %1401 = vmatmul.f32.gmra.mxu1 %v158_v49  ;;  %v5602_v44 = vmax.f32 %v2751_v7, 0.0  ;;  %v2747_v7 = vmax.f32 %v5270_v20, %v5510_v42  ;;  %v4518_v20 = vld [vmem:[#allocation6 + $0x58] sm:$0xff] }
 0x29e   :  { %616 = vmatmul.f32.gmra.mxu0 %v158_v49  ;;  %2317 = vrot.lane.b32.xlu1 %v5580_v15, %s4752_s2  ;;  %v159_v49 = vld [vmem:[#allocation2 + $0x270] sm:$0xff]  ;;  %v3310_v42 = vmul.f32 %v4518_v20, %v5608_v59  ;;  %v2742_v20 = vmax.f32 %v5208_v38, %v5458_v17  ;;  %v2741_v38 = vmax.f32 %v5190_v6, %v5472_v12  ;;  %v321_v12 = vld [vmem:[#allocation2 + $0x780] sm:$0xff] }
 0x29f   :  { %1878 = vmatmul.f32.gmra.mxu3 %v317_v13  ;;  %v5596_v13 = vmax.f32 %v2752_v54, 0.0  ;;  %8930 = vst [vmem:[#allocation152_spill] sm:$0xff] %v5602_v44 }
 0x2a0   :  { %v1046_v32 = vpop.f32.mrf.mxu2  ;;  %v5660_v17 = vmax.f32 %v2742_v20, 0.0  ;;  %v162_v20 = vld [vmem:[#allocation2 + $0x288] sm:$0xff] }
 0x2a1   :  { %v2288_v43 = vpop.permute.xlu1 %2287  ;;  %v1831_v58 = vpop.f32.mrf.mxu3  ;;  %8928 = vst [vmem:[#allocation150_spill] sm:$0xff] %v5596_v13 }
 0x2a2   :  { %v2753_v11 = vmax.f32 %v5376_v31, %v2288_v43  ;;  %v1357_v34 = vpop.f32.mrf.mxu1  ;;  %v5592_v8 = vmax.f32 %v1046_v32, %v1831_v58  ;;  %v572_v36 = vpop.f32.mrf.mxu0  ;;  %v2749_v31 = vmax.f32 %v5302_v47, %v2280_v4  ;;  %v4516_v32 = vld [vmem:[#allocation6 + $0x68] sm:$0xff]  ;;  %v319_v58 = vld [vmem:[#allocation2 + $0x770] sm:$0xff]  ;;  %8941 = vst [vmem:[#allocation163_spill] sm:$0xff] %v5660_v17 }
 0x2a3   :  { %v3312_v43 = vmul.f32 %v4516_v32, %v5596_v13 }
 0x2a4   :  { %8927 = vst [vmem:[#allocation149_spill] sm:$0xff] %v5592_v8  ;;  %v5598_v28 = vmax.f32 %v2753_v11, 0.0  ;;  %2635 = vrot.lane.b32.xlu2 %v5592_v8, %s4752_s2  ;;  %v5613_v47 = vmax.f32 %v2749_v31, 0.0  ;;  %v4517_v11 = vld [vmem:[#allocation6 + $0x60] sm:$0xff]  ;;  %v4519_v31 = vld [vmem:[#allocation6 + $0x50] sm:$0xff] }
 0x2a5   :  { %1096 = vmatmul.f32.gmra.mxu2 %v318_v26  ;;  %1404 = vmatmul.f32.gmra.mxu1 %v159_v49 }
 0x2a6   :  { %8929 = vst [vmem:[#allocation151_spill] sm:$0xff] %v5598_v28  ;;  %619 = vmatmul.f32.gmra.mxu0 %v159_v49  ;;  %v3313_v27 = vmul.f32 %v4515_v24, %v5598_v28  ;;  %v5616_v49 = vmax.f32 %v572_v36, %v1357_v34  ;;  %v5618_v24 = vmax.f32 %v2748_v23, 0.0  ;;  %v2745_v36 = vmax.f32 %v5244_v45, %v5480_v51  ;;  %v4520_v45 = vld [vmem:[#allocation6 + $0x48] sm:$0xff] }
 0x2a7   :  { %1881 = vmatmul.f32.gmra.mxu3 %v318_v26  ;;  %8932 = vst [vmem:[#allocation154_spill] sm:$0xff] %v5613_v47  ;;  %v3311_v26 = vmul.f32 %v4517_v11, %v5602_v44  ;;  %v5629_v34 = vmax.f32 %v2747_v7, 0.0  ;;  %v2743_v11 = vmax.f32 %v5218_v16, %v5514_v56  ;;  %v4522_v16 = vld [vmem:[#allocation6 + $0x38] sm:$0xff] }
 0x2a8   :  { %3564 = vmatpush.msra.mxu2 %v3313_v27  ;;  %v1049_v54 = vpop.f32.mrf.mxu2  ;;  %8933 = vst [vmem:[#allocation155_spill] sm:$0xff] %v5618_v24  ;;  %v2746_v27 = vmax.f32 %v5264_v29, %v5542_v9  ;;  %v3309_v29 = vmul.f32 %v4519_v31, %v5613_v47  ;;  %v2744_v9 = vmax.f32 %v5230_v35, %v5482_v62  ;;  %v5639_v7 = vmax.f32 %v2745_v36, 0.0  ;;  %v320_v62 = vld [vmem:[#allocation2 + $0x778] sm:$0xff] }
 0x2a9   :  { %v1834_v4 = vpop.f32.mrf.mxu3  ;;  %8934 = vst [vmem:[#allocation156_spill] sm:$0xff] %v5629_v34  ;;  %v3308_v51 = vmul.f32 %v4520_v45, %v5618_v24  ;;  %v5655_v31 = vmax.f32 %v2743_v11, 0.0  ;;  %v2740_v45 = vmax.f32 %v5183_v55, %v5500_v22  ;;  %v4525_v11 = vld [vmem:[#allocation6 + $0x20] sm:$0xff]  ;;  %v4526_v55 = vld [vmem:[#allocation6 + $0x18] sm:$0xff] }
 0x2aa   :  { %3565 = vmatpush.msra.mxu2 %v3312_v43  ;;  %v575_v25 = vpop.f32.mrf.mxu0  ;;  %v1360_v18 = vpop.f32.mrf.mxu1  ;;  %v5634_v23 = vmax.f32 %v2746_v27, 0.0  ;;  %8936 = vst [vmem:[#allocation158_spill] sm:$0xff] %v5639_v7  ;;  %v161_v27 = vld [vmem:[#allocation2 + $0x280] sm:$0xff]  ;;  %v5650_v36 = vmax.f32 %v1049_v54, %v1834_v4  ;;  %v4524_v4 = vld [vmem:[#allocation6 + $0x28] sm:$0xff]  ;;  %v3302_v22 = vmul.f32 %v4526_v55, %v5660_v17  ;;  %v167_v17 = vld [vmem:[#allocation2 + $0x2b0] sm:$0xff] }
 0x2ab   :  { %v5622_v32 = vmax.f32 %v575_v25, %v1360_v18  ;;  %8940 = vst [vmem:[#allocation162_spill] sm:$0xff] %v5655_v31  ;;  %v3303_v6 = vmul.f32 %v4525_v11, %v5655_v31  ;;  %v4529_v11 = vld [vmem:[#allocation6] sm:$0xff]  ;;  %v326_v31 = vld [vmem:[#allocation2 + $0x7a8] sm:$0xff]  ;;  %v328_v44 = vld [vmem:[#allocation2 + $0x7b8] sm:$0xff] }
 0x2ac   :  { %3566 = vmatpush.msra.mxu2 %v3311_v26  ;;  %2319 = vrot.lane.b32.xlu2 %v5616_v49, %s4752_s2  ;;  %8935 = vst [vmem:[#allocation157_spill] sm:$0xff] %v5634_v23  ;;  %v3306_v56 = vmul.f32 %v4522_v16, %v5634_v23  ;;  %v327_v23 = vld [vmem:[#allocation2 + $0x7b0] sm:$0xff] }
 0x2ad   :  { %1099 = vmatmul.f32.gmra.mxu2 %v319_v58  ;;  %1407 = vmatmul.f32.gmra.mxu1 %v160_v63  ;;  %8939 = vst [vmem:[#allocation161_spill] sm:$0xff] %v5650_v36 }
 0x2ae   :  { %3567 = vmatpush.msra.mxu2 %v3310_v42  ;;  %622 = vmatmul.f32.gmra.mxu0 %v160_v63  ;;  %v5648_v42 = vmax.f32 %v2744_v9, 0.0 }
 0x2af   :  { %1884 = vmatmul.f32.gmra.mxu3 %v319_v58  ;;  %2321 = vrot.lane.b32.xlu0 %v5622_v32, %s4752_s2  ;;  %v4521_v58 = vld [vmem:[#allocation6 + $0x40] sm:$0xff] }
 0x2b0   :  { %3568 = vmatpush.msra.mxu2 %v3309_v29  ;;  %v1052_v43 = vpop.f32.mrf.mxu2  ;;  %v3307_v35 = vmul.f32 %v4521_v58, %v5629_v34  ;;  %8938 = vst [vmem:[#allocation160_spill] sm:$0xff] %v5648_v42  ;;  %v4523_v29 = vld [vmem:[#allocation6 + $0x30] sm:$0xff]  ;;  %v3304_v9 = vmul.f32 %v4524_v4, %v5648_v42  ;;  %v5670_v58 = vmax.f32 %v2741_v38, 0.0 }
 0x2b2   :  { %v1837_v26 = vpop.f32.mrf.mxu3  ;;  %3569 = vmatpush.msra.mxu2 %v3308_v51  ;;  %v578_v18 = vpop.f32.mrf.mxu0  ;;  %8942 = vst [vmem:[#allocation164_spill] sm:$0xff] %v5670_v58 }
 0x2b3   :  { %v5644_v25 = vmax.f32 %v1052_v43, %v1837_v26  ;;  %v1363_v63 = vpop.f32.mrf.mxu1  ;;  %v3305_v43 = vmul.f32 %v4523_v29, %v5639_v7  ;;  %v2739_v26 = vmax.f32 %v5130_v14, %v5445_v41  ;;  %v5679_v29 = vmax.f32 %v2740_v45, 0.0  ;;  %v4527_v41 = vld [vmem:[#allocation6 + $0x10] sm:$0xff] }
 0x2b4   :  { %3570 = vmatpush.msra.mxu2 %v3307_v35  ;;  %2637 = vrot.lane.b32.xlu2 %v5650_v36, %s4752_s2  ;;  %v5672_v35 = vmax.f32 %v578_v18, %v1363_v63  ;;  %v3301_v18 = vmul.f32 %v4527_v41, %v5670_v58  ;;  %v329_v36 = vld [vmem:[#allocation2 + $0x7c0] sm:$0xff] }
 0x2b5   :  { %8937 = vst [vmem:[#allocation159_spill] sm:$0xff] %v5644_v25  ;;  %2639 = vrot.lane.b32.xlu1 %v5644_v25, %s4752_s2  ;;  %1102 = vmatmul.f32.gmra.mxu2 %v320_v62  ;;  %v5683_v14 = vmax.f32 %v2739_v26, 0.0  ;;  %v322_v26 = vld [vmem:[#allocation2 + $0x788] sm:$0xff] }
 0x2b6   :  { %3571 = vmatpush.msra.mxu2 %v3306_v56  ;;  %625 = vmatmul.f32.gmra.mxu0 %v161_v27  ;;  %8944 = vst [vmem:[#allocation166_spill] sm:$0xff] %v5679_v29 }
 0x2b7   :  { %1410 = vmatmul.f32.gmra.mxu1 %v161_v27  ;;  %1887 = vmatmul.f32.gmra.mxu3 %v320_v62  ;;  %8945 = vst [vmem:[#allocation167_spill] sm:$0xff] %v5683_v14 }
 0x2b8   :  { %3572 = vmatpush.msra.mxu2 %v3305_v43  ;;  %v1055_v54 = vpop.f32.mrf.mxu2  ;;  %v4528_v43 = vld [vmem:[#allocation6 + $0x8] sm:$0xff] }
 0x2b9   :  { %v3300_v38 = vmul.f32 %v4528_v43, %v5679_v29  ;;  %v5718_v29 = vpop.permute.xlu0 %2605 }
 0x2ba   :  { %v1840_v51 = vpop.f32.mrf.mxu3  ;;  %3573 = vmatpush.msra.mxu2 %v3304_v9  ;;  %v581_v62 = vpop.f32.mrf.mxu0  ;;  %8952 = vst [vmem:[#allocation174_spill] sm:$0xff] %v5718_v29  ;;  %v330_v29 = vld [vmem:[#allocation2 + $0x7c8] sm:$0xff] }
 0x2bb   :  { %v1366_v27 = vpop.f32.mrf.mxu1  ;;  %v5674_v16 = vmax.f32 %v1055_v54, %v1840_v51  ;;  %v5691_v54 = vpop.permute.xlu2 %2607 }
 0x2bc   :  { %v5676_v56 = vmax.f32 %v581_v62, %v1366_v27  ;;  %3574 = vmatpush.msra.mxu2 %v3303_v6  ;;  %8946 = vst [vmem:[#allocation168_spill] sm:$0xff] %v5691_v54  ;;  %v3299_v6 = vmul.f32 %v4529_v11, %v5683_v14  ;;  %v325_v14 = vld [vmem:[#allocation2 + $0x7a0] sm:$0xff] }
 0x2bd   :  { %8943 = vst [vmem:[#allocation165_spill] sm:$0xff] %v5674_v16  ;;  %2323 = vrot.lane.b32.xlu1 %v5672_v35, %s4752_s2  ;;  %1105 = vmatmul.f32.gmra.mxu2 %v321_v12 }
 0x2be   :  { %3575 = vmatpush.msra.mxu2 %v3302_v22  ;;  %628 = vmatmul.f32.gmra.mxu0 %v162_v20 }
 0x2bf   :  { %1413 = vmatmul.f32.gmra.mxu1 %v162_v20  ;;  %1890 = vmatmul.f32.gmra.mxu3 %v321_v12  ;;  %v163_v12 = vld [vmem:[#allocation2 + $0x290] sm:$0xff] }
 0x2c0   :  { %2641 = vrot.lane.b32.xlu0 %v5674_v16, %s4752_s2  ;;  %2325 = vrot.lane.b32.xlu2 %v5676_v56, %s4752_s2  ;;  %v1058_v63 = vpop.f32.mrf.mxu2 }
 0x2c1   :  { %3576 = vmatpush.msra.mxu2 %v3301_v18  ;;  %v164_v18 = vld [vmem:[#allocation2 + $0x298] sm:$0xff] }
 0x2c2   :  { %v1843_v4 = vpop.f32.mrf.mxu3  ;;  %v584_v45 = vpop.f32.mrf.mxu0 }
 0x2c3   :  { %v5693_v9 = vmax.f32 %v1058_v63, %v1843_v4  ;;  %3577 = vmatpush.msra.mxu2 %v3300_v38  ;;  %v1369_v51 = vpop.f32.mrf.mxu1  ;;  %v323_v63 = vld [vmem:[#allocation2 + $0x790] sm:$0xff]  ;;  %v5702_v43 = vpop.permute.xlu2 %2609 }
 0x2c4   :  { %v5696_v62 = vmax.f32 %v584_v45, %v1369_v51  ;;  %8949 = vst [vmem:[#allocation171_spill] sm:$0xff] %v5702_v43 }
 0x2c5   :  { %8947 = vst [vmem:[#allocation169_spill] sm:$0xff] %v5693_v9  ;;  %3578 = vmatpush.msra.mxu2 %v3299_v6 }
 0x2c6   :  { %631 = vmatmul.f32.gmra.mxu0 %v163_v12  ;;  %1108 = vmatmul.f32.gmra.mxu2 %v322_v26 }
 0x2c7   :  { %1416 = vmatmul.f32.gmra.mxu1 %v163_v12  ;;  %1893 = vmatmul.f32.gmra.mxu3 %v322_v26  ;;  %v165_v12 = vld [vmem:[#allocation2 + $0x2a0] sm:$0xff]  ;;  %v324_v26 = vld [vmem:[#allocation2 + $0x798] sm:$0xff] }
 0x2c8   :  { %2327 = vrot.lane.b32.xlu0 %v5696_v62, %s4752_s2  ;;  %v1061_v27 = vpop.f32.mrf.mxu2 }
 0x2ca   :  { %v1846_v20 = vpop.f32.mrf.mxu3  ;;  %v587_v22 = vpop.f32.mrf.mxu0 }
 0x2cb   :  { %v5700_v55 = vmax.f32 %v1061_v27, %v1846_v20  ;;  %v1372_v41 = vpop.f32.mrf.mxu1  ;;  %v5712_v20 = vpop.permute.xlu2 %2295 }
 0x2cc   :  { %v5704_v38 = vmax.f32 %v587_v22, %v1372_v41 }
 0x2cd   :  { %8948 = vst [vmem:[#allocation170_spill] sm:$0xff] %v5700_v55 }
 0x2ce   :  { %634 = vmatmul.f32.gmra.mxu0 %v164_v18  ;;  %1111 = vmatmul.f32.gmra.mxu2 %v323_v63 }
 0x2cf   :  { %1419 = vmatmul.f32.gmra.mxu1 %v164_v18  ;;  %1896 = vmatmul.f32.gmra.mxu3 %v323_v63 }
 0x2d0   :  { %2329 = vrot.lane.b32.xlu1 %v5704_v38, %s4752_s2  ;;  %v1064_v4 = vpop.f32.mrf.mxu2 }
 0x2d2   :  { %v1849_v45 = vpop.f32.mrf.mxu3  ;;  %v590_v11 = vpop.f32.mrf.mxu0 }
 0x2d3   :  { %v5708_v51 = vmax.f32 %v1064_v4, %v1849_v45  ;;  %v1375_v6 = vpop.f32.mrf.mxu1  ;;  %v166_v45 = vld [vmem:[#allocation2 + $0x2a8] sm:$0xff] }
 0x2d4   :  { %v5710_v27 = vmax.f32 %v590_v11, %v1375_v6  ;;  %v5722_v6 = vpop.permute.xlu2 %2301 }
 0x2d5   :  { %8950 = vst [vmem:[#allocation172_spill] sm:$0xff] %v5708_v51 }
 0x2d6   :  { %637 = vmatmul.f32.gmra.mxu0 %v165_v12  ;;  %1114 = vmatmul.f32.gmra.mxu2 %v324_v26 }
 0x2d7   :  { %1422 = vmatmul.f32.gmra.mxu1 %v165_v12  ;;  %1899 = vmatmul.f32.gmra.mxu3 %v324_v26 }
 0x2d8   :  { %2331 = vrot.lane.b32.xlu2 %v5710_v27, %s4752_s2  ;;  %v1067_v22 = vpop.f32.mrf.mxu2 }
 0x2da   :  { %v1852_v41 = vpop.f32.mrf.mxu3  ;;  %v593_v63 = vpop.f32.mrf.mxu0 }
 0x2db   :  { %v5716_v18 = vmax.f32 %v1067_v22, %v1852_v41  ;;  %v1378_v4 = vpop.f32.mrf.mxu1 }
 0x2dc   :  { %v5720_v11 = vmax.f32 %v593_v63, %v1378_v4  ;;  %v5730_v63 = vpop.permute.xlu0 %2291  ;;  %v5732_v4 = vpop.permute.xlu2 %2621 }
 0x2dd   :  { %8951 = vst [vmem:[#allocation173_spill] sm:$0xff] %v5716_v18 }
 0x2de   :  { %640 = vmatmul.f32.gmra.mxu0 %v166_v45  ;;  %1117 = vmatmul.f32.gmra.mxu2 %v325_v14  ;;  %8954 = vst [vmem:[#allocation176_spill] sm:$0xff] %v5732_v4 }
 0x2df   :  { %1425 = vmatmul.f32.gmra.mxu1 %v166_v45  ;;  %1902 = vmatmul.f32.gmra.mxu3 %v325_v14 }
 0x2e0   :  { %2333 = vrot.lane.b32.xlu0 %v5720_v11, %s4752_s2  ;;  %v1070_v12 = vpop.f32.mrf.mxu2 }
 0x2e2   :  { %v1855_v26 = vpop.f32.mrf.mxu3  ;;  %v596_v41 = vpop.f32.mrf.mxu0 }
 0x2e3   :  { %v5726_v22 = vmax.f32 %v1070_v12, %v1855_v26  ;;  %v1381_v58 = vpop.f32.mrf.mxu1 }
 0x2e4   :  { %v5728_v42 = vmax.f32 %v596_v41, %v1381_v58  ;;  %v168_v58 = vld [vmem:[#allocation2 + $0x2b8] sm:$0xff]  ;;  %v5738_v41 = vpop.permute.xlu1 %2293  ;;  %v5742_v24 = vpop.permute.xlu0 %2297 }
 0x2e5   :  { %8953 = vst [vmem:[#allocation175_spill] sm:$0xff] %v5726_v22 }
 0x2e6   :  { %643 = vmatmul.f32.gmra.mxu0 %v167_v17  ;;  %1120 = vmatmul.f32.gmra.mxu2 %v326_v31 }
 0x2e7   :  { %1428 = vmatmul.f32.gmra.mxu1 %v167_v17  ;;  %1905 = vmatmul.f32.gmra.mxu3 %v326_v31  ;;  %v5744_v31 = vpop.permute.xlu2 %2307 }
 0x2e8   :  { %2335 = vrot.lane.b32.xlu1 %v5728_v42, %s4752_s2  ;;  %v1073_v14 = vpop.f32.mrf.mxu2 }
 0x2ea   :  { %v1858_v45 = vpop.f32.mrf.mxu3  ;;  %v599_v26 = vpop.f32.mrf.mxu0 }
 0x2eb   :  { %v5736_v12 = vmax.f32 %v1073_v14, %v1858_v45  ;;  %v1384_v7 = vpop.f32.mrf.mxu1 }
 0x2ec   :  { %v5740_v34 = vmax.f32 %v599_v26, %v1384_v7  ;;  %v169_v7 = vld [vmem:[#allocation2 + $0x2c0] sm:$0xff]  ;;  %v5750_v26 = vpop.permute.xlu1 %2299  ;;  %v5754_v28 = vpop.permute.xlu0 %2303 }
 0x2ed   :  { %8955 = vst [vmem:[#allocation177_spill] sm:$0xff] %v5736_v12  ;;  %v332_v12 = vld [vmem:[#allocation2 + $0x7d8] sm:$0xff] }
 0x2ee   :  { %1123 = vmatmul.f32.gmra.mxu2 %v327_v23  ;;  %646 = vmatmul.f32.gmra.mxu0 %v168_v58 }
 0x2ef   :  { %1431 = vmatmul.f32.gmra.mxu1 %v168_v58  ;;  %1908 = vmatmul.f32.gmra.mxu3 %v327_v23  ;;  %v5756_v23 = vpop.permute.xlu2 %2627 }
 0x2f0   :  { %2337 = vrot.lane.b32.xlu2 %v5740_v34, %s4752_s2  ;;  %v1076_v17 = vpop.f32.mrf.mxu2  ;;  %8957 = vst [vmem:[#allocation179_spill] sm:$0xff] %v5756_v23 }
 0x2f2   :  { %v1861_v14 = vpop.f32.mrf.mxu3  ;;  %v602_v47 = vpop.f32.mrf.mxu0 }
 0x2f3   :  { %v5748_v45 = vmax.f32 %v1076_v17, %v1861_v14  ;;  %v1387_v59 = vpop.f32.mrf.mxu1 }
 0x2f4   :  { %v5752_v13 = vmax.f32 %v602_v47, %v1387_v59  ;;  %v170_v59 = vld [vmem:[#allocation2 + $0x2c8] sm:$0xff]  ;;  %v5762_v47 = vpop.permute.xlu1 %2305  ;;  %v5766_v16 = vpop.permute.xlu0 %2625 }
 0x2f5   :  { %8956 = vst [vmem:[#allocation178_spill] sm:$0xff] %v5748_v45 }
 0x2f6   :  { %1126 = vmatmul.f32.gmra.mxu2 %v328_v44  ;;  %649 = vmatmul.f32.gmra.mxu0 %v169_v7  ;;  %8959 = vst [vmem:[#allocation181_spill] sm:$0xff] %v5766_v16 }
 0x2f7   :  { %1434 = vmatmul.f32.gmra.mxu1 %v169_v7  ;;  %1911 = vmatmul.f32.gmra.mxu3 %v328_v44  ;;  %v5770_v7 = vpop.permute.xlu2 %2313 }
 0x2f8   :  { %2339 = vrot.lane.b32.xlu0 %v5752_v13, %s4752_s2  ;;  %v1079_v58 = vpop.f32.mrf.mxu2 }
 0x2fa   :  { %v1864_v17 = vpop.f32.mrf.mxu3  ;;  %v605_v4 = vpop.f32.mrf.mxu0 }
 0x2fb   :  { %v5760_v14 = vmax.f32 %v1079_v58, %v1864_v17  ;;  %v1390_v8 = vpop.f32.mrf.mxu1 }
 0x2fc   :  { %v5764_v25 = vmax.f32 %v605_v4, %v1390_v8  ;;  %v171_v8 = vld [vmem:[#allocation2 + $0x2d0] sm:$0xff]  ;;  %v5774_v4 = vpop.permute.xlu1 %2623 }
 0x2fd   :  { %8958 = vst [vmem:[#allocation180_spill] sm:$0xff] %v5760_v14 }
 0x2fe   :  { %1129 = vmatmul.f32.gmra.mxu2 %v329_v36  ;;  %652 = vmatmul.f32.gmra.mxu0 %v170_v59  ;;  %8961 = vst [vmem:[#allocation183_spill] sm:$0xff] %v5774_v4 }
 0x2ff   :  { %1437 = vmatmul.f32.gmra.mxu1 %v170_v59  ;;  %1914 = vmatmul.f32.gmra.mxu3 %v329_v36  ;;  %v5780_v36 = vpop.permute.xlu0 %2309 }
 0x300   :  { %2341 = vrot.lane.b32.xlu1 %v5764_v25, %s4752_s2  ;;  %v1082_v44 = vpop.f32.mrf.mxu2 }
 0x302   :  { %v1867_v58 = vpop.f32.mrf.mxu3 }
 0x303   :  { %v5772_v17 = vmax.f32 %v1082_v44, %v1867_v58  ;;  %v608_v23 = vpop.f32.mrf.mxu0  ;;  %v1393_v51 = vpop.f32.mrf.mxu1 }
 0x304   :  { %v5776_v16 = vmax.f32 %v608_v23, %v1393_v51  ;;  %v5784_v44 = vpop.permute.xlu2 %2633  ;;  %v331_v51 = vld [vmem:[#allocation2 + $0x7d0] sm:$0xff]  ;;  %v172_v23 = vld [vmem:[#allocation2 + $0x2d8] sm:$0xff]  ;;  %v5790_v55 = vpop.permute.xlu1 %2311 }
 0x305   :  { %8960 = vst [vmem:[#allocation182_spill] sm:$0xff] %v5772_v17  ;;  %2659 = vrot.lane.b32.xlu0 %v5772_v17, %s4752_s2 }
 0x306   :  { %1132 = vmatmul.f32.gmra.mxu2 %v330_v29  ;;  %655 = vmatmul.f32.gmra.mxu0 %v171_v8  ;;  %8962 = vst [vmem:[#allocation184_spill] sm:$0xff] %v5784_v44 }
 0x307   :  { %1440 = vmatmul.f32.gmra.mxu1 %v171_v8  ;;  %1917 = vmatmul.f32.gmra.mxu3 %v330_v29  ;;  %v5792_v29 = vpop.permute.xlu0 %2631 }
 0x308   :  { %2343 = vrot.lane.b32.xlu2 %v5776_v16, %s4752_s2  ;;  %v1085_v59 = vpop.f32.mrf.mxu2  ;;  %8964 = vst [vmem:[#allocation186_spill] sm:$0xff] %v5792_v29 }
 0x30a   :  { %v1870_v58 = vpop.f32.mrf.mxu3 }
 0x30b   :  { %v611_v54 = vpop.f32.mrf.mxu0  ;;  %v1396_v4 = vpop.f32.mrf.mxu1  ;;  %v5786_v43 = vmax.f32 %v1085_v59, %v1870_v58 }
 0x30c   :  { %v5788_v17 = vmax.f32 %v611_v54, %v1396_v4  ;;  %v173_v54 = vld [vmem:[#allocation2 + $0x2e0] sm:$0xff]  ;;  %v5798_v4 = vpop.permute.xlu2 %2635 }
 0x30d   :  { %8963 = vst [vmem:[#allocation185_spill] sm:$0xff] %v5786_v43 }
 0x30e   :  { %1135 = vmatmul.f32.gmra.mxu2 %v331_v51  ;;  %658 = vmatmul.f32.gmra.mxu0 %v172_v23  ;;  %8965 = vst [vmem:[#allocation187_spill] sm:$0xff] %v5798_v4  ;;  %v174_v4 = vld [vmem:[#allocation2 + $0x2e8] sm:$0xff] }
 0x30f   :  { %1443 = vmatmul.f32.gmra.mxu1 %v172_v23  ;;  %1920 = vmatmul.f32.gmra.mxu3 %v331_v51  ;;  %v5802_v23 = vpop.permute.xlu1 %2629  ;;  %v2316_v29 = vpop.permute.xlu0 %2315 }
 0x310   :  { %2345 = vrot.lane.b32.xlu0 %v5788_v17, %s4752_s2  ;;  %v1088_v8 = vpop.f32.mrf.mxu2  ;;  %2661 = vrot.lane.b32.xlu2 %v5786_v43, %s4752_s2  ;;  %8967 = vst [vmem:[#allocation189_spill] sm:$0xff] %v5802_v23  ;;  %v333_v23 = vld [vmem:[#allocation2 + $0x7e0] sm:$0xff]  ;;  %v2767_v45 = vmax.f32 %v5576_v50, %v2316_v29  ;;  %v5844_v29 = vld [vmem:[#allocation6 + $0xf0] sm:$0xff] }
 0x312   :  { %v1873_v44 = vpop.f32.mrf.mxu3 }
 0x313   :  { %v614_v59 = vpop.f32.mrf.mxu0  ;;  %v1399_v58 = vpop.f32.mrf.mxu1  ;;  %v5800_v9 = vmax.f32 %v1088_v8, %v1873_v44 }
 0x314   :  { %v5808_v44 = vmax.f32 %v614_v59, %v1399_v58 }
 0x315   :  { %8966 = vst [vmem:[#allocation188_spill] sm:$0xff] %v5800_v9  ;;  %2663 = vrot.lane.b32.xlu1 %v5800_v9, %s4752_s2  ;;  %v2320_v9 = vpop.permute.xlu2 %2319 }
 0x316   :  { %661 = vmatmul.f32.gmra.mxu0 %v173_v54  ;;  %1138 = vmatmul.f32.gmra.mxu2 %v332_v12 }
 0x317   :  { %1446 = vmatmul.f32.gmra.mxu1 %v173_v54  ;;  %1923 = vmatmul.f32.gmra.mxu3 %v332_v12 }
 0x318   :  { %v1091_v51 = vpop.f32.mrf.mxu2 }
 0x31a   :  { %v1876_v43 = vpop.f32.mrf.mxu3 }
 0x31b   :  { %v5806_v18 = vmax.f32 %v1091_v51, %v1876_v43  ;;  %v617_v22 = vpop.f32.mrf.mxu0  ;;  %v1402_v5 = vpop.f32.mrf.mxu1 }
 0x31c   :  { %v5810_v8 = vmax.f32 %v617_v22, %v1402_v5  ;;  %v2318_v43 = vpop.permute.xlu1 %2317  ;;  %v2769_v5 = vmax.f32 %v5616_v49, %v2320_v9 }
 0x31d   :  { %8968 = vst [vmem:[#allocation190_spill] sm:$0xff] %v5806_v18  ;;  %2665 = vrot.lane.b32.xlu0 %v5806_v18, %s4752_s2  ;;  %2347 = vrot.lane.b32.xlu1 %v5808_v44, %s4752_s2  ;;  %v2768_v58 = vmax.f32 %v5580_v15, %v2318_v43  ;;  %v2766_v15 = vmax.f32 %v5561_v46, %v5770_v7  ;;  %v5848_v7 = vmax.f32 %v2767_v45, 0.0  ;;  %v335_v45 = vld [vmem:[#allocation2 + $0x7f0] sm:$0xff] }
 0x31e   :  { %664 = vmatmul.f32.gmra.mxu0 %v174_v4  ;;  %1141 = vmatmul.f32.gmra.mxu2 %v333_v23  ;;  %v5825_v40 = vmax.f32 %v2769_v5, 0.0  ;;  %v5854_v5 = vld [vmem:[#allocation6 + $0xe8] sm:$0xff] }
 0x31f   :  { %1449 = vmatmul.f32.gmra.mxu1 %v174_v4  ;;  %1926 = vmatmul.f32.gmra.mxu3 %v333_v23  ;;  %v334_v23 = vld [vmem:[#allocation2 + $0x7e8] sm:$0xff]  ;;  %v5834_v49 = vmax.f32 %v2768_v58, 0.0  ;;  %8973 = vst [vmem:[#allocation195_spill] sm:$0xff] %v5848_v7 }
 0x320   :  { %2349 = vrot.lane.b32.xlu2 %v5810_v8, %s4752_s2  ;;  %v1094_v12 = vpop.f32.mrf.mxu2  ;;  %8970 = vst [vmem:[#allocation192_spill] sm:$0xff] %v5825_v40  ;;  %v3329_v46 = vmul.f32 %v5844_v29, %v5825_v40  ;;  %v183_v40 = vld [vmem:[#allocation2 + $0x330] sm:$0xff] }
 0x321   :  { %v2322_v22 = vpop.permute.xlu0 %2321  ;;  %8972 = vst [vmem:[#allocation194_spill] sm:$0xff] %v5834_v49 }
 0x322   :  { %v1879_v59 = vpop.f32.mrf.mxu3  ;;  %v2770_v54 = vmax.f32 %v5622_v32, %v2322_v22  ;;  %v5836_v32 = vld [vmem:[#allocation6 + $0xf8] sm:$0xff]  ;;  %v3328_v22 = vmul.f32 %v5854_v5, %v5834_v49 }
 0x323   :  { %v620_v51 = vpop.f32.mrf.mxu0  ;;  %v1405_v18 = vpop.f32.mrf.mxu1  ;;  %v5821_v57 = vmax.f32 %v1094_v12, %v1879_v59  ;;  %v5850_v12 = vmax.f32 %v2766_v15, 0.0  ;;  %v176_v59 = vld [vmem:[#allocation2 + $0x2f8] sm:$0xff] }
 0x324   :  { %v5823_v4 = vmax.f32 %v620_v51, %v1405_v18  ;;  %v5828_v61 = vmax.f32 %v2770_v54, 0.0  ;;  %v2765_v18 = vmax.f32 %v5544_v1, %v5790_v55  ;;  %v2763_v54 = vmax.f32 %v5518_v2, %v5744_v31  ;;  %v5872_v15 = vld [vmem:[#allocation6 + $0xd8] sm:$0xff] }
 0x325   :  { %8969 = vst [vmem:[#allocation191_spill] sm:$0xff] %v5821_v57  ;;  %v3326_v2 = vmul.f32 %v5872_v15, %v5850_v12  ;;  %v2762_v31 = vmax.f32 %v5504_v48, %v5762_v47  ;;  %v5888_v48 = vld [vmem:[#allocation6 + $0xc8] sm:$0xff] }
 0x326   :  { %8971 = vst [vmem:[#allocation193_spill] sm:$0xff] %v5828_v61  ;;  %667 = vmatmul.f32.gmra.mxu0 %v175_v33  ;;  %2351 = vrot.lane.b32.xlu0 %v5823_v4, %s4752_s2  ;;  %v3330_v9 = vmul.f32 %v5836_v32, %v5828_v61  ;;  %v5862_v51 = vmax.f32 %v2765_v18, 0.0  ;;  %v5880_v18 = vld [vmem:[#allocation6 + $0xd0] sm:$0xff] }
 0x327   :  { %1144 = vmatmul.f32.gmra.mxu2 %v334_v23  ;;  %1452 = vmatmul.f32.gmra.mxu1 %v175_v33  ;;  %8974 = vst [vmem:[#allocation196_spill] sm:$0xff] %v5850_v12  ;;  %v2764_v33 = vmax.f32 %v5538_v30, %v5780_v36 }
 0x328   :  { %1929 = vmatmul.f32.gmra.mxu3 %v334_v23  ;;  %v1097_v50 = vpop.f32.mrf.mxu2  ;;  %2667 = vrot.lane.b32.xlu2 %v5821_v57, %s4752_s2  ;;  %8976 = vst [vmem:[#allocation198_spill] sm:$0xff] %v5862_v51  ;;  %v5864_v23 = vld [vmem:[#allocation6 + $0xe0] sm:$0xff] }
 0x329   :  { %3583 = vmatpush.msra.mxu3 %v3330_v9  ;;  %v3327_v30 = vmul.f32 %v5864_v23, %v5848_v7  ;;  %v5870_v36 = vmax.f32 %v2764_v33, 0.0 }
 0x32a   :  { %v1882_v43 = vpop.f32.mrf.mxu3 }
 0x32b   :  { %v5858_v1 = vmax.f32 %v1097_v50, %v1882_v43  ;;  %3584 = vmatpush.msra.mxu3 %v3329_v46  ;;  %v623_v55 = vpop.f32.mrf.mxu0  ;;  %v1408_v58 = vpop.f32.mrf.mxu1  ;;  %8977 = vst [vmem:[#allocation199_spill] sm:$0xff] %v5870_v36  ;;  %v5878_v50 = vmax.f32 %v2763_v54, 0.0  ;;  %v3325_v46 = vmul.f32 %v5880_v18, %v5862_v51  ;;  %v2761_v43 = vmax.f32 %v5496_v39, %v5754_v28  ;;  %v5902_v28 = vld [vmem:[#allocation6 + $0xc0] sm:$0xff] }
 0x32c   :  { %v5886_v33 = vmax.f32 %v623_v55, %v1408_v58  ;;  %v3324_v47 = vmul.f32 %v5888_v48, %v5870_v36  ;;  %v5894_v54 = vmax.f32 %v2762_v31, 0.0  ;;  %v336_v58 = vld [vmem:[#allocation2 + $0x7f8] sm:$0xff]  ;;  %v2758_v31 = vmax.f32 %v5464_v53, %v5742_v24  ;;  %v182_v36 = vld [vmem:[#allocation2 + $0x328] sm:$0xff] }
 0x32d   :  { %8975 = vst [vmem:[#allocation197_spill] sm:$0xff] %v5858_v1  ;;  %3585 = vmatpush.msra.mxu3 %v3328_v22  ;;  %2669 = vrot.lane.b32.xlu1 %v5858_v1, %s4752_s2  ;;  %v3323_v55 = vmul.f32 %v5902_v28, %v5878_v50  ;;  %v184_v1 = vld [vmem:[#allocation2 + $0x338] sm:$0xff] }
 0x32e   :  { %670 = vmatmul.f32.gmra.mxu0 %v176_v59  ;;  %8978 = vst [vmem:[#allocation200_spill] sm:$0xff] %v5878_v50 }
 0x32f   :  { %3586 = vmatpush.msra.mxu3 %v3327_v30  ;;  %1147 = vmatmul.f32.gmra.mxu2 %v335_v45  ;;  %8979 = vst [vmem:[#allocation201_spill] sm:$0xff] %v5894_v54 }
 0x330   :  { %1455 = vmatmul.f32.gmra.mxu1 %v176_v59  ;;  %1932 = vmatmul.f32.gmra.mxu3 %v335_v45  ;;  %v1100_v9 = vpop.f32.mrf.mxu2  ;;  %v177_v59 = vld [vmem:[#allocation2 + $0x300] sm:$0xff]  ;;  %v2760_v45 = vmax.f32 %v5484_v21, %v5722_v6  ;;  %v2759_v21 = vmax.f32 %v5474_v60, %v5750_v26  ;;  %v5908_v6 = vmax.f32 %v2761_v43, 0.0  ;;  %v2757_v26 = vmax.f32 %v5453_v0, %v5712_v20  ;;  %v5936_v0 = vld [vmem:[#allocation6 + $0xa8] sm:$0xff] }
 0x331   :  { %3587 = vmatpush.msra.mxu3 %v3326_v2  ;;  %8989 = vst [vmem:[#allocation211_spill] sm:$0xff] %v5936_v0 }
 0x332   :  { %v1885_v22 = vpop.f32.mrf.mxu3  ;;  %8982 = vst [vmem:[#allocation204_spill] sm:$0xff] %v5908_v6  ;;  %v5924_v43 = vmax.f32 %v2759_v21, 0.0  ;;  %v5940_v21 = vmax.f32 %v2757_v26, 0.0  ;;  %v6012_v61 = vpop.permute.xlu0 %2641 }
 0x333   :  { %3588 = vmatpush.msra.mxu3 %v3325_v46  ;;  %v626_v30 = vpop.f32.mrf.mxu0  ;;  %v5896_v2 = vmax.f32 %v1100_v9, %v1885_v22  ;;  %v5916_v9 = vld [vmem:[#allocation6 + $0xb8] sm:$0xff]  ;;  %v5926_v22 = vld [vmem:[#allocation6 + $0xb0] sm:$0xff]  ;;  %9011 = vst [vmem:[#allocation233_spill] sm:$0xff] %v6012_v61 }
 0x334   :  { %v1411_v51 = vpop.f32.mrf.mxu1  ;;  %8984 = vst [vmem:[#allocation206_spill] sm:$0xff] %v5916_v9  ;;  %v3322_v46 = vmul.f32 %v5916_v9, %v5894_v54  ;;  %v3321_v53 = vmul.f32 %v5926_v22, %v5908_v6  ;;  %v181_v6 = vld [vmem:[#allocation2 + $0x320] sm:$0xff] }
 0x335   :  { %8980 = vst [vmem:[#allocation202_spill] sm:$0xff] %v5896_v2  ;;  %v5898_v39 = vmax.f32 %v626_v30, %v1411_v51  ;;  %3589 = vmatpush.msra.mxu3 %v3324_v47  ;;  %2353 = vrot.lane.b32.xlu1 %v5886_v33, %s4752_s2  ;;  %v5912_v51 = vmax.f32 %v2760_v45, 0.0  ;;  %v2756_v47 = vmax.f32 %v5435_v37, %v5738_v41  ;;  %v5946_v37 = vld [vmem:[#allocation6 + $0xa0] sm:$0xff] }
 0x336   :  { %2671 = vrot.lane.b32.xlu0 %v5896_v2, %s4752_s2  ;;  %673 = vmatmul.f32.gmra.mxu0 %v177_v59  ;;  %8985 = vst [vmem:[#allocation207_spill] sm:$0xff] %v5924_v43  ;;  %v3319_v41 = vmul.f32 %v5946_v37, %v5924_v43  ;;  %v5968_v43 = vld [vmem:[#allocation6 + $0x88] sm:$0xff] }
 0x337   :  { %8981 = vst [vmem:[#allocation203_spill] sm:$0xff] %v5898_v39  ;;  %3590 = vmatpush.msra.mxu3 %v3323_v55  ;;  %1150 = vmatmul.f32.gmra.mxu2 %v336_v58  ;;  %v3320_v20 = vmul.f32 %v5936_v0, %v5912_v51  ;;  %v191_v0 = vld [vmem:[#allocation2 + $0x370] sm:$0xff] }
 0x338   :  { %8983 = vst [vmem:[#allocation205_spill] sm:$0xff] %v5912_v51  ;;  %1458 = vmatmul.f32.gmra.mxu1 %v177_v59  ;;  %v1103_v60 = vpop.f32.mrf.mxu2  ;;  %1935 = vmatmul.f32.gmra.mxu3 %v336_v58  ;;  %v5932_v59 = vmax.f32 %v2758_v31, 0.0  ;;  %v178_v58 = vld [vmem:[#allocation2 + $0x308] sm:$0xff]  ;;  %v5950_v31 = vmax.f32 %v2756_v47, 0.0 }
 0x339   :  { %2355 = vrot.lane.b32.xlu2 %v5898_v39, %s4752_s2  ;;  %3591 = vmatpush.msra.mxu3 %v3322_v46  ;;  %8986 = vst [vmem:[#allocation208_spill] sm:$0xff] %v5926_v22  ;;  %v2755_v46 = vmax.f32 %v5405_v19, %v5730_v63 }
 0x33a   :  { %v1888_v24 = vpop.f32.mrf.mxu3  ;;  %8987 = vst [vmem:[#allocation209_spill] sm:$0xff] %v5932_v59 }
 0x33b   :  { %v629_v30 = vpop.f32.mrf.mxu0  ;;  %v5934_v45 = vmax.f32 %v1103_v60, %v1888_v24  ;;  %3592 = vmatpush.msra.mxu3 %v3321_v53  ;;  %8990 = vst [vmem:[#allocation212_spill] sm:$0xff] %v5940_v21  ;;  %v5952_v60 = vld [vmem:[#allocation6 + $0x98] sm:$0xff]  ;;  %v5958_v63 = vmax.f32 %v2755_v46, 0.0  ;;  %v5960_v53 = vld [vmem:[#allocation6 + $0x90] sm:$0xff] }
 0x33c   :  { %v1414_v55 = vpop.f32.mrf.mxu1  ;;  %8991 = vst [vmem:[#allocation213_spill] sm:$0xff] %v5946_v37  ;;  %v3318_v26 = vmul.f32 %v5952_v60, %v5932_v59  ;;  %v3317_v24 = vmul.f32 %v5960_v53, %v5940_v21  ;;  %v3316_v59 = vmul.f32 %v5968_v43, %v5950_v31  ;;  %v179_v46 = vld [vmem:[#allocation2 + $0x310] sm:$0xff] }
 0x33d   :  { %8988 = vst [vmem:[#allocation210_spill] sm:$0xff] %v5934_v45  ;;  %3593 = vmatpush.msra.mxu3 %v3320_v20 }
 0x33e   :  { %2673 = vrot.lane.b32.xlu0 %v5934_v45, %s4752_s2  ;;  %676 = vmatmul.f32.gmra.mxu0 %v178_v58  ;;  %8992 = vst [vmem:[#allocation214_spill] sm:$0xff] %v5950_v31 }
 0x33f   :  { %3594 = vmatpush.msra.mxu3 %v3319_v41  ;;  %8993 = vst [vmem:[#allocation215_spill] sm:$0xff] %v5952_v60  ;;  %v5966_v41 = vmax.f32 %v629_v30, %v1414_v55 }
 0x340   :  { %1461 = vmatmul.f32.gmra.mxu1 %v178_v58  ;;  %v5956_v19 = vpop.f32.mrf.mxu2  ;;  %8995 = vst [vmem:[#allocation217_spill] sm:$0xff] %v5958_v63 }
 0x341   :  { %8994 = vst [vmem:[#allocation216_spill] sm:$0xff] %v5956_v19  ;;  %3595 = vmatpush.msra.mxu3 %v3318_v26  ;;  %v5976_v26 = vld [vmem:[#allocation6 + $0x80] sm:$0xff]  ;;  %v6026_v19 = vpop.permute.xlu0 %2327 }
 0x342   :  { %8996 = vst [vmem:[#allocation218_spill] sm:$0xff] %v5960_v53  ;;  %v5964_v20 = vpop.f32.mrf.mxu3  ;;  %v3315_v30 = vmul.f32 %v5976_v26, %v5958_v63 }
 0x343   :  { %8997 = vst [vmem:[#allocation219_spill] sm:$0xff] %v5964_v20  ;;  %v632_v47 = vpop.f32.mrf.mxu0  ;;  %3596 = vmatpush.msra.mxu3 %v3317_v24 }
 0x344   :  { %8998 = vst [vmem:[#allocation220_spill] sm:$0xff] %v5966_v41  ;;  %v1417_v58 = vpop.f32.mrf.mxu1 }
 0x345   :  { %8999 = vst [vmem:[#allocation221_spill] sm:$0xff] %v5968_v43  ;;  %v5972_v51 = vmax.f32 %v632_v47, %v1417_v58  ;;  %3597 = vmatpush.msra.mxu3 %v3316_v59  ;;  %v180_v58 = vld [vmem:[#allocation2 + $0x318] sm:$0xff] }
 0x346   :  { %2357 = vrot.lane.b32.xlu0 %v5966_v41, %s4752_s2  ;;  %9001 = vst [vmem:[#allocation223_spill] sm:$0xff] %v5976_v26  ;;  %679 = vmatmul.f32.gmra.mxu0 %v179_v46 }
 0x347   :  { %9000 = vst [vmem:[#allocation222_spill] sm:$0xff] %v5972_v51  ;;  %2359 = vrot.lane.b32.xlu1 %v5972_v51, %s4752_s2  ;;  %3598 = vmatpush.msra.mxu3 %v3315_v30 }
 0x348   :  { %1464 = vmatmul.f32.gmra.mxu1 %v179_v46 }
 0x349   :  { %v5982_v55 = vpop.f32.mrf.mxu2 }
 0x34a   :  { %9002 = vst [vmem:[#allocation224_spill] sm:$0xff] %v5982_v55  ;;  %v5984_v24 = vpop.f32.mrf.mxu3 }
 0x34b   :  { %9003 = vst [vmem:[#allocation225_spill] sm:$0xff] %v5984_v24  ;;  %v635_v47 = vpop.f32.mrf.mxu0 }
 0x34c   :  { %v1420_v59 = vpop.f32.mrf.mxu1 }
 0x34d   :  { %v5986_v31 = vmax.f32 %v635_v47, %v1420_v59 }
 0x34e   :  { %682 = vmatmul.f32.gmra.mxu0 %v180_v58 }
 0x34f   :  { %2361 = vrot.lane.b32.xlu2 %v5986_v31, %s4752_s2 }
 0x350   :  { %1467 = vmatmul.f32.gmra.mxu1 %v180_v58 }
 0x351   :  { %v5990_v63 = vpop.f32.mrf.mxu2 }
 0x352   :  { %9004 = vst [vmem:[#allocation226_spill] sm:$0xff] %v5990_v63  ;;  %v5992_v21 = vpop.f32.mrf.mxu3  ;;  %v185_v63 = vld [vmem:[#allocation2 + $0x340] sm:$0xff] }
 0x353   :  { %9005 = vst [vmem:[#allocation227_spill] sm:$0xff] %v5992_v21  ;;  %v638_v30 = vpop.f32.mrf.mxu0 }
 0x354   :  { %v1423_v46 = vpop.f32.mrf.mxu1 }
 0x355   :  { %v5994_v54 = vmax.f32 %v638_v30, %v1423_v46  ;;  %v6008_v46 = vpop.permute.xlu1 %2639 }
 0x356   :  { %685 = vmatmul.f32.gmra.mxu0 %v181_v6  ;;  %9009 = vst [vmem:[#allocation231_spill] sm:$0xff] %v6008_v46 }
 0x357   :  { %2363 = vrot.lane.b32.xlu0 %v5994_v54, %s4752_s2 }
 0x358   :  { %1470 = vmatmul.f32.gmra.mxu1 %v181_v6 }
 0x359   :  { %v5998_v47 = vpop.f32.mrf.mxu2 }
 0x35a   :  { %9006 = vst [vmem:[#allocation228_spill] sm:$0xff] %v5998_v47  ;;  %v6000_v59 = vpop.f32.mrf.mxu3 }
 0x35b   :  { %9007 = vst [vmem:[#allocation229_spill] sm:$0xff] %v6000_v59  ;;  %v641_v50 = vpop.f32.mrf.mxu0 }
 0x35c   :  { %v1426_v58 = vpop.f32.mrf.mxu1 }
 0x35d   :  { %v6002_v12 = vmax.f32 %v641_v50, %v1426_v58  ;;  %v6022_v2 = vpop.permute.xlu1 %2323 }
 0x35e   :  { %688 = vmatmul.f32.gmra.mxu0 %v182_v36 }
 0x35f   :  { %2365 = vrot.lane.b32.xlu1 %v6002_v12, %s4752_s2 }
 0x360   :  { %1473 = vmatmul.f32.gmra.mxu1 %v182_v36 }
 0x361   :  { %v6006_v30 = vpop.f32.mrf.mxu2 }
 0x362   :  { %9008 = vst [vmem:[#allocation230_spill] sm:$0xff] %v6006_v30  ;;  %v6010_v7 = vpop.f32.mrf.mxu3 }
 0x363   :  { %9010 = vst [vmem:[#allocation232_spill] sm:$0xff] %v6010_v7  ;;  %v644_v6 = vpop.f32.mrf.mxu0  ;;  %v186_v7 = vld [vmem:[#allocation2 + $0x348] sm:$0xff] }
 0x364   :  { %v1429_v49 = vpop.f32.mrf.mxu1 }
 0x365   :  { %v6014_v57 = vmax.f32 %v644_v6, %v1429_v49  ;;  %v6030_v49 = vpop.permute.xlu2 %2637  ;;  %v6036_v21 = vpop.permute.xlu1 %2329 }
 0x366   :  { %691 = vmatmul.f32.gmra.mxu0 %v183_v40  ;;  %9014 = vst [vmem:[#allocation236_spill] sm:$0xff] %v6030_v49 }
 0x367   :  { %2367 = vrot.lane.b32.xlu2 %v6014_v57, %s4752_s2 }
 0x368   :  { %1476 = vmatmul.f32.gmra.mxu1 %v183_v40 }
 0x369   :  { %v6018_v50 = vpop.f32.mrf.mxu2 }
 0x36a   :  { %9012 = vst [vmem:[#allocation234_spill] sm:$0xff] %v6018_v50  ;;  %v6020_v36 = vpop.f32.mrf.mxu3 }
 0x36b   :  { %9013 = vst [vmem:[#allocation235_spill] sm:$0xff] %v6020_v36  ;;  %v647_v58 = vpop.f32.mrf.mxu0 }
 0x36c   :  { %v1432_v46 = vpop.f32.mrf.mxu1 }
 0x36d   :  { %v6024_v45 = vmax.f32 %v647_v58, %v1432_v46  ;;  %v6040_v58 = vpop.permute.xlu0 %2333  ;;  %v6050_v47 = vpop.permute.xlu1 %2335 }
 0x36e   :  { %694 = vmatmul.f32.gmra.mxu0 %v184_v1 }
 0x36f   :  { %2369 = vrot.lane.b32.xlu0 %v6024_v45, %s4752_s2 }
 0x370   :  { %1479 = vmatmul.f32.gmra.mxu1 %v184_v1  ;;  %v6046_v1 = vpop.permute.xlu2 %2325 }
 0x371   :  { %v6032_v40 = vpop.f32.mrf.mxu2 }
 0x372   :  { %9015 = vst [vmem:[#allocation237_spill] sm:$0xff] %v6032_v40  ;;  %v6034_v6 = vpop.f32.mrf.mxu3  ;;  %v187_v40 = vld [vmem:[#allocation2 + $0x350] sm:$0xff] }
 0x373   :  { %9016 = vst [vmem:[#allocation238_spill] sm:$0xff] %v6034_v6  ;;  %v650_v61 = vpop.f32.mrf.mxu0 }
 0x374   :  { %v1435_v20 = vpop.f32.mrf.mxu1 }
 0x375   :  { %v6038_v46 = vmax.f32 %v650_v61, %v1435_v20  ;;  %v6054_v20 = vpop.permute.xlu0 %2339  ;;  %v6062_v6 = vpop.permute.xlu1 %2341 }
 0x376   :  { %697 = vmatmul.f32.gmra.mxu0 %v185_v63 }
 0x377   :  { %2371 = vrot.lane.b32.xlu1 %v6038_v46, %s4752_s2 }
 0x378   :  { %1482 = vmatmul.f32.gmra.mxu1 %v185_v63  ;;  %v6058_v59 = vpop.permute.xlu2 %2331 }
 0x379   :  { %v6044_v49 = vpop.f32.mrf.mxu2 }
 0x37a   :  { %9017 = vst [vmem:[#allocation239_spill] sm:$0xff] %v6044_v49  ;;  %v6048_v55 = vpop.f32.mrf.mxu3 }
 0x37b   :  { %9018 = vst [vmem:[#allocation240_spill] sm:$0xff] %v6048_v55  ;;  %v653_v24 = vpop.f32.mrf.mxu0 }
 0x37c   :  { %v1438_v30 = vpop.f32.mrf.mxu1 }
 0x37d   :  { %v6052_v61 = vmax.f32 %v653_v24, %v1438_v30  ;;  %v6066_v30 = vpop.permute.xlu0 %2659 }
 0x37e   :  { %700 = vmatmul.f32.gmra.mxu0 %v186_v7  ;;  %9020 = vst [vmem:[#allocation242_spill] sm:$0xff] %v6066_v30 }
 0x37f   :  { %2373 = vrot.lane.b32.xlu2 %v6052_v61, %s4752_s2 }
 0x380   :  { %1485 = vmatmul.f32.gmra.mxu1 %v186_v7  ;;  %v6070_v3 = vpop.permute.xlu2 %2337 }
 0x381   :  { %v1130_v63 = vpop.f32.mrf.mxu2 }
 0x382   :  { %v1915_v50 = vpop.f32.mrf.mxu3 }
 0x383   :  { %v656_v36 = vpop.f32.mrf.mxu0  ;;  %v6060_v49 = vmax.f32 %v1130_v63, %v1915_v50 }
 0x384   :  { %v1441_v55 = vpop.f32.mrf.mxu1 }
 0x385   :  { %9019 = vst [vmem:[#allocation241_spill] sm:$0xff] %v6060_v49  ;;  %v6064_v24 = vmax.f32 %v656_v36, %v1441_v55  ;;  %v188_v49 = vld [vmem:[#allocation2 + $0x358] sm:$0xff]  ;;  %v3219_v55 = vld [vmem:[#allocation7] sm:$0xff]  ;;  %v6078_v36 = vpop.permute.xlu0 %2345 }
 0x386   :  { %703 = vmatmul.f32.gmra.mxu0 %v187_v40  ;;  %3539 = vmatmul.f32.vlgmr.msrb.gmra.mxu2 %v3219_v55 }
 0x387   :  { %2375 = vrot.lane.b32.xlu0 %v6064_v24, %s4752_s2  ;;  %v6074_v52 = vpop.permute.xlu1 %2663 }
 0x388   :  { %1488 = vmatmul.f32.gmra.mxu1 %v187_v40  ;;  %9022 = vst [vmem:[#allocation244_spill] sm:$0xff] %v6074_v52  ;;  %v6080_v30 = vpop.permute.xlu2 %2343  ;;  %v189_v52 = vld [vmem:[#allocation2 + $0x360] sm:$0xff] }
 0x389   :  { %v1133_v7 = vpop.f32.mrf.mxu2 }
 0x38a   :  { %v1918_v14 = vpop.f32.mrf.mxu3 }
 0x38b   :  { %v659_v10 = vpop.f32.mrf.mxu0  ;;  %v6072_v50 = vmax.f32 %v1133_v7, %v1918_v14 }
 0x38c   :  { %v1444_v63 = vpop.f32.mrf.mxu1 }
 0x38d   :  { %9021 = vst [vmem:[#allocation243_spill] sm:$0xff] %v6072_v50  ;;  %2693 = vrot.lane.b32.xlu1 %v6072_v50, %s4752_s2  ;;  %v6082_v43 = vmax.f32 %v659_v10, %v1444_v63  ;;  %v190_v50 = vld [vmem:[#allocation2 + $0x368] sm:$0xff] }
 0x38e   :  { %706 = vmatmul.f32.gmra.mxu0 %v188_v49 }
 0x38f   :  { %v6094_v10 = vpop.permute.xlu0 %2665 }
 0x390   :  { %1491 = vmatmul.f32.gmra.mxu1 %v188_v49  ;;  %v2348_v49 = vpop.permute.xlu1 %2347  ;;  %9024 = vst [vmem:[#allocation246_spill] sm:$0xff] %v6094_v10  ;;  %v6096_v63 = vpop.permute.xlu2 %2661 }
 0x391   :  { %v1136_v40 = vpop.f32.mrf.mxu2  ;;  %9025 = vst [vmem:[#allocation247_spill] sm:$0xff] %v6096_v63 }
 0x392   :  { %v1921_v26 = vpop.f32.mrf.mxu3 }
 0x393   :  { %v6084_v14 = vmax.f32 %v1136_v40, %v1921_v26  ;;  %v662_v7 = vpop.f32.mrf.mxu0 }
 0x394   :  { %v1447_v53 = vpop.f32.mrf.mxu1 }
 0x395   :  { %9023 = vst [vmem:[#allocation245_spill] sm:$0xff] %v6084_v14  ;;  %v6086_v60 = vmax.f32 %v662_v7, %v1447_v53  ;;  %2377 = vrot.lane.b32.xlu1 %v6082_v43, %s4752_s2  ;;  %2695 = vrot.lane.b32.xlu0 %v6084_v14, %s4752_s2 }
 0x396   :  { %709 = vmatmul.f32.gmra.mxu0 %v189_v52 }
 0x397   :  { %2379 = vrot.lane.b32.xlu2 %v6086_v60, %s4752_s2 }
 0x398   :  { %1494 = vmatmul.f32.gmra.mxu1 %v189_v52  ;;  %v2352_v63 = vpop.permute.xlu0 %2351 }
 0x399   :  { %v1139_v26 = vpop.f32.mrf.mxu2 }
 0x39a   :  { %v1924_v55 = vpop.f32.mrf.mxu3 }
 0x39b   :  { %v6098_v53 = vmax.f32 %v1139_v26, %v1924_v55  ;;  %v665_v40 = vpop.f32.mrf.mxu0 }
 0x39c   :  { %v1450_v7 = vpop.f32.mrf.mxu1 }
 0x39d   :  { %9026 = vst [vmem:[#allocation248_spill] sm:$0xff] %v6098_v53  ;;  %v6100_v37 = vmax.f32 %v665_v40, %v1450_v7  ;;  %v2350_v40 = vpop.permute.xlu2 %2349  ;;  %v2785_v7 = vmax.f32 %v5823_v4, %v2352_v63  ;;  %v2782_v63 = vmax.f32 %v5788_v17, %v6078_v36  ;;  %v2780_v17 = vmax.f32 %v5764_v25, %v6062_v6  ;;  %v6150_v36 = vld [vmem:[#allocation6 + $0x68] sm:$0xff] }
 0x39e   :  { %712 = vmatmul.f32.gmra.mxu0 %v190_v50 }
 0x39f   :  { %v6102_v14 = vpop.permute.xlu1 %2669  ;;  %2381 = vrot.lane.b32.xlu0 %v6100_v37, %s4752_s2  ;;  %2697 = vrot.lane.b32.xlu2 %v6098_v53, %s4752_s2  ;;  %v2784_v53 = vmax.f32 %v5810_v8, %v2350_v40  ;;  %v6118_v22 = vmax.f32 %v2785_v7, 0.0 }
 0x3a0   :  { %9027 = vst [vmem:[#allocation249_spill] sm:$0xff] %v6102_v14  ;;  %1497 = vmatmul.f32.gmra.mxu1 %v190_v50 }
 0x3a1   :  { %v1142_v52 = vpop.f32.mrf.mxu2  ;;  %9030 = vst [vmem:[#allocation252_spill] sm:$0xff] %v6118_v22  ;;  %v6128_v8 = vmax.f32 %v2784_v53, 0.0 }
 0x3a2   :  { %v1927_v10 = vpop.f32.mrf.mxu3 }
 0x3a3   :  { %v6108_v26 = vmax.f32 %v1142_v52, %v1927_v10  ;;  %v668_v55 = vpop.f32.mrf.mxu0  ;;  %v2783_v52 = vmax.f32 %v5808_v44, %v2348_v49  ;;  %9032 = vst [vmem:[#allocation254_spill] sm:$0xff] %v6128_v8 }
 0x3a4   :  { %v1453_v39 = vpop.f32.mrf.mxu1 }
 0x3a5   :  { %9028 = vst [vmem:[#allocation250_spill] sm:$0xff] %v6108_v26  ;;  %2699 = vrot.lane.b32.xlu1 %v6108_v26, %s4752_s2  ;;  %v6120_v9 = vmax.f32 %v668_v55, %v1453_v39  ;;  %v6122_v26 = vld [vmem:[#allocation6 + $0x78] sm:$0xff]  ;;  %v2781_v39 = vmax.f32 %v5776_v16, %v6080_v30  ;;  %v6138_v55 = vmax.f32 %v2783_v52, 0.0  ;;  %v3344_v16 = vmul.f32 %v6150_v36, %v6128_v8 }
 0x3a6   :  { %715 = vmatmul.f32.gmra.mxu0 %v191_v0  ;;  %v6154_v30 = vmax.f32 %v2782_v63, 0.0  ;;  %v6168_v63 = vld [vmem:[#allocation6 + $0x58] sm:$0xff] }
 0x3a7   :  { %v2354_v14 = vpop.permute.xlu1 %2353  ;;  %9033 = vst [vmem:[#allocation255_spill] sm:$0xff] %v6138_v55  ;;  %v6156_v7 = vmax.f32 %v2781_v39, 0.0 }
 0x3a8   :  { %1500 = vmatmul.f32.gmra.mxu1 %v191_v0  ;;  %v2786_v50 = vmax.f32 %v5886_v33, %v2354_v14  ;;  %v192_v14 = vld [vmem:[#allocation2 + $0x378] sm:$0xff]  ;;  %9034 = vst [vmem:[#allocation256_spill] sm:$0xff] %v6154_v30 }
 0x3a9   :  { %9035 = vst [vmem:[#allocation257_spill] sm:$0xff] %v6156_v7 }
 0x3aa   :  { %v6115_v41 = vmax.f32 %v2786_v50, 0.0  ;;  %v1145_v10 = vpop.f32.mrf.mxu2  ;;  %v2779_v50 = vmax.f32 %v5752_v13, %v6054_v20 }
 0x3ab   :  { %v1930_v51 = vpop.f32.mrf.mxu3  ;;  %v671_v33 = vpop.f32.mrf.mxu0 }
 0x3ac   :  { %9029 = vst [vmem:[#allocation251_spill] sm:$0xff] %v6115_v41  ;;  %v3346_v4 = vmul.f32 %v6122_v26, %v6115_v41  ;;  %v6126_v0 = vmax.f32 %v1145_v10, %v1930_v51  ;;  %v6140_v51 = vld [vmem:[#allocation6 + $0x70] sm:$0xff]  ;;  %v6160_v10 = vld [vmem:[#allocation6 + $0x60] sm:$0xff] }
 0x3ad   :  { %v1456_v44 = vpop.f32.mrf.mxu1  ;;  %2383 = vrot.lane.b32.xlu1 %v6120_v9, %s4752_s2  ;;  %v3345_v53 = vmul.f32 %v6140_v51, %v6118_v22  ;;  %v3343_v52 = vmul.f32 %v6160_v10, %v6138_v55  ;;  %v201_v41 = vld [vmem:[#allocation2 + $0x3c0] sm:$0xff] }
 0x3ae   :  { %9031 = vst [vmem:[#allocation253_spill] sm:$0xff] %v6126_v0  ;;  %v6132_v49 = vmax.f32 %v671_v33, %v1456_v44  ;;  %3603 = vmatpush.msrb.mxu2 %v3346_v4  ;;  %718 = vmatmul.f32.gmra.mxu0 %v192_v14  ;;  %v193_v4 = vld [vmem:[#allocation2 + $0x380] sm:$0xff]  ;;  %v2778_v33 = vmax.f32 %v5740_v34, %v6070_v3  ;;  %v6182_v34 = vmax.f32 %v2779_v50, 0.0 }
 0x3af   :  { %2701 = vrot.lane.b32.xlu0 %v6126_v0, %s4752_s2  ;;  %v3342_v44 = vmul.f32 %v6168_v63, %v6154_v30 }
 0x3b0   :  { %1503 = vmatmul.f32.gmra.mxu1 %v192_v14  ;;  %2385 = vrot.lane.b32.xlu2 %v6132_v49, %s4752_s2  ;;  %v6166_v14 = vmax.f32 %v2780_v17, 0.0  ;;  %9039 = vst [vmem:[#allocation261_spill] sm:$0xff] %v6182_v34  ;;  %v6186_v17 = vmax.f32 %v2778_v33, 0.0  ;;  %v2774_v33 = vmax.f32 %v5704_v38, %v6036_v21  ;;  %v2772_v21 = vmax.f32 %v5676_v56, %v6046_v1 }
 0x3b1   :  { %3604 = vmatpush.msrb.mxu2 %v3345_v53  ;;  %v2777_v53 = vmax.f32 %v5728_v42, %v6050_v47  ;;  %v2775_v47 = vmax.f32 %v5710_v27, %v6058_v59 }
 0x3b2   :  { %v1148_v40 = vpop.f32.mrf.mxu2  ;;  %9036 = vst [vmem:[#allocation258_spill] sm:$0xff] %v6166_v14  ;;  %v6240_v1 = vmax.f32 %v2772_v21, 0.0 }
 0x3b3   :  { %v1933_v25 = vpop.f32.mrf.mxu3  ;;  %3605 = vmatpush.msrb.mxu2 %v3344_v16  ;;  %v674_v6 = vpop.f32.mrf.mxu0  ;;  %v6178_v16 = vld [vmem:[#allocation6 + $0x50] sm:$0xff]  ;;  %9040 = vst [vmem:[#allocation262_spill] sm:$0xff] %v6186_v17  ;;  %v6198_v50 = vmax.f32 %v2777_v53, 0.0 }
 0x3b4   :  { %v6172_v13 = vmax.f32 %v1148_v40, %v1933_v25  ;;  %v3341_v3 = vmul.f32 %v6178_v16, %v6156_v7  ;;  %v2776_v40 = vmax.f32 %v5720_v11, %v6040_v58  ;;  %v6200_v25 = vld [vmem:[#allocation6 + $0x40] sm:$0xff]  ;;  %9050 = vst [vmem:[#allocation272_spill] sm:$0xff] %v6240_v1 }
 0x3b5   :  { %v1459_v20 = vpop.f32.mrf.mxu1  ;;  %3606 = vmatpush.msrb.mxu2 %v3343_v52  ;;  %v6190_v52 = vld [vmem:[#allocation6 + $0x48] sm:$0xff]  ;;  %9041 = vst [vmem:[#allocation263_spill] sm:$0xff] %v6198_v50 }
 0x3b6   :  { %9037 = vst [vmem:[#allocation259_spill] sm:$0xff] %v6172_v13  ;;  %v6174_v39 = vmax.f32 %v674_v6, %v1459_v20  ;;  %721 = vmatmul.f32.gmra.mxu0 %v193_v4  ;;  %v3340_v42 = vmul.f32 %v6190_v52, %v6166_v14  ;;  %v3339_v6 = vmul.f32 %v6200_v25, %v6182_v34  ;;  %v6210_v27 = vmax.f32 %v2776_v40, 0.0  ;;  %v6218_v14 = vld [vmem:[#allocation6 + $0x30] sm:$0xff] }
 0x3b7   :  { %3607 = vmatpush.msrb.mxu2 %v3342_v44  ;;  %v6206_v44 = vld [vmem:[#allocation6 + $0x38] sm:$0xff]  ;;  %v6214_v34 = vmax.f32 %v2775_v47, 0.0  ;;  %9045 = vst [vmem:[#allocation267_spill] sm:$0xff] %v6218_v14  ;;  %v3337_v38 = vmul.f32 %v6218_v14, %v6198_v50  ;;  %v6226_v40 = vmax.f32 %v2774_v33, 0.0  ;;  %v6228_v47 = vld [vmem:[#allocation6 + $0x28] sm:$0xff] }
 0x3b8   :  { %9038 = vst [vmem:[#allocation260_spill] sm:$0xff] %v6174_v39  ;;  %1506 = vmatmul.f32.gmra.mxu1 %v193_v4  ;;  %2387 = vrot.lane.b32.xlu0 %v6174_v39, %s4752_s2  ;;  %v3338_v20 = vmul.f32 %v6206_v44, %v6186_v17  ;;  %v6242_v33 = vld [vmem:[#allocation6 + $0x18] sm:$0xff] }
 0x3b9   :  { %3608 = vmatpush.msrb.mxu2 %v3341_v3  ;;  %2703 = vrot.lane.b32.xlu2 %v6172_v13, %s4752_s2  ;;  %9042 = vst [vmem:[#allocation264_spill] sm:$0xff] %v6210_v27  ;;  %v194_v3 = vld [vmem:[#allocation2 + $0x388] sm:$0xff]  ;;  %v6296_v30 = vpop.permute.xlu1 %2359 }
 0x3ba   :  { %v1151_v11 = vpop.f32.mrf.mxu2  ;;  %9044 = vst [vmem:[#allocation266_spill] sm:$0xff] %v6214_v34 }
 0x3bb   :  { %3609 = vmatpush.msrb.mxu2 %v3340_v42  ;;  %v1936_v58 = vpop.f32.mrf.mxu3  ;;  %v677_v4 = vpop.f32.mrf.mxu0  ;;  %v2773_v42 = vmax.f32 %v5696_v62, %v6026_v19  ;;  %9046 = vst [vmem:[#allocation268_spill] sm:$0xff] %v6226_v40  ;;  %v3336_v62 = vmul.f32 %v6228_v47, %v6210_v27  ;;  %v2771_v19 = vmax.f32 %v5672_v35, %v6022_v2  ;;  %v195_v35 = vld [vmem:[#allocation2 + $0x390] sm:$0xff] }
 0x3bc   :  { %v6212_v59 = vmax.f32 %v1151_v11, %v1936_v58  ;;  %9047 = vst [vmem:[#allocation269_spill] sm:$0xff] %v6228_v47 }
 0x3bd   :  { %v1462_v53 = vpop.f32.mrf.mxu1  ;;  %3610 = vmatpush.msrb.mxu2 %v3339_v6  ;;  %v6234_v6 = vld [vmem:[#allocation6 + $0x20] sm:$0xff]  ;;  %v6238_v58 = vmax.f32 %v2773_v42, 0.0  ;;  %9051 = vst [vmem:[#allocation273_spill] sm:$0xff] %v6242_v33  ;;  %v6250_v27 = vmax.f32 %v2771_v19, 0.0  ;;  %v6252_v42 = vld [vmem:[#allocation6 + $0x10] sm:$0xff] }
 0x3be   :  { %9043 = vst [vmem:[#allocation265_spill] sm:$0xff] %v6212_v59  ;;  %2705 = vrot.lane.b32.xlu1 %v6212_v59, %s4752_s2  ;;  %724 = vmatmul.f32.gmra.mxu0 %v194_v3  ;;  %v3335_v11 = vmul.f32 %v6234_v6, %v6214_v34 }
 0x3bf   :  { %3611 = vmatpush.msrb.mxu2 %v3338_v20  ;;  %9048 = vst [vmem:[#allocation270_spill] sm:$0xff] %v6234_v6  ;;  %v3334_v20 = vmul.f32 %v6242_v33, %v6226_v40  ;;  %v3333_v21 = vmul.f32 %v6252_v42, %v6238_v58  ;;  %v204_v6 = vld [vmem:[#allocation2 + $0x3d8] sm:$0xff] }
 0x3c0   :  { %1509 = vmatmul.f32.gmra.mxu1 %v194_v3  ;;  %9049 = vst [vmem:[#allocation271_spill] sm:$0xff] %v6238_v58  ;;  %v6246_v3 = vmax.f32 %v677_v4, %v1462_v53  ;;  %v6258_v4 = vld [vmem:[#allocation6 + $0x8] sm:$0xff]  ;;  %v197_v58 = vld [vmem:[#allocation2 + $0x3a0] sm:$0xff] }
 0x3c1   :  { %3612 = vmatpush.msrb.mxu2 %v3337_v38  ;;  %9053 = vst [vmem:[#allocation275_spill] sm:$0xff] %v6250_v27  ;;  %v3332_v53 = vmul.f32 %v6258_v4, %v6240_v1 }
 0x3c2   :  { %9052 = vst [vmem:[#allocation274_spill] sm:$0xff] %v6246_v3 }
 0x3c3   :  { %3613 = vmatpush.msrb.mxu2 %v3336_v62  ;;  %v680_v56 = vpop.f32.mrf.mxu0  ;;  %9054 = vst [vmem:[#allocation276_spill] sm:$0xff] %v6252_v42  ;;  %v6264_v62 = vld [vmem:[#allocation6] sm:$0xff] }
 0x3c4   :  { %9055 = vst [vmem:[#allocation277_spill] sm:$0xff] %v6258_v4  ;;  %v3331_v19 = vmul.f32 %v6264_v62, %v6250_v27 }
 0x3c5   :  { %v1465_v38 = vpop.f32.mrf.mxu1  ;;  %3614 = vmatpush.msrb.mxu2 %v3335_v11  ;;  %9056 = vst [vmem:[#allocation278_spill] sm:$0xff] %v6264_v62  ;;  %v203_v62 = vld [vmem:[#allocation2 + $0x3d0] sm:$0xff] }
 0x3c6   :  { %v6248_v2 = vmax.f32 %v680_v56, %v1465_v38  ;;  %2389 = vrot.lane.b32.xlu1 %v6246_v3, %s4752_s2  ;;  %727 = vmatmul.f32.gmra.mxu0 %v195_v35  ;;  %v6268_v38 = vpop.permute.xlu2 %2667 }
 0x3c7   :  { %3615 = vmatpush.msrb.mxu2 %v3334_v20  ;;  %v196_v20 = vld [vmem:[#allocation2 + $0x398] sm:$0xff]  ;;  %9057 = vst [vmem:[#allocation279_spill] sm:$0xff] %v6268_v38  ;;  %v202_v38 = vld [vmem:[#allocation2 + $0x3c8] sm:$0xff] }
 0x3c8   :  { %1512 = vmatmul.f32.gmra.mxu1 %v195_v35  ;;  %2391 = vrot.lane.b32.xlu2 %v6248_v2, %s4752_s2 }
 0x3c9   :  { %3616 = vmatpush.msrb.mxu2 %v3333_v21 }
 0x3cb   :  { %3617 = vmatpush.msrb.mxu2 %v3332_v53  ;;  %v683_v11 = vpop.f32.mrf.mxu0 }
 0x3cd   :  { %v1468_v56 = vpop.f32.mrf.mxu1  ;;  %3618 = vmatpush.msrb.mxu2 %v3331_v19 }
 0x3ce   :  { %v6270_v35 = vmax.f32 %v683_v11, %v1468_v56  ;;  %730 = vmatmul.f32.gmra.mxu0 %v196_v20  ;;  %v6276_v27 = vpop.permute.xlu2 %2355  ;;  %v198_v11 = vld [vmem:[#allocation2 + $0x3a8] sm:$0xff]  ;;  %v6280_v56 = vpop.permute.xlu0 %2671 }
 0x3cf   :  { %9058 = vst [vmem:[#allocation280_spill] sm:$0xff] %v6280_v56 }
 0x3d0   :  { %1515 = vmatmul.f32.gmra.mxu1 %v196_v20  ;;  %2393 = vrot.lane.b32.xlu0 %v6270_v35, %s4752_s2 }
 0x3d1   :  { %v6306_v0 = vpop.permute.xlu1 %2365 }
 0x3d3   :  { %v686_v21 = vpop.f32.mrf.mxu0 }
 0x3d5   :  { %v1471_v1 = vpop.f32.mrf.mxu1 }
 0x3d6   :  { %v6274_v40 = vmax.f32 %v686_v21, %v1471_v1  ;;  %733 = vmatmul.f32.gmra.mxu0 %v197_v58  ;;  %v6284_v34 = vpop.permute.xlu2 %2361  ;;  %v6290_v17 = vpop.permute.xlu0 %2673 }
 0x3d7   :  { %9059 = vst [vmem:[#allocation281_spill] sm:$0xff] %v6290_v17 }
 0x3d8   :  { %1518 = vmatmul.f32.gmra.mxu1 %v197_v58  ;;  %2395 = vrot.lane.b32.xlu1 %v6274_v40, %s4752_s2  ;;  %v199_v58 = vld [vmem:[#allocation2 + $0x3b0] sm:$0xff] }
 0x3db   :  { %v689_v53 = vpop.f32.mrf.mxu0 }
 0x3dd   :  { %v1474_v19 = vpop.f32.mrf.mxu1 }
 0x3de   :  { %v6282_v20 = vmax.f32 %v689_v53, %v1474_v19  ;;  %736 = vmatmul.f32.gmra.mxu0 %v198_v11  ;;  %v6292_v7 = vpop.permute.xlu2 %2367 }
 0x3e0   :  { %1521 = vmatmul.f32.gmra.mxu1 %v198_v11  ;;  %2397 = vrot.lane.b32.xlu2 %v6282_v20, %s4752_s2  ;;  %v200_v11 = vld [vmem:[#allocation2 + $0x3b8] sm:$0xff] }
 0x3e3   :  { %v692_v1 = vpop.f32.mrf.mxu0 }
 0x3e5   :  { %v1477_v21 = vpop.f32.mrf.mxu1 }
 0x3e6   :  { %v6288_v50 = vmax.f32 %v692_v1, %v1477_v21  ;;  %739 = vmatmul.f32.gmra.mxu0 %v199_v58  ;;  %v6300_v8 = vpop.permute.xlu2 %2373  ;;  %v3220_v1 = vld [vmem:[#allocation7 + $0x8] sm:$0xff]  ;;  %v6304_v21 = vpop.permute.xlu0 %2357 }
 0x3e7   :  { %3559 = vmatmul.f32.vlgmr.msrb.gmra.mxu3 %v3220_v1 }
 0x3e8   :  { %1524 = vmatmul.f32.gmra.mxu1 %v199_v58  ;;  %2399 = vrot.lane.b32.xlu0 %v6288_v50, %s4752_s2 }
 0x3e9   :  { %v6314_v56 = vpop.permute.xlu1 %2371 }
 0x3eb   :  { %v695_v53 = vpop.f32.mrf.mxu0 }
 0x3ed   :  { %v1480_v19 = vpop.f32.mrf.mxu1 }
 0x3ee   :  { %v6298_v55 = vmax.f32 %v695_v53, %v1480_v19  ;;  %742 = vmatmul.f32.gmra.mxu0 %v200_v11  ;;  %v6312_v19 = vpop.permute.xlu0 %2363 }
 0x3f0   :  { %1527 = vmatmul.f32.gmra.mxu1 %v200_v11  ;;  %2401 = vrot.lane.b32.xlu1 %v6298_v55, %s4752_s2 }
 0x3f1   :  { %v2380_v53 = vpop.permute.xlu2 %2379 }
 0x3f3   :  { %v698_v58 = vpop.f32.mrf.mxu0 }
 0x3f5   :  { %v1483_v22 = vpop.f32.mrf.mxu1 }
 0x3f6   :  { %v6308_v13 = vmax.f32 %v698_v58, %v1483_v22  ;;  %745 = vmatmul.f32.gmra.mxu0 %v201_v41  ;;  %v6322_v22 = vpop.permute.xlu0 %2369 }
 0x3f8   :  { %1530 = vmatmul.f32.gmra.mxu1 %v201_v41  ;;  %2403 = vrot.lane.b32.xlu2 %v6308_v13, %s4752_s2 }
 0x3f9   :  { %v6318_v17 = vpop.permute.xlu2 %2697 }
 0x3fa   :  { %9060 = vst [vmem:[#allocation282_spill] sm:$0xff] %v6318_v17 }
 0x3fb   :  { %v701_v11 = vpop.f32.mrf.mxu0 }
 0x3fd   :  { %v1486_v59 = vpop.f32.mrf.mxu1 }
 0x3fe   :  { %v6316_v1 = vmax.f32 %v701_v11, %v1486_v59  ;;  %748 = vmatmul.f32.gmra.mxu0 %v202_v38  ;;  %v2376_v59 = vpop.permute.xlu0 %2375 }
 0x3ff   :  { %v6324_v4 = vpop.permute.xlu1 %2693 }
 0x400   :  { %1533 = vmatmul.f32.gmra.mxu1 %v202_v38  ;;  %2405 = vrot.lane.b32.xlu0 %v6316_v1, %s4752_s2  ;;  %9061 = vst [vmem:[#allocation283_spill] sm:$0xff] %v6324_v4 }
 0x403   :  { %v704_v41 = vpop.f32.mrf.mxu0 }
 0x405   :  { %v1489_v58 = vpop.f32.mrf.mxu1 }
 0x406   :  { %v6326_v42 = vmax.f32 %v704_v41, %v1489_v58  ;;  %751 = vmatmul.f32.gmra.mxu0 %v203_v62 }
 0x407   :  { %v2378_v3 = vpop.permute.xlu1 %2377 }
 0x408   :  { %1536 = vmatmul.f32.gmra.mxu1 %v203_v62  ;;  %2407 = vrot.lane.b32.xlu1 %v6326_v42, %s4752_s2  ;;  %v6339_v62 = vpop.permute.xlu0 %2695 }
 0x409   :  { %9063 = vst [vmem:[#allocation285_spill] sm:$0xff] %v6339_v62 }
 0x40a   :  { %v2386_v38 = vpop.permute.xlu2 %2385 }
 0x40b   :  { %v2802_v11 = vmax.f32 %v6132_v49, %v2386_v38  ;;  %v707_v17 = vpop.f32.mrf.mxu0  ;;  %v205_v38 = vld [vmem:[#allocation2 + $0x3e0] sm:$0xff] }
 0x40d   :  { %v1492_v33 = vpop.f32.mrf.mxu1  ;;  %v6331_v39 = vmax.f32 %v2802_v11, 0.0  ;;  %v206_v11 = vld [vmem:[#allocation2 + $0x3e8] sm:$0xff] }
 0x40e   :  { %v6333_v47 = vmax.f32 %v707_v17, %v1492_v33  ;;  %754 = vmatmul.f32.gmra.mxu0 %v204_v6 }
 0x40f   :  { %9062 = vst [vmem:[#allocation284_spill] sm:$0xff] %v6331_v39  ;;  %v3362_v41 = vmul.f32 %v5836_v32, %v6331_v39 }
 0x410   :  { %1539 = vmatmul.f32.gmra.mxu1 %v204_v6  ;;  %2409 = vrot.lane.b32.xlu2 %v6333_v47, %s4752_s2 }
 0x411   :  { %3623 = vmatpush.msrb.mxu3 %v3362_v41  ;;  %v2382_v32 = vpop.permute.xlu0 %2381 }
 0x412   :  { %v2800_v41 = vmax.f32 %v6100_v37, %v2382_v32  ;;  %v2797_v37 = vmax.f32 %v6064_v24, %v2376_v59  ;;  %v2795_v24 = vmax.f32 %v6038_v46, %v6314_v56  ;;  %v2793_v46 = vmax.f32 %v6014_v57, %v6292_v7 }
 0x413   :  { %v710_v49 = vpop.f32.mrf.mxu0 }
 0x414   :  { %v6376_v59 = vmax.f32 %v2797_v37, 0.0  ;;  %v6400_v57 = vmax.f32 %v2793_v46, 0.0  ;;  %v9076_v37 = vld [vmem:[#allocation222_spill] sm:$0xff] }
 0x415   :  { %v1495_v58 = vpop.f32.mrf.mxu1 }
 0x416   :  { %v6341_v4 = vmax.f32 %v710_v49, %v1495_v58  ;;  %757 = vmatmul.f32.gmra.mxu0 %v205_v38  ;;  %v2799_v49 = vmax.f32 %v6086_v60, %v2380_v53  ;;  %v207_v53 = vld [vmem:[#allocation2 + $0x3f0] sm:$0xff]  ;;  %9069 = vst [vmem:[#allocation291_spill] sm:$0xff] %v6376_v59  ;;  %v3357_v56 = vmul.f32 %v5880_v18, %v6376_v59 }
 0x417   :  { %v6343_v17 = vpop.permute.xlu1 %2699  ;;  %9073 = vst [vmem:[#allocation295_spill] sm:$0xff] %v6400_v57  ;;  %v2791_v18 = vmax.f32 %v5994_v54, %v6312_v19  ;;  %v2789_v54 = vmax.f32 %v9076_v37, %v6296_v30  ;;  %v9077_v19 = vld [vmem:[#allocation208_spill] sm:$0xff]  ;;  %v9083_v30 = vld [vmem:[#allocation203_spill] sm:$0xff] }
 0x418   :  { %1542 = vmatmul.f32.gmra.mxu1 %v205_v38  ;;  %9064 = vst [vmem:[#allocation286_spill] sm:$0xff] %v6343_v17  ;;  %2411 = vrot.lane.b32.xlu0 %v6341_v4, %s4752_s2  ;;  %v2798_v38 = vmax.f32 %v6082_v43, %v2378_v3  ;;  %v6355_v17 = vmax.f32 %v2800_v41, 0.0 }
 0x41a   :  { %9065 = vst [vmem:[#allocation287_spill] sm:$0xff] %v6355_v17  ;;  %v6368_v43 = vmax.f32 %v2798_v38, 0.0  ;;  %v3360_v3 = vmul.f32 %v5854_v5, %v6355_v17  ;;  %v2794_v5 = vmax.f32 %v6024_v45, %v6322_v22  ;;  %v2792_v45 = vmax.f32 %v6002_v12, %v6306_v0  ;;  %v9075_v0 = vld [vmem:[#allocation206_spill] sm:$0xff] }
 0x41b   :  { %v713_v6 = vpop.f32.mrf.mxu0  ;;  %v2790_v12 = vmax.f32 %v5986_v31, %v6284_v34  ;;  %v9081_v34 = vld [vmem:[#allocation220_spill] sm:$0xff] }
 0x41c   :  { %9068 = vst [vmem:[#allocation290_spill] sm:$0xff] %v6368_v43  ;;  %v6398_v22 = vmax.f32 %v2794_v5, 0.0  ;;  %v2787_v5 = vmax.f32 %v9083_v30, %v6276_v27 }
 0x41d   :  { %v1498_v33 = vpop.f32.mrf.mxu1  ;;  %v6422_v31 = vmax.f32 %v2790_v12, 0.0 }
 0x41e   :  { %v6347_v39 = vmax.f32 %v713_v6, %v1498_v33  ;;  %760 = vmatmul.f32.gmra.mxu0 %v206_v11  ;;  %v6359_v33 = vmax.f32 %v2799_v49, 0.0  ;;  %v208_v49 = vld [vmem:[#allocation2 + $0x3f8] sm:$0xff]  ;;  %9072 = vst [vmem:[#allocation294_spill] sm:$0xff] %v6398_v22  ;;  %v3354_v38 = vmul.f32 %v9075_v0, %v6398_v22  ;;  %v9090_v0 = vld [vmem:[#allocation221_spill] sm:$0xff] }
 0x41f   :  { %v2384_v62 = vpop.permute.xlu1 %2383  ;;  %9080 = vst [vmem:[#allocation208_spill] sm:$0xff] %v6422_v31 }
 0x420   :  { %1545 = vmatmul.f32.gmra.mxu1 %v206_v11  ;;  %v2801_v58 = vmax.f32 %v6120_v9, %v2384_v62  ;;  %2413 = vrot.lane.b32.xlu1 %v6347_v39, %s4752_s2  ;;  %9067 = vst [vmem:[#allocation289_spill] sm:$0xff] %v6359_v33  ;;  %v2796_v62 = vmax.f32 %v6052_v61, %v6300_v8 }
 0x421   :  { %v3358_v8 = vmul.f32 %v5872_v15, %v6368_v43 }
 0x422   :  { %v6357_v14 = vmax.f32 %v2801_v58, 0.0  ;;  %v6380_v61 = vmax.f32 %v2796_v62, 0.0 }
 0x423   :  { %v716_v6 = vpop.f32.mrf.mxu0 }
 0x424   :  { %9066 = vst [vmem:[#allocation288_spill] sm:$0xff] %v6357_v14  ;;  %v3361_v32 = vmul.f32 %v5844_v29, %v6357_v14  ;;  %v3359_v29 = vmul.f32 %v5864_v23, %v6359_v33  ;;  %v6388_v23 = vmax.f32 %v2795_v24, 0.0  ;;  %v3356_v15 = vmul.f32 %v5888_v48, %v6380_v61  ;;  %v9082_v24 = vld [vmem:[#allocation211_spill] sm:$0xff] }
 0x425   :  { %v1501_v60 = vpop.f32.mrf.mxu1  ;;  %9070 = vst [vmem:[#allocation292_spill] sm:$0xff] %v6380_v61  ;;  %v6410_v48 = vmax.f32 %v2792_v45, 0.0  ;;  %v9089_v45 = vld [vmem:[#allocation218_spill] sm:$0xff] }
 0x426   :  { %v6364_v9 = vmax.f32 %v716_v6, %v1501_v60  ;;  %3624 = vmatpush.msrb.mxu3 %v3361_v32  ;;  %763 = vmatmul.f32.gmra.mxu0 %v207_v53  ;;  %9071 = vst [vmem:[#allocation293_spill] sm:$0xff] %v6388_v23  ;;  %v3355_v7 = vmul.f32 %v5902_v28, %v6388_v23  ;;  %v6418_v32 = vmax.f32 %v2791_v18, 0.0  ;;  %v222_v23 = vld [vmem:[#allocation2 + $0x468] sm:$0xff] }
 0x427   :  { %9074 = vst [vmem:[#allocation296_spill] sm:$0xff] %v6410_v48  ;;  %v3353_v28 = vmul.f32 %v9077_v19, %v6400_v57 }
 0x428   :  { %1548 = vmatmul.f32.gmra.mxu1 %v207_v53  ;;  %2415 = vrot.lane.b32.xlu2 %v6364_v9, %s4752_s2  ;;  %9078 = vst [vmem:[#allocation206_spill] sm:$0xff] %v6418_v32  ;;  %v209_v53 = vld [vmem:[#allocation2 + $0x400] sm:$0xff] }
 0x429   :  { %3625 = vmatpush.msrb.mxu3 %v3360_v3  ;;  %v2788_v3 = vmax.f32 %v9081_v34, %v6304_v21  ;;  %v9086_v21 = vld [vmem:[#allocation215_spill] sm:$0xff] }
 0x42b   :  { %3626 = vmatpush.msrb.mxu3 %v3359_v29  ;;  %v719_v11 = vpop.f32.mrf.mxu0  ;;  %v3352_v29 = vmul.f32 %v9082_v24, %v6410_v48 }
 0x42d   :  { %v1504_v41 = vpop.f32.mrf.mxu1  ;;  %3627 = vmatpush.msrb.mxu3 %v3358_v8  ;;  %v6430_v8 = vmax.f32 %v2789_v54, 0.0 }
 0x42e   :  { %v6392_v58 = vmax.f32 %v719_v11, %v1504_v41  ;;  %766 = vmatmul.f32.gmra.mxu0 %v208_v49  ;;  %v9085_v11 = vld [vmem:[#allocation213_spill] sm:$0xff]  ;;  %v6438_v41 = vmax.f32 %v2788_v3, 0.0  ;;  %v212_v3 = vld [vmem:[#allocation2 + $0x418] sm:$0xff] }
 0x42f   :  { %3628 = vmatpush.msrb.mxu3 %v3357_v56  ;;  %9084 = vst [vmem:[#allocation220_spill] sm:$0xff] %v6430_v8  ;;  %v3351_v46 = vmul.f32 %v9085_v11, %v6418_v32  ;;  %v3350_v56 = vmul.f32 %v9086_v21, %v6422_v31  ;;  %v3349_v27 = vmul.f32 %v9089_v45, %v6430_v8 }
 0x430   :  { %1551 = vmatmul.f32.gmra.mxu1 %v208_v49  ;;  %2417 = vrot.lane.b32.xlu0 %v6392_v58, %s4752_s2  ;;  %9087 = vst [vmem:[#allocation211_spill] sm:$0xff] %v6438_v41  ;;  %v6440_v49 = vmax.f32 %v2787_v5, 0.0  ;;  %v213_v5 = vld [vmem:[#allocation2 + $0x420] sm:$0xff] }
 0x431   :  { %3629 = vmatpush.msrb.mxu3 %v3356_v15 }
 0x432   :  { %9088 = vst [vmem:[#allocation203_spill] sm:$0xff] %v6440_v49 }
 0x433   :  { %3630 = vmatpush.msrb.mxu3 %v3355_v7  ;;  %v722_v6 = vpop.f32.mrf.mxu0  ;;  %v210_v7 = vld [vmem:[#allocation2 + $0x408] sm:$0xff] }
 0x435   :  { %v1507_v60 = vpop.f32.mrf.mxu1  ;;  %3631 = vmatpush.msrb.mxu3 %v3354_v38  ;;  %v3348_v38 = vmul.f32 %v9090_v0, %v6438_v41  ;;  %v220_v41 = vld [vmem:[#allocation2 + $0x458] sm:$0xff] }
 0x436   :  { %v6420_v62 = vmax.f32 %v722_v6, %v1507_v60  ;;  %769 = vmatmul.f32.gmra.mxu0 %v209_v53  ;;  %v9091_v6 = vld [vmem:[#allocation223_spill] sm:$0xff] }
 0x437   :  { %3632 = vmatpush.msrb.mxu3 %v3353_v28  ;;  %v3347_v37 = vmul.f32 %v9091_v6, %v6440_v49  ;;  %v211_v28 = vld [vmem:[#allocation2 + $0x410] sm:$0xff]  ;;  %v216_v6 = vld [vmem:[#allocation2 + $0x438] sm:$0xff] }
 0x438   :  { %9079 = vst [vmem:[#allocation222_spill] sm:$0xff] %v6420_v62  ;;  %1554 = vmatmul.f32.gmra.mxu1 %v209_v53  ;;  %2419 = vrot.lane.b32.xlu1 %v6420_v62, %s4752_s2 }
 0x439   :  { %3633 = vmatpush.msrb.mxu3 %v3352_v29 }
 0x43b   :  { %3634 = vmatpush.msrb.mxu3 %v3351_v46  ;;  %v725_v15 = vpop.f32.mrf.mxu0 }
 0x43d   :  { %v1510_v18 = vpop.f32.mrf.mxu1  ;;  %3635 = vmatpush.msrb.mxu3 %v3350_v56  ;;  %v214_v56 = vld [vmem:[#allocation2 + $0x428] sm:$0xff] }
 0x43e   :  { %v6444_v12 = vmax.f32 %v725_v15, %v1510_v18  ;;  %772 = vmatmul.f32.gmra.mxu0 %v210_v7  ;;  %v215_v18 = vld [vmem:[#allocation2 + $0x430] sm:$0xff] }
 0x43f   :  { %3636 = vmatpush.msrb.mxu3 %v3349_v27 }
 0x440   :  { %1557 = vmatmul.f32.gmra.mxu1 %v210_v7  ;;  %2421 = vrot.lane.b32.xlu2 %v6444_v12, %s4752_s2 }
 0x441   :  { %3637 = vmatpush.msrb.mxu3 %v3348_v38 }
 0x443   :  { %3638 = vmatpush.msrb.mxu3 %v3347_v37  ;;  %v728_v54 = vpop.f32.mrf.mxu0 }
 0x445   :  { %v1513_v19 = vpop.f32.mrf.mxu1 }
 0x446   :  { %v6452_v60 = vmax.f32 %v728_v54, %v1513_v19  ;;  %775 = vmatmul.f32.gmra.mxu0 %v211_v28  ;;  %v6474_v54 = vpop.permute.xlu0 %2701  ;;  %v6478_v19 = vpop.permute.xlu2 %2703 }
 0x447   :  { %9092 = vst [vmem:[#allocation213_spill] sm:$0xff] %v6474_v54  ;;  %v223_v54 = vld [vmem:[#allocation2 + $0x470] sm:$0xff] }
 0x448   :  { %1560 = vmatmul.f32.gmra.mxu1 %v211_v28  ;;  %2423 = vrot.lane.b32.xlu1 %v6452_v60, %s4752_s2  ;;  %9093 = vst [vmem:[#allocation215_spill] sm:$0xff] %v6478_v19 }
 0x44b   :  { %v731_v53 = vpop.f32.mrf.mxu0 }
 0x44d   :  { %v1516_v34 = vpop.f32.mrf.mxu1 }
 0x44e   :  { %v6456_v24 = vmax.f32 %v731_v53, %v1516_v34  ;;  %778 = vmatmul.f32.gmra.mxu0 %v212_v3  ;;  %v217_v34 = vld [vmem:[#allocation2 + $0x440] sm:$0xff] }
 0x450   :  { %1563 = vmatmul.f32.gmra.mxu1 %v212_v3  ;;  %2425 = vrot.lane.b32.xlu1 %v6456_v24, %s4752_s2 }
 0x453   :  { %v734_v29 = vpop.f32.mrf.mxu0 }
 0x455   :  { %v1519_v30 = vpop.f32.mrf.mxu1 }
 0x456   :  { %v6460_v11 = vmax.f32 %v734_v29, %v1519_v30  ;;  %781 = vmatmul.f32.gmra.mxu0 %v213_v5  ;;  %v6482_v29 = vpop.permute.xlu1 %2705  ;;  %v6486_v30 = vpop.permute.xlu0 %2387 }
 0x457   :  { %9094 = vst [vmem:[#allocation218_spill] sm:$0xff] %v6482_v29 }
 0x458   :  { %1566 = vmatmul.f32.gmra.mxu1 %v213_v5  ;;  %2427 = vrot.lane.b32.xlu2 %v6460_v11, %s4752_s2 }
 0x45b   :  { %v737_v46 = vpop.f32.mrf.mxu0 }
 0x45d   :  { %v1522_v21 = vpop.f32.mrf.mxu1 }
 0x45e   :  { %v6464_v45 = vmax.f32 %v737_v46, %v1522_v21  ;;  %784 = vmatmul.f32.gmra.mxu0 %v214_v56  ;;  %v218_v21 = vld [vmem:[#allocation2 + $0x448] sm:$0xff] }
 0x460   :  { %1569 = vmatmul.f32.gmra.mxu1 %v214_v56  ;;  %2429 = vrot.lane.b32.xlu1 %v6464_v45, %s4752_s2 }
 0x463   :  { %v740_v27 = vpop.f32.mrf.mxu0 }
 0x465   :  { %v1525_v15 = vpop.f32.mrf.mxu1 }
 0x466   :  { %v6468_v7 = vmax.f32 %v740_v27, %v1525_v15  ;;  %787 = vmatmul.f32.gmra.mxu0 %v215_v18  ;;  %v6490_v27 = vpop.permute.xlu2 %2391  ;;  %v6492_v15 = vpop.permute.xlu1 %2389 }
 0x468   :  { %1572 = vmatmul.f32.gmra.mxu1 %v215_v18  ;;  %2431 = vrot.lane.b32.xlu0 %v6468_v7, %s4752_s2  ;;  %v6496_v18 = vpop.permute.xlu0 %2393 }
 0x46b   :  { %v743_v0 = vpop.f32.mrf.mxu0 }
 0x46d   :  { %v1528_v38 = vpop.f32.mrf.mxu1 }
 0x46e   :  { %v6472_v37 = vmax.f32 %v743_v0, %v1528_v38  ;;  %790 = vmatmul.f32.gmra.mxu0 %v216_v6 }
 0x470   :  { %1575 = vmatmul.f32.gmra.mxu1 %v216_v6  ;;  %2433 = vrot.lane.b32.xlu2 %v6472_v37, %s4752_s2  ;;  %v219_v6 = vld [vmem:[#allocation2 + $0x450] sm:$0xff] }
 0x473   :  { %v746_v28 = vpop.f32.mrf.mxu0 }
 0x475   :  { %v1531_v53 = vpop.f32.mrf.mxu1 }
 0x476   :  { %v6480_v3 = vmax.f32 %v746_v28, %v1531_v53  ;;  %793 = vmatmul.f32.gmra.mxu0 %v217_v34  ;;  %v6500_v53 = vpop.permute.xlu2 %2397 }
 0x478   :  { %1578 = vmatmul.f32.gmra.mxu1 %v217_v34  ;;  %2435 = vrot.lane.b32.xlu1 %v6480_v3, %s4752_s2  ;;  %v6502_v34 = vpop.permute.xlu1 %2395 }
 0x47b   :  { %v749_v5 = vpop.f32.mrf.mxu0 }
 0x47d   :  { %v1534_v46 = vpop.f32.mrf.mxu1 }
 0x47e   :  { %v6488_v56 = vmax.f32 %v749_v5, %v1534_v46  ;;  %796 = vmatmul.f32.gmra.mxu0 %v218_v21  ;;  %v3221_v5 = vld [vmem:[#allocation7 + $0x10] sm:$0xff]  ;;  %v6506_v46 = vpop.permute.xlu0 %2399 }
 0x47f   :  { %3579 = vmatmul.f32.vlgmr.msra.gmra.mxu2 %v3221_v5  ;;  %v221_v5 = vld [vmem:[#allocation2 + $0x460] sm:$0xff] }
 0x480   :  { %1581 = vmatmul.f32.gmra.mxu1 %v218_v21  ;;  %2437 = vrot.lane.b32.xlu0 %v6488_v56, %s4752_s2 }
 0x483   :  { %v752_v0 = vpop.f32.mrf.mxu0 }
 0x485   :  { %v1537_v38 = vpop.f32.mrf.mxu1 }
 0x486   :  { %v6498_v28 = vmax.f32 %v752_v0, %v1537_v38  ;;  %799 = vmatmul.f32.gmra.mxu0 %v219_v6  ;;  %v6510_v0 = vpop.permute.xlu2 %2403  ;;  %v6512_v38 = vpop.permute.xlu1 %2401 }
 0x488   :  { %1584 = vmatmul.f32.gmra.mxu1 %v219_v6  ;;  %2439 = vrot.lane.b32.xlu2 %v6498_v28, %s4752_s2  ;;  %v2406_v6 = vpop.permute.xlu0 %2405 }
 0x48b   :  { %v755_v21 = vpop.f32.mrf.mxu0 }
 0x48d   :  { %v1540_v49 = vpop.f32.mrf.mxu1 }
 0x48e   :  { %v6508_v8 = vmax.f32 %v755_v21, %v1540_v49  ;;  %802 = vmatmul.f32.gmra.mxu0 %v220_v41  ;;  %v2410_v57 = vpop.permute.xlu2 %2409  ;;  %v2408_v49 = vpop.permute.xlu1 %2407 }
 0x48f   :  { %v2814_v29 = vmax.f32 %v6333_v47, %v2410_v57  ;;  %v2812_v47 = vmax.f32 %v6316_v1, %v2406_v6  ;;  %v2810_v1 = vmax.f32 %v6298_v55, %v6512_v38  ;;  %v2808_v55 = vmax.f32 %v6282_v20, %v6500_v53 }
 0x490   :  { %1587 = vmatmul.f32.gmra.mxu1 %v220_v41  ;;  %2441 = vrot.lane.b32.xlu1 %v6508_v8, %s4752_s2  ;;  %v2412_v21 = vpop.permute.xlu0 %2411 }
 0x491   :  { %v6587_v20 = vmax.f32 %v2808_v55, 0.0  ;;  %v227_v55 = vld [vmem:[#allocation2 + $0x490] sm:$0xff] }
 0x493   :  { %v758_v31 = vpop.f32.mrf.mxu0  ;;  %9105 = vst [vmem:[#allocation305_spill] sm:$0xff] %v6587_v20 }
 0x495   :  { %v1543_v32 = vpop.f32.mrf.mxu1 }
 0x496   :  { %v6516_v48 = vmax.f32 %v758_v31, %v1543_v32  ;;  %805 = vmatmul.f32.gmra.mxu0 %v221_v5  ;;  %v2416_v59 = vpop.permute.xlu2 %2415  ;;  %v2414_v43 = vpop.permute.xlu1 %2413 }
 0x497   :  { %v2817_v32 = vmax.f32 %v6364_v9, %v2416_v59  ;;  %v2813_v9 = vmax.f32 %v6326_v42, %v2408_v49  ;;  %v224_v59 = vld [vmem:[#allocation2 + $0x478] sm:$0xff]  ;;  %v2811_v42 = vmax.f32 %v6308_v13, %v6510_v0  ;;  %v225_v49 = vld [vmem:[#allocation2 + $0x480] sm:$0xff] }
 0x498   :  { %1590 = vmatmul.f32.gmra.mxu1 %v221_v5  ;;  %2443 = vrot.lane.b32.xlu0 %v6516_v48, %s4752_s2  ;;  %v2816_v5 = vmax.f32 %v6347_v39, %v2414_v43 }
 0x499   :  { %v6527_v19 = vmax.f32 %v2817_v32, 0.0  ;;  %v6567_v13 = vmax.f32 %v2811_v42, 0.0  ;;  %v9116_v42 = vld [vmem:[#allocation276_spill] sm:$0xff] }
 0x49a   :  { %v6535_v62 = vmax.f32 %v2816_v5, 0.0 }
 0x49b   :  { %v761_v41 = vpop.f32.mrf.mxu0  ;;  %9095 = vst [vmem:[#allocation221_spill] sm:$0xff] %v6527_v19 }
 0x49c   :  { %9097 = vst [vmem:[#allocation297_spill] sm:$0xff] %v6535_v62 }
 0x49d   :  { %v1546_v22 = vpop.f32.mrf.mxu1  ;;  %9102 = vst [vmem:[#allocation302_spill] sm:$0xff] %v6567_v13 }
 0x49e   :  { %v6520_v61 = vmax.f32 %v761_v41, %v1546_v22  ;;  %808 = vmatmul.f32.gmra.mxu0 %v222_v23  ;;  %v2815_v22 = vmax.f32 %v6341_v4, %v2412_v21  ;;  %v3377_v4 = vmul.f32 %v6140_v51, %v6527_v19  ;;  %v2807_v21 = vmax.f32 %v6274_v40, %v6502_v34  ;;  %v9107_v34 = vld [vmem:[#allocation267_spill] sm:$0xff] }
 0x4a0   :  { %1593 = vmatmul.f32.gmra.mxu1 %v222_v23  ;;  %2445 = vrot.lane.b32.xlu2 %v6520_v61, %s4752_s2  ;;  %v6597_v40 = vmax.f32 %v2807_v21, 0.0 }
 0x4a2   :  { %v2418_v31 = vpop.permute.xlu0 %2417  ;;  %9106 = vst [vmem:[#allocation306_spill] sm:$0xff] %v6597_v40 }
 0x4a3   :  { %v2818_v33 = vmax.f32 %v6392_v58, %v2418_v31  ;;  %v764_v17 = vpop.f32.mrf.mxu0  ;;  %v6553_v58 = vmax.f32 %v2813_v9, 0.0  ;;  %v226_v9 = vld [vmem:[#allocation2 + $0x488] sm:$0xff] }
 0x4a5   :  { %v1549_v14 = vpop.f32.mrf.mxu1  ;;  %v6530_v41 = vmax.f32 %v2818_v33, 0.0  ;;  %v6544_v33 = vmax.f32 %v2815_v22, 0.0  ;;  %9100 = vst [vmem:[#allocation300_spill] sm:$0xff] %v6553_v58 }
 0x4a6   :  { %v6532_v23 = vmax.f32 %v764_v17, %v1549_v14  ;;  %811 = vmatmul.f32.gmra.mxu0 %v223_v54  ;;  %v6546_v14 = vmax.f32 %v2814_v29, 0.0  ;;  %v3373_v29 = vmul.f32 %v6178_v16, %v6553_v58 }
 0x4a7   :  { %9096 = vst [vmem:[#allocation223_spill] sm:$0xff] %v6530_v41  ;;  %v3378_v39 = vmul.f32 %v6122_v26, %v6530_v41  ;;  %v3376_v26 = vmul.f32 %v6150_v36, %v6535_v62  ;;  %v3375_v51 = vmul.f32 %v6160_v10, %v6544_v33  ;;  %v2809_v10 = vmax.f32 %v6288_v50, %v6506_v46 }
 0x4a8   :  { %1596 = vmatmul.f32.gmra.mxu1 %v223_v54  ;;  %2447 = vrot.lane.b32.xlu1 %v6532_v23, %s4752_s2  ;;  %9098 = vst [vmem:[#allocation298_spill] sm:$0xff] %v6544_v33  ;;  %v3374_v36 = vmul.f32 %v6168_v63, %v6546_v14  ;;  %v6563_v54 = vmax.f32 %v2812_v47, 0.0  ;;  %v6575_v63 = vmax.f32 %v2810_v1, 0.0  ;;  %v3371_v50 = vmul.f32 %v6200_v25, %v6567_v13  ;;  %v9113_v47 = vld [vmem:[#allocation270_spill] sm:$0xff]  ;;  %v9118_v1 = vld [vmem:[#allocation277_spill] sm:$0xff] }
 0x4a9   :  { %3643 = vmatpush.msra.mxu2 %v3378_v39  ;;  %9099 = vst [vmem:[#allocation299_spill] sm:$0xff] %v6546_v14  ;;  %v6583_v16 = vmax.f32 %v2809_v10, 0.0  ;;  %v2805_v25 = vmax.f32 %v6248_v2, %v6490_v27  ;;  %v9112_v2 = vld [vmem:[#allocation260_spill] sm:$0xff] }
 0x4aa   :  { %9101 = vst [vmem:[#allocation301_spill] sm:$0xff] %v6563_v54  ;;  %v3372_v0 = vmul.f32 %v6190_v52, %v6563_v54  ;;  %v2806_v52 = vmax.f32 %v6270_v35, %v6496_v18  ;;  %v3370_v53 = vmul.f32 %v6206_v44, %v6575_v63  ;;  %v9108_v35 = vld [vmem:[#allocation274_spill] sm:$0xff]  ;;  %v9109_v44 = vld [vmem:[#allocation269_spill] sm:$0xff]  ;;  %v2803_v27 = vmax.f32 %v9112_v2, %v6486_v30 }
 0x4ab   :  { %3644 = vmatpush.msra.mxu2 %v3377_v4  ;;  %v767_v17 = vpop.f32.mrf.mxu0  ;;  %9103 = vst [vmem:[#allocation303_spill] sm:$0xff] %v6575_v63  ;;  %v3369_v32 = vmul.f32 %v9107_v34, %v6583_v16  ;;  %v2804_v18 = vmax.f32 %v9108_v35, %v6492_v15  ;;  %v3368_v31 = vmul.f32 %v9109_v44, %v6587_v20  ;;  %v6607_v4 = vmax.f32 %v2805_v25, 0.0  ;;  %v229_v34 = vld [vmem:[#allocation2 + $0x4a0] sm:$0xff]  ;;  %v230_v44 = vld [vmem:[#allocation2 + $0x4a8] sm:$0xff]  ;;  %v239_v20 = vld [vmem:[#allocation2 + $0x4f0] sm:$0xff] }
 0x4ac   :  { %9104 = vst [vmem:[#allocation304_spill] sm:$0xff] %v6583_v16  ;;  %v6605_v5 = vmax.f32 %v2806_v52, 0.0 }
 0x4ad   :  { %v1552_v43 = vpop.f32.mrf.mxu1  ;;  %3645 = vmatpush.msra.mxu2 %v3376_v26  ;;  %9111 = vst [vmem:[#allocation274_spill] sm:$0xff] %v6607_v4  ;;  %v3367_v26 = vmul.f32 %v9113_v47, %v6597_v40  ;;  %v6615_v15 = vmax.f32 %v2804_v18, 0.0  ;;  %v3365_v30 = vmul.f32 %v9116_v42, %v6607_v4 }
 0x4ae   :  { %v6557_v57 = vmax.f32 %v767_v17, %v1552_v43  ;;  %814 = vmatmul.f32.gmra.mxu0 %v224_v59  ;;  %9110 = vst [vmem:[#allocation267_spill] sm:$0xff] %v6605_v5  ;;  %v9115_v43 = vld [vmem:[#allocation273_spill] sm:$0xff] }
 0x4af   :  { %3646 = vmatpush.msra.mxu2 %v3375_v51  ;;  %9114 = vst [vmem:[#allocation269_spill] sm:$0xff] %v6615_v15  ;;  %v6623_v51 = vmax.f32 %v2803_v27, 0.0  ;;  %v6649_v27 = vpop.permute.xlu1 %2419 }
 0x4b0   :  { %1599 = vmatmul.f32.gmra.mxu1 %v224_v59  ;;  %2449 = vrot.lane.b32.xlu0 %v6557_v57, %s4752_s2  ;;  %v3366_v59 = vmul.f32 %v9115_v43, %v6605_v5  ;;  %v232_v43 = vld [vmem:[#allocation2 + $0x4b8] sm:$0xff] }
 0x4b1   :  { %3647 = vmatpush.msra.mxu2 %v3374_v36  ;;  %9117 = vst [vmem:[#allocation260_spill] sm:$0xff] %v6623_v51  ;;  %v3364_v36 = vmul.f32 %v9118_v1, %v6615_v15 }
 0x4b3   :  { %3648 = vmatpush.msra.mxu2 %v3373_v29  ;;  %v770_v38 = vpop.f32.mrf.mxu0 }
 0x4b5   :  { %v1555_v6 = vpop.f32.mrf.mxu1  ;;  %3649 = vmatpush.msra.mxu2 %v3372_v0  ;;  %v9119_v0 = vld [vmem:[#allocation278_spill] sm:$0xff] }
 0x4b6   :  { %v6585_v46 = vmax.f32 %v770_v38, %v1555_v6  ;;  %817 = vmatmul.f32.gmra.mxu0 %v225_v49  ;;  %v3363_v38 = vmul.f32 %v9119_v0, %v6623_v51  ;;  %v234_v0 = vld [vmem:[#allocation2 + $0x4c8] sm:$0xff] }
 0x4b7   :  { %3650 = vmatpush.msra.mxu2 %v3371_v50  ;;  %v228_v50 = vld [vmem:[#allocation2 + $0x498] sm:$0xff] }
 0x4b8   :  { %1602 = vmatmul.f32.gmra.mxu1 %v225_v49  ;;  %2451 = vrot.lane.b32.xlu1 %v6585_v46, %s4752_s2 }
 0x4b9   :  { %3651 = vmatpush.msra.mxu2 %v3370_v53 }
 0x4ba   :  { %v6655_v42 = vpop.permute.xlu1 %2423 }
 0x4bb   :  { %3652 = vmatpush.msra.mxu2 %v3369_v32  ;;  %v773_v22 = vpop.f32.mrf.mxu0 }
 0x4bd   :  { %v1558_v39 = vpop.f32.mrf.mxu1  ;;  %3653 = vmatpush.msra.mxu2 %v3368_v31 }
 0x4be   :  { %v6613_v17 = vmax.f32 %v773_v22, %v1558_v39  ;;  %820 = vmatmul.f32.gmra.mxu0 %v226_v9 }
 0x4bf   :  { %3654 = vmatpush.msra.mxu2 %v3367_v26 }
 0x4c0   :  { %1605 = vmatmul.f32.gmra.mxu1 %v226_v9  ;;  %2453 = vrot.lane.b32.xlu0 %v6613_v17, %s4752_s2  ;;  %v231_v9 = vld [vmem:[#allocation2 + $0x4b0] sm:$0xff] }
 0x4c1   :  { %3655 = vmatpush.msra.mxu2 %v3366_v59 }
 0x4c3   :  { %3656 = vmatpush.msra.mxu2 %v3365_v30  ;;  %v776_v10 = vpop.f32.mrf.mxu0 }
 0x4c5   :  { %v1561_v29 = vpop.f32.mrf.mxu1  ;;  %3657 = vmatpush.msra.mxu2 %v3364_v36  ;;  %v233_v36 = vld [vmem:[#allocation2 + $0x4c0] sm:$0xff] }
 0x4c6   :  { %v6629_v6 = vmax.f32 %v776_v10, %v1561_v29  ;;  %823 = vmatmul.f32.gmra.mxu0 %v227_v55 }
 0x4c7   :  { %3658 = vmatpush.msra.mxu2 %v3363_v38 }
 0x4c8   :  { %1608 = vmatmul.f32.gmra.mxu1 %v227_v55  ;;  %2455 = vrot.lane.b32.xlu2 %v6629_v6, %s4752_s2 }
 0x4cb   :  { %v779_v49 = vpop.f32.mrf.mxu0 }
 0x4cd   :  { %v1564_v21 = vpop.f32.mrf.mxu1 }
 0x4ce   :  { %v6633_v52 = vmax.f32 %v779_v49, %v1564_v21  ;;  %826 = vmatmul.f32.gmra.mxu0 %v228_v50  ;;  %v6663_v49 = vpop.permute.xlu1 %2425  ;;  %v6667_v21 = vpop.permute.xlu2 %2421 }
 0x4d0   :  { %2457 = vrot.lane.b32.xlu1 %v6633_v52, %s4752_s2  ;;  %1611 = vmatmul.f32.gmra.mxu1 %v228_v50 }
 0x4d3   :  { %v782_v53 = vpop.f32.mrf.mxu0 }
 0x4d5   :  { %v1567_v25 = vpop.f32.mrf.mxu1 }
 0x4d6   :  { %v6637_v32 = vmax.f32 %v782_v53, %v1567_v25  ;;  %829 = vmatmul.f32.gmra.mxu0 %v229_v34  ;;  %v235_v25 = vld [vmem:[#allocation2 + $0x4d0] sm:$0xff] }
 0x4d8   :  { %2459 = vrot.lane.b32.xlu0 %v6637_v32, %s4752_s2  ;;  %1614 = vmatmul.f32.gmra.mxu1 %v229_v34 }
 0x4db   :  { %v785_v35 = vpop.f32.mrf.mxu0 }
 0x4dd   :  { %v1570_v18 = vpop.f32.mrf.mxu1 }
 0x4de   :  { %v6641_v31 = vmax.f32 %v785_v35, %v1570_v18  ;;  %832 = vmatmul.f32.gmra.mxu0 %v230_v44  ;;  %v6671_v35 = vpop.permute.xlu1 %2429  ;;  %v6675_v18 = vpop.permute.xlu2 %2427 }
 0x4e0   :  { %2461 = vrot.lane.b32.xlu2 %v6641_v31, %s4752_s2  ;;  %1617 = vmatmul.f32.gmra.mxu1 %v230_v44  ;;  %v3222_v44 = vld [vmem:[#allocation7 + $0x18] sm:$0xff] }
 0x4e1   :  { %3599 = vmatmul.f32.vlgmr.msra.gmra.mxu3 %v3222_v44 }
 0x4e3   :  { %v788_v22 = vpop.f32.mrf.mxu0 }
 0x4e5   :  { %v1573_v39 = vpop.f32.mrf.mxu1 }
 0x4e6   :  { %v6645_v2 = vmax.f32 %v788_v22, %v1573_v39  ;;  %835 = vmatmul.f32.gmra.mxu0 %v231_v9  ;;  %v6677_v22 = vpop.permute.xlu0 %2431 }
 0x4e8   :  { %2463 = vrot.lane.b32.xlu1 %v6645_v2, %s4752_s2  ;;  %1620 = vmatmul.f32.gmra.mxu1 %v231_v9 }
 0x4eb   :  { %v791_v47 = vpop.f32.mrf.mxu0 }
 0x4ed   :  { %v1576_v26 = vpop.f32.mrf.mxu1 }
 0x4ee   :  { %v6651_v59 = vmax.f32 %v791_v47, %v1576_v26  ;;  %838 = vmatmul.f32.gmra.mxu0 %v232_v43  ;;  %v236_v47 = vld [vmem:[#allocation2 + $0x4d8] sm:$0xff] }
 0x4f0   :  { %2465 = vrot.lane.b32.xlu0 %v6651_v59, %s4752_s2  ;;  %1623 = vmatmul.f32.gmra.mxu1 %v232_v43  ;;  %v6681_v43 = vpop.permute.xlu1 %2435 }
 0x4f3   :  { %v794_v30 = vpop.f32.mrf.mxu0 }
 0x4f5   :  { %v1579_v1 = vpop.f32.mrf.mxu1 }
 0x4f6   :  { %v6657_v10 = vmax.f32 %v794_v30, %v1579_v1  ;;  %841 = vmatmul.f32.gmra.mxu0 %v233_v36  ;;  %v6685_v30 = vpop.permute.xlu2 %2433  ;;  %v2438_v1 = vpop.permute.xlu0 %2437 }
 0x4f8   :  { %2467 = vrot.lane.b32.xlu2 %v6657_v10, %s4752_s2  ;;  %1626 = vmatmul.f32.gmra.mxu1 %v233_v36 }
 0x4fb   :  { %v797_v29 = vpop.f32.mrf.mxu0 }
 0x4fd   :  { %v1582_v55 = vpop.f32.mrf.mxu1 }
 0x4fe   :  { %v6661_v38 = vmax.f32 %v797_v29, %v1582_v55  ;;  %844 = vmatmul.f32.gmra.mxu0 %v234_v0  ;;  %v237_v55 = vld [vmem:[#allocation2 + $0x4e0] sm:$0xff] }
 0x500   :  { %2469 = vrot.lane.b32.xlu1 %v6661_v38, %s4752_s2  ;;  %1629 = vmatmul.f32.gmra.mxu1 %v234_v0 }
 0x503   :  { %v800_v50 = vpop.f32.mrf.mxu0 }
 0x505   :  { %v1585_v53 = vpop.f32.mrf.mxu1 }
 0x506   :  { %v6669_v34 = vmax.f32 %v800_v50, %v1585_v53  ;;  %847 = vmatmul.f32.gmra.mxu0 %v235_v25  ;;  %v2442_v50 = vpop.permute.xlu1 %2441  ;;  %v2440_v53 = vpop.permute.xlu2 %2439 }
 0x508   :  { %2471 = vrot.lane.b32.xlu0 %v6669_v34, %s4752_s2  ;;  %1632 = vmatmul.f32.gmra.mxu1 %v235_v25 }
 0x50a   :  { %v2444_v25 = vpop.permute.xlu0 %2443 }
 0x50b   :  { %v803_v39 = vpop.f32.mrf.mxu0 }
 0x50d   :  { %v1588_v9 = vpop.f32.mrf.mxu1 }
 0x50e   :  { %v6679_v26 = vmax.f32 %v803_v39, %v1588_v9  ;;  %850 = vmatmul.f32.gmra.mxu0 %v236_v47  ;;  %v238_v9 = vld [vmem:[#allocation2 + $0x4e8] sm:$0xff] }
 0x510   :  { %2473 = vrot.lane.b32.xlu0 %v6679_v26, %s4752_s2  ;;  %1635 = vmatmul.f32.gmra.mxu1 %v236_v47 }
 0x513   :  { %v806_v36 = vpop.f32.mrf.mxu0 }
 0x515   :  { %v1591_v29 = vpop.f32.mrf.mxu1 }
 0x516   :  { %v6687_v0 = vmax.f32 %v806_v36, %v1591_v29  ;;  %853 = vmatmul.f32.gmra.mxu0 %v237_v55  ;;  %v2446_v36 = vpop.permute.xlu2 %2445 }
 0x517   :  { %v2832_v4 = vmax.f32 %v6520_v61, %v2446_v36 }
 0x518   :  { %2475 = vrot.lane.b32.xlu1 %v6687_v0, %s4752_s2  ;;  %1638 = vmatmul.f32.gmra.mxu1 %v237_v55 }
 0x519   :  { %v6705_v13 = vmax.f32 %v2832_v4, 0.0  ;;  %v6722_v4 = vld [vmem:[#allocation6 + $0xe8] sm:$0xff] }
 0x51a   :  { %v2448_v47 = vpop.permute.xlu1 %2447 }
 0x51b   :  { %v809_v44 = vpop.f32.mrf.mxu0  ;;  %v2833_v29 = vmax.f32 %v6532_v23, %v2448_v47  ;;  %9122 = vst [vmem:[#allocation276_spill] sm:$0xff] %v6705_v13  ;;  %v2830_v23 = vmax.f32 %v6508_v8, %v2442_v50  ;;  %v6732_v47 = vld [vmem:[#allocation6 + $0xe0] sm:$0xff] }
 0x51d   :  { %v1594_v39 = vpop.f32.mrf.mxu1  ;;  %v6726_v50 = vmax.f32 %v2830_v23, 0.0 }
 0x51e   :  { %v6691_v51 = vmax.f32 %v809_v44, %v1594_v39  ;;  %856 = vmatmul.f32.gmra.mxu0 %v238_v9  ;;  %v2831_v44 = vmax.f32 %v6516_v48, %v2444_v25  ;;  %v6699_v39 = vmax.f32 %v2833_v29, 0.0  ;;  %v2829_v48 = vmax.f32 %v6498_v28, %v2440_v53 }
 0x51f   :  { %9125 = vst [vmem:[#allocation307_spill] sm:$0xff] %v6726_v50  ;;  %v2827_v25 = vmax.f32 %v6480_v3, %v6681_v43  ;;  %v2826_v29 = vmax.f32 %v6472_v37, %v6685_v30  ;;  %v2825_v3 = vmax.f32 %v6468_v7, %v6677_v22  ;;  %v6750_v43 = vld [vmem:[#allocation6 + $0xd0] sm:$0xff]  ;;  %v2823_v22 = vmax.f32 %v6460_v11, %v6675_v18 }
 0x520   :  { %2477 = vrot.lane.b32.xlu2 %v6691_v51, %s4752_s2  ;;  %1641 = vmatmul.f32.gmra.mxu1 %v238_v9  ;;  %9120 = vst [vmem:[#allocation270_spill] sm:$0xff] %v6699_v39  ;;  %v6708_v9 = vld [vmem:[#allocation6 + $0xf8] sm:$0xff]  ;;  %v6728_v53 = vmax.f32 %v2829_v48, 0.0  ;;  %v6760_v48 = vld [vmem:[#allocation6 + $0xc8] sm:$0xff] }
 0x521   :  { %9123 = vst [vmem:[#allocation277_spill] sm:$0xff] %v6708_v9  ;;  %v6754_v37 = vmax.f32 %v2827_v25, 0.0  ;;  %v6756_v30 = vmax.f32 %v2826_v29, 0.0  ;;  %v6784_v18 = vmax.f32 %v2823_v22, 0.0  ;;  %v2821_v29 = vmax.f32 %v6452_v60, %v6655_v42  ;;  %v9136_v60 = vld [vmem:[#allocation222_spill] sm:$0xff] }
 0x522   :  { %v2450_v15 = vpop.permute.xlu0 %2449  ;;  %9126 = vst [vmem:[#allocation308_spill] sm:$0xff] %v6728_v53  ;;  %v2819_v42 = vmax.f32 %v9136_v60, %v6649_v27  ;;  %v6822_v60 = vld [vmem:[#allocation6 + $0x90] sm:$0xff] }
 0x523   :  { %v2834_v55 = vmax.f32 %v6557_v57, %v2450_v15  ;;  %v812_v5 = vpop.f32.mrf.mxu0  ;;  %v3224_v57 = vld [vmem:[#allocation7 + $0x28] sm:$0xff]  ;;  %v6715_v15 = vmax.f32 %v2831_v44, 0.0  ;;  %v6742_v44 = vld [vmem:[#allocation6 + $0xd8] sm:$0xff]  ;;  %9128 = vst [vmem:[#allocation310_spill] sm:$0xff] %v6754_v37 }
 0x524   :  { %3639 = vmatmul.f32.vlgmr.msrb.gmra.mxu3 %v3224_v57  ;;  %v3390_v23 = vmul.f32 %v6742_v44, %v6726_v50  ;;  %9129 = vst [vmem:[#allocation311_spill] sm:$0xff] %v6756_v30  ;;  %v2824_v57 = vmax.f32 %v6464_v45, %v6671_v35  ;;  %v2822_v35 = vmax.f32 %v6456_v24, %v6663_v49 }
 0x525   :  { %v1597_v40 = vpop.f32.mrf.mxu1  ;;  %v6701_v16 = vmax.f32 %v2834_v55, 0.0  ;;  %9124 = vst [vmem:[#allocation278_spill] sm:$0xff] %v6715_v15  ;;  %v3391_v36 = vmul.f32 %v6732_v47, %v6715_v15  ;;  %v2820_v49 = vmax.f32 %v6444_v12, %v6667_v21  ;;  %v9139_v21 = vld [vmem:[#allocation29_spill] sm:$0xff] }
 0x526   :  { %v6703_v63 = vmax.f32 %v812_v5, %v1597_v40  ;;  %859 = vmatmul.f32.gmra.mxu0 %v239_v20  ;;  %v6717_v40 = vld [vmem:[#allocation6 + $0xf0] sm:$0xff]  ;;  %v2828_v5 = vmax.f32 %v6488_v56, %v2438_v1  ;;  %v6780_v11 = vmax.f32 %v2824_v57, 0.0  ;;  %9133 = vst [vmem:[#allocation315_spill] sm:$0xff] %v6784_v18 }
 0x527   :  { %9121 = vst [vmem:[#allocation273_spill] sm:$0xff] %v6701_v16  ;;  %v3394_v61 = vmul.f32 %v6708_v9, %v6701_v16  ;;  %v3393_v8 = vmul.f32 %v6717_v40, %v6699_v39 }
 0x528   :  { %1644 = vmatmul.f32.gmra.mxu1 %v239_v20  ;;  %2479 = vrot.lane.b32.xlu2 %v6703_v63, %s4752_s2  ;;  %v3392_v20 = vmul.f32 %v6722_v4, %v6705_v13  ;;  %v6740_v55 = vmax.f32 %v2828_v5, 0.0  ;;  %v6766_v5 = vmax.f32 %v2825_v3, 0.0  ;;  %9132 = vst [vmem:[#allocation314_spill] sm:$0xff] %v6780_v11  ;;  %v6794_v3 = vmax.f32 %v2822_v35, 0.0 }
 0x529   :  { %3663 = vmatpush.msra.mxu3 %v3394_v61  ;;  %v3389_v61 = vmul.f32 %v6750_v43, %v6728_v53  ;;  %9144 = vst [vmem:[#allocation320_spill] sm:$0xff] %v6822_v60 }
 0x52a   :  { %9127 = vst [vmem:[#allocation309_spill] sm:$0xff] %v6740_v55 }
 0x52b   :  { %3664 = vmatpush.msra.mxu3 %v3393_v8  ;;  %v815_v28 = vpop.f32.mrf.mxu0  ;;  %v3388_v8 = vmul.f32 %v6760_v48, %v6740_v55  ;;  %9130 = vst [vmem:[#allocation312_spill] sm:$0xff] %v6766_v5 }
 0x52c   :  { %9134 = vst [vmem:[#allocation316_spill] sm:$0xff] %v6794_v3 }
 0x52d   :  { %v1600_v56 = vpop.f32.mrf.mxu1  ;;  %3665 = vmatpush.msra.mxu3 %v3392_v20  ;;  %v6768_v20 = vld [vmem:[#allocation6 + $0xc0] sm:$0xff] }
 0x52e   :  { %v6736_v1 = vmax.f32 %v815_v28, %v1600_v56  ;;  %v3387_v28 = vmul.f32 %v6768_v20, %v6754_v37 }
 0x52f   :  { %3666 = vmatpush.msra.mxu3 %v3391_v36  ;;  %v6776_v36 = vld [vmem:[#allocation6 + $0xb8] sm:$0xff] }
 0x530   :  { %2481 = vrot.lane.b32.xlu0 %v6736_v1, %s4752_s2  ;;  %v3386_v56 = vmul.f32 %v6776_v36, %v6756_v30 }
 0x531   :  { %3667 = vmatpush.msra.mxu3 %v3390_v23  ;;  %v6788_v23 = vld [vmem:[#allocation6 + $0xb0] sm:$0xff] }
 0x532   :  { %v3385_v24 = vmul.f32 %v6788_v23, %v6766_v5  ;;  %v6864_v5 = vpop.permute.xlu0 %2453 }
 0x533   :  { %3668 = vmatpush.msra.mxu3 %v3389_v61  ;;  %v818_v7 = vpop.f32.mrf.mxu0  ;;  %v6796_v61 = vld [vmem:[#allocation6 + $0xa8] sm:$0xff] }
 0x534   :  { %9135 = vst [vmem:[#allocation317_spill] sm:$0xff] %v6796_v61  ;;  %v3384_v57 = vmul.f32 %v6796_v61, %v6780_v11  ;;  %v6812_v11 = vmax.f32 %v2820_v49, 0.0  ;;  %v6828_v49 = vld [vmem:[#allocation6 + $0x88] sm:$0xff] }
 0x535   :  { %v1603_v25 = vpop.f32.mrf.mxu1  ;;  %3669 = vmatpush.msra.mxu3 %v3388_v8  ;;  %9146 = vst [vmem:[#allocation322_spill] sm:$0xff] %v6828_v49 }
 0x536   :  { %v6772_v45 = vmax.f32 %v818_v7, %v1603_v25  ;;  %v6802_v7 = vld [vmem:[#allocation6 + $0xa0] sm:$0xff]  ;;  %9141 = vst [vmem:[#allocation29_spill] sm:$0xff] %v6812_v11 }
 0x537   :  { %3670 = vmatpush.msra.mxu3 %v3387_v28  ;;  %9137 = vst [vmem:[#allocation222_spill] sm:$0xff] %v6802_v7  ;;  %v3383_v22 = vmul.f32 %v6802_v7, %v6784_v18  ;;  %v6806_v28 = vmax.f32 %v2821_v29, 0.0  ;;  %v9140_v25 = vld [vmem:[#allocation12_spill] sm:$0xff]  ;;  %v6820_v29 = vmax.f32 %v2819_v42, 0.0 }
 0x538   :  { %9131 = vst [vmem:[#allocation313_spill] sm:$0xff] %v6772_v45  ;;  %2483 = vrot.lane.b32.xlu2 %v6772_v45, %s4752_s2  ;;  %v2866_v35 = vmax.f32 %v9140_v25, %v9139_v21  ;;  %v6832_v21 = vld [vmem:[#allocation6 + $0x80] sm:$0xff] }
 0x539   :  { %3671 = vmatpush.msra.mxu3 %v3386_v56  ;;  %9138 = vst [vmem:[#allocation318_spill] sm:$0xff] %v6806_v28  ;;  %v3379_v42 = vmul.f32 %v6832_v21, %v6820_v29 }
 0x53a   :  { %9143 = vst [vmem:[#allocation319_spill] sm:$0xff] %v6820_v29 }
 0x53b   :  { %3672 = vmatpush.msra.mxu3 %v3385_v24  ;;  %v821_v8 = vpop.f32.mrf.mxu0  ;;  %v6814_v24 = vld [vmem:[#allocation6 + $0x98] sm:$0xff]  ;;  %9147 = vst [vmem:[#allocation323_spill] sm:$0xff] %v6832_v21 }
 0x53c   :  { %9142 = vst [vmem:[#allocation12_spill] sm:$0xff] %v6814_v24  ;;  %v3382_v27 = vmul.f32 %v6814_v24, %v6794_v3 }
 0x53d   :  { %v1606_v12 = vpop.f32.mrf.mxu1  ;;  %3673 = vmatpush.msra.mxu3 %v3384_v57  ;;  %v3381_v57 = vmul.f32 %v6822_v60, %v6806_v28 }
 0x53e   :  { %v6810_v56 = vmax.f32 %v821_v8, %v1606_v12  ;;  %v6826_v8 = vmax.f32 %v2866_v35, 0.0  ;;  %v3380_v12 = vmul.f32 %v6828_v49, %v6812_v11 }
 0x53f   :  { %3674 = vmatpush.msra.mxu3 %v3383_v22 }
 0x540   :  { %2485 = vrot.lane.b32.xlu2 %v6810_v56, %s4752_s2  ;;  %9145 = vst [vmem:[#allocation321_spill] sm:$0xff] %v6826_v8  ;;  %v3426_v28 = vmul.f32 %v6708_v9, %v6826_v8  ;;  %v9148_v9 = vld [vmem:[#allocation180_spill] sm:$0xff] }
 0x541   :  { %3675 = vmatpush.msra.mxu3 %v3382_v27 }
 0x543   :  { %3676 = vmatpush.msra.mxu3 %v3381_v57  ;;  %v824_v22 = vpop.f32.mrf.mxu0 }
 0x545   :  { %v1609_v25 = vpop.f32.mrf.mxu1  ;;  %3677 = vmatpush.msra.mxu3 %v3380_v12 }
 0x546   :  { %v6838_v27 = vmax.f32 %v824_v22, %v1609_v25 }
 0x547   :  { %3678 = vmatpush.msra.mxu3 %v3379_v42 }
 0x548   :  { %2487 = vrot.lane.b32.xlu1 %v6838_v27, %s4752_s2 }
 0x549   :  { %3703 = vmatpush.msrb.mxu3 %v3426_v28 }
 0x54b   :  { %v827_v35 = vpop.f32.mrf.mxu0 }
 0x54d   :  { %v1612_v57 = vpop.f32.mrf.mxu1 }
 0x54e   :  { %v6842_v11 = vmax.f32 %v827_v35, %v1612_v57 }
 0x550   :  { %2489 = vrot.lane.b32.xlu0 %v6842_v11, %s4752_s2 }
 0x553   :  { %v830_v29 = vpop.f32.mrf.mxu0 }
 0x555   :  { %v1615_v3 = vpop.f32.mrf.mxu1 }
 0x556   :  { %v6846_v12 = vmax.f32 %v830_v29, %v1615_v3 }
 0x558   :  { %2491 = vrot.lane.b32.xlu2 %v6846_v12, %s4752_s2 }
 0x55b   :  { %v833_v22 = vpop.f32.mrf.mxu0 }
 0x55d   :  { %v1618_v42 = vpop.f32.mrf.mxu1 }
 0x55e   :  { %v6850_v28 = vmax.f32 %v833_v22, %v1618_v42 }
 0x560   :  { %2493 = vrot.lane.b32.xlu1 %v6850_v28, %s4752_s2 }
 0x563   :  { %v836_v25 = vpop.f32.mrf.mxu0 }
 0x565   :  { %v1621_v35 = vpop.f32.mrf.mxu1 }
 0x566   :  { %v6854_v57 = vmax.f32 %v836_v25, %v1621_v35  ;;  %v6868_v25 = vpop.permute.xlu2 %2455 }
 0x568   :  { %2495 = vrot.lane.b32.xlu0 %v6854_v57, %s4752_s2 }
 0x56b   :  { %v839_v8 = vpop.f32.mrf.mxu0 }
 0x56d   :  { %v1624_v3 = vpop.f32.mrf.mxu1 }
 0x56e   :  { %v6858_v29 = vmax.f32 %v839_v8, %v1624_v3  ;;  %v6872_v8 = vpop.permute.xlu0 %2459  ;;  %v6876_v3 = vpop.permute.xlu1 %2451 }
 0x570   :  { %2497 = vrot.lane.b32.xlu2 %v6858_v29, %s4752_s2 }
 0x573   :  { %v842_v18 = vpop.f32.mrf.mxu0 }
 0x575   :  { %v1627_v22 = vpop.f32.mrf.mxu1 }
 0x576   :  { %v6862_v42 = vmax.f32 %v842_v18, %v1627_v22  ;;  %v6878_v18 = vpop.permute.xlu2 %2461  ;;  %v6882_v50 = vpop.permute.xlu0 %2465 }
 0x578   :  { %2499 = vrot.lane.b32.xlu1 %v6862_v42, %s4752_s2 }
 0x57b   :  { %v845_v35 = vpop.f32.mrf.mxu0 }
 0x57d   :  { %v1630_v30 = vpop.f32.mrf.mxu1 }
 0x57e   :  { %v6870_v37 = vmax.f32 %v845_v35, %v1630_v30  ;;  %v3223_v30 = vld [vmem:[#allocation7 + $0x20] sm:$0xff]  ;;  %v6886_v35 = vpop.permute.xlu1 %2457  ;;  %v2468_v15 = vpop.permute.xlu2 %2467 }
 0x57f   :  { %3619 = vmatmul.f32.vlgmr.msrb.gmra.mxu2 %v3223_v30  ;;  %v2472_v54 = vpop.permute.xlu0 %2471 }
 0x580   :  { %2501 = vrot.lane.b32.xlu0 %v6870_v37, %s4752_s2 }
 0x583   :  { %v848_v22 = vpop.f32.mrf.mxu0 }
 0x585   :  { %v1633_v55 = vpop.f32.mrf.mxu1 }
 0x586   :  { %v6880_v53 = vmax.f32 %v848_v22, %v1633_v55  ;;  %v6892_v55 = vpop.permute.xlu1 %2463  ;;  %v2478_v22 = vpop.permute.xlu2 %2477 }
 0x587   :  { %v2474_v62 = vpop.permute.xlu0 %2473  ;;  %v2848_v49 = vmax.f32 %v6691_v51, %v2478_v22 }
 0x588   :  { %2503 = vrot.lane.b32.xlu2 %v6880_v53, %s4752_s2 }
 0x589   :  { %v6914_v61 = vmax.f32 %v2848_v49, 0.0  ;;  %v6935_v49 = vld [vmem:[#allocation6 + $0x68] sm:$0xff] }
 0x58a   :  { %9155 = vst [vmem:[#allocation328_spill] sm:$0xff] %v6935_v49 }
 0x58b   :  { %v851_v13 = vpop.f32.mrf.mxu0  ;;  %9151 = vst [vmem:[#allocation326_spill] sm:$0xff] %v6914_v61  ;;  %v3408_v22 = vmul.f32 %v6935_v49, %v6914_v61 }
 0x58d   :  { %v1636_v39 = vpop.f32.mrf.mxu1 }
 0x58e   :  { %v6888_v16 = vmax.f32 %v851_v13, %v1636_v39  ;;  %v2470_v30 = vpop.permute.xlu1 %2469  ;;  %v2480_v13 = vpop.permute.xlu2 %2479 }
 0x58f   :  { %v2849_v21 = vmax.f32 %v6703_v63, %v2480_v13  ;;  %v2846_v63 = vmax.f32 %v6679_v26, %v2474_v62  ;;  %v6917_v13 = vld [vmem:[#allocation6 + $0x78] sm:$0xff]  ;;  %v2844_v26 = vmax.f32 %v6661_v38, %v2470_v30  ;;  %v2842_v38 = vmax.f32 %v6651_v59, %v6882_v50  ;;  %v6964_v59 = vld [vmem:[#allocation6 + $0x50] sm:$0xff] }
 0x590   :  { %2505 = vrot.lane.b32.xlu1 %v6888_v16, %s4752_s2 }
 0x591   :  { %v6907_v7 = vmax.f32 %v2849_v21, 0.0  ;;  %v9152_v21 = vld [vmem:[#allocation129_spill] sm:$0xff]  ;;  %v6950_v30 = vmax.f32 %v2844_v26, 0.0  ;;  %v2840_v26 = vmax.f32 %v6641_v31, %v6878_v18  ;;  %v9165_v31 = vld [vmem:[#allocation238_spill] sm:$0xff] }
 0x592   :  { %v9166_v18 = vld [vmem:[#allocation237_spill] sm:$0xff] }
 0x593   :  { %v854_v58 = vpop.f32.mrf.mxu0  ;;  %9149 = vst [vmem:[#allocation324_spill] sm:$0xff] %v6907_v7 }
 0x594   :  { %9158 = vst [vmem:[#allocation331_spill] sm:$0xff] %v6950_v30 }
 0x595   :  { %v1639_v14 = vpop.f32.mrf.mxu1 }
 0x596   :  { %v6894_v33 = vmax.f32 %v854_v58, %v1639_v14  ;;  %v2476_v14 = vpop.permute.xlu1 %2475 }
 0x598   :  { %2507 = vrot.lane.b32.xlu1 %v6894_v33, %s4752_s2 }
 0x59b   :  { %v857_v19 = vpop.f32.mrf.mxu0 }
 0x59d   :  { %v1642_v41 = vpop.f32.mrf.mxu1 }
 0x59e   :  { %v6898_v39 = vmax.f32 %v857_v19, %v1642_v41  ;;  %v2847_v19 = vmax.f32 %v6687_v0, %v2476_v14  ;;  %v9153_v0 = vld [vmem:[#allocation241_spill] sm:$0xff] }
 0x5a0   :  { %2657 = vrot.lane.b32.xlu1 %v9148_v9, %s4752_s2  ;;  %2509 = vrot.lane.b32.xlu2 %v6898_v39, %s4752_s2  ;;  %v6930_v62 = vmax.f32 %v2847_v19, 0.0 }
 0x5a2   :  { %v2482_v58 = vpop.permute.xlu0 %2481  ;;  %9154 = vst [vmem:[#allocation327_spill] sm:$0xff] %v6930_v62 }
 0x5a3   :  { %v2850_v60 = vmax.f32 %v6736_v1, %v2482_v58  ;;  %v860_v24 = vpop.f32.mrf.mxu0  ;;  %v3225_v1 = vld [vmem:[#allocation7 + $0x30] sm:$0xff]  ;;  %v6944_v58 = vld [vmem:[#allocation6 + $0x60] sm:$0xff] }
 0x5a4   :  { %3659 = vmatmul.f32.vlgmr.msra.gmra.mxu2 %v3225_v1  ;;  %v3407_v19 = vmul.f32 %v6944_v58, %v6930_v62  ;;  %v9180_v62 = vld [vmem:[#allocation239_spill] sm:$0xff] }
 0x5a5   :  { %v6910_v41 = vmax.f32 %v2850_v60, 0.0  ;;  %v1645_v45 = vpop.f32.mrf.mxu1  ;;  %v2845_v60 = vmax.f32 %v6669_v34, %v2472_v54  ;;  %v6939_v54 = vmax.f32 %v2846_v63, 0.0  ;;  %v2843_v34 = vmax.f32 %v6657_v10, %v2468_v15  ;;  %v9159_v10 = vld [vmem:[#allocation77_spill] sm:$0xff]  ;;  %v9160_v15 = vld [vmem:[#allocation178_spill] sm:$0xff] }
 0x5a6   :  { %v6912_v9 = vmax.f32 %v860_v24, %v1645_v45  ;;  %v6926_v45 = vld [vmem:[#allocation6 + $0x70] sm:$0xff] }
 0x5a7   :  { %9150 = vst [vmem:[#allocation325_spill] sm:$0xff] %v6910_v41  ;;  %v3410_v51 = vmul.f32 %v6917_v13, %v6910_v41  ;;  %v3409_v24 = vmul.f32 %v6926_v45, %v6907_v7  ;;  %v6942_v14 = vmax.f32 %v2845_v60, 0.0  ;;  %v6960_v1 = vmax.f32 %v2843_v34, 0.0 }
 0x5a8   :  { %2617 = vrot.lane.b32.xlu1 %v9152_v21, %s4752_s2  ;;  %2691 = vrot.lane.b32.xlu2 %v9153_v0, %s4752_s2  ;;  %9156 = vst [vmem:[#allocation329_spill] sm:$0xff] %v6939_v54  ;;  %v2841_v60 = vmax.f32 %v6645_v2, %v6892_v55  ;;  %v2839_v2 = vmax.f32 %v6637_v32, %v6872_v8  ;;  %v6980_v55 = vld [vmem:[#allocation6 + $0x40] sm:$0xff] }
 0x5a9   :  { %2511 = vrot.lane.b32.xlu0 %v6912_v9, %s4752_s2  ;;  %3683 = vmatpush.msrb.mxu2 %v3410_v51  ;;  %9157 = vst [vmem:[#allocation330_spill] sm:$0xff] %v6942_v14  ;;  %v6952_v51 = vld [vmem:[#allocation6 + $0x58] sm:$0xff]  ;;  %v3405_v50 = vmul.f32 %v6964_v59, %v6942_v14  ;;  %v3403_v14 = vmul.f32 %v6980_v55, %v6960_v1  ;;  %v9169_v8 = vld [vmem:[#allocation128_spill] sm:$0xff] }
 0x5aa   :  { %v3406_v63 = vmul.f32 %v6952_v51, %v6939_v54  ;;  %9161 = vst [vmem:[#allocation77_spill] sm:$0xff] %v6960_v1  ;;  %v6990_v54 = vmax.f32 %v2840_v26, 0.0  ;;  %v7004_v26 = vmax.f32 %v2839_v2, 0.0  ;;  %v2835_v2 = vmax.f32 %v6585_v46, %v6876_v3  ;;  %v9179_v1 = vld [vmem:[#allocation240_spill] sm:$0xff]  ;;  %v9184_v3 = vld [vmem:[#allocation78_spill] sm:$0xff] }
 0x5ab   :  { %3684 = vmatpush.msrb.mxu2 %v3409_v24  ;;  %v9162_v24 = vld [vmem:[#allocation131_spill] sm:$0xff] }
 0x5ac   :  { %9168 = vst [vmem:[#allocation237_spill] sm:$0xff] %v6990_v54 }
 0x5ad   :  { %3685 = vmatpush.msrb.mxu2 %v3408_v22  ;;  %v6972_v22 = vmax.f32 %v2842_v38, 0.0  ;;  %v6988_v38 = vmax.f32 %v9166_v18, %v9165_v31  ;;  %9170 = vst [vmem:[#allocation334_spill] sm:$0xff] %v7004_v26  ;;  %v7014_v31 = vld [vmem:[#allocation6 + $0x28] sm:$0xff] }
 0x5ae   :  { %v3400_v18 = vmul.f32 %v7014_v31, %v6990_v54  ;;  %v7032_v54 = vmax.f32 %v9180_v62, %v9179_v1  ;;  %v7050_v1 = vmax.f32 %v2835_v2, 0.0  ;;  %v9194_v2 = vld [vmem:[#allocation25_spill] sm:$0xff] }
 0x5af   :  { %3686 = vmatpush.msrb.mxu2 %v3407_v19  ;;  %9163 = vst [vmem:[#allocation332_spill] sm:$0xff] %v6972_v22  ;;  %v6974_v19 = vld [vmem:[#allocation6 + $0x48] sm:$0xff] }
 0x5b0   :  { %2581 = vrot.lane.b32.xlu1 %v9159_v10, %s4752_s2  ;;  %2655 = vrot.lane.b32.xlu2 %v9160_v15, %s4752_s2  ;;  %v3404_v34 = vmul.f32 %v6974_v19, %v6950_v30  ;;  %9167 = vst [vmem:[#allocation238_spill] sm:$0xff] %v6988_v38  ;;  %v6994_v30 = vld [vmem:[#allocation6 + $0x38] sm:$0xff] }
 0x5b1   :  { %2619 = vrot.lane.b32.xlu0 %v9162_v24, %s4752_s2  ;;  %3687 = vmatpush.msrb.mxu2 %v3406_v63  ;;  %v6984_v63 = vmax.f32 %v2841_v60, 0.0  ;;  %v3402_v32 = vmul.f32 %v6994_v30, %v6972_v22  ;;  %v2837_v60 = vmax.f32 %v6629_v6, %v6868_v25  ;;  %9188 = vst [vmem:[#allocation239_spill] sm:$0xff] %v7050_v1  ;;  %v9213_v24 = vld [vmem:[#allocation20_spill] sm:$0xff] }
 0x5b3   :  { %3688 = vmatpush.msrb.mxu2 %v3405_v50  ;;  %9164 = vst [vmem:[#allocation333_spill] sm:$0xff] %v6984_v63  ;;  %v2838_v50 = vmax.f32 %v6633_v52, %v6886_v35  ;;  %v9172_v35 = vld [vmem:[#allocation80_spill] sm:$0xff]  ;;  %v7020_v25 = vmax.f32 %v2837_v60, 0.0  ;;  %v7036_v60 = vld [vmem:[#allocation6 + $0x18] sm:$0xff] }
 0x5b4   :  { %9173 = vst [vmem:[#allocation80_spill] sm:$0xff] %v7014_v31 }
 0x5b5   :  { %3689 = vmatpush.msrb.mxu2 %v3404_v34  ;;  %v7006_v34 = vld [vmem:[#allocation6 + $0x30] sm:$0xff]  ;;  %v7018_v6 = vmax.f32 %v2838_v50, 0.0  ;;  %9175 = vst [vmem:[#allocation337_spill] sm:$0xff] %v7020_v25 }
 0x5b6   :  { %9171 = vst [vmem:[#allocation335_spill] sm:$0xff] %v7006_v34  ;;  %v3401_v52 = vmul.f32 %v7006_v34, %v6984_v63  ;;  %v7024_v63 = vld [vmem:[#allocation6 + $0x20] sm:$0xff] }
 0x5b7   :  { %3690 = vmatpush.msrb.mxu2 %v3403_v14  ;;  %v2836_v14 = vmax.f32 %v6613_v17, %v6864_v5  ;;  %9174 = vst [vmem:[#allocation336_spill] sm:$0xff] %v7018_v6  ;;  %v9177_v17 = vld [vmem:[#allocation81_spill] sm:$0xff]  ;;  %v9178_v5 = vld [vmem:[#allocation28_spill] sm:$0xff]  ;;  %v3398_v46 = vmul.f32 %v7036_v60, %v7018_v6 }
 0x5b8   :  { %2687 = vrot.lane.b32.xlu1 %v6988_v38, %s4752_s2  ;;  %2615 = vrot.lane.b32.xlu2 %v9169_v8, %s4752_s2  ;;  %9176 = vst [vmem:[#allocation338_spill] sm:$0xff] %v7024_v63  ;;  %v2882_v22 = vmax.f32 %v9178_v5, %v9177_v17  ;;  %v9187_v17 = vld [vmem:[#allocation74_spill] sm:$0xff]  ;;  %v7058_v6 = vld [vmem:[#allocation6 + $0x8] sm:$0xff]  ;;  %v7066_v38 = vld [vmem:[#allocation6] sm:$0xff] }
 0x5b9   :  { %2583 = vrot.lane.b32.xlu0 %v9172_v35, %s4752_s2  ;;  %3691 = vmatpush.msrb.mxu2 %v3402_v32  ;;  %v3399_v32 = vmul.f32 %v7024_v63, %v7004_v26  ;;  %9181 = vst [vmem:[#allocation81_spill] sm:$0xff] %v7032_v54  ;;  %v7034_v50 = vmax.f32 %v2836_v14, 0.0  ;;  %v7046_v5 = vld [vmem:[#allocation6 + $0x10] sm:$0xff] }
 0x5ba   :  { %9183 = vst [vmem:[#allocation240_spill] sm:$0xff] %v7036_v60  ;;  %v3397_v62 = vmul.f32 %v7046_v5, %v7020_v25  ;;  %v7054_v14 = vmax.f32 %v2882_v22, 0.0  ;;  %v9193_v25 = vld [vmem:[#allocation70_spill] sm:$0xff]  ;;  %v3395_v22 = vmul.f32 %v7066_v38, %v7050_v1 }
 0x5bb   :  { %3692 = vmatpush.msrb.mxu2 %v3401_v52  ;;  %9182 = vst [vmem:[#allocation28_spill] sm:$0xff] %v7034_v50  ;;  %v9185_v52 = vld [vmem:[#allocation27_spill] sm:$0xff]  ;;  %v3396_v26 = vmul.f32 %v7058_v6, %v7034_v50  ;;  %v2879_v41 = vmax.f32 %v9194_v2, %v9193_v25  ;;  %v9201_v25 = vld [vmem:[#allocation49_spill] sm:$0xff] }
 0x5bc   :  { %v2881_v61 = vmax.f32 %v9185_v52, %v9184_v3  ;;  %9189 = vst [vmem:[#allocation78_spill] sm:$0xff] %v7054_v14  ;;  %v9191_v3 = vld [vmem:[#allocation26_spill] sm:$0xff]  ;;  %v9202_v2 = vld [vmem:[#allocation23_spill] sm:$0xff] }
 0x5bd   :  { %3693 = vmatpush.msrb.mxu2 %v3400_v18  ;;  %v9186_v18 = vld [vmem:[#allocation175_spill] sm:$0xff]  ;;  %v2877_v8 = vmax.f32 %v9202_v2, %v9201_v25  ;;  %v7082_v21 = vmax.f32 %v2879_v41, 0.0  ;;  %v9209_v2 = vld [vmem:[#allocation46_spill] sm:$0xff] }
 0x5be   :  { %v7062_v7 = vmax.f32 %v2881_v61, 0.0  ;;  %v9199_v61 = vld [vmem:[#allocation234_spill] sm:$0xff]  ;;  %v3226_v25 = vld [vmem:[#allocation7 + $0x38] sm:$0xff] }
 0x5bf   :  { %3694 = vmatpush.msrb.mxu2 %v3399_v32  ;;  %v9190_v32 = vld [vmem:[#allocation54_spill] sm:$0xff]  ;;  %9203 = vst [vmem:[#allocation26_spill] sm:$0xff] %v7082_v21  ;;  %v7100_v1 = vmax.f32 %v2877_v8, 0.0  ;;  %3679 = vmatmul.f32.vlgmr.msra.gmra.mxu3 %v3226_v25  ;;  %v9218_v8 = vld [vmem:[#allocation232_spill] sm:$0xff]  ;;  %v9222_v25 = vld [vmem:[#allocation47_spill] sm:$0xff] }
 0x5c0   :  { %2651 = vrot.lane.b32.xlu1 %v9186_v18, %s4752_s2  ;;  %2579 = vrot.lane.b32.xlu2 %v9187_v17, %s4752_s2  ;;  %v2880_v52 = vmax.f32 %v9191_v3, %v9190_v32  ;;  %9192 = vst [vmem:[#allocation27_spill] sm:$0xff] %v7062_v7  ;;  %v3442_v3 = vmul.f32 %v6917_v13, %v7054_v14 }
 0x5c1   :  { %2689 = vrot.lane.b32.xlu0 %v7032_v54, %s4752_s2  ;;  %3695 = vmatpush.msrb.mxu2 %v3398_v46  ;;  %v9195_v46 = vld [vmem:[#allocation51_spill] sm:$0xff]  ;;  %v9196_v54 = vld [vmem:[#allocation24_spill] sm:$0xff]  ;;  %9211 = vst [vmem:[#allocation25_spill] sm:$0xff] %v7100_v1 }
 0x5c2   :  { %v2878_v32 = vmax.f32 %v9196_v54, %v9195_v46  ;;  %v7074_v0 = vmax.f32 %v2880_v52, 0.0  ;;  %v3441_v54 = vmul.f32 %v6926_v45, %v7062_v7  ;;  %v3227_v46 = vld [vmem:[#allocation7 + $0x40] sm:$0xff]  ;;  %v9205_v52 = vld [vmem:[#allocation177_spill] sm:$0xff] }
 0x5c3   :  { %3696 = vmatpush.msrb.mxu2 %v3397_v62  ;;  %v9198_v62 = vld [vmem:[#allocation235_spill] sm:$0xff]  ;;  %v9210_v7 = vld [vmem:[#allocation21_spill] sm:$0xff] }
 0x5c4   :  { %9197 = vst [vmem:[#allocation74_spill] sm:$0xff] %v7074_v0  ;;  %v7078_v50 = vmax.f32 %v9199_v61, %v9198_v62  ;;  %v9207_v62 = vld [vmem:[#allocation52_spill] sm:$0xff]  ;;  %v9208_v61 = vld [vmem:[#allocation22_spill] sm:$0xff]  ;;  %v2875_v14 = vmax.f32 %v9210_v7, %v9209_v2 }
 0x5c5   :  { %3697 = vmatpush.msrb.mxu2 %v3396_v26  ;;  %v9204_v26 = vld [vmem:[#allocation173_spill] sm:$0xff]  ;;  %v2876_v41 = vmax.f32 %v9208_v61, %v9207_v62  ;;  %v9216_v61 = vld [vmem:[#allocation228_spill] sm:$0xff] }
 0x5c6   :  { %9200 = vst [vmem:[#allocation54_spill] sm:$0xff] %v7078_v50  ;;  %v7118_v2 = vmax.f32 %v2875_v14, 0.0 }
 0x5c7   :  { %3698 = vmatpush.msrb.mxu2 %v3395_v22  ;;  %v7092_v22 = vmax.f32 %v2878_v32, 0.0  ;;  %v9212_v32 = vld [vmem:[#allocation43_spill] sm:$0xff]  ;;  %v7106_v62 = vmax.f32 %v2876_v41, 0.0  ;;  %v9225_v41 = vld [vmem:[#allocation42_spill] sm:$0xff] }
 0x5c8   :  { %2649 = vrot.lane.b32.xlu1 %v9204_v26, %s4752_s2  ;;  %2685 = vrot.lane.b32.xlu2 %v7078_v50, %s4752_s2  ;;  %v3439_v50 = vmul.f32 %v6944_v58, %v7082_v21  ;;  %v2874_v26 = vmax.f32 %v9213_v24, %v9212_v32  ;;  %9221 = vst [vmem:[#allocation234_spill] sm:$0xff] %v7118_v2  ;;  %v9223_v21 = vld [vmem:[#allocation19_spill] sm:$0xff]  ;;  %v9226_v32 = vld [vmem:[#allocation18_spill] sm:$0xff] }
 0x5c9   :  { %3723 = vmatpush.msra.mxu2 %v3442_v3  ;;  %2653 = vrot.lane.b32.xlu0 %v9205_v52, %s4752_s2  ;;  %9206 = vst [vmem:[#allocation70_spill] sm:$0xff] %v7092_v22  ;;  %v3440_v3 = vmul.f32 %v6935_v49, %v7074_v0  ;;  %v3438_v7 = vmul.f32 %v6952_v51, %v7092_v22  ;;  %v9232_v22 = vld [vmem:[#allocation36_spill] sm:$0xff]  ;;  %v9268_v52 = vld [vmem:[#allocation227_spill] sm:$0xff] }
 0x5ca   :  { %3699 = vmatmul.f32.vlgmr.msrb.gmra.mxu2 %v3227_v46  ;;  %9214 = vst [vmem:[#allocation51_spill] sm:$0xff] %v7106_v62  ;;  %v9219_v46 = vld [vmem:[#allocation230_spill] sm:$0xff]  ;;  %v2873_v18 = vmax.f32 %v9223_v21, %v9222_v25  ;;  %v3437_v24 = vmul.f32 %v6964_v59, %v7100_v1  ;;  %v2872_v14 = vmax.f32 %v9226_v32, %v9225_v41  ;;  %v9234_v32 = vld [vmem:[#allocation33_spill] sm:$0xff] }
 0x5cb   :  { %3724 = vmatpush.msra.mxu2 %v3441_v54  ;;  %v9215_v54 = vld [vmem:[#allocation229_spill] sm:$0xff]  ;;  %v3436_v21 = vmul.f32 %v6974_v19, %v7106_v62  ;;  %v3435_v25 = vmul.f32 %v6980_v55, %v7118_v2  ;;  %v9235_v62 = vld [vmem:[#allocation15_spill] sm:$0xff] }
 0x5cc   :  { %v7110_v0 = vmax.f32 %v9216_v61, %v9215_v54  ;;  %v7132_v54 = vmax.f32 %v2874_v26, 0.0  ;;  %v9228_v61 = vld [vmem:[#allocation38_spill] sm:$0xff]  ;;  %v7142_v1 = vmax.f32 %v2872_v14, 0.0 }
 0x5cd   :  { %3725 = vmatpush.msra.mxu2 %v3440_v3  ;;  %v7116_v3 = vmax.f32 %v9219_v46, %v9218_v8  ;;  %v7138_v46 = vmax.f32 %v2873_v18, 0.0 }
 0x5ce   :  { %9217 = vst [vmem:[#allocation24_spill] sm:$0xff] %v7110_v0  ;;  %v3434_v26 = vmul.f32 %v6994_v30, %v7132_v54 }
 0x5cf   :  { %3726 = vmatpush.msra.mxu2 %v3439_v50  ;;  %9220 = vst [vmem:[#allocation235_spill] sm:$0xff] %v7116_v3  ;;  %v9224_v50 = vld [vmem:[#allocation126_spill] sm:$0xff]  ;;  %v3433_v14 = vmul.f32 %v7006_v34, %v7138_v46 }
 0x5d0   :  { %2681 = vrot.lane.b32.xlu1 %v7110_v0, %s4752_s2  ;;  %2683 = vrot.lane.b32.xlu2 %v7116_v3, %s4752_s2  ;;  %9227 = vst [vmem:[#allocation49_spill] sm:$0xff] %v7132_v54  ;;  %v9233_v0 = vld [vmem:[#allocation16_spill] sm:$0xff] }
 0x5d1   :  { %3727 = vmatpush.msra.mxu2 %v3438_v7  ;;  %2613 = vrot.lane.b32.xlu0 %v9224_v50, %s4752_s2  ;;  %v9229_v7 = vld [vmem:[#allocation17_spill] sm:$0xff]  ;;  %9230 = vst [vmem:[#allocation23_spill] sm:$0xff] %v7138_v46  ;;  %v2870_v41 = vmax.f32 %v9233_v0, %v9232_v22  ;;  %v9238_v0 = vld [vmem:[#allocation170_spill] sm:$0xff]  ;;  %v9239_v22 = vld [vmem:[#allocation124_spill] sm:$0xff] }
 0x5d2   :  { %v2871_v8 = vmax.f32 %v9229_v7, %v9228_v61  ;;  %9231 = vst [vmem:[#allocation52_spill] sm:$0xff] %v7142_v1  ;;  %v2869_v61 = vmax.f32 %v9235_v62, %v9234_v32  ;;  %v9240_v7 = vld [vmem:[#allocation39_spill] sm:$0xff]  ;;  %v3432_v62 = vmul.f32 %v7014_v31, %v7142_v1  ;;  %v9251_v1 = vld [vmem:[#allocation225_spill] sm:$0xff] }
 0x5d3   :  { %3728 = vmatpush.msra.mxu2 %v3437_v24  ;;  %v7148_v24 = vpop.permute.xlu2 %2483  ;;  %v7164_v2 = vmax.f32 %v2870_v41, 0.0  ;;  %v9246_v50 = vld [vmem:[#allocation171_spill] sm:$0xff] }
 0x5d4   :  { %v7152_v18 = vmax.f32 %v2871_v8, 0.0  ;;  %v9243_v8 = vld [vmem:[#allocation34_spill] sm:$0xff]  ;;  %v7170_v3 = vmax.f32 %v2869_v61, 0.0 }
 0x5d5   :  { %3729 = vmatpush.msra.mxu2 %v3436_v21  ;;  %v9237_v21 = vld [vmem:[#allocation169_spill] sm:$0xff]  ;;  %9242 = vst [vmem:[#allocation46_spill] sm:$0xff] %v7164_v2  ;;  %v3430_v41 = vmul.f32 %v7036_v60, %v7164_v2 }
 0x5d6   :  { %9236 = vst [vmem:[#allocation22_spill] sm:$0xff] %v7152_v18  ;;  %v3431_v46 = vmul.f32 %v7024_v63, %v7152_v18 }
 0x5d7   :  { %3730 = vmatpush.msra.mxu2 %v3435_v25  ;;  %v9241_v25 = vld [vmem:[#allocation14_spill] sm:$0xff]  ;;  %9245 = vst [vmem:[#allocation21_spill] sm:$0xff] %v7170_v3 }
 0x5d8   :  { %2643 = vrot.lane.b32.xlu1 %v9237_v21, %s4752_s2  ;;  %2645 = vrot.lane.b32.xlu2 %v9238_v0, %s4752_s2  ;;  %v2868_v54 = vmax.f32 %v9241_v25, %v9240_v7  ;;  %v9250_v7 = vld [vmem:[#allocation114_spill] sm:$0xff] }
 0x5d9   :  { %3731 = vmatpush.msra.mxu2 %v3434_v26  ;;  %2611 = vrot.lane.b32.xlu0 %v9239_v22, %s4752_s2  ;;  %v9244_v26 = vld [vmem:[#allocation13_spill] sm:$0xff]  ;;  %v9247_v22 = vld [vmem:[#allocation120_spill] sm:$0xff] }
 0x5da   :  { %v2867_v32 = vmax.f32 %v9244_v26, %v9243_v8  ;;  %v2914_v21 = vmax.f32 %v9247_v22, %v9246_v50  ;;  %v7176_v0 = vmax.f32 %v2868_v54, 0.0  ;;  %v9252_v8 = vld [vmem:[#allocation224_spill] sm:$0xff]  ;;  %v3429_v26 = vmul.f32 %v7046_v5, %v7170_v3  ;;  %v9256_v54 = vld [vmem:[#allocation174_spill] sm:$0xff] }
 0x5db   :  { %3732 = vmatpush.msra.mxu2 %v3433_v14  ;;  %v9249_v14 = vld [vmem:[#allocation168_spill] sm:$0xff]  ;;  %v7184_v61 = vmax.f32 %v9252_v8, %v9251_v1  ;;  %v7194_v18 = vpop.permute.xlu2 %2485 }
 0x5dc   :  { %9248 = vst [vmem:[#allocation43_spill] sm:$0xff] %v7176_v0  ;;  %v2913_v25 = vmax.f32 %v9250_v7, %v9249_v14  ;;  %v7190_v50 = vmax.f32 %v2914_v21, 0.0  ;;  %v9258_v14 = vld [vmem:[#allocation172_spill] sm:$0xff]  ;;  %v3428_v1 = vmul.f32 %v7058_v6, %v7176_v0  ;;  %v9261_v21 = vld [vmem:[#allocation103_spill] sm:$0xff]  ;;  %v9266_v0 = vld [vmem:[#allocation98_spill] sm:$0xff] }
 0x5dd   :  { %3733 = vmatpush.msra.mxu2 %v3432_v62  ;;  %9253 = vst [vmem:[#allocation20_spill] sm:$0xff] %v7184_v61  ;;  %v7186_v62 = vmax.f32 %v2867_v32, 0.0 }
 0x5de   :  { %9255 = vst [vmem:[#allocation228_spill] sm:$0xff] %v7190_v50  ;;  %v7202_v32 = vmax.f32 %v2913_v25, 0.0  ;;  %v3474_v2 = vmul.f32 %v6917_v13, %v7190_v50 }
 0x5df   :  { %3734 = vmatpush.msra.mxu2 %v3431_v46  ;;  %9254 = vst [vmem:[#allocation229_spill] sm:$0xff] %v7186_v62  ;;  %v9257_v46 = vld [vmem:[#allocation109_spill] sm:$0xff]  ;;  %v3427_v8 = vmul.f32 %v7066_v38, %v7186_v62 }
 0x5e0   :  { %v2912_v22 = vmax.f32 %v9257_v46, %v9256_v54  ;;  %2677 = vrot.lane.b32.xlu2 %v7184_v61, %s4752_s2  ;;  %9259 = vst [vmem:[#allocation232_spill] sm:$0xff] %v7202_v32  ;;  %v9262_v54 = vld [vmem:[#allocation145_spill] sm:$0xff]  ;;  %v9263_v46 = vld [vmem:[#allocation102_spill] sm:$0xff] }
 0x5e1   :  { %3735 = vmatpush.msra.mxu2 %v3430_v41  ;;  %2647 = vrot.lane.b32.xlu0 %v9258_v14, %s4752_s2  ;;  %v9260_v41 = vld [vmem:[#allocation147_spill] sm:$0xff]  ;;  %v2910_v3 = vmax.f32 %v9263_v46, %v9262_v54  ;;  %v9271_v54 = vld [vmem:[#allocation136_spill] sm:$0xff]  ;;  %v9272_v46 = vld [vmem:[#allocation97_spill] sm:$0xff] }
 0x5e2   :  { %v2911_v7 = vmax.f32 %v9261_v21, %v9260_v41  ;;  %v7212_v61 = vmax.f32 %v2912_v22, 0.0  ;;  %v9269_v41 = vld [vmem:[#allocation226_spill] sm:$0xff]  ;;  %v3473_v21 = vmul.f32 %v6926_v45, %v7202_v32  ;;  %v2908_v62 = vmax.f32 %v9272_v46, %v9271_v54  ;;  %v9278_v54 = vld [vmem:[#allocation137_spill] sm:$0xff]  ;;  %v9279_v46 = vld [vmem:[#allocation92_spill] sm:$0xff] }
 0x5e3   :  { %3736 = vmatpush.msra.mxu2 %v3429_v26  ;;  %v9265_v26 = vld [vmem:[#allocation141_spill] sm:$0xff]  ;;  %v7226_v50 = vmax.f32 %v2910_v3, 0.0  ;;  %v7228_v22 = vpop.permute.xlu2 %2491  ;;  %v2906_v32 = vmax.f32 %v9279_v46, %v9278_v54 }
 0x5e4   :  { %9264 = vst [vmem:[#allocation230_spill] sm:$0xff] %v7212_v61  ;;  %v2909_v25 = vmax.f32 %v9266_v0, %v9265_v26  ;;  %v7216_v14 = vmax.f32 %v2911_v7, 0.0  ;;  %v3472_v0 = vmul.f32 %v6935_v49, %v7212_v61  ;;  %v9275_v7 = vld [vmem:[#allocation93_spill] sm:$0xff]  ;;  %v9280_v61 = vld [vmem:[#allocation132_spill] sm:$0xff] }
 0x5e5   :  { %3737 = vmatpush.msra.mxu2 %v3428_v1  ;;  %v7220_v1 = vmax.f32 %v9269_v41, %v9268_v52  ;;  %9273 = vst [vmem:[#allocation42_spill] sm:$0xff] %v7226_v50  ;;  %v7234_v52 = vpop.permute.xlu1 %2487  ;;  %v7242_v41 = vmax.f32 %v2908_v62, 0.0 }
 0x5e6   :  { %9267 = vst [vmem:[#allocation47_spill] sm:$0xff] %v7216_v14  ;;  %v7238_v26 = vmax.f32 %v2909_v25, 0.0  ;;  %v3471_v3 = vmul.f32 %v6944_v58, %v7216_v14  ;;  %v9283_v25 = vld [vmem:[#allocation219_spill] sm:$0xff]  ;;  %v9287_v14 = vld [vmem:[#allocation88_spill] sm:$0xff] }
 0x5e7   :  { %3738 = vmatpush.msra.mxu2 %v3427_v8  ;;  %9270 = vst [vmem:[#allocation19_spill] sm:$0xff] %v7220_v1 }
 0x5e8   :  { %9276 = vst [vmem:[#allocation18_spill] sm:$0xff] %v7238_v26  ;;  %v3469_v62 = vmul.f32 %v6964_v59, %v7238_v26 }
 0x5e9   :  { %3763 = vmatpush.msrb.mxu2 %v3474_v2  ;;  %2679 = vrot.lane.b32.xlu0 %v7220_v1, %s4752_s2  ;;  %v9274_v2 = vld [vmem:[#allocation142_spill] sm:$0xff]  ;;  %9277 = vst [vmem:[#allocation38_spill] sm:$0xff] %v7242_v41 }
 0x5ea   :  { %v2907_v8 = vmax.f32 %v9275_v7, %v9274_v2  ;;  %v9281_v1 = vld [vmem:[#allocation90_spill] sm:$0xff]  ;;  %v9284_v2 = vld [vmem:[#allocation216_spill] sm:$0xff] }
 0x5eb   :  { %3764 = vmatpush.msrb.mxu2 %v3473_v21  ;;  %v3470_v21 = vmul.f32 %v6952_v51, %v7226_v50  ;;  %v2905_v15 = vmax.f32 %v9281_v1, %v9280_v61  ;;  %v9286_v7 = vld [vmem:[#allocation138_spill] sm:$0xff]  ;;  %v7262_v46 = vpop.permute.xlu2 %2497  ;;  %v3468_v61 = vmul.f32 %v6974_v19, %v7242_v41 }
 0x5ec   :  { %v7250_v49 = vmax.f32 %v2907_v8, 0.0  ;;  %v2904_v54 = vmax.f32 %v9287_v14, %v9286_v7  ;;  %v9293_v7 = vld [vmem:[#allocation83_spill] sm:$0xff] }
 0x5ed   :  { %3765 = vmatpush.msrb.mxu2 %v3472_v0  ;;  %v7254_v0 = vmax.f32 %v9284_v2, %v9283_v25  ;;  %v7268_v1 = vpop.permute.xlu1 %2493  ;;  %v7270_v8 = vmax.f32 %v2905_v15, 0.0  ;;  %v9291_v25 = vld [vmem:[#allocation86_spill] sm:$0xff] }
 0x5ee   :  { %9282 = vst [vmem:[#allocation17_spill] sm:$0xff] %v7250_v49  ;;  %v3467_v14 = vmul.f32 %v6980_v55, %v7250_v49  ;;  %v7278_v50 = vmax.f32 %v2904_v54, 0.0  ;;  %v3229_v49 = vld [vmem:[#allocation7 + $0x50] sm:$0xff] }
 0x5ef   :  { %3766 = vmatpush.msrb.mxu2 %v3471_v3  ;;  %9285 = vst [vmem:[#allocation36_spill] sm:$0xff] %v7254_v0  ;;  %v7260_v3 = vmax.f32 %v2906_v32, 0.0  ;;  %v9292_v32 = vld [vmem:[#allocation127_spill] sm:$0xff]  ;;  %v3465_v15 = vmul.f32 %v7006_v34, %v7270_v8 }
 0x5f0   :  { %9289 = vst [vmem:[#allocation33_spill] sm:$0xff] %v7270_v8  ;;  %v2902_v26 = vmax.f32 %v9293_v7, %v9292_v32  ;;  %3739 = vmatmul.f32.vlgmr.msra.gmra.mxu2 %v3229_v49 }
 0x5f1   :  { %3767 = vmatpush.msrb.mxu2 %v3470_v21  ;;  %9288 = vst [vmem:[#allocation16_spill] sm:$0xff] %v7260_v3  ;;  %2675 = vrot.lane.b32.xlu0 %v7254_v0, %s4752_s2  ;;  %v9290_v21 = vld [vmem:[#allocation133_spill] sm:$0xff] }
 0x5f2   :  { %v2903_v2 = vmax.f32 %v9291_v25, %v9290_v21  ;;  %9294 = vst [vmem:[#allocation15_spill] sm:$0xff] %v7278_v50  ;;  %v7286_v21 = vmax.f32 %v2902_v26, 0.0  ;;  %v3464_v25 = vmul.f32 %v7014_v31, %v7278_v50 }
 0x5f3   :  { %3768 = vmatpush.msrb.mxu2 %v3469_v62  ;;  %v3466_v62 = vmul.f32 %v6994_v30, %v7260_v3 }
 0x5f4   :  { %v7282_v41 = vmax.f32 %v2903_v2, 0.0  ;;  %9296 = vst [vmem:[#allocation14_spill] sm:$0xff] %v7286_v21  ;;  %v3462_v2 = vmul.f32 %v7036_v60, %v7286_v21 }
 0x5f5   :  { %3769 = vmatpush.msrb.mxu2 %v3468_v61  ;;  %v2504_v61 = vpop.permute.xlu2 %2503  ;;  %v2500_v32 = vpop.permute.xlu1 %2499 }
 0x5f6   :  { %9295 = vst [vmem:[#allocation39_spill] sm:$0xff] %v7282_v41  ;;  %v3463_v54 = vmul.f32 %v7024_v63, %v7282_v41  ;;  %v2861_v34 = vmax.f32 %v6880_v53, %v2504_v61  ;;  %v2859_v53 = vmax.f32 %v6862_v42, %v2500_v32 }
 0x5f7   :  { %3770 = vmatpush.msrb.mxu2 %v3467_v14 }
 0x5f9   :  { %3771 = vmatpush.msrb.mxu2 %v3466_v62  ;;  %v7294_v62 = vpop.permute.xlu0 %2489 }
 0x5fb   :  { %3772 = vmatpush.msrb.mxu2 %v3465_v15 }
 0x5fd   :  { %3773 = vmatpush.msrb.mxu2 %v3464_v25  ;;  %v2510_v14 = vpop.permute.xlu2 %2509 }
 0x5ff   :  { %3774 = vmatpush.msrb.mxu2 %v3463_v54  ;;  %v2864_v54 = vmax.f32 %v6898_v39, %v2510_v14 }
 0x601   :  { %3775 = vmatpush.msrb.mxu2 %v3462_v2  ;;  %v2496_v8 = vpop.permute.xlu0 %2495  ;;  %v7307_v60 = vmax.f32 %v2864_v54, 0.0 }
 0x602   :  { %v2506_v7 = vpop.permute.xlu1 %2505 }
 0x605   :  { %v7296_v15 = vpop.permute.xlu2 %2691 }
 0x606   :  { %9297 = vst [vmem:[#allocation34_spill] sm:$0xff] %v7296_v15  ;;  %v2862_v15 = vmax.f32 %v6888_v16, %v2506_v7  ;;  %v7326_v7 = vmax.f32 %v2861_v34, 0.0 }
 0x608   :  { %v3421_v34 = vmul.f32 %v6750_v43, %v7326_v7  ;;  %v2855_v43 = vmax.f32 %v6846_v12, %v7228_v22 }
 0x609   :  { %v2502_v50 = vpop.permute.xlu0 %2501 }
 0x60a   :  { %v2508_v26 = vpop.permute.xlu1 %2507  ;;  %v2860_v14 = vmax.f32 %v6870_v37, %v2502_v50  ;;  %v2858_v37 = vmax.f32 %v6858_v29, %v7262_v46  ;;  %v2856_v29 = vmax.f32 %v6850_v28, %v7268_v1  ;;  %v9300_v1 = vld [vmem:[#allocation210_spill] sm:$0xff] }
 0x60b   :  { %v2863_v21 = vmax.f32 %v6894_v33, %v2508_v26  ;;  %v3424_v33 = vmul.f32 %v6722_v4, %v7307_v60  ;;  %v2857_v26 = vmax.f32 %v6854_v57, %v2496_v8 }
 0x60c   :  { %v7333_v50 = vmax.f32 %v2860_v14, 0.0  ;;  %v7365_v22 = vmax.f32 %v2856_v29, 0.0  ;;  %v9313_v29 = vld [vmem:[#allocation279_spill] sm:$0xff] }
 0x60d   :  { %v7300_v25 = vpop.permute.xlu2 %2655  ;;  %v7315_v49 = vmax.f32 %v2863_v21, 0.0  ;;  %v7353_v8 = vmax.f32 %v2857_v26, 0.0 }
 0x60e   :  { %v3420_v46 = vmul.f32 %v6760_v48, %v7333_v50  ;;  %v9299_v48 = vld [vmem:[#allocation281_spill] sm:$0xff]  ;;  %9301 = vst [vmem:[#allocation171_spill] sm:$0xff] %v7365_v22 }
 0x60f   :  { %v3423_v21 = vmul.f32 %v6732_v47, %v7315_v49  ;;  %v7342_v47 = vmax.f32 %v2858_v37, 0.0  ;;  %9298 = vst [vmem:[#allocation13_spill] sm:$0xff] %v7353_v8  ;;  %v9309_v37 = vld [vmem:[#allocation197_spill] sm:$0xff] }
 0x611   :  { %v3418_v12 = vmul.f32 %v6776_v36, %v7342_v47 }
 0x612   :  { %v7298_v3 = vpop.permute.xlu1 %2657 }
 0x615   :  { %v7312_v31 = vpop.permute.xlu2 %2615 }
 0x61a   :  { %v7303_v41 = vpop.permute.xlu1 %2617 }
 0x61b   :  { %v2512_v2 = vpop.permute.xlu0 %2511 }
 0x61c   :  { %v2865_v0 = vmax.f32 %v6912_v9, %v2512_v2  ;;  %v7322_v9 = vmax.f32 %v2862_v15, 0.0  ;;  %v7340_v15 = vmax.f32 %v2859_v53, 0.0  ;;  %v2853_v53 = vmax.f32 %v6838_v27, %v7234_v52  ;;  %v9312_v27 = vld [vmem:[#allocation317_spill] sm:$0xff] }
 0x61d   :  { %v2580_v42 = vpop.permute.xlu2 %2579  ;;  %v3416_v52 = vmul.f32 %v9312_v27, %v7365_v22  ;;  %v9327_v27 = vld [vmem:[#allocation188_spill] sm:$0xff] }
 0x61e   :  { %v7310_v63 = vmax.f32 %v2865_v0, 0.0  ;;  %v3422_v61 = vmul.f32 %v6742_v44, %v7322_v9  ;;  %v3419_v54 = vmul.f32 %v6768_v20, %v7340_v15  ;;  %v2899_v2 = vmax.f32 %v9187_v17, %v2580_v42  ;;  %v9304_v20 = vld [vmem:[#allocation280_spill] sm:$0xff]  ;;  %v9305_v17 = vld [vmem:[#allocation202_spill] sm:$0xff] }
 0x620   :  { %v3425_v39 = vmul.f32 %v6717_v40, %v7310_v63 }
 0x622   :  { %3704 = vmatpush.msrb.mxu3 %v3425_v39  ;;  %v2582_v16 = vpop.permute.xlu1 %2581  ;;  %v2854_v39 = vmax.f32 %v6842_v11, %v7294_v62  ;;  %v3417_v11 = vmul.f32 %v6788_v23, %v7353_v8  ;;  %v7379_v62 = vmax.f32 %v2899_v2, 0.0  ;;  %v9317_v2 = vld [vmem:[#allocation222_spill] sm:$0xff] }
 0x623   :  { %v7324_v0 = vpop.permute.xlu0 %2619  ;;  %v2900_v44 = vmax.f32 %v9159_v10, %v2582_v16  ;;  %v2946_v10 = vmax.f32 %v9300_v1, %v9299_v48  ;;  %v7373_v16 = vmax.f32 %v2855_v43, 0.0  ;;  %v7407_v48 = vmax.f32 %v2853_v53, 0.0  ;;  %v9325_v53 = vld [vmem:[#allocation12_spill] sm:$0xff] }
 0x624   :  { %3705 = vmatpush.msrb.mxu3 %v3424_v33  ;;  %9307 = vst [vmem:[#allocation225_spill] sm:$0xff] %v7379_v62  ;;  %v7389_v42 = vmax.f32 %v2854_v39, 0.0  ;;  %v3459_v1 = vmul.f32 %v7066_v38, %v7379_v62  ;;  %v9320_v39 = vld [vmem:[#allocation190_spill] sm:$0xff] }
 0x625   :  { %v7367_v14 = vmax.f32 %v2900_v44, 0.0  ;;  %9306 = vst [vmem:[#allocation114_spill] sm:$0xff] %v7373_v16  ;;  %v7385_v26 = vmax.f32 %v2946_v10, 0.0  ;;  %v9319_v10 = vld [vmem:[#allocation246_spill] sm:$0xff] }
 0x626   :  { %3706 = vmatpush.msrb.mxu3 %v3423_v21  ;;  %v9308_v21 = vld [vmem:[#allocation249_spill] sm:$0xff]  ;;  %9311 = vst [vmem:[#allocation174_spill] sm:$0xff] %v7389_v42 }
 0x627   :  { %9302 = vst [vmem:[#allocation120_spill] sm:$0xff] %v7367_v14  ;;  %v3460_v23 = vmul.f32 %v7058_v6, %v7367_v14 }
 0x628   :  { %3707 = vmatpush.msrb.mxu3 %v3422_v61  ;;  %v2944_v61 = vmax.f32 %v9309_v37, %v9308_v21  ;;  %9310 = vst [vmem:[#allocation224_spill] sm:$0xff] %v7385_v26  ;;  %v3414_v21 = vmul.f32 %v9325_v53, %v7389_v42  ;;  %v9326_v37 = vld [vmem:[#allocation244_spill] sm:$0xff] }
 0x629   :  { %9318 = vst [vmem:[#allocation147_spill] sm:$0xff] %v7407_v48 }
 0x62a   :  { %3708 = vmatpush.msrb.mxu3 %v3421_v34  ;;  %v7349_v32 = vpop.permute.xlu1 %2687  ;;  %v2852_v34 = vmax.f32 %v6810_v56, %v7194_v18  ;;  %v9316_v56 = vld [vmem:[#allocation313_spill] sm:$0xff] }
 0x62b   :  { %v2584_v57 = vpop.permute.xlu0 %2583  ;;  %v2851_v18 = vmax.f32 %v9316_v56, %v7148_v24  ;;  %v9323_v24 = vld [vmem:[#allocation68_spill] sm:$0xff] }
 0x62c   :  { %v2901_v28 = vmax.f32 %v9172_v35, %v2584_v57  ;;  %3709 = vmatpush.msrb.mxu3 %v3420_v46  ;;  %v2945_v35 = vmax.f32 %v9305_v17, %v9304_v20  ;;  %v9314_v46 = vld [vmem:[#allocation191_spill] sm:$0xff]  ;;  %v7413_v20 = vmax.f32 %v2944_v61, 0.0  ;;  %v3506_v17 = vmul.f32 %v6917_v13, %v7385_v26  ;;  %v9329_v13 = vld [vmem:[#allocation125_spill] sm:$0xff] }
 0x62d   :  { %v2943_v44 = vmax.f32 %v9314_v46, %v9313_v29  ;;  %v9330_v29 = vld [vmem:[#allocation64_spill] sm:$0xff]  ;;  %v7431_v56 = vmax.f32 %v2851_v18, 0.0  ;;  %v9340_v18 = vld [vmem:[#allocation322_spill] sm:$0xff] }
 0x62e   :  { %v7369_v33 = vmax.f32 %v2901_v28, 0.0  ;;  %3710 = vmatpush.msrb.mxu3 %v3419_v54  ;;  %v7397_v43 = vmax.f32 %v2945_v35, 0.0  ;;  %v3415_v28 = vmul.f32 %v9317_v2, %v7373_v16  ;;  %9321 = vst [vmem:[#allocation103_spill] sm:$0xff] %v7413_v20  ;;  %v9322_v35 = vld [vmem:[#allocation130_spill] sm:$0xff]  ;;  %v2897_v46 = vmax.f32 %v9330_v29, %v9329_v13 }
 0x62f   :  { %9331 = vst [vmem:[#allocation141_spill] sm:$0xff] %v7431_v56 }
 0x630   :  { %9303 = vst [vmem:[#allocation168_spill] sm:$0xff] %v7369_v33  ;;  %v3461_v36 = vmul.f32 %v7046_v5, %v7369_v33  ;;  %3711 = vmatpush.msrb.mxu3 %v3418_v12  ;;  %v2942_v12 = vmax.f32 %v9320_v39, %v9319_v10  ;;  %v3505_v61 = vmul.f32 %v6926_v45, %v7397_v43  ;;  %v9337_v45 = vld [vmem:[#allocation117_spill] sm:$0xff] }
 0x631   :  { %9315 = vst [vmem:[#allocation109_spill] sm:$0xff] %v7397_v43  ;;  %v7680_v43 = vld [vmem:[#allocation6 + $0xe8] sm:$0xff] }
 0x632   :  { %3712 = vmatpush.msrb.mxu3 %v3417_v11  ;;  %3776 = vmatpush.msrb.mxu2 %v3461_v36  ;;  %v7399_v57 = vpop.permute.xlu1 %2651  ;;  %v2898_v11 = vmax.f32 %v9323_v24, %v9322_v35  ;;  %v7419_v36 = vmax.f32 %v2852_v34, 0.0  ;;  %v9332_v34 = vld [vmem:[#allocation320_spill] sm:$0xff]  ;;  %v7437_v39 = vmax.f32 %v2942_v12, 0.0 }
 0x633   :  { %v7401_v54 = vpop.permute.xlu0 %2689  ;;  %v3413_v2 = vmul.f32 %v9332_v34, %v7407_v48  ;;  %v7453_v34 = vpop.permute.xlu2 %2685 }
 0x634   :  { %3713 = vmatpush.msrb.mxu3 %v3416_v52  ;;  %3777 = vmatpush.msrb.mxu2 %v3460_v23  ;;  %9324 = vst [vmem:[#allocation145_spill] sm:$0xff] %v7419_v36  ;;  %v2941_v52 = vmax.f32 %v9327_v27, %v9326_v37  ;;  %v7425_v23 = vmax.f32 %v2943_v44, 0.0  ;;  %v9336_v44 = vld [vmem:[#allocation328_spill] sm:$0xff]  ;;  %v7443_v53 = vmax.f32 %v2898_v11, 0.0  ;;  %v3412_v37 = vmul.f32 %v9340_v18, %v7419_v36  ;;  %v9341_v27 = vld [vmem:[#allocation242_spill] sm:$0xff] }
 0x635   :  { %9335 = vst [vmem:[#allocation98_spill] sm:$0xff] %v7437_v39  ;;  %v3504_v35 = vmul.f32 %v9336_v44, %v7413_v20  ;;  %v7457_v44 = vmax.f32 %v2897_v46, 0.0  ;;  %v9352_v46 = vld [vmem:[#allocation53_spill] sm:$0xff] }
 0x636   :  { %3714 = vmatpush.msrb.mxu3 %v3415_v28  ;;  %3778 = vmatpush.msrb.mxu2 %v3459_v1  ;;  %9328 = vst [vmem:[#allocation102_spill] sm:$0xff] %v7425_v23  ;;  %v9333_v28 = vld [vmem:[#allocation247_spill] sm:$0xff]  ;;  %v9334_v1 = vld [vmem:[#allocation185_spill] sm:$0xff]  ;;  %v7449_v29 = vmax.f32 %v2941_v52, 0.0  ;;  %v3503_v12 = vmul.f32 %v6944_v58, %v7425_v23  ;;  %v3502_v52 = vmul.f32 %v6952_v51, %v7437_v39  ;;  %v9349_v58 = vld [vmem:[#allocation180_spill] sm:$0xff] }
 0x637   :  { %v2940_v10 = vmax.f32 %v9334_v1, %v9333_v28  ;;  %9339 = vst [vmem:[#allocation227_spill] sm:$0xff] %v7443_v53  ;;  %v9344_v28 = vld [vmem:[#allocation100_spill] sm:$0xff]  ;;  %v9345_v1 = vld [vmem:[#allocation55_spill] sm:$0xff]  ;;  %v9353_v23 = vld [vmem:[#allocation277_spill] sm:$0xff] }
 0x638   :  { %3803 = vmatpush.msra.mxu2 %v3506_v17  ;;  %3715 = vmatpush.msrb.mxu3 %v3414_v21  ;;  %v9338_v17 = vld [vmem:[#allocation58_spill] sm:$0xff]  ;;  %9343 = vst [vmem:[#allocation226_spill] sm:$0xff] %v7449_v29  ;;  %v2895_v11 = vmax.f32 %v9345_v1, %v9344_v28  ;;  %v9351_v28 = vld [vmem:[#allocation101_spill] sm:$0xff] }
 0x639   :  { %v2896_v24 = vmax.f32 %v9338_v17, %v9337_v45  ;;  %v9342_v21 = vld [vmem:[#allocation182_spill] sm:$0xff]  ;;  %9346 = vst [vmem:[#allocation136_spill] sm:$0xff] %v7457_v44  ;;  %v9347_v45 = vld [vmem:[#allocation323_spill] sm:$0xff]  ;;  %v3228_v17 = vld [vmem:[#allocation7 + $0x48] sm:$0xff]  ;;  %v7461_v18 = vmax.f32 %v2940_v10, 0.0  ;;  %v2894_v1 = vmax.f32 %v9352_v46, %v9351_v28  ;;  %v3501_v10 = vmul.f32 %v6964_v59, %v7449_v29 }
 0x63a   :  { %3804 = vmatpush.msra.mxu2 %v3505_v61  ;;  %3716 = vmatpush.msrb.mxu3 %v3413_v2  ;;  %v2939_v13 = vmax.f32 %v9342_v21, %v9341_v27  ;;  %v3411_v2 = vmul.f32 %v9347_v45, %v7431_v56  ;;  %v2938_v27 = vmax.f32 %v9349_v58, %v7298_v3  ;;  %v9355_v51 = vld [vmem:[#allocation178_spill] sm:$0xff]  ;;  %v9356_v3 = vld [vmem:[#allocation99_spill] sm:$0xff]  ;;  %v7481_v58 = vmax.f32 %v2895_v11, 0.0  ;;  %v9360_v59 = vld [vmem:[#allocation177_spill] sm:$0xff] }
 0x63b   :  { %v2654_v61 = vpop.permute.xlu0 %2653  ;;  %9348 = vst [vmem:[#allocation97_spill] sm:$0xff] %v7461_v18  ;;  %v7467_v21 = vmax.f32 %v2896_v24, 0.0  ;;  %v3458_v45 = vmul.f32 %v9353_v23, %v7443_v53  ;;  %v2937_v39 = vmax.f32 %v9355_v51, %v7300_v25  ;;  %v9357_v24 = vld [vmem:[#allocation50_spill] sm:$0xff]  ;;  %v3457_v23 = vmul.f32 %v6717_v40, %v7457_v44  ;;  %v9361_v25 = vld [vmem:[#allocation95_spill] sm:$0xff] }
 0x63c   :  { %3805 = vmatpush.msra.mxu2 %v3504_v35  ;;  %3717 = vmatpush.msrb.mxu3 %v3412_v37  ;;  %v2650_v35 = vpop.permute.xlu1 %2649  ;;  %v7473_v37 = vmax.f32 %v2939_v13, 0.0  ;;  %9358 = vst [vmem:[#allocation137_spill] sm:$0xff] %v7481_v58  ;;  %v3500_v13 = vmul.f32 %v6974_v19, %v7461_v18  ;;  %v7487_v28 = vmax.f32 %v2938_v27, 0.0  ;;  %v2936_v46 = vmax.f32 %v9360_v59, %v2654_v61  ;;  %v9365_v19 = vld [vmem:[#allocation175_spill] sm:$0xff]  ;;  %v9372_v59 = vld [vmem:[#allocation44_spill] sm:$0xff] }
 0x63d   :  { %9350 = vst [vmem:[#allocation142_spill] sm:$0xff] %v7467_v21  ;;  %v7492_v51 = vmax.f32 %v2894_v1, 0.0  ;;  %v3456_v11 = vmul.f32 %v6722_v4, %v7467_v21  ;;  %v2935_v27 = vmax.f32 %v9365_v19, %v7399_v57  ;;  %v9367_v1 = vld [vmem:[#allocation96_spill] sm:$0xff]  ;;  %v9369_v57 = vld [vmem:[#allocation173_spill] sm:$0xff] }
 0x63e   :  { %3806 = vmatpush.msra.mxu2 %v3503_v12  ;;  %3718 = vmatpush.msrb.mxu3 %v3411_v2  ;;  %9354 = vst [vmem:[#allocation93_spill] sm:$0xff] %v7473_v37  ;;  %v2893_v12 = vmax.f32 %v9357_v24, %v9356_v3  ;;  %v3231_v2 = vld [vmem:[#allocation7 + $0x60] sm:$0xff]  ;;  %v3499_v40 = vmul.f32 %v6980_v55, %v7473_v37  ;;  %v9368_v3 = vld [vmem:[#allocation45_spill] sm:$0xff]  ;;  %v7571_v37 = vld [vmem:[#allocation6 + $0xb8] sm:$0xff] }
 0x63f   :  { %3719 = vmatmul.f32.vlgmr.msrb.gmra.mxu3 %v3228_v17  ;;  %9359 = vst [vmem:[#allocation92_spill] sm:$0xff] %v7487_v28  ;;  %v9362_v17 = vld [vmem:[#allocation48_spill] sm:$0xff]  ;;  %3779 = vmatmul.f32.vlgmr.msrb.gmra.mxu2 %v3231_v2  ;;  %v2891_v24 = vmax.f32 %v9368_v3, %v9367_v1  ;;  %v3498_v55 = vmul.f32 %v6994_v30, %v7487_v28  ;;  %v9374_v30 = vld [vmem:[#allocation335_spill] sm:$0xff]  ;;  %v7529_v3 = vmax.f32 %v2935_v27, 0.0 }
 0x640   :  { %3807 = vmatpush.msra.mxu2 %v3502_v52  ;;  %3743 = vmatpush.msra.mxu3 %v3458_v45  ;;  %v2892_v52 = vmax.f32 %v9362_v17, %v9361_v25  ;;  %9363 = vst [vmem:[#allocation132_spill] sm:$0xff] %v7492_v51  ;;  %v7498_v45 = vmax.f32 %v2937_v39, 0.0  ;;  %v7514_v39 = vpop.permute.xlu2 %2683  ;;  %v2934_v2 = vmax.f32 %v9369_v57, %v2650_v35  ;;  %v9383_v28 = vld [vmem:[#allocation40_spill] sm:$0xff] }
 0x641   :  { %9375 = vst [vmem:[#allocation88_spill] sm:$0xff] %v7529_v3 }
 0x642   :  { %3808 = vmatpush.msra.mxu2 %v3501_v10  ;;  %3744 = vmatpush.msra.mxu3 %v3457_v23  ;;  %9364 = vst [vmem:[#allocation90_spill] sm:$0xff] %v7498_v45  ;;  %v7504_v10 = vmax.f32 %v2893_v12, 0.0  ;;  %v7508_v23 = vld [vmem:[#allocation6 + $0xe0] sm:$0xff]  ;;  %v9371_v12 = vld [vmem:[#allocation94_spill] sm:$0xff]  ;;  %v7521_v17 = vmax.f32 %v2892_v52, 0.0  ;;  %v3497_v1 = vmul.f32 %v9374_v30, %v7498_v45 }
 0x643   :  { %v7502_v61 = vpop.permute.xlu0 %2613  ;;  %v3455_v4 = vmul.f32 %v7508_v23, %v7481_v58  ;;  %v2890_v25 = vmax.f32 %v9372_v59, %v9371_v12  ;;  %v7535_v12 = vmax.f32 %v2891_v24, 0.0  ;;  %v7537_v52 = vld [vmem:[#allocation6 + $0xd0] sm:$0xff]  ;;  %v7541_v59 = vmax.f32 %v2934_v2, 0.0  ;;  %v9380_v30 = vld [vmem:[#allocation80_spill] sm:$0xff]  ;;  %v7549_v24 = vld [vmem:[#allocation6 + $0xc8] sm:$0xff] }
 0x644   :  { %3809 = vmatpush.msra.mxu2 %v3500_v13  ;;  %9366 = vst [vmem:[#allocation219_spill] sm:$0xff] %v7504_v10  ;;  %3745 = vmatpush.msra.mxu3 %v3456_v11  ;;  %v7517_v13 = vmax.f32 %v2936_v46, 0.0  ;;  %v7523_v11 = vld [vmem:[#allocation6 + $0xd8] sm:$0xff]  ;;  %v7531_v35 = vpop.permute.xlu1 %2681  ;;  %v9376_v46 = vld [vmem:[#allocation89_spill] sm:$0xff] }
 0x645   :  { %9373 = vst [vmem:[#allocation138_spill] sm:$0xff] %v7521_v17  ;;  %v3454_v19 = vmul.f32 %v7523_v11, %v7492_v51  ;;  %v7545_v45 = vmax.f32 %v2890_v25, 0.0 }
 0x646   :  { %9370 = vst [vmem:[#allocation216_spill] sm:$0xff] %v7517_v13  ;;  %3810 = vmatpush.msra.mxu2 %v3499_v40  ;;  %3746 = vmatpush.msra.mxu3 %v3455_v4  ;;  %v9377_v40 = vld [vmem:[#allocation41_spill] sm:$0xff]  ;;  %v3453_v4 = vmul.f32 %v7537_v52, %v7504_v10  ;;  %v3496_v27 = vmul.f32 %v9380_v30, %v7517_v13  ;;  %v7561_v13 = vld [vmem:[#allocation6 + $0xc0] sm:$0xff] }
 0x647   :  { %v2889_v57 = vmax.f32 %v9377_v40, %v9376_v46  ;;  %9378 = vst [vmem:[#allocation133_spill] sm:$0xff] %v7535_v12  ;;  %v9384_v46 = vld [vmem:[#allocation338_spill] sm:$0xff]  ;;  %v9385_v10 = vld [vmem:[#allocation85_spill] sm:$0xff] }
 0x648   :  { %3811 = vmatpush.msra.mxu2 %v3498_v55  ;;  %3747 = vmatpush.msra.mxu3 %v3454_v19  ;;  %9379 = vst [vmem:[#allocation86_spill] sm:$0xff] %v7541_v59  ;;  %v9382_v55 = vld [vmem:[#allocation91_spill] sm:$0xff]  ;;  %v3452_v19 = vmul.f32 %v7549_v24, %v7521_v17  ;;  %v3495_v40 = vmul.f32 %v9384_v46, %v7529_v3  ;;  %v9386_v30 = vld [vmem:[#allocation37_spill] sm:$0xff]  ;;  %v9389_v17 = vld [vmem:[#allocation82_spill] sm:$0xff] }
 0x649   :  { %9381 = vst [vmem:[#allocation127_spill] sm:$0xff] %v7545_v45  ;;  %v2888_v51 = vmax.f32 %v9383_v28, %v9382_v55  ;;  %v7559_v25 = vmax.f32 %v2889_v57, 0.0  ;;  %v3451_v28 = vmul.f32 %v7561_v13, %v7535_v12  ;;  %v9390_v46 = vld [vmem:[#allocation35_spill] sm:$0xff]  ;;  %v2646_v57 = vpop.permute.xlu2 %2645 }
 0x64a   :  { %3812 = vmatpush.msra.mxu2 %v3497_v1  ;;  %3748 = vmatpush.msra.mxu3 %v3453_v4  ;;  %v2887_v1 = vmax.f32 %v9386_v30, %v9385_v10  ;;  %v9388_v4 = vld [vmem:[#allocation240_spill] sm:$0xff]  ;;  %v3450_v10 = vmul.f32 %v7571_v37, %v7545_v45  ;;  %v9398_v45 = vld [vmem:[#allocation170_spill] sm:$0xff] }
 0x64b   :  { %v7555_v2 = vpop.permute.xlu0 %2611  ;;  %9387 = vst [vmem:[#allocation83_spill] sm:$0xff] %v7559_v25  ;;  %v3494_v55 = vmul.f32 %v9388_v4, %v7541_v59  ;;  %v7569_v3 = vmax.f32 %v2888_v51, 0.0  ;;  %v9393_v30 = vld [vmem:[#allocation32_spill] sm:$0xff]  ;;  %v2932_v18 = vmax.f32 %v9398_v45, %v2646_v57 }
 0x64c   :  { %3813 = vmatpush.msra.mxu2 %v3496_v27  ;;  %3749 = vmatpush.msra.mxu3 %v3452_v19  ;;  %v2886_v27 = vmax.f32 %v9390_v46, %v9389_v17  ;;  %v9392_v19 = vld [vmem:[#allocation87_spill] sm:$0xff]  ;;  %v7577_v58 = vmax.f32 %v2887_v1, 0.0  ;;  %v9395_v17 = vld [vmem:[#allocation84_spill] sm:$0xff]  ;;  %v2644_v46 = vpop.permute.xlu1 %2643 }
 0x64d   :  { %9391 = vst [vmem:[#allocation281_spill] sm:$0xff] %v7569_v3  ;;  %v2885_v12 = vmax.f32 %v9393_v30, %v9392_v19  ;;  %v9400_v19 = vld [vmem:[#allocation30_spill] sm:$0xff]  ;;  %v7606_v56 = vmax.f32 %v2932_v18, 0.0 }
 0x64e   :  { %3814 = vmatpush.msra.mxu2 %v3495_v40  ;;  %3750 = vmatpush.msra.mxu3 %v3451_v28  ;;  %9394 = vst [vmem:[#allocation210_spill] sm:$0xff] %v7577_v58  ;;  %v7579_v40 = vld [vmem:[#allocation6 + $0xb0] sm:$0xff]  ;;  %v9396_v28 = vld [vmem:[#allocation31_spill] sm:$0xff]  ;;  %v7585_v59 = vmax.f32 %v2886_v27, 0.0 }
 0x64f   :  { %v3449_v51 = vmul.f32 %v7579_v40, %v7559_v25  ;;  %v2884_v4 = vmax.f32 %v9396_v28, %v9395_v17  ;;  %v7594_v29 = vmax.f32 %v2885_v12, 0.0  ;;  %v9402_v25 = vld [vmem:[#allocation169_spill] sm:$0xff]  ;;  %v9403_v17 = vld [vmem:[#allocation172_spill] sm:$0xff]  ;;  %9407 = vst [vmem:[#allocation197_spill] sm:$0xff] %v7606_v56  ;;  %v7610_v12 = vld [vmem:[#allocation6 + $0x98] sm:$0xff] }
 0x650   :  { %3815 = vmatpush.msra.mxu2 %v3494_v55  ;;  %3751 = vmatpush.msra.mxu3 %v3450_v10  ;;  %9397 = vst [vmem:[#allocation280_spill] sm:$0xff] %v7585_v59  ;;  %v7588_v55 = vld [vmem:[#allocation6 + $0xa8] sm:$0xff]  ;;  %v9399_v10 = vld [vmem:[#allocation79_spill] sm:$0xff]  ;;  %v2931_v44 = vmax.f32 %v9402_v25, %v2644_v46  ;;  %v7598_v28 = vld [vmem:[#allocation6 + $0xa0] sm:$0xff] }
 0x651   :  { %v3448_v1 = vmul.f32 %v7588_v55, %v7569_v3  ;;  %v2883_v30 = vmax.f32 %v9400_v19, %v9399_v10  ;;  %9401 = vst [vmem:[#allocation202_spill] sm:$0xff] %v7594_v29  ;;  %v3447_v45 = vmul.f32 %v7598_v28, %v7577_v58  ;;  %v7602_v57 = vmax.f32 %v2884_v4, 0.0  ;;  %v9406_v3 = vld [vmem:[#allocation165_spill] sm:$0xff]  ;;  %v9410_v46 = vld [vmem:[#allocation231_spill] sm:$0xff]  ;;  %v7622_v18 = vld [vmem:[#allocation6 + $0x90] sm:$0xff] }
 0x652   :  { %3752 = vmatpush.msra.mxu3 %v3449_v51  ;;  %v9405_v51 = vld [vmem:[#allocation233_spill] sm:$0xff]  ;;  %v7618_v4 = vmax.f32 %v2931_v44, 0.0  ;;  %v3492_v44 = vmul.f32 %v7058_v6, %v7606_v56  ;;  %v7646_v6 = vld [vmem:[#allocation6 + $0x80] sm:$0xff]  ;;  %v7656_v56 = vld [vmem:[#allocation6 + $0xf8] sm:$0xff] }
 0x653   :  { %v2648_v21 = vpop.permute.xlu0 %2647  ;;  %9404 = vst [vmem:[#allocation249_spill] sm:$0xff] %v7602_v57  ;;  %v2930_v53 = vmax.f32 %v9406_v3, %v9405_v51  ;;  %v7614_v25 = vmax.f32 %v2883_v30, 0.0  ;;  %v9414_v51 = vld [vmem:[#allocation161_spill] sm:$0xff] }
 0x654   :  { %3753 = vmatpush.msra.mxu3 %v3448_v1  ;;  %v2933_v27 = vmax.f32 %v9403_v17, %v2648_v21  ;;  %v3446_v21 = vmul.f32 %v7610_v12, %v7585_v59  ;;  %v9411_v1 = vld [vmem:[#allocation159_spill] sm:$0xff]  ;;  %9412 = vst [vmem:[#allocation191_spill] sm:$0xff] %v7618_v4  ;;  %v3445_v17 = vmul.f32 %v7622_v18, %v7594_v29 }
 0x655   :  { %9409 = vst [vmem:[#allocation279_spill] sm:$0xff] %v7614_v25  ;;  %v2929_v19 = vmax.f32 %v9411_v1, %v9410_v46  ;;  %v7630_v59 = vmax.f32 %v2930_v53, 0.0  ;;  %v7634_v46 = vld [vmem:[#allocation6 + $0x88] sm:$0xff]  ;;  %v3491_v53 = vmul.f32 %v7066_v38, %v7618_v4  ;;  %v9425_v4 = vld [vmem:[#allocation186_spill] sm:$0xff] }
 0x656   :  { %v7608_v10 = vmax.f32 %v2933_v27, 0.0  ;;  %3754 = vmatpush.msra.mxu3 %v3447_v45  ;;  %v7626_v27 = vld [vmem:[#allocation6 + $0x178] sm:$0xff]  ;;  %v9413_v45 = vld [vmem:[#allocation236_spill] sm:$0xff]  ;;  %v9417_v1 = vld [vmem:[#allocation149_spill] sm:$0xff] }
 0x657   :  { %v2928_v30 = vmax.f32 %v9414_v51, %v9413_v45  ;;  %9415 = vst [vmem:[#allocation313_spill] sm:$0xff] %v7630_v59  ;;  %v7640_v58 = vmax.f32 %v2929_v19, 0.0  ;;  %v9419_v45 = vld [vmem:[#allocation56_spill] sm:$0xff]  ;;  %v3490_v38 = vmul.f32 %v7656_v56, %v7630_v59 }
 0x658   :  { %9408 = vst [vmem:[#allocation317_spill] sm:$0xff] %v7608_v10  ;;  %v3493_v3 = vmul.f32 %v7046_v5, %v7608_v10  ;;  %3755 = vmatpush.msra.mxu3 %v3446_v21  ;;  %v3444_v5 = vmul.f32 %v7634_v46, %v7602_v57  ;;  %v9416_v21 = vld [vmem:[#allocation187_spill] sm:$0xff]  ;;  %v7642_v10 = vld [vmem:[#allocation6 + $0x170] sm:$0xff]  ;;  %v3893_v51 = vmul.f32 %v7626_v27, %v9419_v45  ;;  %v9420_v57 = vld [vmem:[#allocation184_spill] sm:$0xff] }
 0x659   :  { %v2927_v29 = vmax.f32 %v9417_v1, %v9416_v21  ;;  %9418 = vst [vmem:[#allocation222_spill] sm:$0xff] %v7640_v58  ;;  %v9421_v21 = vld [vmem:[#allocation148_spill] sm:$0xff]  ;;  %v7654_v1 = vmax.f32 %v2928_v30, 0.0 }
 0x65a   :  { %3756 = vmatpush.msra.mxu3 %v3445_v17  ;;  %3816 = vmatpush.msra.mxu2 %v3493_v3  ;;  %v3443_v3 = vmul.f32 %v7646_v6, %v7614_v25  ;;  %v3230_v17 = vld [vmem:[#allocation7 + $0x58] sm:$0xff]  ;;  %v2926_v19 = vmax.f32 %v9421_v21, %v9420_v57  ;;  %v9426_v57 = vld [vmem:[#allocation146_spill] sm:$0xff]  ;;  %v7672_v59 = vld [vmem:[#allocation6 + $0x160] sm:$0xff] }
 0x65b   :  { %9422 = vst [vmem:[#allocation246_spill] sm:$0xff] %v7654_v1  ;;  %v7664_v45 = vmax.f32 %v2927_v29, 0.0  ;;  %v2925_v30 = vmax.f32 %v9426_v57, %v9425_v4  ;;  %v7668_v21 = vld [vmem:[#allocation6 + $0xf0] sm:$0xff]  ;;  %v9429_v29 = vld [vmem:[#allocation189_spill] sm:$0xff]  ;;  %v3488_v4 = vmul.f32 %v7680_v43, %v7654_v1  ;;  %v7684_v57 = vld [vmem:[#allocation6 + $0x158] sm:$0xff] }
 0x65c   :  { %3757 = vmatpush.msra.mxu3 %v3444_v5  ;;  %3817 = vmatpush.msra.mxu2 %v3492_v44  ;;  %v7660_v44 = vld [vmem:[#allocation6 + $0x168] sm:$0xff]  ;;  %v3489_v20 = vmul.f32 %v7668_v21, %v7640_v58  ;;  %v9432_v58 = vld [vmem:[#allocation179_spill] sm:$0xff] }
 0x65d   :  { %v9423_v5 = vld [vmem:[#allocation57_spill] sm:$0xff]  ;;  %9424 = vst [vmem:[#allocation190_spill] sm:$0xff] %v7664_v45  ;;  %v3487_v48 = vmul.f32 %v7508_v23, %v7664_v45  ;;  %v9442_v45 = vld [vmem:[#allocation135_spill] sm:$0xff] }
 0x65e   :  { %3758 = vmatpush.msra.mxu3 %v3443_v3  ;;  %3818 = vmatpush.msra.mxu2 %v3491_v53  ;;  %v3892_v25 = vmul.f32 %v7642_v10, %v9423_v5  ;;  %v3233_v3 = vld [vmem:[#allocation7 + $0x70] sm:$0xff]  ;;  %v9427_v53 = vld [vmem:[#allocation59_spill] sm:$0xff]  ;;  %v9435_v1 = vld [vmem:[#allocation61_spill] sm:$0xff] }
 0x65f   :  { %3759 = vmatmul.f32.vlgmr.msra.gmra.mxu3 %v3230_v17  ;;  %v3891_v17 = vmul.f32 %v7660_v44, %v9427_v53  ;;  %v9430_v5 = vld [vmem:[#allocation143_spill] sm:$0xff]  ;;  %3819 = vmatmul.f32.vlgmr.msra.gmra.mxu2 %v3233_v3  ;;  %v9433_v53 = vld [vmem:[#allocation140_spill] sm:$0xff]  ;;  %v9436_v3 = vld [vmem:[#allocation181_spill] sm:$0xff] }
 0x660   :  { %4134 = vmatpush.msrb.mxu2 %v3893_v51  ;;  %3783 = vmatpush.msrb.mxu3 %v3490_v38  ;;  %v7676_v51 = vmax.f32 %v2926_v19, 0.0  ;;  %v2924_v36 = vmax.f32 %v9430_v5, %v9429_v29  ;;  %v9431_v38 = vld [vmem:[#allocation60_spill] sm:$0xff]  ;;  %v2923_v19 = vmax.f32 %v9433_v53, %v9432_v58  ;;  %v7692_v29 = vmax.f32 %v2925_v30, 0.0  ;;  %v7694_v5 = vld [vmem:[#allocation6 + $0x150] sm:$0xff]  ;;  %v7704_v58 = vld [vmem:[#allocation6 + $0x148] sm:$0xff] }
 0x661   :  { %v9439_v30 = vld [vmem:[#allocation62_spill] sm:$0xff] }
 0x662   :  { %4135 = vmatpush.msrb.mxu2 %v3892_v25  ;;  %9428 = vst [vmem:[#allocation130_spill] sm:$0xff] %v7676_v51  ;;  %3784 = vmatpush.msrb.mxu3 %v3489_v20  ;;  %v3890_v25 = vmul.f32 %v7672_v59, %v9431_v38  ;;  %v3889_v20 = vmul.f32 %v7684_v57, %v9435_v1  ;;  %v7702_v62 = vmax.f32 %v2924_v36, 0.0  ;;  %v9443_v36 = vld [vmem:[#allocation63_spill] sm:$0xff] }
 0x663   :  { %9434 = vst [vmem:[#allocation68_spill] sm:$0xff] %v7692_v29  ;;  %v3486_v38 = vmul.f32 %v7523_v11, %v7676_v51  ;;  %v3888_v53 = vmul.f32 %v7694_v5, %v9439_v30  ;;  %v3887_v51 = vmul.f32 %v7704_v58, %v9443_v36  ;;  %v9447_v30 = vld [vmem:[#allocation65_spill] sm:$0xff]  ;;  %v9449_v36 = vld [vmem:[#allocation131_spill] sm:$0xff] }
 0x664   :  { %4136 = vmatpush.msrb.mxu2 %v3891_v17  ;;  %3785 = vmatpush.msrb.mxu3 %v3488_v4  ;;  %v9437_v17 = vld [vmem:[#allocation139_spill] sm:$0xff]  ;;  %9438 = vst [vmem:[#allocation12_spill] sm:$0xff] %v7702_v62  ;;  %v7708_v4 = vmax.f32 %v2923_v19, 0.0 }
 0x665   :  { %v2922_v26 = vmax.f32 %v9437_v17, %v9436_v3  ;;  %v3485_v3 = vmul.f32 %v7537_v52, %v7692_v29  ;;  %v7714_v17 = vld [vmem:[#allocation6 + $0x140] sm:$0xff]  ;;  %v7722_v19 = vld [vmem:[#allocation6 + $0x138] sm:$0xff]  ;;  %v2919_v29 = vmax.f32 %v9449_v36, %v7324_v0 }
 0x666   :  { %4137 = vmatpush.msrb.mxu2 %v3890_v25  ;;  %3786 = vmatpush.msrb.mxu3 %v3487_v48  ;;  %9440 = vst [vmem:[#allocation244_spill] sm:$0xff] %v7708_v4  ;;  %v9441_v25 = vld [vmem:[#allocation183_spill] sm:$0xff]  ;;  %v9444_v48 = vld [vmem:[#allocation176_spill] sm:$0xff] }
 0x667   :  { %v2921_v1 = vmax.f32 %v9442_v45, %v9441_v25  ;;  %v7720_v14 = vmax.f32 %v2922_v26, 0.0  ;;  %v3484_v45 = vmul.f32 %v7549_v24, %v7702_v62  ;;  %v3886_v25 = vmul.f32 %v7714_v17, %v9447_v30  ;;  %v9453_v0 = vld [vmem:[#allocation67_spill] sm:$0xff]  ;;  %v7748_v36 = vld [vmem:[#allocation6 + $0x120] sm:$0xff] }
 0x668   :  { %4138 = vmatpush.msrb.mxu2 %v3889_v20  ;;  %3787 = vmatpush.msrb.mxu3 %v3486_v38  ;;  %v9445_v20 = vld [vmem:[#allocation134_spill] sm:$0xff]  ;;  %v3483_v26 = vmul.f32 %v7561_v13, %v7708_v4 }
 0x669   :  { %v2920_v42 = vmax.f32 %v9445_v20, %v9444_v48  ;;  %9446 = vst [vmem:[#allocation188_spill] sm:$0xff] %v7720_v14  ;;  %v7728_v38 = vmax.f32 %v2921_v1, 0.0  ;;  %v9452_v1 = vld [vmem:[#allocation129_spill] sm:$0xff]  ;;  %v3482_v62 = vmul.f32 %v7571_v37, %v7720_v14 }
 0x66a   :  { %4139 = vmatpush.msrb.mxu2 %v3888_v53  ;;  %3788 = vmatpush.msrb.mxu3 %v3485_v3  ;;  %v7730_v53 = vld [vmem:[#allocation6 + $0x130] sm:$0xff]  ;;  %v2918_v30 = vmax.f32 %v9452_v1, %v7303_v41  ;;  %v9456_v41 = vld [vmem:[#allocation69_spill] sm:$0xff]  ;;  %v7758_v1 = vld [vmem:[#allocation6 + $0x118] sm:$0xff] }
 0x66b   :  { %9448 = vst [vmem:[#allocation125_spill] sm:$0xff] %v7728_v38  ;;  %v9450_v3 = vld [vmem:[#allocation66_spill] sm:$0xff]  ;;  %v7738_v20 = vmax.f32 %v2920_v42, 0.0  ;;  %v7752_v42 = vmax.f32 %v2919_v29, 0.0  ;;  %v3481_v4 = vmul.f32 %v7579_v40, %v7728_v38 }
 0x66c   :  { %4140 = vmatpush.msrb.mxu2 %v3887_v51  ;;  %3789 = vmatpush.msrb.mxu3 %v3484_v45  ;;  %v3885_v48 = vmul.f32 %v7722_v19, %v9450_v3  ;;  %v7740_v51 = vld [vmem:[#allocation6 + $0x128] sm:$0xff]  ;;  %v3884_v45 = vmul.f32 %v7730_v53, %v9453_v0  ;;  %v9458_v0 = vld [vmem:[#allocation126_spill] sm:$0xff] }
 0x66d   :  { %9451 = vst [vmem:[#allocation64_spill] sm:$0xff] %v7738_v20  ;;  %v2916_v14 = vmax.f32 %v9458_v0, %v7502_v61  ;;  %v9462_v61 = vld [vmem:[#allocation72_spill] sm:$0xff]  ;;  %v7778_v0 = vld [vmem:[#allocation6 + $0x108] sm:$0xff] }
 0x66e   :  { %4141 = vmatpush.msrb.mxu2 %v3886_v25  ;;  %3790 = vmatpush.msrb.mxu3 %v3483_v26  ;;  %v9454_v25 = vld [vmem:[#allocation128_spill] sm:$0xff]  ;;  %9455 = vst [vmem:[#allocation320_spill] sm:$0xff] %v7752_v42  ;;  %v3883_v26 = vmul.f32 %v7740_v51, %v9456_v41  ;;  %v3479_v41 = vmul.f32 %v7598_v28, %v7752_v42  ;;  %v9466_v42 = vld [vmem:[#allocation73_spill] sm:$0xff] }
 0x66f   :  { %v2917_v3 = vmax.f32 %v9454_v25, %v7312_v31  ;;  %v3480_v31 = vmul.f32 %v7588_v55, %v7738_v20  ;;  %v7768_v25 = vld [vmem:[#allocation6 + $0x110] sm:$0xff]  ;;  %v9464_v20 = vld [vmem:[#allocation265_spill] sm:$0xff]  ;;  %v7784_v16 = vmax.f32 %v2916_v14, 0.0 }
 0x670   :  { %4142 = vmatpush.msrb.mxu2 %v3885_v48  ;;  %3791 = vmatpush.msrb.mxu3 %v3482_v62  ;;  %v7760_v48 = vmax.f32 %v2918_v30, 0.0  ;;  %v9459_v62 = vld [vmem:[#allocation71_spill] sm:$0xff]  ;;  %v9461_v30 = vld [vmem:[#allocation124_spill] sm:$0xff] }
 0x671   :  { %v3882_v29 = vmul.f32 %v7748_v36, %v9459_v62  ;;  %v2915_v38 = vmax.f32 %v9461_v30, %v7555_v2  ;;  %9465 = vst [vmem:[#allocation328_spill] sm:$0xff] %v7784_v16  ;;  %v3880_v2 = vmul.f32 %v7768_v25, %v9466_v42  ;;  %v9468_v30 = vld [vmem:[#allocation259_spill] sm:$0xff]  ;;  %v3476_v42 = vmul.f32 %v7634_v46, %v7784_v16 }
 0x672   :  { %4143 = vmatpush.msrb.mxu2 %v3884_v45  ;;  %9457 = vst [vmem:[#allocation247_spill] sm:$0xff] %v7760_v48  ;;  %3792 = vmatpush.msrb.mxu3 %v3481_v4  ;;  %v7770_v45 = vmax.f32 %v2917_v3, 0.0  ;;  %v3881_v4 = vmul.f32 %v7758_v1, %v9462_v61  ;;  %v3478_v3 = vmul.f32 %v7610_v12, %v7760_v48 }
 0x673   :  { %v7794_v22 = vmax.f32 %v2915_v38, 0.0  ;;  %v9474_v38 = vld [vmem:[#allocation144_spill] sm:$0xff] }
 0x674   :  { %4144 = vmatpush.msrb.mxu2 %v3883_v26  ;;  %9460 = vst [vmem:[#allocation185_spill] sm:$0xff] %v7770_v45  ;;  %3793 = vmatpush.msrb.mxu3 %v3480_v31  ;;  %v9463_v26 = vld [vmem:[#allocation218_spill] sm:$0xff]  ;;  %v7788_v31 = vld [vmem:[#allocation6 + $0x100] sm:$0xff]  ;;  %v3477_v33 = vmul.f32 %v7622_v18, %v7770_v45 }
 0x675   :  { %v2962_v62 = vmax.f32 %v9464_v20, %v9463_v26  ;;  %9469 = vst [vmem:[#allocation117_spill] sm:$0xff] %v7794_v22  ;;  %v9470_v20 = vld [vmem:[#allocation75_spill] sm:$0xff]  ;;  %v9476_v45 = vld [vmem:[#allocation250_spill] sm:$0xff] }
 0x676   :  { %4145 = vmatpush.msrb.mxu2 %v3882_v29  ;;  %3794 = vmatpush.msrb.mxu3 %v3479_v41  ;;  %v9467_v29 = vld [vmem:[#allocation215_spill] sm:$0xff]  ;;  %v3879_v14 = vmul.f32 %v7778_v0, %v9470_v20  ;;  %v9471_v41 = vld [vmem:[#allocation213_spill] sm:$0xff] }
 0x677   :  { %v2961_v61 = vmax.f32 %v9468_v30, %v9467_v29  ;;  %v7800_v48 = vmax.f32 %v2962_v62, 0.0  ;;  %v9473_v29 = vld [vmem:[#allocation76_spill] sm:$0xff]  ;;  %v3475_v62 = vmul.f32 %v7646_v6, %v7794_v22 }
 0x678   :  { %4146 = vmatpush.msrb.mxu2 %v3881_v4  ;;  %3795 = vmatpush.msrb.mxu3 %v3478_v3  ;;  %v9472_v4 = vld [vmem:[#allocation253_spill] sm:$0xff]  ;;  %v3878_v30 = vmul.f32 %v7788_v31, %v9473_v29  ;;  %v3925_v3 = vmul.f32 %v7626_v27, %v9474_v38  ;;  %v9479_v38 = vld [vmem:[#allocation151_spill] sm:$0xff] }
 0x679   :  { %v2960_v26 = vmax.f32 %v9472_v4, %v9471_v41  ;;  %v7810_v20 = vmax.f32 %v2961_v61, 0.0  ;;  %v3232_v41 = vld [vmem:[#allocation7 + $0x68] sm:$0xff]  ;;  %v9477_v4 = vld [vmem:[#allocation282_spill] sm:$0xff]  ;;  %v3522_v29 = vmul.f32 %v7656_v56, %v7800_v48  ;;  %v4610_v61 = vld [vmem:[#allocation7] sm:$0xff] }
 0x67a   :  { %4147 = vmatpush.msrb.mxu2 %v3880_v2  ;;  %3796 = vmatpush.msrb.mxu3 %v3477_v33  ;;  %v9475_v2 = vld [vmem:[#allocation286_spill] sm:$0xff]  ;;  %v9478_v33 = vld [vmem:[#allocation248_spill] sm:$0xff] }
 0x67b   :  { %v2959_v8 = vmax.f32 %v9476_v45, %v9475_v2  ;;  %v7816_v16 = vmax.f32 %v2960_v26, 0.0  ;;  %v3924_v45 = vmul.f32 %v7642_v10, %v9479_v38  ;;  %v9480_v2 = vld [vmem:[#allocation285_spill] sm:$0xff]  ;;  %v3521_v26 = vmul.f32 %v7668_v21, %v7810_v20 }
 0x67c   :  { %4148 = vmatpush.msrb.mxu2 %v3879_v14  ;;  %3797 = vmatpush.msrb.mxu3 %v3476_v42  ;;  %v2958_v14 = vmax.f32 %v9478_v33, %v9477_v4  ;;  %v9481_v42 = vld [vmem:[#allocation245_spill] sm:$0xff]  ;;  %v9482_v4 = vld [vmem:[#allocation150_spill] sm:$0xff] }
 0x67d   :  { %v2957_v22 = vmax.f32 %v9481_v42, %v9480_v2  ;;  %v3923_v56 = vmul.f32 %v7660_v44, %v9482_v4 }
 0x67e   :  { %4149 = vmatpush.msrb.mxu2 %v3878_v30  ;;  %3798 = vmatpush.msrb.mxu3 %v3475_v62  ;;  %v7824_v30 = vmax.f32 %v2959_v8, 0.0  ;;  %v9484_v62 = vld [vmem:[#allocation243_spill] sm:$0xff]  ;;  %v7832_v38 = vmax.f32 %v2958_v14, 0.0  ;;  %v9485_v8 = vld [vmem:[#allocation152_spill] sm:$0xff]  ;;  %v9489_v14 = vld [vmem:[#allocation153_spill] sm:$0xff] }
 0x67f   :  { %3799 = vmatmul.f32.vlgmr.msrb.gmra.mxu3 %v3232_v41  ;;  %4150 = vmatmul.f32.vlgmr.msrb.gmra.mxu2 %v4610_v61  ;;  %v3520_v41 = vmul.f32 %v7680_v43, %v7816_v16  ;;  %v3922_v61 = vmul.f32 %v7672_v59, %v9485_v8  ;;  %v7838_v2 = vmax.f32 %v2957_v22, 0.0  ;;  %v3921_v4 = vmul.f32 %v7684_v57, %v9489_v14 }
 0x680   :  { %4174 = vmatpush.msra.mxu2 %v3925_v3  ;;  %3823 = vmatpush.msra.mxu3 %v3522_v29  ;;  %v9483_v3 = vld [vmem:[#allocation283_spill] sm:$0xff]  ;;  %v3519_v21 = vmul.f32 %v7508_v23, %v7824_v30  ;;  %v9487_v29 = vld [vmem:[#allocation34_spill] sm:$0xff]  ;;  %v3518_v43 = vmul.f32 %v7523_v11, %v7832_v38 }
 0x681   :  { %v2956_v33 = vmax.f32 %v9484_v62, %v9483_v3  ;;  %9486 = vst [vmem:[#allocation58_spill] sm:$0xff] %v7838_v2  ;;  %v2680_v62 = vpop.permute.xlu0 %2679  ;;  %v9495_v11 = vld [vmem:[#allocation155_spill] sm:$0xff] }
 0x682   :  { %4175 = vmatpush.msra.mxu2 %v3924_v45  ;;  %3824 = vmatpush.msra.mxu3 %v3521_v26  ;;  %v9488_v45 = vld [vmem:[#allocation241_spill] sm:$0xff] }
 0x683   :  { %v2955_v42 = vmax.f32 %v9488_v45, %v9487_v29  ;;  %v7846_v3 = vmax.f32 %v2956_v33, 0.0  ;;  %v9491_v26 = vld [vmem:[#allocation81_spill] sm:$0xff]  ;;  %v9494_v33 = vld [vmem:[#allocation238_spill] sm:$0xff]  ;;  %v3919_v29 = vmul.f32 %v7704_v58, %v9495_v11 }
 0x684   :  { %4176 = vmatpush.msra.mxu2 %v3923_v56  ;;  %3825 = vmatpush.msra.mxu3 %v3520_v41  ;;  %v2954_v22 = vmax.f32 %v9491_v26, %v7401_v54  ;;  %v9492_v56 = vld [vmem:[#allocation154_spill] sm:$0xff]  ;;  %v3517_v41 = vmul.f32 %v7537_v52, %v7838_v2  ;;  %v9498_v52 = vld [vmem:[#allocation156_spill] sm:$0xff] }
 0x685   :  { %9490 = vst [vmem:[#allocation322_spill] sm:$0xff] %v7846_v3  ;;  %v3920_v23 = vmul.f32 %v7694_v5, %v9492_v56  ;;  %v7856_v8 = vmax.f32 %v2955_v42, 0.0  ;;  %v3516_v54 = vmul.f32 %v7549_v24, %v7846_v3  ;;  %v3918_v42 = vmul.f32 %v7714_v17, %v9498_v52  ;;  %v9501_v24 = vld [vmem:[#allocation157_spill] sm:$0xff]  ;;  %v9508_v52 = vld [vmem:[#allocation20_spill] sm:$0xff] }
 0x686   :  { %4177 = vmatpush.msra.mxu2 %v3922_v61  ;;  %3826 = vmatpush.msra.mxu3 %v3519_v21  ;;  %v2953_v61 = vmax.f32 %v9494_v33, %v7349_v32  ;;  %v9496_v21 = vld [vmem:[#allocation54_spill] sm:$0xff]  ;;  %v7866_v14 = vmax.f32 %v2954_v22, 0.0 }
 0x687   :  { %9493 = vst [vmem:[#allocation242_spill] sm:$0xff] %v7856_v8  ;;  %v2952_v45 = vmax.f32 %v9496_v21, %v7453_v34  ;;  %v3515_v32 = vmul.f32 %v7561_v13, %v7856_v8  ;;  %v3917_v34 = vmul.f32 %v7722_v19, %v9501_v24  ;;  %v9504_v13 = vld [vmem:[#allocation158_spill] sm:$0xff]  ;;  %v9507_v21 = vld [vmem:[#allocation160_spill] sm:$0xff] }
 0x688   :  { %4178 = vmatpush.msra.mxu2 %v3921_v4  ;;  %3827 = vmatpush.msra.mxu3 %v3518_v43  ;;  %9497 = vst [vmem:[#allocation182_spill] sm:$0xff] %v7866_v14  ;;  %v7872_v4 = vmax.f32 %v2953_v61, 0.0  ;;  %v9500_v43 = vld [vmem:[#allocation235_spill] sm:$0xff]  ;;  %v3514_v56 = vmul.f32 %v7571_v37, %v7866_v14  ;;  %v3916_v33 = vmul.f32 %v7730_v53, %v9504_v13  ;;  %v2678_v61 = vpop.permute.xlu2 %2677  ;;  %v9512_v24 = vld [vmem:[#allocation36_spill] sm:$0xff]  ;;  %v9599_v14 = vld [vmem:[#allocation293_spill] sm:$0xff] }
 0x689   :  { %v2951_v26 = vmax.f32 %v9500_v43, %v7514_v39  ;;  %v7878_v22 = vmax.f32 %v2952_v45, 0.0  ;;  %v3915_v37 = vmul.f32 %v7740_v51, %v9507_v21  ;;  %v2676_v45 = vpop.permute.xlu0 %2675  ;;  %v9515_v13 = vld [vmem:[#allocation164_spill] sm:$0xff]  ;;  %v9604_v8 = vld [vmem:[#allocation334_spill] sm:$0xff] }
 0x68a   :  { %4179 = vmatpush.msra.mxu2 %v3920_v23  ;;  %3828 = vmatpush.msra.mxu3 %v3517_v41  ;;  %9499 = vst [vmem:[#allocation100_spill] sm:$0xff] %v7872_v4  ;;  %v9503_v23 = vld [vmem:[#allocation24_spill] sm:$0xff]  ;;  %v3513_v39 = vmul.f32 %v7579_v40, %v7872_v4  ;;  %v9510_v40 = vld [vmem:[#allocation162_spill] sm:$0xff]  ;;  %v9594_v4 = vld [vmem:[#allocation331_spill] sm:$0xff] }
 0x68b   :  { %9502 = vst [vmem:[#allocation55_spill] sm:$0xff] %v7878_v22  ;;  %v2950_v41 = vmax.f32 %v9503_v23, %v7531_v35  ;;  %v7888_v11 = vmax.f32 %v2951_v26, 0.0  ;;  %v3512_v35 = vmul.f32 %v7588_v55, %v7878_v22  ;;  %v3914_v43 = vmul.f32 %v7748_v36, %v9510_v40  ;;  %v9520_v40 = vld [vmem:[#allocation252_spill] sm:$0xff]  ;;  %v9554_v22 = vld [vmem:[#allocation297_spill] sm:$0xff] }
 0x68c   :  { %4180 = vmatpush.msra.mxu2 %v3919_v29  ;;  %3829 = vmatpush.msra.mxu3 %v3516_v54  ;;  %v9506_v29 = vld [vmem:[#allocation19_spill] sm:$0xff] }
 0x68d   :  { %9505 = vst [vmem:[#allocation323_spill] sm:$0xff] %v7888_v11  ;;  %v2949_v54 = vmax.f32 %v9506_v29, %v2680_v62  ;;  %v3511_v62 = vmul.f32 %v7598_v28, %v7888_v11 }
 0x68e   :  { %4181 = vmatpush.msra.mxu2 %v3918_v42  ;;  %3830 = vmatpush.msra.mxu3 %v3515_v32  ;;  %v2948_v42 = vmax.f32 %v9508_v52, %v2678_v61  ;;  %v7896_v32 = vmax.f32 %v2950_v41, 0.0  ;;  %v7927_v52 = vld [vmem:[#allocation6 + $0x1f8] sm:$0xff] }
 0x68f   :  { %v7902_v26 = vmax.f32 %v2949_v54, 0.0 }
 0x690   :  { %4182 = vmatpush.msra.mxu2 %v3917_v34  ;;  %3831 = vmatpush.msra.mxu3 %v3514_v56  ;;  %9509 = vst [vmem:[#allocation180_spill] sm:$0xff] %v7896_v32  ;;  %v2947_v34 = vmax.f32 %v9512_v24, %v2676_v45  ;;  %v9513_v56 = vld [vmem:[#allocation163_spill] sm:$0xff]  ;;  %v7907_v23 = vmax.f32 %v2948_v42, 0.0  ;;  %v3510_v41 = vmul.f32 %v7610_v12, %v7896_v32  ;;  %v7929_v42 = vld [vmem:[#allocation6 + $0x1f0] sm:$0xff]  ;;  %v9551_v32 = vld [vmem:[#allocation221_spill] sm:$0xff] }
 0x691   :  { %9511 = vst [vmem:[#allocation101_spill] sm:$0xff] %v7902_v26  ;;  %v3913_v55 = vmul.f32 %v7758_v1, %v9513_v56  ;;  %v3509_v28 = vmul.f32 %v7622_v18, %v7902_v26  ;;  %v9518_v12 = vld [vmem:[#allocation167_spill] sm:$0xff]  ;;  %v4611_v24 = vld [vmem:[#allocation7 + $0x10] sm:$0xff]  ;;  %v8015_v26 = vld [vmem:[#allocation6 + $0x180] sm:$0xff] }
 0x692   :  { %4183 = vmatpush.msra.mxu2 %v3916_v33  ;;  %3832 = vmatpush.msra.mxu3 %v3513_v39  ;;  %9514 = vst [vmem:[#allocation53_spill] sm:$0xff] %v7907_v23  ;;  %v3912_v33 = vmul.f32 %v7768_v25, %v9515_v13  ;;  %v7915_v61 = vmax.f32 %v2947_v34, 0.0  ;;  %v9517_v39 = vld [vmem:[#allocation166_spill] sm:$0xff]  ;;  %v3508_v54 = vmul.f32 %v7634_v46, %v7907_v23  ;;  %v7935_v34 = vld [vmem:[#allocation6 + $0x1e8] sm:$0xff]  ;;  %v7941_v13 = vld [vmem:[#allocation6 + $0x1e0] sm:$0xff] }
 0x693   :  { %v3911_v29 = vmul.f32 %v7778_v0, %v9517_v39  ;;  %v3910_v21 = vmul.f32 %v7788_v31, %v9518_v12  ;;  %v3956_v46 = vmul.f32 %v7642_v10, %v9520_v40  ;;  %v9525_v39 = vld [vmem:[#allocation106_spill] sm:$0xff]  ;;  %v9526_v12 = vld [vmem:[#allocation256_spill] sm:$0xff]  ;;  %v8009_v23 = vld [vmem:[#allocation6 + $0x188] sm:$0xff] }
 0x694   :  { %4184 = vmatpush.msra.mxu2 %v3915_v37  ;;  %3833 = vmatpush.msra.mxu3 %v3512_v35  ;;  %9516 = vst [vmem:[#allocation277_spill] sm:$0xff] %v7915_v61  ;;  %v9519_v37 = vld [vmem:[#allocation251_spill] sm:$0xff]  ;;  %v3507_v18 = vmul.f32 %v7646_v6, %v7915_v61  ;;  %v9522_v6 = vld [vmem:[#allocation254_spill] sm:$0xff] }
 0x695   :  { %v3957_v45 = vmul.f32 %v7626_v27, %v9519_v37  ;;  %v3234_v35 = vld [vmem:[#allocation7 + $0x78] sm:$0xff]  ;;  %v3955_v56 = vmul.f32 %v7660_v44, %v9522_v6  ;;  %v7961_v6 = vld [vmem:[#allocation6 + $0x1c8] sm:$0xff]  ;;  %v8003_v61 = vld [vmem:[#allocation6 + $0x190] sm:$0xff] }
 0x696   :  { %4185 = vmatpush.msra.mxu2 %v3914_v43  ;;  %3834 = vmatpush.msra.mxu3 %v3511_v62  ;;  %v9521_v43 = vld [vmem:[#allocation105_spill] sm:$0xff]  ;;  %v9527_v37 = vld [vmem:[#allocation107_spill] sm:$0xff] }
 0x697   :  { %v3909_v62 = vmul.f32 %v7927_v52, %v9521_v43 }
 0x698   :  { %4186 = vmatpush.msra.mxu2 %v3913_v55  ;;  %3835 = vmatpush.msra.mxu3 %v3510_v41  ;;  %v9523_v55 = vld [vmem:[#allocation104_spill] sm:$0xff] }
 0x699   :  { %v3908_v41 = vmul.f32 %v7929_v42, %v9523_v55 }
 0x69a   :  { %4187 = vmatpush.msra.mxu2 %v3912_v33  ;;  %3836 = vmatpush.msra.mxu3 %v3509_v28  ;;  %v9524_v33 = vld [vmem:[#allocation255_spill] sm:$0xff] }
 0x69b   :  { %v3954_v28 = vmul.f32 %v7672_v59, %v9524_v33 }
 0x69c   :  { %4188 = vmatpush.msra.mxu2 %v3911_v29  ;;  %3837 = vmatpush.msra.mxu3 %v3508_v54  ;;  %v3907_v29 = vmul.f32 %v7935_v34, %v9525_v39  ;;  %v7947_v54 = vld [vmem:[#allocation6 + $0x1d8] sm:$0xff] }
 0x69d   :  { %v9533_v39 = vld [vmem:[#allocation111_spill] sm:$0xff] }
 0x69e   :  { %4189 = vmatpush.msra.mxu2 %v3910_v21  ;;  %3838 = vmatpush.msra.mxu3 %v3507_v18  ;;  %v3953_v21 = vmul.f32 %v7684_v57, %v9526_v12  ;;  %v7953_v18 = vld [vmem:[#allocation6 + $0x1d0] sm:$0xff] }
 0x69f   :  { %4190 = vmatmul.f32.vlgmr.msra.gmra.mxu2 %v4611_v24  ;;  %3839 = vmatmul.f32.vlgmr.msra.gmra.mxu3 %v3234_v35  ;;  %v9528_v35 = vld [vmem:[#allocation257_spill] sm:$0xff]  ;;  %v9534_v12 = vld [vmem:[#allocation262_spill] sm:$0xff] }
 0x6a0   :  { %4214 = vmatpush.msrb.mxu2 %v3957_v45  ;;  %4154 = vmatpush.msrb.mxu3 %v3909_v62  ;;  %v3906_v45 = vmul.f32 %v7941_v13, %v9527_v37  ;;  %v3952_v40 = vmul.f32 %v7694_v5, %v9528_v35  ;;  %v9530_v62 = vld [vmem:[#allocation258_spill] sm:$0xff]  ;;  %v7973_v37 = vld [vmem:[#allocation6 + $0x1b8] sm:$0xff] }
 0x6a1   :  { %v3951_v24 = vmul.f32 %v7704_v58, %v9530_v62  ;;  %v9537_v62 = vld [vmem:[#allocation113_spill] sm:$0xff] }
 0x6a2   :  { %4215 = vmatpush.msrb.mxu2 %v3956_v46  ;;  %4155 = vmatpush.msrb.mxu3 %v3908_v41  ;;  %v9529_v46 = vld [vmem:[#allocation108_spill] sm:$0xff]  ;;  %v9532_v41 = vld [vmem:[#allocation261_spill] sm:$0xff] }
 0x6a3   :  { %v3905_v43 = vmul.f32 %v7947_v54, %v9529_v46  ;;  %v3950_v33 = vmul.f32 %v7714_v17, %v9532_v41  ;;  %v7985_v41 = vld [vmem:[#allocation6 + $0x1a8] sm:$0xff] }
 0x6a4   :  { %4216 = vmatpush.msrb.mxu2 %v3955_v56  ;;  %4156 = vmatpush.msrb.mxu3 %v3907_v29  ;;  %v9531_v56 = vld [vmem:[#allocation110_spill] sm:$0xff]  ;;  %v3903_v29 = vmul.f32 %v7961_v6, %v9533_v39 }
 0x6a5   :  { %v3904_v55 = vmul.f32 %v7953_v18, %v9531_v56  ;;  %v9538_v56 = vld [vmem:[#allocation264_spill] sm:$0xff] }
 0x6a6   :  { %4217 = vmatpush.msrb.mxu2 %v3954_v28  ;;  %4157 = vmatpush.msrb.mxu3 %v3906_v45  ;;  %v7967_v28 = vld [vmem:[#allocation6 + $0x1c0] sm:$0xff] }
 0x6a7   :  { %v9535_v45 = vld [vmem:[#allocation112_spill] sm:$0xff] }
 0x6a8   :  { %4218 = vmatpush.msrb.mxu2 %v3953_v21  ;;  %4158 = vmatpush.msrb.mxu3 %v3905_v43  ;;  %v3949_v21 = vmul.f32 %v7722_v19, %v9534_v12  ;;  %v3902_v35 = vmul.f32 %v7967_v28, %v9535_v45  ;;  %v7979_v43 = vld [vmem:[#allocation6 + $0x1b0] sm:$0xff]  ;;  %v7991_v45 = vld [vmem:[#allocation6 + $0x1a0] sm:$0xff] }
 0x6aa   :  { %4219 = vmatpush.msrb.mxu2 %v3952_v40  ;;  %4159 = vmatpush.msrb.mxu3 %v3904_v55  ;;  %v9536_v40 = vld [vmem:[#allocation263_spill] sm:$0xff]  ;;  %v3947_v55 = vmul.f32 %v7740_v51, %v9538_v56 }
 0x6ab   :  { %v3948_v46 = vmul.f32 %v7730_v53, %v9536_v40  ;;  %v9542_v40 = vld [vmem:[#allocation268_spill] sm:$0xff]  ;;  %v7997_v56 = vld [vmem:[#allocation6 + $0x198] sm:$0xff] }
 0x6ac   :  { %4220 = vmatpush.msrb.mxu2 %v3951_v24  ;;  %4160 = vmatpush.msrb.mxu3 %v3903_v29  ;;  %v3901_v24 = vmul.f32 %v7973_v37, %v9537_v62  ;;  %v9540_v29 = vld [vmem:[#allocation266_spill] sm:$0xff]  ;;  %v3945_v62 = vmul.f32 %v7758_v1, %v9542_v40 }
 0x6ad   :  { %v3946_v12 = vmul.f32 %v7748_v36, %v9540_v29 }
 0x6ae   :  { %4221 = vmatpush.msrb.mxu2 %v3950_v33  ;;  %4161 = vmatpush.msrb.mxu3 %v3902_v35  ;;  %v9539_v33 = vld [vmem:[#allocation115_spill] sm:$0xff] }
 0x6af   :  { %v3900_v39 = vmul.f32 %v7979_v43, %v9539_v33  ;;  %v9544_v33 = vld [vmem:[#allocation271_spill] sm:$0xff] }
 0x6b0   :  { %4222 = vmatpush.msrb.mxu2 %v3949_v21  ;;  %4162 = vmatpush.msrb.mxu3 %v3901_v24  ;;  %v9541_v21 = vld [vmem:[#allocation116_spill] sm:$0xff]  ;;  %v3944_v29 = vmul.f32 %v7768_v25, %v9544_v33 }
 0x6b1   :  { %v3899_v35 = vmul.f32 %v7985_v41, %v9541_v21  ;;  %v9546_v21 = vld [vmem:[#allocation272_spill] sm:$0xff] }
 0x6b2   :  { %4223 = vmatpush.msrb.mxu2 %v3948_v46  ;;  %4163 = vmatpush.msrb.mxu3 %v3900_v39  ;;  %v9543_v46 = vld [vmem:[#allocation118_spill] sm:$0xff]  ;;  %v3943_v40 = vmul.f32 %v7778_v0, %v9546_v21 }
 0x6b3   :  { %v3898_v24 = vmul.f32 %v7991_v45, %v9543_v46  ;;  %v9548_v46 = vld [vmem:[#allocation275_spill] sm:$0xff] }
 0x6b4   :  { %4224 = vmatpush.msrb.mxu2 %v3947_v55  ;;  %4164 = vmatpush.msrb.mxu3 %v3899_v35  ;;  %v9545_v55 = vld [vmem:[#allocation119_spill] sm:$0xff]  ;;  %v3942_v33 = vmul.f32 %v7788_v31, %v9548_v46  ;;  %v9553_v46 = vld [vmem:[#allocation193_spill] sm:$0xff] }
 0x6b5   :  { %v3897_v39 = vmul.f32 %v7997_v56, %v9545_v55  ;;  %v9550_v55 = vld [vmem:[#allocation122_spill] sm:$0xff]  ;;  %v3941_v11 = vmul.f32 %v7927_v52, %v9553_v46  ;;  %v9558_v46 = vld [vmem:[#allocation299_spill] sm:$0xff] }
 0x6b6   :  { %4225 = vmatpush.msrb.mxu2 %v3946_v12  ;;  %4165 = vmatpush.msrb.mxu3 %v3898_v24  ;;  %v9547_v12 = vld [vmem:[#allocation121_spill] sm:$0xff]  ;;  %v3895_v21 = vmul.f32 %v8009_v23, %v9550_v55 }
 0x6b7   :  { %v3896_v35 = vmul.f32 %v8003_v61, %v9547_v12 }
 0x6b8   :  { %4226 = vmatpush.msrb.mxu2 %v3945_v62  ;;  %4166 = vmatpush.msrb.mxu3 %v3897_v39  ;;  %v9549_v62 = vld [vmem:[#allocation223_spill] sm:$0xff] }
 0x6b9   :  { %v3989_v24 = vmul.f32 %v7626_v27, %v9549_v62  ;;  %v9552_v39 = vld [vmem:[#allocation123_spill] sm:$0xff]  ;;  %v9555_v62 = vld [vmem:[#allocation192_spill] sm:$0xff] }
 0x6ba   :  { %4227 = vmatpush.msrb.mxu2 %v3944_v29  ;;  %4167 = vmatpush.msrb.mxu3 %v3896_v35  ;;  %v3988_v29 = vmul.f32 %v7642_v10, %v9551_v32  ;;  %v3894_v12 = vmul.f32 %v8015_v26, %v9552_v39  ;;  %v3987_v35 = vmul.f32 %v7660_v44, %v9554_v22  ;;  %v9556_v32 = vld [vmem:[#allocation298_spill] sm:$0xff]  ;;  %v9559_v22 = vld [vmem:[#allocation195_spill] sm:$0xff] }
 0x6bb   :  { %v3986_v55 = vmul.f32 %v7672_v59, %v9556_v32  ;;  %v9562_v32 = vld [vmem:[#allocation301_spill] sm:$0xff] }
 0x6bc   :  { %4228 = vmatpush.msrb.mxu2 %v3943_v40  ;;  %4168 = vmatpush.msrb.mxu3 %v3895_v21  ;;  %v4612_v40 = vld [vmem:[#allocation7 + $0x20] sm:$0xff]  ;;  %v4613_v21 = vld [vmem:[#allocation7 + $0x8] sm:$0xff] }
 0x6be   :  { %4229 = vmatpush.msrb.mxu2 %v3942_v33  ;;  %4169 = vmatpush.msrb.mxu3 %v3894_v12  ;;  %v3940_v33 = vmul.f32 %v7929_v42, %v9555_v62  ;;  %v9560_v12 = vld [vmem:[#allocation300_spill] sm:$0xff] }
 0x6bf   :  { %4230 = vmatmul.f32.vlgmr.msrb.gmra.mxu2 %v4612_v40  ;;  %4170 = vmatmul.f32.vlgmr.msrb.gmra.mxu3 %v4613_v21  ;;  %v3985_v40 = vmul.f32 %v7684_v57, %v9558_v46  ;;  %v3983_v21 = vmul.f32 %v7704_v58, %v9562_v32  ;;  %v9569_v32 = vld [vmem:[#allocation201_spill] sm:$0xff] }
 0x6c0   :  { %4254 = vmatpush.msra.mxu2 %v3989_v24  ;;  %4194 = vmatpush.msra.mxu3 %v3941_v11  ;;  %v9557_v24 = vld [vmem:[#allocation194_spill] sm:$0xff]  ;;  %v3984_v11 = vmul.f32 %v7694_v5, %v9560_v12  ;;  %v9567_v12 = vld [vmem:[#allocation200_spill] sm:$0xff] }
 0x6c1   :  { %v3939_v39 = vmul.f32 %v7935_v34, %v9557_v24  ;;  %v9564_v24 = vld [vmem:[#allocation302_spill] sm:$0xff] }
 0x6c2   :  { %4255 = vmatpush.msra.mxu2 %v3988_v29  ;;  %4195 = vmatpush.msra.mxu3 %v3940_v33  ;;  %v3938_v29 = vmul.f32 %v7941_v13, %v9559_v22  ;;  %v9563_v33 = vld [vmem:[#allocation198_spill] sm:$0xff]  ;;  %v3982_v46 = vmul.f32 %v7714_v17, %v9564_v24  ;;  %v9566_v22 = vld [vmem:[#allocation303_spill] sm:$0xff]  ;;  %v9571_v24 = vld [vmem:[#allocation204_spill] sm:$0xff] }
 0x6c4   :  { %4256 = vmatpush.msra.mxu2 %v3987_v35  ;;  %4196 = vmatpush.msra.mxu3 %v3939_v39  ;;  %v9561_v35 = vld [vmem:[#allocation196_spill] sm:$0xff]  ;;  %v9565_v39 = vld [vmem:[#allocation199_spill] sm:$0xff] }
 0x6c5   :  { %v3937_v62 = vmul.f32 %v7947_v54, %v9561_v35  ;;  %v9568_v35 = vld [vmem:[#allocation304_spill] sm:$0xff] }
 0x6c6   :  { %4257 = vmatpush.msra.mxu2 %v3986_v55  ;;  %4197 = vmatpush.msra.mxu3 %v3938_v29  ;;  %v3936_v55 = vmul.f32 %v7953_v18, %v9563_v33  ;;  %v3981_v29 = vmul.f32 %v7722_v19, %v9566_v22  ;;  %v9570_v33 = vld [vmem:[#allocation305_spill] sm:$0xff] }
 0x6c7   :  { %v9573_v22 = vld [vmem:[#allocation205_spill] sm:$0xff] }
 0x6c8   :  { %4258 = vmatpush.msra.mxu2 %v3985_v40  ;;  %4198 = vmatpush.msra.mxu3 %v3937_v62  ;;  %v3935_v40 = vmul.f32 %v7961_v6, %v9565_v39  ;;  %v3980_v62 = vmul.f32 %v7730_v53, %v9568_v35  ;;  %v9572_v39 = vld [vmem:[#allocation306_spill] sm:$0xff]  ;;  %v9575_v35 = vld [vmem:[#allocation207_spill] sm:$0xff] }
 0x6ca   :  { %4259 = vmatpush.msra.mxu2 %v3984_v11  ;;  %4199 = vmatpush.msra.mxu3 %v3936_v55  ;;  %v3934_v11 = vmul.f32 %v7967_v28, %v9567_v12  ;;  %v3979_v55 = vmul.f32 %v7740_v51, %v9570_v33  ;;  %v9574_v12 = vld [vmem:[#allocation267_spill] sm:$0xff]  ;;  %v9577_v33 = vld [vmem:[#allocation209_spill] sm:$0xff] }
 0x6cc   :  { %4260 = vmatpush.msra.mxu2 %v3983_v21  ;;  %4200 = vmatpush.msra.mxu3 %v3935_v40  ;;  %v3933_v21 = vmul.f32 %v7973_v37, %v9569_v32  ;;  %v3978_v40 = vmul.f32 %v7748_v36, %v9572_v39  ;;  %v9576_v32 = vld [vmem:[#allocation274_spill] sm:$0xff]  ;;  %v9579_v39 = vld [vmem:[#allocation212_spill] sm:$0xff] }
 0x6ce   :  { %4261 = vmatpush.msra.mxu2 %v3982_v46  ;;  %4201 = vmatpush.msra.mxu3 %v3934_v11  ;;  %v3932_v46 = vmul.f32 %v7979_v43, %v9571_v24  ;;  %v3977_v11 = vmul.f32 %v7758_v1, %v9574_v12  ;;  %v9578_v24 = vld [vmem:[#allocation269_spill] sm:$0xff] }
 0x6cf   :  { %v9581_v12 = vld [vmem:[#allocation325_spill] sm:$0xff] }
 0x6d0   :  { %4262 = vmatpush.msra.mxu2 %v3981_v29  ;;  %4202 = vmatpush.msra.mxu3 %v3933_v21  ;;  %v3931_v29 = vmul.f32 %v7985_v41, %v9573_v22  ;;  %v3976_v21 = vmul.f32 %v7768_v25, %v9576_v32  ;;  %v9580_v22 = vld [vmem:[#allocation260_spill] sm:$0xff] }
 0x6d1   :  { %v9583_v32 = vld [vmem:[#allocation324_spill] sm:$0xff] }
 0x6d2   :  { %4263 = vmatpush.msra.mxu2 %v3980_v62  ;;  %4203 = vmatpush.msra.mxu3 %v3932_v46  ;;  %v3930_v62 = vmul.f32 %v7991_v45, %v9575_v35  ;;  %v3975_v46 = vmul.f32 %v7778_v0, %v9578_v24  ;;  %v4021_v35 = vmul.f32 %v7626_v27, %v9581_v12  ;;  %v9585_v24 = vld [vmem:[#allocation284_spill] sm:$0xff] }
 0x6d3   :  { %v9587_v12 = vld [vmem:[#allocation288_spill] sm:$0xff] }
 0x6d4   :  { %4264 = vmatpush.msra.mxu2 %v3979_v55  ;;  %4204 = vmatpush.msra.mxu3 %v3931_v29  ;;  %v3929_v55 = vmul.f32 %v7997_v56, %v9577_v33  ;;  %v3974_v29 = vmul.f32 %v7788_v31, %v9580_v22  ;;  %v4020_v33 = vmul.f32 %v7642_v10, %v9583_v32  ;;  %v9586_v22 = vld [vmem:[#allocation326_spill] sm:$0xff] }
 0x6d6   :  { %4265 = vmatpush.msra.mxu2 %v3978_v40  ;;  %4205 = vmatpush.msra.mxu3 %v3930_v62  ;;  %v3928_v40 = vmul.f32 %v8003_v61, %v9579_v39  ;;  %v3973_v39 = vmul.f32 %v7927_v52, %v9585_v24 }
 0x6d8   :  { %4266 = vmatpush.msra.mxu2 %v3977_v11  ;;  %4206 = vmatpush.msra.mxu3 %v3929_v55  ;;  %v9582_v11 = vld [vmem:[#allocation214_spill] sm:$0xff] }
 0x6d9   :  { %v3927_v62 = vmul.f32 %v8009_v23, %v9582_v11  ;;  %v3540_v11 = vpop.f32.mrf.mxu2 }
 0x6da   :  { %4267 = vmatpush.msra.mxu2 %v3976_v21  ;;  %4207 = vmatpush.msra.mxu3 %v3928_v40  ;;  %v9584_v21 = vld [vmem:[#allocation217_spill] sm:$0xff]  ;;  %v4019_v40 = vmul.f32 %v7660_v44, %v9586_v22 }
 0x6db   :  { %v3926_v55 = vmul.f32 %v8015_v26, %v9584_v21  ;;  %v4615_v21 = vld [vmem:[#allocation7 + $0x18] sm:$0xff] }
 0x6dc   :  { %4268 = vmatpush.msra.mxu2 %v3975_v46  ;;  %4208 = vmatpush.msra.mxu3 %v3927_v62  ;;  %v4614_v46 = vld [vmem:[#allocation7 + $0x30] sm:$0xff]  ;;  %v9588_v62 = vld [vmem:[#allocation327_spill] sm:$0xff] }
 0x6dd   :  { %v4018_v32 = vmul.f32 %v7672_v59, %v9588_v62  ;;  %v9593_v62 = vld [vmem:[#allocation290_spill] sm:$0xff] }
 0x6de   :  { %4269 = vmatpush.msra.mxu2 %v3974_v29  ;;  %4209 = vmatpush.msra.mxu3 %v3926_v55  ;;  %v3972_v29 = vmul.f32 %v7929_v42, %v9587_v12  ;;  %v9592_v12 = vld [vmem:[#allocation330_spill] sm:$0xff] }
 0x6df   :  { %4270 = vmatmul.f32.vlgmr.msra.gmra.mxu2 %v4614_v46  ;;  %4210 = vmatmul.f32.vlgmr.msra.gmra.mxu3 %v4615_v21  ;;  %v9590_v46 = vld [vmem:[#allocation329_spill] sm:$0xff]  ;;  %v3969_v21 = vmul.f32 %v7947_v54, %v9593_v62  ;;  %v9598_v62 = vld [vmem:[#allocation332_spill] sm:$0xff] }
 0x6e0   :  { %4294 = vmatpush.msrb.mxu2 %v4021_v35  ;;  %4234 = vmatpush.msrb.mxu3 %v3973_v39  ;;  %v9589_v35 = vld [vmem:[#allocation287_spill] sm:$0xff]  ;;  %v4017_v22 = vmul.f32 %v7684_v57, %v9590_v46  ;;  %v4016_v39 = vmul.f32 %v7694_v5, %v9592_v12  ;;  %v9596_v46 = vld [vmem:[#allocation77_spill] sm:$0xff] }
 0x6e1   :  { %v3971_v24 = vmul.f32 %v7935_v34, %v9589_v35  ;;  %v9595_v35 = vld [vmem:[#allocation291_spill] sm:$0xff]  ;;  %v3580_v12 = vpop.f32.mrf.mxu2 }
 0x6e2   :  { %4295 = vmatpush.msrb.mxu2 %v4020_v33  ;;  %4235 = vmatpush.msrb.mxu3 %v3972_v29  ;;  %v9591_v33 = vld [vmem:[#allocation289_spill] sm:$0xff]  ;;  %v4015_v29 = vmul.f32 %v7704_v58, %v9594_v4  ;;  %v3966_v4 = vmul.f32 %v7967_v28, %v9599_v14  ;;  %v4010_v14 = vmul.f32 %v7748_v36, %v9604_v8  ;;  %v9609_v8 = vld [vmem:[#allocation208_spill] sm:$0xff] }
 0x6e3   :  { %v3970_v55 = vmul.f32 %v7941_v13, %v9591_v33  ;;  %v9597_v33 = vld [vmem:[#allocation292_spill] sm:$0xff] }
 0x6e4   :  { %4296 = vmatpush.msrb.mxu2 %v4019_v40  ;;  %4236 = vmatpush.msrb.mxu3 %v3971_v24  ;;  %v3560_v40 = vpop.f32.mrf.mxu3  ;;  %v4014_v24 = vmul.f32 %v7714_v17, %v9596_v46  ;;  %v9602_v46 = vld [vmem:[#allocation237_spill] sm:$0xff] }
 0x6e5   :  { %v3561_v3 = vadd.f32 %v3560_v40, %v3540_v11  ;;  %v9614_v40 = vld [vmem:[#allocation211_spill] sm:$0xff] }
 0x6e6   :  { %4297 = vmatpush.msrb.mxu2 %v4018_v32  ;;  %4237 = vmatpush.msrb.mxu3 %v3970_v55  ;;  %v3968_v32 = vmul.f32 %v7953_v18, %v9595_v35  ;;  %v4013_v55 = vmul.f32 %v7722_v19, %v9598_v62  ;;  %v9601_v35 = vld [vmem:[#allocation294_spill] sm:$0xff] }
 0x6e7   :  { %v3581_v2 = vadd.f32 %v3580_v12, %v3561_v3  ;;  %v4616_v3 = vld [vmem:[#allocation7 + $0x40] sm:$0xff]  ;;  %v9617_v12 = vld [vmem:[#allocation273_spill] sm:$0xff] }
 0x6e8   :  { %4298 = vmatpush.msrb.mxu2 %v4017_v22  ;;  %4238 = vmatpush.msrb.mxu3 %v3969_v21  ;;  %v3967_v22 = vmul.f32 %v7961_v6, %v9597_v33  ;;  %v4011_v33 = vmul.f32 %v7740_v51, %v9602_v46 }
 0x6e9   :  { %v3620_v46 = vpop.f32.mrf.mxu2 }
 0x6ea   :  { %4299 = vmatpush.msrb.mxu2 %v4016_v39  ;;  %4239 = vmatpush.msrb.mxu3 %v3968_v32  ;;  %v9600_v39 = vld [vmem:[#allocation333_spill] sm:$0xff]  ;;  %v9603_v32 = vld [vmem:[#allocation295_spill] sm:$0xff] }
 0x6eb   :  { %v4012_v21 = vmul.f32 %v7730_v53, %v9600_v39  ;;  %v3964_v62 = vmul.f32 %v7979_v43, %v9603_v32  ;;  %v9606_v39 = vld [vmem:[#allocation336_spill] sm:$0xff]  ;;  %v9608_v32 = vld [vmem:[#allocation337_spill] sm:$0xff] }
 0x6ec   :  { %4300 = vmatpush.msrb.mxu2 %v4015_v29  ;;  %4240 = vmatpush.msrb.mxu3 %v3967_v22  ;;  %v3965_v29 = vmul.f32 %v7973_v37, %v9601_v35  ;;  %v9605_v22 = vld [vmem:[#allocation296_spill] sm:$0xff]  ;;  %v9607_v35 = vld [vmem:[#allocation206_spill] sm:$0xff] }
 0x6ee   :  { %4301 = vmatpush.msrb.mxu2 %v4014_v24  ;;  %4241 = vmatpush.msrb.mxu3 %v3966_v4  ;;  %v3600_v24 = vpop.f32.mrf.mxu3  ;;  %v4009_v4 = vmul.f32 %v7758_v1, %v9606_v39  ;;  %v9611_v39 = vld [vmem:[#allocation220_spill] sm:$0xff] }
 0x6f0   :  { %4302 = vmatpush.msrb.mxu2 %v4013_v55  ;;  %4242 = vmatpush.msrb.mxu3 %v3965_v29  ;;  %v3963_v55 = vmul.f32 %v7985_v41, %v9605_v22  ;;  %v4008_v29 = vmul.f32 %v7768_v25, %v9608_v32  ;;  %v9610_v22 = vld [vmem:[#allocation28_spill] sm:$0xff]  ;;  %v9613_v32 = vld [vmem:[#allocation78_spill] sm:$0xff] }
 0x6f1   :  { %v4053_v11 = vmul.f32 %v7626_v27, %v9613_v32  ;;  %v4005_v27 = vmul.f32 %v7927_v52, %v9617_v12  ;;  %v9619_v32 = vld [vmem:[#allocation270_spill] sm:$0xff] }
 0x6f2   :  { %4303 = vmatpush.msrb.mxu2 %v4012_v21  ;;  %4243 = vmatpush.msrb.mxu3 %v3964_v62  ;;  %v3962_v21 = vmul.f32 %v7991_v45, %v9607_v35  ;;  %v4007_v62 = vmul.f32 %v7778_v0, %v9610_v22  ;;  %v9612_v35 = vld [vmem:[#allocation239_spill] sm:$0xff] }
 0x6f4   :  { %4304 = vmatpush.msrb.mxu2 %v4011_v33  ;;  %4244 = vmatpush.msrb.mxu3 %v3963_v55  ;;  %v3961_v33 = vmul.f32 %v7997_v56, %v9609_v8  ;;  %v4006_v55 = vmul.f32 %v7788_v31, %v9612_v35  ;;  %v9615_v8 = vld [vmem:[#allocation203_spill] sm:$0xff]  ;;  %v9618_v35 = vld [vmem:[#allocation74_spill] sm:$0xff] }
 0x6f6   :  { %4305 = vmatpush.msrb.mxu2 %v4010_v14  ;;  %4245 = vmatpush.msrb.mxu3 %v3962_v21  ;;  %v3960_v14 = vmul.f32 %v8003_v61, %v9611_v39  ;;  %v3640_v21 = vpop.f32.mrf.mxu3  ;;  %v3601_v39 = vadd.f32 %v3600_v24, %v3581_v2 }
 0x6f8   :  { %4306 = vmatpush.msrb.mxu2 %v4009_v4  ;;  %4246 = vmatpush.msrb.mxu3 %v3961_v33  ;;  %v3959_v4 = vmul.f32 %v8009_v23, %v9614_v40  ;;  %v9616_v33 = vld [vmem:[#allocation27_spill] sm:$0xff]  ;;  %v3621_v24 = vadd.f32 %v3620_v46, %v3601_v39  ;;  %v9621_v40 = vld [vmem:[#allocation276_spill] sm:$0xff] }
 0x6f9   :  { %v4052_v22 = vmul.f32 %v7642_v10, %v9616_v33  ;;  %v9620_v10 = vld [vmem:[#allocation26_spill] sm:$0xff]  ;;  %v9626_v39 = vld [vmem:[#allocation51_spill] sm:$0xff] }
 0x6fa   :  { %4307 = vmatpush.msrb.mxu2 %v4008_v29  ;;  %4247 = vmatpush.msrb.mxu3 %v3960_v14  ;;  %v3958_v29 = vmul.f32 %v8015_v26, %v9615_v8  ;;  %v4051_v14 = vmul.f32 %v7660_v44, %v9618_v35  ;;  %v4050_v2 = vmul.f32 %v7672_v59, %v9620_v10  ;;  %v9622_v8 = vld [vmem:[#allocation70_spill] sm:$0xff]  ;;  %v9625_v59 = vld [vmem:[#allocation307_spill] sm:$0xff] }
 0x6fb   :  { %v9623_v44 = vld [vmem:[#allocation278_spill] sm:$0xff]  ;;  %v4001_v46 = vmul.f32 %v7947_v54, %v9625_v59  ;;  %v4047_v35 = vmul.f32 %v7704_v58, %v9626_v39 }
 0x6fc   :  { %4308 = vmatpush.msrb.mxu2 %v4007_v62  ;;  %4248 = vmatpush.msrb.mxu3 %v3959_v4  ;;  %v3660_v62 = vpop.f32.mrf.mxu2  ;;  %v4003_v4 = vmul.f32 %v7935_v34, %v9621_v40  ;;  %v4002_v33 = vmul.f32 %v7941_v13, %v9623_v44  ;;  %v9632_v44 = vld [vmem:[#allocation23_spill] sm:$0xff] }
 0x6fe   :  { %4309 = vmatpush.msrb.mxu2 %v4006_v55  ;;  %4249 = vmatpush.msrb.mxu3 %v3958_v29  ;;  %v4617_v55 = vld [vmem:[#allocation7 + $0x28] sm:$0xff]  ;;  %v4049_v29 = vmul.f32 %v7684_v57, %v9622_v8 }
 0x6ff   :  { %4310 = vmatmul.f32.vlgmr.msrb.gmra.mxu2 %v4616_v3  ;;  %4250 = vmatmul.f32.vlgmr.msrb.gmra.mxu3 %v4617_v55  ;;  %v9624_v3 = vld [vmem:[#allocation25_spill] sm:$0xff] }
 0x700   :  { %4334 = vmatpush.msra.mxu2 %v4053_v11  ;;  %v4004_v11 = vmul.f32 %v7929_v42, %v9619_v32  ;;  %4274 = vmatpush.msra.mxu3 %v4005_v27  ;;  %v4048_v12 = vmul.f32 %v7694_v5, %v9624_v3  ;;  %v3641_v27 = vadd.f32 %v3640_v21, %v3621_v24  ;;  %v9628_v32 = vld [vmem:[#allocation234_spill] sm:$0xff]  ;;  %v9630_v24 = vld [vmem:[#allocation49_spill] sm:$0xff] }
 0x701   :  { %v4045_v40 = vmul.f32 %v7722_v19, %v9630_v24  ;;  %v9639_v24 = vld [vmem:[#allocation315_spill] sm:$0xff] }
 0x702   :  { %4335 = vmatpush.msra.mxu2 %v4052_v22  ;;  %4275 = vmatpush.msra.mxu3 %v4004_v11  ;;  %v3680_v22 = vpop.f32.mrf.mxu3  ;;  %v4046_v11 = vmul.f32 %v7714_v17, %v9628_v32  ;;  %v3661_v10 = vadd.f32 %v3660_v62, %v3641_v27  ;;  %v9634_v27 = vld [vmem:[#allocation52_spill] sm:$0xff] }
 0x703   :  { %v4043_v59 = vmul.f32 %v7740_v51, %v9634_v27  ;;  %v9643_v27 = vld [vmem:[#allocation318_spill] sm:$0xff] }
 0x704   :  { %4336 = vmatpush.msra.mxu2 %v4051_v14  ;;  %4276 = vmatpush.msra.mxu3 %v4003_v4  ;;  %v9627_v14 = vld [vmem:[#allocation308_spill] sm:$0xff]  ;;  %v3700_v55 = vpop.f32.mrf.mxu2  ;;  %v9631_v4 = vld [vmem:[#allocation310_spill] sm:$0xff]  ;;  %v3681_v3 = vadd.f32 %v3680_v22, %v3661_v10 }
 0x705   :  { %v4000_v57 = vmul.f32 %v7953_v18, %v9627_v14  ;;  %v3998_v8 = vmul.f32 %v7967_v28, %v9631_v4  ;;  %v9636_v14 = vld [vmem:[#allocation22_spill] sm:$0xff] }
 0x706   :  { %4337 = vmatpush.msra.mxu2 %v4050_v2  ;;  %4277 = vmatpush.msra.mxu3 %v4002_v33  ;;  %v9629_v2 = vld [vmem:[#allocation309_spill] sm:$0xff]  ;;  %v4044_v33 = vmul.f32 %v7730_v53, %v9632_v44  ;;  %v3701_v32 = vadd.f32 %v3700_v55, %v3681_v3  ;;  %v9638_v10 = vld [vmem:[#allocation46_spill] sm:$0xff]  ;;  %v9642_v3 = vld [vmem:[#allocation43_spill] sm:$0xff] }
 0x707   :  { %v3999_v21 = vmul.f32 %v7961_v6, %v9629_v2  ;;  %v4041_v2 = vmul.f32 %v7758_v1, %v9638_v10 }
 0x708   :  { %4338 = vmatpush.msra.mxu2 %v4049_v29  ;;  %4278 = vmatpush.msra.mxu3 %v4001_v46  ;;  %v9635_v46 = vld [vmem:[#allocation312_spill] sm:$0xff] }
 0x709   :  { %v3996_v39 = vmul.f32 %v7979_v43, %v9635_v46  ;;  %v9644_v46 = vld [vmem:[#allocation229_spill] sm:$0xff] }
 0x70a   :  { %4339 = vmatpush.msra.mxu2 %v4048_v12  ;;  %4279 = vmatpush.msra.mxu3 %v4000_v57  ;;  %v3720_v29 = vpop.f32.mrf.mxu3  ;;  %v9633_v12 = vld [vmem:[#allocation311_spill] sm:$0xff]  ;;  %v4042_v57 = vmul.f32 %v7748_v36, %v9636_v14 }
 0x70b   :  { %v3997_v62 = vmul.f32 %v7973_v37, %v9633_v12  ;;  %v4039_v12 = vmul.f32 %v7778_v0, %v9642_v3  ;;  %v8209_v14 = vld [vmem:[#allocation6 + $0x178] sm:$0xff] }
 0x70c   :  { %4340 = vmatpush.msra.mxu2 %v4047_v35  ;;  %4280 = vmatpush.msra.mxu3 %v3999_v21  ;;  %v3740_v35 = vpop.f32.mrf.mxu2  ;;  %v3721_v21 = vadd.f32 %v3720_v29, %v3701_v32  ;;  %v3992_v29 = vmul.f32 %v8003_v61, %v9643_v27 }
 0x70e   :  { %4341 = vmatpush.msra.mxu2 %v4046_v11  ;;  %4281 = vmatpush.msra.mxu3 %v3998_v8  ;;  %v9637_v11 = vld [vmem:[#allocation314_spill] sm:$0xff]  ;;  %v9640_v8 = vld [vmem:[#allocation21_spill] sm:$0xff] }
 0x70f   :  { %v3995_v22 = vmul.f32 %v7985_v41, %v9637_v11  ;;  %v4040_v44 = vmul.f32 %v7768_v25, %v9640_v8 }
 0x710   :  { %4342 = vmatpush.msra.mxu2 %v4045_v40  ;;  %4282 = vmatpush.msra.mxu3 %v3997_v62  ;;  %v3994_v40 = vmul.f32 %v7991_v45, %v9639_v24  ;;  %v3741_v62 = vadd.f32 %v3740_v35, %v3721_v21  ;;  %v8215_v35 = vld [vmem:[#allocation6 + $0x170] sm:$0xff]  ;;  %v9648_v24 = vld [vmem:[#allocation319_spill] sm:$0xff] }
 0x712   :  { %4343 = vmatpush.msra.mxu2 %v4044_v33  ;;  %4283 = vmatpush.msra.mxu3 %v3996_v39  ;;  %v3760_v4 = vpop.f32.mrf.mxu3  ;;  %v9641_v33 = vld [vmem:[#allocation316_spill] sm:$0xff]  ;;  %v4038_v39 = vmul.f32 %v7788_v31, %v9644_v46 }
 0x713   :  { %v3993_v55 = vmul.f32 %v7997_v56, %v9641_v33  ;;  %v3761_v11 = vadd.f32 %v3760_v4, %v3741_v62  ;;  %v8221_v4 = vld [vmem:[#allocation6 + $0x168] sm:$0xff]  ;;  %v8227_v46 = vld [vmem:[#allocation6 + $0x160] sm:$0xff] }
 0x714   :  { %4344 = vmatpush.msra.mxu2 %v4043_v59  ;;  %4284 = vmatpush.msra.mxu3 %v3995_v22  ;;  %v3780_v59 = vpop.f32.mrf.mxu2  ;;  %v9646_v22 = vld [vmem:[#allocation29_spill] sm:$0xff] }
 0x715   :  { %v3991_v10 = vmul.f32 %v8009_v23, %v9646_v22  ;;  %v3781_v33 = vadd.f32 %v3780_v59, %v3761_v11  ;;  %v4036_v59 = vmul.f32 %v7929_v42, %v7310_v63  ;;  %v8233_v11 = vld [vmem:[#allocation6 + $0x158] sm:$0xff]  ;;  %v9652_v22 = vld [vmem:[#allocation42_spill] sm:$0xff]  ;;  %v4034_v63 = vmul.f32 %v7941_v13, %v7315_v49  ;;  %v9656_v49 = vld [vmem:[#allocation16_spill] sm:$0xff] }
 0x716   :  { %4345 = vmatpush.msra.mxu2 %v4042_v57  ;;  %4285 = vmatpush.msra.mxu3 %v3994_v40  ;;  %v9645_v57 = vld [vmem:[#allocation228_spill] sm:$0xff]  ;;  %v3990_v40 = vmul.f32 %v8015_v26, %v9648_v24  ;;  %v9653_v24 = vld [vmem:[#allocation18_spill] sm:$0xff] }
 0x717   :  { %v4085_v32 = vmul.f32 %v8209_v14, %v9645_v57 }
 0x718   :  { %4346 = vmatpush.msra.mxu2 %v4041_v2  ;;  %4286 = vmatpush.msra.mxu3 %v3993_v55  ;;  %v9647_v2 = vld [vmem:[#allocation232_spill] sm:$0xff]  ;;  %v9649_v55 = vld [vmem:[#allocation230_spill] sm:$0xff] }
 0x719   :  { %v4084_v21 = vmul.f32 %v8215_v35, %v9647_v2  ;;  %v4083_v3 = vmul.f32 %v8221_v4, %v9649_v55  ;;  %v4035_v2 = vmul.f32 %v7935_v34, %v7307_v60  ;;  %v9655_v60 = vld [vmem:[#allocation17_spill] sm:$0xff] }
 0x71a   :  { %4347 = vmatpush.msra.mxu2 %v4040_v44  ;;  %4287 = vmatpush.msra.mxu3 %v3992_v29  ;;  %v3800_v8 = vpop.f32.mrf.mxu3  ;;  %v4620_v44 = vld [vmem:[#allocation7 + $0x50] sm:$0xff]  ;;  %v4622_v29 = vld [vmem:[#allocation7 + $0x38] sm:$0xff] }
 0x71b   :  { %v3801_v27 = vadd.f32 %v3800_v8, %v3781_v33  ;;  %v9654_v33 = vld [vmem:[#allocation38_spill] sm:$0xff] }
 0x71c   :  { %4348 = vmatpush.msra.mxu2 %v4039_v12  ;;  %4288 = vmatpush.msra.mxu3 %v3991_v10  ;;  %v9650_v12 = vld [vmem:[#allocation321_spill] sm:$0xff]  ;;  %v4081_v10 = vmul.f32 %v8233_v11, %v9652_v22  ;;  %v4079_v55 = vmul.f32 %v7704_v58, %v9654_v33  ;;  %v4031_v58 = vmul.f32 %v7961_v6, %v7333_v50 }
 0x71d   :  { %v4037_v62 = vmul.f32 %v7927_v52, %v9650_v12  ;;  %v4078_v12 = vmul.f32 %v7714_v17, %v9655_v60  ;;  %v9658_v17 = vld [vmem:[#allocation15_spill] sm:$0xff] }
 0x71e   :  { %4349 = vmatpush.msra.mxu2 %v4038_v39  ;;  %4289 = vmatpush.msra.mxu3 %v3990_v40  ;;  %v9651_v39 = vld [vmem:[#allocation47_spill] sm:$0xff]  ;;  %v4080_v40 = vmul.f32 %v7694_v5, %v9653_v24  ;;  %v4032_v5 = vmul.f32 %v7953_v18, %v7326_v7  ;;  %v4075_v7 = vmul.f32 %v7740_v51, %v9658_v17  ;;  %v9663_v51 = vld [vmem:[#allocation168_spill] sm:$0xff]  ;;  %v9666_v24 = vld [vmem:[#allocation174_spill] sm:$0xff] }
 0x71f   :  { %4350 = vmatmul.f32.vlgmr.msra.gmra.mxu2 %v4620_v44  ;;  %4290 = vmatmul.f32.vlgmr.msra.gmra.mxu3 %v4622_v29  ;;  %v4082_v57 = vmul.f32 %v8227_v46, %v9651_v39  ;;  %v4030_v29 = vmul.f32 %v7967_v28, %v7340_v15  ;;  %v4029_v39 = vmul.f32 %v7973_v37, %v7342_v47 }
 0x720   :  { %4374 = vmatpush.msrb.mxu2 %v4085_v32  ;;  %v3820_v32 = vpop.f32.mrf.mxu2  ;;  %4314 = vmatpush.msrb.mxu3 %v4037_v62  ;;  %v4077_v62 = vmul.f32 %v7722_v19, %v9656_v49  ;;  %v9659_v19 = vld [vmem:[#allocation39_spill] sm:$0xff]  ;;  %v4072_v47 = vmul.f32 %v7768_v25, %v9663_v51  ;;  %v9673_v49 = vld [vmem:[#allocation141_spill] sm:$0xff] }
 0x721   :  { %v4074_v50 = vmul.f32 %v7748_v36, %v9659_v19  ;;  %v9665_v36 = vld [vmem:[#allocation120_spill] sm:$0xff]  ;;  %v9678_v19 = vld [vmem:[#allocation226_spill] sm:$0xff]  ;;  %v9682_v51 = vld [vmem:[#allocation93_spill] sm:$0xff] }
 0x722   :  { %4375 = vmatpush.msrb.mxu2 %v4084_v21  ;;  %4315 = vmatpush.msrb.mxu3 %v4036_v59  ;;  %v3821_v21 = vadd.f32 %v3820_v32, %v3801_v27  ;;  %v3840_v8 = vpop.f32.mrf.mxu3  ;;  %v9662_v32 = vld [vmem:[#allocation171_spill] sm:$0xff] }
 0x723   :  { %v4027_v22 = vmul.f32 %v7985_v41, %v9662_v32  ;;  %v9681_v32 = vld [vmem:[#allocation137_spill] sm:$0xff] }
 0x724   :  { %4376 = vmatpush.msrb.mxu2 %v4083_v3  ;;  %4316 = vmatpush.msrb.mxu3 %v4035_v2  ;;  %v3841_v44 = vadd.f32 %v3840_v8, %v3821_v21  ;;  %v4033_v3 = vmul.f32 %v7947_v54, %v7322_v9  ;;  %v9657_v9 = vld [vmem:[#allocation33_spill] sm:$0xff]  ;;  %v4071_v21 = vmul.f32 %v7778_v0, %v9665_v36  ;;  %v9668_v8 = vld [vmem:[#allocation224_spill] sm:$0xff]  ;;  %v4630_v36 = vld [vmem:[#allocation6 + $0x138] sm:$0xff] }
 0x725   :  { %v4076_v27 = vmul.f32 %v7730_v53, %v9657_v9  ;;  %v9661_v53 = vld [vmem:[#allocation14_spill] sm:$0xff]  ;;  %v4117_v25 = vmul.f32 %v8209_v14, %v9668_v8  ;;  %v4022_v14 = vmul.f32 %v8015_v26, %v9673_v49 }
 0x726   :  { %4377 = vmatpush.msrb.mxu2 %v4082_v57  ;;  %4317 = vmatpush.msrb.mxu3 %v4034_v63  ;;  %v9660_v57 = vld [vmem:[#allocation13_spill] sm:$0xff]  ;;  %v4073_v15 = vmul.f32 %v7758_v1, %v9661_v53  ;;  %v9675_v9 = vld [vmem:[#allocation102_spill] sm:$0xff] }
 0x727   :  { %3843 = vadd.xlane.f32.xlu1 %v3841_v44  ;;  %v4028_v59 = vmul.f32 %v7979_v43, %v9660_v57  ;;  %v9667_v1 = vld [vmem:[#allocation225_spill] sm:$0xff]  ;;  %v9669_v44 = vld [vmem:[#allocation147_spill] sm:$0xff]  ;;  %v9679_v57 = vld [vmem:[#allocation142_spill] sm:$0xff] }
 0x728   :  { %4378 = vmatpush.msrb.mxu2 %v4081_v10  ;;  %4318 = vmatpush.msrb.mxu3 %v4033_v3  ;;  %v9664_v10 = vld [vmem:[#allocation114_spill] sm:$0xff]  ;;  %v4070_v63 = vmul.f32 %v7788_v31, %v9667_v1  ;;  %v4024_v33 = vmul.f32 %v8003_v61, %v9669_v44  ;;  %v9671_v3 = vld [vmem:[#allocation145_spill] sm:$0xff]  ;;  %v9672_v31 = vld [vmem:[#allocation103_spill] sm:$0xff] }
 0x729   :  { %v4026_v2 = vmul.f32 %v7991_v45, %v9664_v10  ;;  %v4023_v60 = vmul.f32 %v8009_v23, %v9671_v3  ;;  %v9680_v53 = vld [vmem:[#allocation97_spill] sm:$0xff]  ;;  %v9683_v10 = vld [vmem:[#allocation132_spill] sm:$0xff]  ;;  %v9686_v8 = vld [vmem:[#allocation90_spill] sm:$0xff] }
 0x72a   :  { %4379 = vmatpush.msrb.mxu2 %v4080_v40  ;;  %4319 = vmatpush.msrb.mxu3 %v4032_v5  ;;  %v4025_v40 = vmul.f32 %v7997_v56, %v9666_v24  ;;  %v4115_v5 = vmul.f32 %v8221_v4, %v9672_v31  ;;  %v9677_v4 = vld [vmem:[#allocation136_spill] sm:$0xff]  ;;  %v9687_v44 = vld [vmem:[#allocation138_spill] sm:$0xff] }
 0x72b   :  { %v4633_v31 = vld [vmem:[#allocation6 + $0x120] sm:$0xff] }
 0x72c   :  { %4380 = vmatpush.msrb.mxu2 %v4079_v55  ;;  %4320 = vmatpush.msrb.mxu3 %v4031_v58  ;;  %v9670_v55 = vld [vmem:[#allocation109_spill] sm:$0xff] }
 0x72d   :  { %v4116_v0 = vmul.f32 %v8215_v35, %v9670_v55  ;;  %v4114_v35 = vmul.f32 %v8227_v46, %v9675_v9  ;;  %v4628_v46 = vld [vmem:[#allocation6 + $0x148] sm:$0xff]  ;;  %v9692_v9 = vld [vmem:[#allocation86_spill] sm:$0xff] }
 0x72e   :  { %4381 = vmatpush.msrb.mxu2 %v4078_v12  ;;  %4321 = vmatpush.msrb.mxu3 %v4030_v29  ;;  %v4625_v12 = vld [vmem:[#allocation7 + $0x60] sm:$0xff]  ;;  %v9676_v29 = vld [vmem:[#allocation98_spill] sm:$0xff]  ;;  %v4632_v55 = vld [vmem:[#allocation6 + $0x128] sm:$0xff] }
 0x72f   :  { %v4113_v17 = vmul.f32 %v8233_v11, %v9676_v29  ;;  %v4066_v11 = vmul.f32 %v7941_v13, %v9681_v32  ;;  %v9698_v32 = vld [vmem:[#allocation191_spill] sm:$0xff] }
 0x730   :  { %4382 = vmatpush.msrb.mxu2 %v4077_v62  ;;  %4322 = vmatpush.msrb.mxu3 %v4029_v39  ;;  %v9674_v62 = vld [vmem:[#allocation227_spill] sm:$0xff]  ;;  %v4627_v39 = vld [vmem:[#allocation6 + $0x150] sm:$0xff] }
 0x731   :  { %v4069_v58 = vmul.f32 %v7927_v52, %v9674_v62 }
 0x732   :  { %4383 = vmatpush.msrb.mxu2 %v4076_v27  ;;  %4323 = vmatpush.msrb.mxu3 %v4028_v59  ;;  %v4626_v27 = vld [vmem:[#allocation7 + $0x48] sm:$0xff]  ;;  %v4067_v59 = vmul.f32 %v7935_v34, %v9679_v57 }
 0x733   :  { %v9696_v57 = vld [vmem:[#allocation197_spill] sm:$0xff] }
 0x734   :  { %4384 = vmatpush.msrb.mxu2 %v4075_v7  ;;  %4324 = vmatpush.msrb.mxu3 %v4027_v22  ;;  %v4068_v7 = vmul.f32 %v7929_v42, %v9677_v4  ;;  %v4629_v22 = vld [vmem:[#allocation6 + $0x140] sm:$0xff]  ;;  %v9694_v4 = vld [vmem:[#allocation317_spill] sm:$0xff] }
 0x736   :  { %4385 = vmatpush.msrb.mxu2 %v4074_v50  ;;  %4325 = vmatpush.msrb.mxu3 %v4026_v2  ;;  %v4112_v50 = vmul.f32 %v4627_v39, %v9678_v19  ;;  %v4065_v2 = vmul.f32 %v7947_v54, %v9683_v10  ;;  %v9695_v39 = vld [vmem:[#allocation281_spill] sm:$0xff] }
 0x737   :  { %v4059_v19 = vmul.f32 %v7985_v41, %v9695_v39 }
 0x738   :  { %4386 = vmatpush.msrb.mxu2 %v4073_v15  ;;  %4326 = vmatpush.msrb.mxu3 %v4025_v40  ;;  %v4111_v15 = vmul.f32 %v4628_v46, %v9680_v53  ;;  %v9685_v40 = vld [vmem:[#allocation219_spill] sm:$0xff]  ;;  %v9697_v46 = vld [vmem:[#allocation210_spill] sm:$0xff] }
 0x739   :  { %v4064_v1 = vmul.f32 %v7953_v18, %v9685_v40  ;;  %v4058_v53 = vmul.f32 %v7991_v45, %v9697_v46  ;;  %v9717_v46 = vld [vmem:[#allocation328_spill] sm:$0xff] }
 0x73a   :  { %4387 = vmatpush.msrb.mxu2 %v4072_v47  ;;  %4327 = vmatpush.msrb.mxu3 %v4024_v33  ;;  %v4110_v47 = vmul.f32 %v4629_v22, %v9682_v51  ;;  %v4063_v33 = vmul.f32 %v7961_v6, %v9687_v44  ;;  %v9699_v22 = vld [vmem:[#allocation280_spill] sm:$0xff] }
 0x73b   :  { %v4057_v51 = vmul.f32 %v7997_v56, %v9699_v22  ;;  %v4640_v22 = vld [vmem:[#allocation7 + $0x68] sm:$0xff] }
 0x73c   :  { %4388 = vmatpush.msrb.mxu2 %v4071_v21  ;;  %4328 = vmatpush.msrb.mxu3 %v4023_v60  ;;  %v9684_v21 = vld [vmem:[#allocation92_spill] sm:$0xff]  ;;  %v9689_v60 = vld [vmem:[#allocation133_spill] sm:$0xff] }
 0x73d   :  { %v4109_v24 = vmul.f32 %v4630_v36, %v9684_v21  ;;  %v9701_v36 = vld [vmem:[#allocation249_spill] sm:$0xff] }
 0x73e   :  { %4389 = vmatpush.msrb.mxu2 %v4070_v63  ;;  %4329 = vmatpush.msrb.mxu3 %v4022_v14  ;;  %v4631_v63 = vld [vmem:[#allocation6 + $0x130] sm:$0xff]  ;;  %v9691_v14 = vld [vmem:[#allocation127_spill] sm:$0xff]  ;;  %v4055_v21 = vmul.f32 %v8009_v23, %v9701_v36 }
 0x73f   :  { %4390 = vmatmul.f32.vlgmr.msrb.gmra.mxu2 %v4625_v12  ;;  %4330 = vmatmul.f32.vlgmr.msrb.gmra.mxu3 %v4626_v27  ;;  %v4062_v12 = vmul.f32 %v7967_v28, %v9689_v60  ;;  %v4061_v62 = vmul.f32 %v7973_v37, %v9691_v14  ;;  %v9693_v27 = vld [vmem:[#allocation83_spill] sm:$0xff]  ;;  %v9707_v60 = vld [vmem:[#allocation130_spill] sm:$0xff] }
 0x740   :  { %4414 = vmatpush.msra.mxu2 %v4117_v25  ;;  %4354 = vmatpush.msra.mxu3 %v4069_v58  ;;  %v4108_v25 = vmul.f32 %v4631_v63, %v9686_v8  ;;  %v4634_v58 = vld [vmem:[#allocation6 + $0x118] sm:$0xff]  ;;  %v4060_v29 = vmul.f32 %v7979_v43, %v9693_v27  ;;  %v9712_v27 = vld [vmem:[#allocation125_spill] sm:$0xff]  ;;  %v9720_v36 = vld [vmem:[#allocation322_spill] sm:$0xff] }
 0x741   :  { %v4639_v8 = vld [vmem:[#allocation7 + $0x58] sm:$0xff] }
 0x742   :  { %4415 = vmatpush.msra.mxu2 %v4116_v0  ;;  %4355 = vmatpush.msra.mxu3 %v4068_v7  ;;  %v9688_v0 = vld [vmem:[#allocation216_spill] sm:$0xff] }
 0x743   :  { %v4107_v3 = vmul.f32 %v4632_v55, %v9688_v0  ;;  %v9706_v0 = vld [vmem:[#allocation190_spill] sm:$0xff] }
 0x744   :  { %4416 = vmatpush.msra.mxu2 %v4115_v5  ;;  %4356 = vmatpush.msra.mxu3 %v4067_v59  ;;  %v9690_v5 = vld [vmem:[#allocation88_spill] sm:$0xff] }
 0x745   :  { %v4106_v49 = vmul.f32 %v4633_v31, %v9690_v5  ;;  %v9708_v31 = vld [vmem:[#allocation68_spill] sm:$0xff] }
 0x746   :  { %4417 = vmatpush.msra.mxu2 %v4114_v35  ;;  %4357 = vmatpush.msra.mxu3 %v4066_v11  ;;  %v4105_v35 = vmul.f32 %v4634_v58, %v9692_v9  ;;  %v4096_v5 = vmul.f32 %v7953_v18, %v9708_v31  ;;  %v9711_v9 = vld [vmem:[#allocation188_spill] sm:$0xff] }
 0x748   :  { %4418 = vmatpush.msra.mxu2 %v4113_v17  ;;  %4358 = vmatpush.msra.mxu3 %v4065_v2  ;;  %v4635_v17 = vld [vmem:[#allocation6 + $0x110] sm:$0xff] }
 0x749   :  { %v4104_v7 = vmul.f32 %v4635_v17, %v9694_v4  ;;  %v4638_v2 = vld [vmem:[#allocation7 + $0x70] sm:$0xff]  ;;  %v9713_v17 = vld [vmem:[#allocation64_spill] sm:$0xff] }
 0x74a   :  { %4419 = vmatpush.msra.mxu2 %v4112_v50  ;;  %4359 = vmatpush.msra.mxu3 %v4064_v1  ;;  %v4636_v50 = vld [vmem:[#allocation6 + $0x108] sm:$0xff]  ;;  %v4091_v4 = vmul.f32 %v7985_v41, %v9713_v17 }
 0x74b   :  { %v4103_v59 = vmul.f32 %v4636_v50, %v9696_v57  ;;  %v9703_v1 = vld [vmem:[#allocation313_spill] sm:$0xff] }
 0x74c   :  { %4420 = vmatpush.msra.mxu2 %v4111_v15  ;;  %4360 = vmatpush.msra.mxu3 %v4063_v33  ;;  %v4637_v15 = vld [vmem:[#allocation6 + $0x100] sm:$0xff]  ;;  %v4101_v63 = vmul.f32 %v7927_v52, %v9703_v1  ;;  %v9705_v33 = vld [vmem:[#allocation246_spill] sm:$0xff]  ;;  %v9716_v57 = vld [vmem:[#allocation185_spill] sm:$0xff] }
 0x74d   :  { %v4102_v11 = vmul.f32 %v4637_v15, %v9698_v32  ;;  %v4099_v55 = vmul.f32 %v7935_v34, %v9705_v33  ;;  %v9718_v15 = vld [vmem:[#allocation117_spill] sm:$0xff] }
 0x74e   :  { %4421 = vmatpush.msra.mxu2 %v4110_v47  ;;  %4361 = vmatpush.msra.mxu3 %v4062_v12  ;;  %v9700_v47 = vld [vmem:[#allocation202_spill] sm:$0xff]  ;;  %v4097_v12 = vmul.f32 %v7947_v54, %v9707_v60  ;;  %v4086_v32 = vmul.f32 %v8015_v26, %v9718_v15  ;;  %v9728_v1 = vld [vmem:[#allocation53_spill] sm:$0xff] }
 0x74f   :  { %v4056_v10 = vmul.f32 %v8003_v61, %v9700_v47  ;;  %v4131_v47 = vmul.f32 %v7935_v34, %v7816_v16  ;;  %v9722_v34 = vld [vmem:[#allocation182_spill] sm:$0xff] }
 0x750   :  { %4422 = vmatpush.msra.mxu2 %v4109_v24  ;;  %4362 = vmatpush.msra.mxu3 %v4061_v62  ;;  %v9702_v24 = vld [vmem:[#allocation279_spill] sm:$0xff]  ;;  %v9710_v62 = vld [vmem:[#allocation244_spill] sm:$0xff] }
 0x751   :  { %v4054_v40 = vmul.f32 %v8015_v26, %v9702_v24  ;;  %v4094_v58 = vmul.f32 %v7967_v28, %v9710_v62  ;;  %v9726_v24 = vld [vmem:[#allocation180_spill] sm:$0xff] }
 0x752   :  { %4423 = vmatpush.msra.mxu2 %v4108_v25  ;;  %4363 = vmatpush.msra.mxu3 %v4060_v29  ;;  %v9704_v25 = vld [vmem:[#allocation222_spill] sm:$0xff]  ;;  %v4092_v29 = vmul.f32 %v7979_v43, %v9712_v27 }
 0x753   :  { %v4100_v44 = vmul.f32 %v7929_v42, %v9704_v25  ;;  %v4171_v25 = vpop.f32.mrf.mxu3 }
 0x754   :  { %4424 = vmatpush.msra.mxu2 %v4107_v3  ;;  %4364 = vmatpush.msra.mxu3 %v4059_v19  ;;  %v4098_v3 = vmul.f32 %v7941_v13, %v9706_v0  ;;  %v9715_v19 = vld [vmem:[#allocation247_spill] sm:$0xff] }
 0x755   :  { %v4089_v50 = vmul.f32 %v7997_v56, %v9715_v19 }
 0x756   :  { %4425 = vmatpush.msra.mxu2 %v4106_v49  ;;  %4365 = vmatpush.msra.mxu3 %v4058_v53  ;;  %v9709_v49 = vld [vmem:[#allocation12_spill] sm:$0xff]  ;;  %v4087_v53 = vmul.f32 %v8009_v23, %v9717_v46 }
 0x757   :  { %v4095_v14 = vmul.f32 %v7961_v6, %v9709_v49  ;;  %v4513_v46 = vld [vmem:[%s8414_s4] ss:$0 sm:$0xff] }
 0x758   :  { %4426 = vmatpush.msra.mxu2 %v4105_v35  ;;  %4366 = vmatpush.msra.mxu3 %v4057_v51  ;;  %v4093_v35 = vmul.f32 %v7973_v37, %v9711_v9  ;;  %v4132_v51 = vmul.f32 %v7929_v42, %v7810_v20  ;;  %v4127_v20 = vmul.f32 %v7961_v6, %v9720_v36  ;;  %v9721_v42 = vld [vmem:[#allocation242_spill] sm:$0xff] }
 0x759   :  { %v4126_v16 = vmul.f32 %v7967_v28, %v9721_v42  ;;  %v4121_v28 = vmul.f32 %v7997_v56, %v9726_v24 }
 0x75a   :  { %4427 = vmatpush.msra.mxu2 %v4104_v7  ;;  %4367 = vmatpush.msra.mxu3 %v4056_v10  ;;  %v9714_v7 = vld [vmem:[#allocation320_spill] sm:$0xff]  ;;  %v4130_v10 = vmul.f32 %v7941_v13, %v7824_v30  ;;  %v4125_v30 = vmul.f32 %v7973_v37, %v9722_v34 }
 0x75b   :  { %v4090_v39 = vmul.f32 %v7991_v45, %v9714_v7  ;;  %v9723_v13 = vld [vmem:[#allocation100_spill] sm:$0xff] }
 0x75c   :  { %4428 = vmatpush.msra.mxu2 %v4103_v59  ;;  %4368 = vmatpush.msra.mxu3 %v4055_v21  ;;  %v4088_v59 = vmul.f32 %v8003_v61, %v9716_v57  ;;  %v9725_v21 = vld [vmem:[#allocation323_spill] sm:$0xff] }
 0x75d   :  { %v4122_v6 = vmul.f32 %v7991_v45, %v9725_v21  ;;  %v4151_v45 = vpop.f32.mrf.mxu2 }
 0x75e   :  { %4429 = vmatpush.msra.mxu2 %v4102_v11  ;;  %4369 = vmatpush.msra.mxu3 %v4054_v40  ;;  %v4133_v11 = vmul.f32 %v7927_v52, %v7800_v48  ;;  %v9719_v48 = vld [vmem:[#allocation58_spill] sm:$0xff]  ;;  %v9727_v40 = vld [vmem:[#allocation101_spill] sm:$0xff] }
 0x75f   :  { %4430 = vmatmul.f32.vlgmr.msra.gmra.mxu2 %v4638_v2  ;;  %4370 = vmatmul.f32.vlgmr.msra.gmra.mxu3 %v4639_v8  ;;  %v4129_v2 = vmul.f32 %v7947_v54, %v7832_v38  ;;  %v4128_v52 = vmul.f32 %v7953_v18, %v9719_v48  ;;  %v4124_v38 = vmul.f32 %v7979_v43, %v9723_v13  ;;  %v9724_v54 = vld [vmem:[#allocation55_spill] sm:$0xff] }
 0x760   :  { %4394 = vmatpush.msrb.mxu3 %v4101_v63  ;;  %v4123_v18 = vmul.f32 %v7985_v41, %v9724_v54  ;;  %v4120_v37 = vmul.f32 %v8003_v61, %v9727_v40  ;;  %v4119_v43 = vmul.f32 %v8009_v23, %v9728_v1  ;;  %v9729_v63 = vld [vmem:[#allocation277_spill] sm:$0xff]  ;;  %v4641_v8 = vld [vmem:[#allocation7 + $0x78] sm:$0xff] }
 0x761   :  { %v4118_v41 = vmul.f32 %v8015_v26, %v9729_v63 }
 0x762   :  { %4395 = vmatpush.msrb.mxu3 %v4100_v44  ;;  %v4211_v56 = vpop.f32.mrf.mxu3 }
 0x764   :  { %4396 = vmatpush.msrb.mxu3 %v4099_v55  ;;  %v4172_v55 = vadd.f32 %v4171_v25, %v4151_v45 }
 0x765   :  { %v4191_v44 = vpop.f32.mrf.mxu2 }
 0x766   :  { %4397 = vmatpush.msrb.mxu3 %v4098_v3  ;;  %v4192_v61 = vadd.f32 %v4191_v44, %v4172_v55 }
 0x768   :  { %4398 = vmatpush.msrb.mxu3 %v4097_v12  ;;  %v4212_v60 = vadd.f32 %v4211_v56, %v4192_v61 }
 0x76a   :  { %4399 = vmatpush.msrb.mxu3 %v4096_v5 }
 0x76c   :  { %4400 = vmatpush.msrb.mxu3 %v4095_v14 }
 0x76d   :  { %v4231_v33 = vpop.f32.mrf.mxu2 }
 0x76e   :  { %4401 = vmatpush.msrb.mxu3 %v4094_v58  ;;  %v4232_v23 = vadd.f32 %v4231_v33, %v4212_v60 }
 0x770   :  { %4402 = vmatpush.msrb.mxu3 %v4093_v35 }
 0x772   :  { %4403 = vmatpush.msrb.mxu3 %v4092_v29 }
 0x774   :  { %4404 = vmatpush.msrb.mxu3 %v4091_v4 }
 0x775   :  { %v4271_v3 = vpop.f32.mrf.mxu2 }
 0x776   :  { %4405 = vmatpush.msrb.mxu3 %v4090_v39 }
 0x778   :  { %4406 = vmatpush.msrb.mxu3 %v4089_v50 }
 0x77a   :  { %4407 = vmatpush.msrb.mxu3 %v4088_v59 }
 0x77c   :  { %4408 = vmatpush.msrb.mxu3 %v4087_v53 }
 0x77e   :  { %4409 = vmatpush.msrb.mxu3 %v4086_v32 }
 0x77f   :  { %4410 = vmatmul.f32.vlgmr.msrb.gmra.mxu3 %v4640_v22 }
 0x780   :  { %4434 = vmatpush.msra.mxu3 %v4133_v11 }
 0x782   :  { %4435 = vmatpush.msra.mxu3 %v4132_v51  ;;  %v4251_v0 = vpop.f32.mrf.mxu3  ;;  %v4311_v5 = vpop.f32.mrf.mxu2 }
 0x783   :  { %v4252_v31 = vadd.f32 %v4251_v0, %v4232_v23 }
 0x784   :  { %4436 = vmatpush.msra.mxu3 %v4131_v47 }
 0x785   :  { %v4272_v49 = vadd.f32 %v4271_v3, %v4252_v31 }
 0x786   :  { %4437 = vmatpush.msra.mxu3 %v4130_v10 }
 0x788   :  { %4438 = vmatpush.msra.mxu3 %v4129_v2 }
 0x78a   :  { %4439 = vmatpush.msra.mxu3 %v4128_v52 }
 0x78c   :  { %4440 = vmatpush.msra.mxu3 %v4127_v20 }
 0x78e   :  { %4441 = vmatpush.msra.mxu3 %v4126_v16 }
 0x790   :  { %4442 = vmatpush.msra.mxu3 %v4125_v30 }
 0x792   :  { %4443 = vmatpush.msra.mxu3 %v4124_v38 }
 0x794   :  { %4444 = vmatpush.msra.mxu3 %v4123_v18 }
 0x796   :  { %4445 = vmatpush.msra.mxu3 %v4122_v6 }
 0x798   :  { %4446 = vmatpush.msra.mxu3 %v4121_v28 }
 0x79a   :  { %4447 = vmatpush.msra.mxu3 %v4120_v37  ;;  %v3844_v53 = vpop.xlane.xlu1 %3843 }
 0x79c   :  { %4448 = vmatpush.msra.mxu3 %v4119_v43 }
 0x79e   :  { %4449 = vmatpush.msra.mxu3 %v4118_v41 }
 0x79f   :  { %4450 = vmatmul.f32.vlgmr.msra.gmra.mxu3 %v4641_v8 }
 0x7a2   :  { %v4291_v12 = vpop.f32.mrf.mxu3  ;;  %v4351_v62 = vpop.f32.mrf.mxu2 }
 0x7a3   :  { %v4292_v14 = vadd.f32 %v4291_v12, %v4272_v49 }
 0x7a5   :  { %v4312_v58 = vadd.f32 %v4311_v5, %v4292_v14 }
 0x7c2   :  { %v4331_v26 = vpop.f32.mrf.mxu3  ;;  %v4391_v29 = vpop.f32.mrf.mxu2 }
 0x7c3   :  { %v4332_v9 = vadd.f32 %v4331_v26, %v4312_v58 }
 0x7c5   :  { %v4352_v27 = vadd.f32 %v4351_v62, %v4332_v9 }
 0x7e2   :  { %v4371_v35 = vpop.f32.mrf.mxu3  ;;  %v4431_v19 = vpop.f32.mrf.mxu2 }
 0x7e3   :  { %v4372_v17 = vadd.f32 %v4371_v35, %v4352_v27 }
 0x7e5   :  { %v4392_v7 = vadd.f32 %v4391_v29, %v4372_v17 }
 0x802   :  { %v4411_v4 = vpop.f32.mrf.mxu3 }
 0x803   :  { %v4412_v39 = vadd.f32 %v4411_v4, %v4392_v7 }
 0x805   :  { %v4432_v50 = vadd.f32 %v4431_v19, %v4412_v39 }
 0x822   :  { %v4451_v57 = vpop.f32.mrf.mxu3 }
 0x823   :  { %v4452_v59 = vadd.f32 %v4451_v57, %v4432_v50 }
 0x825   :  { %4454 = vadd.xlane.f32.xlu2 %v4452_v59 }
 0x898   :  { %v4455_v15 = vpop.xlane.xlu2 %4454 }
 0x899   :  { %v4457_v32 = vsel %vm4456_vm0, %v3844_v53, %v4455_v15 }
 0x89a   :  { %v4462_v11 = vadd.f32 %v4513_v46, %v4457_v32 }
 0x89c   :  { %4464 = vst.msk [vmem:[%s8415_s5] sm:$0xff] %vm4463_vm1, %v4462_v11 }
 0x89d   :  { %4469 = vsyncpa [#allocation3], 1 }
 0x89e   :  { %4470 = vsyncpa [#allocation5], 1 }
 0x89f   :  { %4471 = vsyncpa [#allocation8], 1 }

</bundles_post_ra>
